<compile_context>
chip_gen: v7x
topology: tpu7x:2x2x1
jax: 0.10.0
libtpu: 0.0.40
codegen_flags: <defaults>
</compile_context>

<pallas_src>
import jax
import jax.numpy as jnp
from jax.experimental import pallas as pl
from jax.experimental.pallas import tpu as pltpu


def _make_conv_kernel(H, W, Cin, Cout):
    H2, W2 = 2 * H, 2 * W

    def kernel(x_ref, w_ref, bias_ref, y_ref, sum_ref, sq_ref, xpad_ref):
        # Stage the input tile with a zero halo in VMEM (replaces wrapper-side jnp.pad).
        xpad_ref[...] = jnp.zeros(xpad_ref.shape, xpad_ref.dtype)
        xpad_ref[1:H + 1, 1:W + 1, :] = x_ref[0]
        xp = xpad_ref[...]                              # (H+2, W+2, Cin) f32

        bias = bias_ref[...]                            # (1, Cout) f32
        s_sum = jnp.zeros((1, Cout), jnp.float32)
        s_sq = jnp.zeros((1, Cout), jnp.float32)

        # One fused matmul per sub-pixel phase: im2col over the 2x2 taps -> K = 4*Cin.
        phases = []
        for a in range(2):                              # output row parity
            row = []
            for bcol in range(2):                       # output col parity
                taps = []
                for th in range(2):
                    for tw in range(2):
                        t = xp[a + th:a + th + H, bcol + tw:bcol + tw + W, :]
                        taps.append(t.reshape(H * W, Cin))
                patch = jnp.concatenate(taps, axis=-1).astype(jnp.bfloat16)   # (H*W, 4*Cin)
                acc = jnp.dot(patch, w_ref[a, bcol],
                              preferred_element_type=jnp.float32)             # (H*W, Cout) f32
                acc = acc + bias
                s_sum = s_sum + jnp.sum(acc, axis=0, keepdims=True)
                s_sq = s_sq + jnp.sum(acc * acc, axis=0, keepdims=True)
                row.append(acc)
            phases.append(row)

        # Pixel-shuffle the 4 phases in-register (no HBM transpose round trip).
        rows = []
        for a in range(2):
            qa = jnp.stack([phases[a][0], phases[a][1]], axis=1)    # (H*W, 2, Cout)
            qa = qa.reshape(H, W2, Cout)                            # cols interleaved: 2*ow+b
            rows.append(qa)
        y_img = jnp.stack(rows, axis=1).reshape(H2 * W2, Cout)      # rows interleaved: 2*oh+a

        # Channel-major store: (Cout, H2*W2) is lane-dense for any Cout.
        y_ref[0] = y_img.T
        sum_ref[0] = s_sum
        sq_ref[0] = s_sq

    return kernel


def _bn_relu_kernel(y_ref, scale_ref, shift_ref, o_ref):
    # Lane-dense elementwise pass: (Cout, H2*W2) block, per-channel scale/shift on sublanes.
    o_ref[0] = jnp.maximum(y_ref[0] * scale_ref[...] + shift_ref[...], 0.0)


@jax.jit
def trans_conv_forward(x_nchw, w, b, gamma, beta, eps=1e-5):
    """ConvTranspose2d(4,4,stride=2,pad=1) -> BatchNorm2d (batch stats) -> ReLU, NCHW in/out."""
    N, Cin, H, W = x_nchw.shape
    Cout = w.shape[1]
    H2, W2 = 2 * H, 2 * W
    S = H2 * W2

    # Input glue: NCHW -> NHWC (smallest tensor; fused with the f32 cast). No padding here.
    x_nhwc = jnp.transpose(x_nchw, (0, 2, 3, 1)).astype(jnp.float32)

    # Pre-fold the ConvTranspose2d weight (Cin, Cout, 4, 4) into per-phase (4*Cin, Cout) slabs.
    # Row order = (th, tw, ci), matching the in-kernel im2col concat order. Cast to bf16.
    w_t = jnp.transpose(w, (2, 3, 0, 1)).astype(jnp.float32)        # (kh, kw, Cin, Cout)
    phase_rows = []
    for a in range(2):
        cols = []
        for bb in range(2):
            taps = [w_t[3 - a - 2 * th, 3 - bb - 2 * tw]
                    for th in range(2) for tw in range(2)]          # each (Cin, Cout)
            cols.append(jnp.concatenate(taps, axis=0))              # (4*Cin, Cout)
        phase_rows.append(jnp.stack(cols))
    w_slab = jnp.stack(phase_rows).astype(jnp.bfloat16)             # (2, 2, 4*Cin, Cout)

    bias2d = b.reshape(1, Cout).astype(jnp.float32)

    conv_kernel = _make_conv_kernel(H, W, Cin, Cout)
    conv_bytes = int(x_nhwc.size * 4 + w_slab.size * 2 + N * Cout * S * 4 + 2 * N * Cout * 4)
    y_t, s_sum_n, s_sq_n = pl.pallas_call(
        conv_kernel,
        out_shape=(
            jax.ShapeDtypeStruct((N, Cout, S), jnp.float32),        # channel-major, lane-dense
            jax.ShapeDtypeStruct((N, 1, Cout), jnp.float32),        # per-image partial sum
            jax.ShapeDtypeStruct((N, 1, Cout), jnp.float32),        # per-image partial sum-sq
        ),
        grid_spec=pltpu.PrefetchScalarGridSpec(
            num_scalar_prefetch=0,
            grid=(N,),
            in_specs=[
                pl.BlockSpec((1, H, W, Cin), lambda n: (n, 0, 0, 0)),
                pl.BlockSpec((2, 2, 4 * Cin, Cout), lambda n: (0, 0, 0, 0)),
                pl.BlockSpec((1, Cout), lambda n: (0, 0)),
            ],
            out_specs=[
                pl.BlockSpec((1, Cout, S), lambda n: (n, 0, 0)),
                pl.BlockSpec((1, 1, Cout), lambda n: (n, 0, 0)),
                pl.BlockSpec((1, 1, Cout), lambda n: (n, 0, 0)),
            ],
            scratch_shapes=[pltpu.VMEM((H + 2, W + 2, Cin), jnp.float32)],
        ),
        compiler_params=pltpu.CompilerParams(
            dimension_semantics=("parallel",),          # per-image partials -> megacore-safe
            vmem_limit_bytes=32 * 1024 * 1024,
        ),
        cost_estimate=pl.CostEstimate(
            flops=int(2 * N * 4 * H * W * 4 * Cin * Cout),
            transcendentals=0,
            bytes_accessed=conv_bytes,
        ),
    )(x_nhwc, w_slab, bias2d)

    # BatchNorm2d (training-mode) statistic finalization: tiny per-channel math in the wrapper.
    count = float(N * H2 * W2)
    tot = jnp.sum(s_sum_n, axis=0)[0]                   # (Cout,)
    tot_sq = jnp.sum(s_sq_n, axis=0)[0]                 # (Cout,)
    mean = tot / count
    var = jnp.maximum(tot_sq / count - mean * mean, 0.0)   # biased variance, clamped >= 0
    scale = gamma.astype(jnp.float32) / jnp.sqrt(var + eps)
    shift = beta.astype(jnp.float32) - mean * scale

    out_flat = pl.pallas_call(
        _bn_relu_kernel,
        out_shape=jax.ShapeDtypeStruct((N, Cout, S), jnp.float32),
        grid_spec=pltpu.PrefetchScalarGridSpec(
            num_scalar_prefetch=0,
            grid=(N,),
            in_specs=[
                pl.BlockSpec((1, Cout, S), lambda n: (n, 0, 0)),
                pl.BlockSpec((Cout, 1), lambda n: (0, 0)),
                pl.BlockSpec((Cout, 1), lambda n: (0, 0)),
            ],
            out_specs=pl.BlockSpec((1, Cout, S), lambda n: (n, 0, 0)),
        ),
        compiler_params=pltpu.CompilerParams(
            dimension_semantics=("parallel",),
            vmem_limit_bytes=32 * 1024 * 1024,
        ),
        cost_estimate=pl.CostEstimate(
            flops=int(2 * N * Cout * S),
            transcendentals=0,
            bytes_accessed=int(2 * N * Cout * S * 4),
        ),
        # Normalize in place: the conv intermediate y_t is dead after this call.
        input_output_aliases={0: 0},
    )(y_t, scale.reshape(Cout, 1), shift.reshape(Cout, 1))

    # Already channel-major NCHW order: the reshape is free (no transpose pass).
    return out_flat.reshape(N, Cout, H2, W2)


def _reference(x, w, b, gamma, beta, eps=1e-5):
    """Pure-JAX reference of the PyTorch module (train-mode BN), f32 HIGHEST precision."""
    w_conv = jnp.transpose(jnp.flip(w, (2, 3)), (1, 0, 2, 3))   # (Cout, Cin, 4, 4)
    y = jax.lax.conv_general_dilated(
        x, w_conv, window_strides=(1, 1), padding=((2, 2), (2, 2)),
        lhs_dilation=(2, 2), dimension_numbers=("NCHW", "OIHW", "NCHW"),
        precision=jax.lax.Precision.HIGHEST)
    y = y + b.reshape(1, -1, 1, 1)
    mean = y.mean(axis=(0, 2, 3), keepdims=True)
    var = y.var(axis=(0, 2, 3), keepdims=True)
    yn = (y - mean) / jnp.sqrt(var + eps)
    yn = yn * gamma.reshape(1, -1, 1, 1) + beta.reshape(1, -1, 1, 1)
    return jnp.maximum(yn, 0.0)


if __name__ == "__main__":
    N, Cin, Cout, H, W = 2, 4, 8, 16, 16

    key = jax.random.PRNGKey(0)
    kx, kw, kb, kg, kbt = jax.random.split(key, 5)
    x = jax.random.normal(kx, (N, Cin, H, W), jnp.float32)
    w = 0.1 * jax.random.normal(kw, (Cin, Cout, 4, 4), jnp.float32)   # ConvTranspose2d.weight
    b = 0.1 * jax.random.normal(kb, (Cout,), jnp.float32)             # ConvTranspose2d.bias
    gamma = 1.0 + 0.1 * jax.random.normal(kg, (Cout,), jnp.float32)   # BatchNorm2d.weight
    beta = 0.1 * jax.random.normal(kbt, (Cout,), jnp.float32)         # BatchNorm2d.bias

    out = jax.block_until_ready(trans_conv_forward(x, w, b, gamma, beta))
    ref = jax.block_until_ready(_reference(x, w, b, gamma, beta))

    assert out.shape == (N, Cout, 2 * H, 2 * W), out.shape
    # bf16 MXU operands (f32 accumulate) vs the f32-HIGHEST reference -> slightly looser tol.
    err = float(jnp.max(jnp.abs(out - ref)))
    assert jnp.allclose(out, ref, atol=2e-2, rtol=2e-2), err
    print("KERNEL_OK")
</pallas_src>

<mosaic_0001>
module attributes {stable_mosaic.version = 11 : i64} {
  func.func @_bn_relu_kernel(%arg0: i32, %arg1: memref<1x8x1024xf32, #tpu.memory_space<vmem>>, %arg2: memref<8x1xf32, #tpu.memory_space<vmem>>, %arg3: memref<8x1xf32, #tpu.memory_space<vmem>>, %arg4: memref<1x8x1024xf32, #tpu.memory_space<vmem>>) attributes {dimension_semantics = [#tpu.dimension_semantics<parallel>], iteration_bounds = array<i64: 2>, scalar_prefetch = 0 : i64, scratch_operands = 0 : i64, tpu.core_type = #tpu.core_type<tc>, window_params = [{transform_indices = @transform_0, window_bounds = array<i64: 1, 8, 1024>}, {pipeline_mode = #tpu.pipeline_mode<synchronous>, transform_indices = @transform_1, window_bounds = array<i64: 8, 1>}, {pipeline_mode = #tpu.pipeline_mode<synchronous>, transform_indices = @transform_2, window_bounds = array<i64: 8, 1>}, {transform_indices = @transform_3, window_bounds = array<i64: 1, 8, 1024>}]} {
    %c0 = arith.constant 0 : index
    %c0_0 = arith.constant 0 : index
    %c0_1 = arith.constant 0 : index
    %0 = vector.load %arg1[%c0, %c0_0, %c0_1] : memref<1x8x1024xf32, #tpu.memory_space<vmem>>, vector<1x8x1024xf32>
    %1 = vector.shape_cast %0 : vector<1x8x1024xf32> to vector<8x1024xf32>
    %c0_2 = arith.constant 0 : index
    %c0_3 = arith.constant 0 : index
    %2 = vector.load %arg2[%c0_2, %c0_3] : memref<8x1xf32, #tpu.memory_space<vmem>>, vector<8x1xf32>
    %3 = vector.broadcast %2 : vector<8x1xf32> to vector<8x1024xf32>
    %4 = arith.mulf %1, %3 : vector<8x1024xf32>
    %c0_4 = arith.constant 0 : index
    %c0_5 = arith.constant 0 : index
    %5 = vector.load %arg3[%c0_4, %c0_5] : memref<8x1xf32, #tpu.memory_space<vmem>>, vector<8x1xf32>
    %6 = vector.broadcast %5 : vector<8x1xf32> to vector<8x1024xf32>
    %7 = arith.addf %4, %6 : vector<8x1024xf32>
    %cst = arith.constant 0.000000e+00 : f32
    %8 = vector.broadcast %cst : f32 to vector<8x1024xf32>
    %9 = arith.maximumf %7, %8 : vector<8x1024xf32>
    %c0_6 = arith.constant 0 : index
    %c0_7 = arith.constant 0 : index
    %c0_8 = arith.constant 0 : index
    %10 = vector.load %arg4[%c0_6, %c0_7, %c0_8] : memref<1x8x1024xf32, #tpu.memory_space<vmem>>, vector<1x8x1024xf32>
    %11 = vector.shape_cast %10 : vector<1x8x1024xf32> to vector<8x1024xf32>
    %12 = vector.shape_cast %9 : vector<8x1024xf32> to vector<1x8x1024xf32>
    tpu.vector_store %arg4[%c0_6, %c0_7, %c0_8], %12 {strides = array<i32>} : memref<1x8x1024xf32, #tpu.memory_space<vmem>>, vector<1x8x1024xf32>,
    return
  }
  func.func @transform_0(%arg0: i32) -> (i32, i32, i32) {
    %c0_i32 = arith.constant 0 : i32
    %c0_i32_0 = arith.constant 0 : i32
    %c0_i32_1 = arith.constant 0 : i32
    return %arg0, %c0_i32, %c0_i32_0 : i32, i32, i32
  }
  func.func @transform_1(%arg0: i32) -> (i32, i32) {
    %c0_i32 = arith.constant 0 : i32
    %c0_i32_0 = arith.constant 0 : i32
    %c0_i32_1 = arith.constant 0 : i32
    return %c0_i32, %c0_i32_0 : i32, i32
  }
  func.func @transform_2(%arg0: i32) -> (i32, i32) {
    %c0_i32 = arith.constant 0 : i32
    %c0_i32_0 = arith.constant 0 : i32
    %c0_i32_1 = arith.constant 0 : i32
    return %c0_i32, %c0_i32_0 : i32, i32
  }
  func.func @transform_3(%arg0: i32) -> (i32, i32, i32) {
    %c0_i32 = arith.constant 0 : i32
    %c0_i32_0 = arith.constant 0 : i32
    %c0_i32_1 = arith.constant 0 : i32
    return %arg0, %c0_i32, %c0_i32_0 : i32, i32, i32
  }
}

module attributes {stable_mosaic.version = 11 : i64} {
  func.func @kernel(%arg0: i32, %arg1: memref<1x16x16x4xf32, #tpu.memory_space<vmem>>, %arg2: memref<2x2x16x8xbf16, #tpu.memory_space<vmem>>, %arg3: memref<1x8xf32, #tpu.memory_space<vmem>>, %arg4: memref<1x8x1024xf32, #tpu.memory_space<vmem>>, %arg5: memref<1x1x8xf32, #tpu.memory_space<vmem>>, %arg6: memref<1x1x8xf32, #tpu.memory_space<vmem>>, %arg7: memref<18x18x4xf32, #tpu.memory_space<vmem>>) attributes {dimension_semantics = [#tpu.dimension_semantics<parallel>], iteration_bounds = array<i64: 2>, scalar_prefetch = 0 : i64, scratch_operands = 1 : i64, tpu.core_type = #tpu.core_type<tc>, window_params = [{transform_indices = @transform_0, window_bounds = array<i64: 1, 16, 16, 4>}, {pipeline_mode = #tpu.pipeline_mode<synchronous>, transform_indices = @transform_1, window_bounds = array<i64: 2, 2, 16, 8>}, {pipeline_mode = #tpu.pipeline_mode<synchronous>, transform_indices = @transform_2, window_bounds = array<i64: 1, 8>}, {transform_indices = @transform_3, window_bounds = array<i64: 1, 8, 1024>}, {transform_indices = @transform_4, window_bounds = array<i64: 1, 1, 8>}, {transform_indices = @transform_5, window_bounds = array<i64: 1, 1, 8>}]} {
    %cst = arith.constant 0.000000e+00 : f32
    %0 = vector.broadcast %cst : f32 to vector<18x18x4xf32>
    %c0 = arith.constant 0 : index
    %c0_0 = arith.constant 0 : index
    %c0_1 = arith.constant 0 : index
    %1 = vector.load %arg7[%c0, %c0_0, %c0_1] : memref<18x18x4xf32, #tpu.memory_space<vmem>>, vector<18x18x4xf32>
    tpu.vector_store %arg7[%c0, %c0_0, %c0_1], %0 {strides = array<i32>} : memref<18x18x4xf32, #tpu.memory_space<vmem>>, vector<18x18x4xf32>,
    %c0_2 = arith.constant 0 : index
    %c0_3 = arith.constant 0 : index
    %c0_4 = arith.constant 0 : index
    %c0_5 = arith.constant 0 : index
    %2 = vector.load %arg1[%c0_2, %c0_3, %c0_4, %c0_5] : memref<1x16x16x4xf32, #tpu.memory_space<vmem>>, vector<1x16x16x4xf32>
    %3 = vector.shape_cast %2 : vector<1x16x16x4xf32> to vector<16x16x4xf32>
    %c1 = arith.constant 1 : index
    %c1_6 = arith.constant 1 : index
    %c0_7 = arith.constant 0 : index
    %4 = vector.load %arg7[%c1, %c1_6, %c0_7] : memref<18x18x4xf32, #tpu.memory_space<vmem>>, vector<16x16x4xf32>
    tpu.vector_store %arg7[%c1, %c1_6, %c0_7], %3 {strides = array<i32>} : memref<18x18x4xf32, #tpu.memory_space<vmem>>, vector<16x16x4xf32>,
    %c0_8 = arith.constant 0 : index
    %c0_9 = arith.constant 0 : index
    %c0_10 = arith.constant 0 : index
    %5 = vector.load %arg7[%c0_8, %c0_9, %c0_10] : memref<18x18x4xf32, #tpu.memory_space<vmem>>, vector<18x18x4xf32>
    %c0_11 = arith.constant 0 : index
    %c0_12 = arith.constant 0 : index
    %6 = vector.load %arg3[%c0_11, %c0_12] : memref<1x8xf32, #tpu.memory_space<vmem>>, vector<1x8xf32>
    %cst_13 = arith.constant 0.000000e+00 : f32
    %7 = vector.broadcast %cst_13 : f32 to vector<1x8xf32>
    %cst_14 = arith.constant 0.000000e+00 : f32
    %8 = vector.broadcast %cst_14 : f32 to vector<1x8xf32>
    %9 = vector.extract_strided_slice %5 {offsets = [0, 0, 0], sizes = [16, 16, 4], strides = [1, 1, 1]} : vector<18x18x4xf32> to vector<16x16x4xf32>
    %10 = vector.shape_cast %9 : vector<16x16x4xf32> to vector<256x4xf32>
    %11 = vector.extract_strided_slice %5 {offsets = [0, 1, 0], sizes = [16, 16, 4], strides = [1, 1, 1]} : vector<18x18x4xf32> to vector<16x16x4xf32>
    %12 = vector.shape_cast %11 : vector<16x16x4xf32> to vector<256x4xf32>
    %13 = vector.extract_strided_slice %5 {offsets = [1, 0, 0], sizes = [16, 16, 4], strides = [1, 1, 1]} : vector<18x18x4xf32> to vector<16x16x4xf32>
    %14 = vector.shape_cast %13 : vector<16x16x4xf32> to vector<256x4xf32>
    %15 = vector.extract_strided_slice %5 {offsets = [1, 1, 0], sizes = [16, 16, 4], strides = [1, 1, 1]} : vector<18x18x4xf32> to vector<16x16x4xf32>
    %16 = vector.shape_cast %15 : vector<16x16x4xf32> to vector<256x4xf32>
    %17 = tpu.concatenate %10, %12, %14, %16 in 1 : vector<256x4xf32>, vector<256x4xf32>, vector<256x4xf32>, vector<256x4xf32> -> vector<256x16xf32>
    %18 = arith.truncf %17 : vector<256x16xf32> to vector<256x16xbf16>
    %c0_15 = arith.constant 0 : index
    %c0_16 = arith.constant 0 : index
    %c0_17 = arith.constant 0 : index
    %c0_18 = arith.constant 0 : index
    %19 = vector.load %arg2[%c0_15, %c0_16, %c0_17, %c0_18] : memref<2x2x16x8xbf16, #tpu.memory_space<vmem>>, vector<1x1x16x8xbf16>
    %20 = vector.shape_cast %19 : vector<1x1x16x8xbf16> to vector<16x8xbf16>
    %cst_19 = arith.constant dense<0.000000e+00> : vector<256x8xf32>
    %21 = tpu.matmul %18, %20, %cst_19 {dimension_numbers = #tpu.dot_dimension_numbers<[1], [0], [0], [1], [0, 0, 1, 1], [], []>} : vector<256x16xbf16>, vector<16x8xbf16>, vector<256x8xf32> -> vector<256x8xf32>
    %22 = vector.broadcast %6 : vector<1x8xf32> to vector<256x8xf32>
    %23 = arith.addf %21, %22 : vector<256x8xf32>
    %cst_20 = arith.constant dense<0.000000e+00> : vector<8xf32>
    %24 = vector.multi_reduction <add>, %23, %cst_20 [0] : vector<256x8xf32> to vector<8xf32>
    %25 = vector.shape_cast %24 : vector<8xf32> to vector<1x8xf32>
    %26 = arith.addf %7, %25 : vector<1x8xf32>
    %27 = arith.mulf %23, %23 : vector<256x8xf32>
    %cst_21 = arith.constant dense<0.000000e+00> : vector<8xf32>
    %28 = vector.multi_reduction <add>, %27, %cst_21 [0] : vector<256x8xf32> to vector<8xf32>
    %29 = vector.shape_cast %28 : vector<8xf32> to vector<1x8xf32>
    %30 = arith.addf %8, %29 : vector<1x8xf32>
    %31 = vector.extract_strided_slice %5 {offsets = [0, 1, 0], sizes = [16, 16, 4], strides = [1, 1, 1]} : vector<18x18x4xf32> to vector<16x16x4xf32>
    %32 = vector.shape_cast %31 : vector<16x16x4xf32> to vector<256x4xf32>
    %33 = vector.extract_strided_slice %5 {offsets = [0, 2, 0], sizes = [16, 16, 4], strides = [1, 1, 1]} : vector<18x18x4xf32> to vector<16x16x4xf32>
    %34 = vector.shape_cast %33 : vector<16x16x4xf32> to vector<256x4xf32>
    %35 = vector.extract_strided_slice %5 {offsets = [1, 1, 0], sizes = [16, 16, 4], strides = [1, 1, 1]} : vector<18x18x4xf32> to vector<16x16x4xf32>
    %36 = vector.shape_cast %35 : vector<16x16x4xf32> to vector<256x4xf32>
    %37 = vector.extract_strided_slice %5 {offsets = [1, 2, 0], sizes = [16, 16, 4], strides = [1, 1, 1]} : vector<18x18x4xf32> to vector<16x16x4xf32>
    %38 = vector.shape_cast %37 : vector<16x16x4xf32> to vector<256x4xf32>
    %39 = tpu.concatenate %32, %34, %36, %38 in 1 : vector<256x4xf32>, vector<256x4xf32>, vector<256x4xf32>, vector<256x4xf32> -> vector<256x16xf32>
    %40 = arith.truncf %39 : vector<256x16xf32> to vector<256x16xbf16>
    %c0_22 = arith.constant 0 : index
    %c1_23 = arith.constant 1 : index
    %c0_24 = arith.constant 0 : index
    %c0_25 = arith.constant 0 : index
    %41 = vector.load %arg2[%c0_22, %c1_23, %c0_24, %c0_25] : memref<2x2x16x8xbf16, #tpu.memory_space<vmem>>, vector<1x1x16x8xbf16>
    %42 = vector.shape_cast %41 : vector<1x1x16x8xbf16> to vector<16x8xbf16>
    %cst_26 = arith.constant dense<0.000000e+00> : vector<256x8xf32>
    %43 = tpu.matmul %40, %42, %cst_26 {dimension_numbers = #tpu.dot_dimension_numbers<[1], [0], [0], [1], [0, 0, 1, 1], [], []>} : vector<256x16xbf16>, vector<16x8xbf16>, vector<256x8xf32> -> vector<256x8xf32>
    %44 = vector.broadcast %6 : vector<1x8xf32> to vector<256x8xf32>
    %45 = arith.addf %43, %44 : vector<256x8xf32>
    %cst_27 = arith.constant dense<0.000000e+00> : vector<8xf32>
    %46 = vector.multi_reduction <add>, %45, %cst_27 [0] : vector<256x8xf32> to vector<8xf32>
    %47 = vector.shape_cast %46 : vector<8xf32> to vector<1x8xf32>
    %48 = arith.addf %26, %47 : vector<1x8xf32>
    %49 = arith.mulf %45, %45 : vector<256x8xf32>
    %cst_28 = arith.constant dense<0.000000e+00> : vector<8xf32>
    %50 = vector.multi_reduction <add>, %49, %cst_28 [0] : vector<256x8xf32> to vector<8xf32>
    %51 = vector.shape_cast %50 : vector<8xf32> to vector<1x8xf32>
    %52 = arith.addf %30, %51 : vector<1x8xf32>
    %53 = vector.extract_strided_slice %5 {offsets = [1, 0, 0], sizes = [16, 16, 4], strides = [1, 1, 1]} : vector<18x18x4xf32> to vector<16x16x4xf32>
    %54 = vector.shape_cast %53 : vector<16x16x4xf32> to vector<256x4xf32>
    %55 = vector.extract_strided_slice %5 {offsets = [1, 1, 0], sizes = [16, 16, 4], strides = [1, 1, 1]} : vector<18x18x4xf32> to vector<16x16x4xf32>
    %56 = vector.shape_cast %55 : vector<16x16x4xf32> to vector<256x4xf32>
    %57 = vector.extract_strided_slice %5 {offsets = [2, 0, 0], sizes = [16, 16, 4], strides = [1, 1, 1]} : vector<18x18x4xf32> to vector<16x16x4xf32>
    %58 = vector.shape_cast %57 : vector<16x16x4xf32> to vector<256x4xf32>
    %59 = vector.extract_strided_slice %5 {offsets = [2, 1, 0], sizes = [16, 16, 4], strides = [1, 1, 1]} : vector<18x18x4xf32> to vector<16x16x4xf32>
    %60 = vector.shape_cast %59 : vector<16x16x4xf32> to vector<256x4xf32>
    %61 = tpu.concatenate %54, %56, %58, %60 in 1 : vector<256x4xf32>, vector<256x4xf32>, vector<256x4xf32>, vector<256x4xf32> -> vector<256x16xf32>
    %62 = arith.truncf %61 : vector<256x16xf32> to vector<256x16xbf16>
    %c1_29 = arith.constant 1 : index
    %c0_30 = arith.constant 0 : index
    %c0_31 = arith.constant 0 : index
    %c0_32 = arith.constant 0 : index
    %63 = vector.load %arg2[%c1_29, %c0_30, %c0_31, %c0_32] : memref<2x2x16x8xbf16, #tpu.memory_space<vmem>>, vector<1x1x16x8xbf16>
    %64 = vector.shape_cast %63 : vector<1x1x16x8xbf16> to vector<16x8xbf16>
    %cst_33 = arith.constant dense<0.000000e+00> : vector<256x8xf32>
    %65 = tpu.matmul %62, %64, %cst_33 {dimension_numbers = #tpu.dot_dimension_numbers<[1], [0], [0], [1], [0, 0, 1, 1], [], []>} : vector<256x16xbf16>, vector<16x8xbf16>, vector<256x8xf32> -> vector<256x8xf32>
    %66 = vector.broadcast %6 : vector<1x8xf32> to vector<256x8xf32>
    %67 = arith.addf %65, %66 : vector<256x8xf32>
    %cst_34 = arith.constant dense<0.000000e+00> : vector<8xf32>
    %68 = vector.multi_reduction <add>, %67, %cst_34 [0] : vector<256x8xf32> to vector<8xf32>
    %69 = vector.shape_cast %68 : vector<8xf32> to vector<1x8xf32>
    %70 = arith.addf %48, %69 : vector<1x8xf32>
    %71 = arith.mulf %67, %67 : vector<256x8xf32>
    %cst_35 = arith.constant dense<0.000000e+00> : vector<8xf32>
    %72 = vector.multi_reduction <add>, %71, %cst_35 [0] : vector<256x8xf32> to vector<8xf32>
    %73 = vector.shape_cast %72 : vector<8xf32> to vector<1x8xf32>
    %74 = arith.addf %52, %73 : vector<1x8xf32>
    %75 = vector.extract_strided_slice %5 {offsets = [1, 1, 0], sizes = [16, 16, 4], strides = [1, 1, 1]} : vector<18x18x4xf32> to vector<16x16x4xf32>
    %76 = vector.shape_cast %75 : vector<16x16x4xf32> to vector<256x4xf32>
    %77 = vector.extract_strided_slice %5 {offsets = [1, 2, 0], sizes = [16, 16, 4], strides = [1, 1, 1]} : vector<18x18x4xf32> to vector<16x16x4xf32>
    %78 = vector.shape_cast %77 : vector<16x16x4xf32> to vector<256x4xf32>
    %79 = vector.extract_strided_slice %5 {offsets = [2, 1, 0], sizes = [16, 16, 4], strides = [1, 1, 1]} : vector<18x18x4xf32> to vector<16x16x4xf32>
    %80 = vector.shape_cast %79 : vector<16x16x4xf32> to vector<256x4xf32>
    %81 = vector.extract_strided_slice %5 {offsets = [2, 2, 0], sizes = [16, 16, 4], strides = [1, 1, 1]} : vector<18x18x4xf32> to vector<16x16x4xf32>
    %82 = vector.shape_cast %81 : vector<16x16x4xf32> to vector<256x4xf32>
    %83 = tpu.concatenate %76, %78, %80, %82 in 1 : vector<256x4xf32>, vector<256x4xf32>, vector<256x4xf32>, vector<256x4xf32> -> vector<256x16xf32>
    %84 = arith.truncf %83 : vector<256x16xf32> to vector<256x16xbf16>
    %c1_36 = arith.constant 1 : index
    %c1_37 = arith.constant 1 : index
    %c0_38 = arith.constant 0 : index
    %c0_39 = arith.constant 0 : index
    %85 = vector.load %arg2[%c1_36, %c1_37, %c0_38, %c0_39] : memref<2x2x16x8xbf16, #tpu.memory_space<vmem>>, vector<1x1x16x8xbf16>
    %86 = vector.shape_cast %85 : vector<1x1x16x8xbf16> to vector<16x8xbf16>
    %cst_40 = arith.constant dense<0.000000e+00> : vector<256x8xf32>
    %87 = tpu.matmul %84, %86, %cst_40 {dimension_numbers = #tpu.dot_dimension_numbers<[1], [0], [0], [1], [0, 0, 1, 1], [], []>} : vector<256x16xbf16>, vector<16x8xbf16>, vector<256x8xf32> -> vector<256x8xf32>
    %88 = vector.broadcast %6 : vector<1x8xf32> to vector<256x8xf32>
    %89 = arith.addf %87, %88 : vector<256x8xf32>
    %cst_41 = arith.constant dense<0.000000e+00> : vector<8xf32>
    %90 = vector.multi_reduction <add>, %89, %cst_41 [0] : vector<256x8xf32> to vector<8xf32>
    %91 = vector.shape_cast %90 : vector<8xf32> to vector<1x8xf32>
    %92 = arith.addf %70, %91 : vector<1x8xf32>
    %93 = arith.mulf %89, %89 : vector<256x8xf32>
    %cst_42 = arith.constant dense<0.000000e+00> : vector<8xf32>
    %94 = vector.multi_reduction <add>, %93, %cst_42 [0] : vector<256x8xf32> to vector<8xf32>
    %95 = vector.shape_cast %94 : vector<8xf32> to vector<1x8xf32>
    %96 = arith.addf %74, %95 : vector<1x8xf32>
    %97 = vector.shape_cast %23 : vector<256x8xf32> to vector<256x1x8xf32>
    %98 = vector.shape_cast %45 : vector<256x8xf32> to vector<256x1x8xf32>
    %99 = tpu.concatenate %97, %98 in 1 : vector<256x1x8xf32>, vector<256x1x8xf32> -> vector<256x2x8xf32>
    %100 = vector.shape_cast %99 : vector<256x2x8xf32> to vector<16x32x8xf32>
    %101 = vector.shape_cast %67 : vector<256x8xf32> to vector<256x1x8xf32>
    %102 = vector.shape_cast %89 : vector<256x8xf32> to vector<256x1x8xf32>
    %103 = tpu.concatenate %101, %102 in 1 : vector<256x1x8xf32>, vector<256x1x8xf32> -> vector<256x2x8xf32>
    %104 = vector.shape_cast %103 : vector<256x2x8xf32> to vector<16x32x8xf32>
    %105 = vector.shape_cast %100 : vector<16x32x8xf32> to vector<16x1x32x8xf32>
    %106 = vector.shape_cast %104 : vector<16x32x8xf32> to vector<16x1x32x8xf32>
    %107 = tpu.concatenate %105, %106 in 1 : vector<16x1x32x8xf32>, vector<16x1x32x8xf32> -> vector<16x2x32x8xf32>
    %108 = vector.shape_cast %107 : vector<16x2x32x8xf32> to vector<1024x8xf32>
    %109 = tpu.transpose %108, [1, 0] : vector<1024x8xf32> -> vector<8x1024xf32>
    %c0_43 = arith.constant 0 : index
    %c0_44 = arith.constant 0 : index
    %c0_45 = arith.constant 0 : index
    %110 = vector.load %arg4[%c0_43, %c0_44, %c0_45] : memref<1x8x1024xf32, #tpu.memory_space<vmem>>, vector<1x8x1024xf32>
    %111 = vector.shape_cast %110 : vector<1x8x1024xf32> to vector<8x1024xf32>
    %112 = vector.shape_cast %109 : vector<8x1024xf32> to vector<1x8x1024xf32>
    tpu.vector_store %arg4[%c0_43, %c0_44, %c0_45], %112 {strides = array<i32>} : memref<1x8x1024xf32, #tpu.memory_space<vmem>>, vector<1x8x1024xf32>,
    %c0_46 = arith.constant 0 : index
    %c0_47 = arith.constant 0 : index
    %c0_48 = arith.constant 0 : index
    %113 = vector.load %arg5[%c0_46, %c0_47, %c0_48] : memref<1x1x8xf32, #tpu.memory_space<vmem>>, vector<1x1x8xf32>
    %114 = vector.shape_cast %113 : vector<1x1x8xf32> to vector<1x8xf32>
    %115 = vector.shape_cast %92 : vector<1x8xf32> to vector<1x1x8xf32>
    tpu.vector_store %arg5[%c0_46, %c0_47, %c0_48], %115 {strides = array<i32>} : memref<1x1x8xf32, #tpu.memory_space<vmem>>, vector<1x1x8xf32>,
    %c0_49 = arith.constant 0 : index
    %c0_50 = arith.constant 0 : index
    %c0_51 = arith.constant 0 : index
    %116 = vector.load %arg6[%c0_49, %c0_50, %c0_51] : memref<1x1x8xf32, #tpu.memory_space<vmem>>, vector<1x1x8xf32>
    %117 = vector.shape_cast %116 : vector<1x1x8xf32> to vector<1x8xf32>
    %118 = vector.shape_cast %96 : vector<1x8xf32> to vector<1x1x8xf32>
    tpu.vector_store %arg6[%c0_49, %c0_50, %c0_51], %118 {strides = array<i32>} : memref<1x1x8xf32, #tpu.memory_space<vmem>>, vector<1x1x8xf32>,
    return
  }
  func.func @transform_0(%arg0: i32) -> (i32, i32, i32, i32) {
    %c0_i32 = arith.constant 0 : i32
    %c0_i32_0 = arith.constant 0 : i32
    %c0_i32_1 = arith.constant 0 : i32
    %c0_i32_2 = arith.constant 0 : i32
    return %arg0, %c0_i32, %c0_i32_0, %c0_i32_1 : i32, i32, i32, i32
  }
  func.func @transform_1(%arg0: i32) -> (i32, i32, i32, i32) {
    %c0_i32 = arith.constant 0 : i32
    %c0_i32_0 = arith.constant 0 : i32
    %c0_i32_1 = arith.constant 0 : i32
    %c0_i32_2 = arith.constant 0 : i32
    %c0_i32_3 = arith.constant 0 : i32
    return %c0_i32, %c0_i32_0, %c0_i32_1, %c0_i32_2 : i32, i32, i32, i32
  }
  func.func @transform_2(%arg0: i32) -> (i32, i32) {
    %c0_i32 = arith.constant 0 : i32
    %c0_i32_0 = arith.constant 0 : i32
    %c0_i32_1 = arith.constant 0 : i32
    return %c0_i32, %c0_i32_0 : i32, i32
  }
  func.func @transform_3(%arg0: i32) -> (i32, i32, i32) {
    %c0_i32 = arith.constant 0 : i32
    %c0_i32_0 = arith.constant 0 : i32
    %c0_i32_1 = arith.constant 0 : i32
    return %arg0, %c0_i32, %c0_i32_0 : i32, i32, i32
  }
  func.func @transform_4(%arg0: i32) -> (i32, i32, i32) {
    %c0_i32 = arith.constant 0 : i32
    %c0_i32_0 = arith.constant 0 : i32
    %c0_i32_1 = arith.constant 0 : i32
    return %arg0, %c0_i32, %c0_i32_0 : i32, i32, i32
  }
  func.func @transform_5(%arg0: i32) -> (i32, i32, i32) {
    %c0_i32 = arith.constant 0 : i32
    %c0_i32_0 = arith.constant 0 : i32
    %c0_i32_1 = arith.constant 0 : i32
    return %arg0, %c0_i32, %c0_i32_0 : i32, i32, i32
  }
}

</mosaic_0001>

<bundles_post_ra>
// kernel: trans_conv_forward.3
= control target key start
LH: loop header
LB: loop body
LE: loop exit
PB: predicated region body
PF: predicated region fallthrough
CT: control target
= control target key end

     0   :  { %s330_s12 = smov 0   ;;  %s353_s0 = inlined_call_operand.vmem [shape: f32[2,8,1024], index: 0, kind: input, shape index: {}, may-alias: {0,3}]   ;;  %s354_s1 = inlined_call_operand.vmem [shape: f32[8,1], index: 1, kind: input, shape index: {}]   ;;  %s355_s2 = inlined_call_operand.vmem [shape: f32[8,1], index: 2, kind: input, shape index: {}]   ;;  %s356_s3 = inlined_call_operand.vmem [shape: f32[2,8,1024], index: 3, kind: output, shape index: {}, may-alias: {0,3}]  }
   0x1 LB: > { %s278_s13 = sadd.s32 4294967295, %s307_s12   ;;  %p282_p0 = scmp.ge.s32.totalorder %s307_s12, 1  ;;  %s307_s12 = sphi %s330_s12, %s13_s12  }
   0x2   : > { %p137_p1 = scmp.lt.s32.totalorder %s307_s12, 3 }
   0x4   : > { %p138_p2 = pnand %p282_p0, %p137_p1 }
   0x5   : > { %v179_v0 = vld [vmem:[%s354_s1] sm:$0xff] (!%p138_p2)  ;;  %v309_v1 = vmov (!%p138_p2), 0   ;;  %p161_p3 = scmp.lt.s32.totalorder (!%p138_p2), %s278_s13, 1 }
   0x6   : > { %141 = sbr.rel (%p138_p2) target bundleno = 147 (0x93), region = 32  ;;  %300 = vset.pattern.permute.xlu0 (!%p138_p2), %v309_v1  ;;  %v193_v2 = vld [vmem:[%s355_s2] sm:$0xff] (!%p138_p2) }
   0x7   : > { %182 = vperm.xlu0 (!%p138_p2), %300, %v179_v0  }
   0xb   : > { %196 = vperm.xlu0 (!%p138_p2), %300, %v193_v2  }
   0xd   : > { %s358_s13 = smov (!%p161_p3, %s278_s13), 1 }
   0xe   : > { %s289_s18 = sshll.u32 %s358_s13, 6 }
   0xf   : > { %s165_s21 = scalar_lea.vmem %s353_s0, %s289_s18  ;;  %s170_s24 = scalar_lea.vmem %s356_s3, %s289_s18 }
  0x10   : > { %v171_v3 = vld [vmem:[%s165_s21] sm:$0xff]  ;;  %v172_v4 = vld [vmem:[%s165_s21 + $0x8] sm:$0xff]  ;;  %v173_v6 = vld [vmem:[%s165_s21 + $0x10] sm:$0xff] }
  0x11   : > { %v174_v7 = vld [vmem:[%s165_s21 + $0x18] sm:$0xff]  ;;  %v175_v8 = vld [vmem:[%s165_s21 + $0x20] sm:$0xff]  ;;  %v176_v9 = vld [vmem:[%s165_s21 + $0x28] sm:$0xff] }
  0x12   : > { %v177_v10 = vld [vmem:[%s165_s21 + $0x30] sm:$0xff]  ;;  %v178_v11 = vld [vmem:[%s165_s21 + $0x38] sm:$0xff] }
  0x86   : > { %v183_v5 = vpop.permute.xlu0 %182 }
  0x87   : > { %v185_v12 = vmul.f32 %v183_v5, %v171_v3  ;;  %v186_v13 = vmul.f32 %v183_v5, %v172_v4  ;;  %v187_v14 = vmul.f32 %v183_v5, %v173_v6  ;;  %v188_v15 = vmul.f32 %v183_v5, %v174_v7 }
  0x88   : > { %v189_v17 = vmul.f32 %v183_v5, %v175_v8  ;;  %v190_v18 = vmul.f32 %v183_v5, %v176_v9  ;;  %v191_v19 = vmul.f32 %v183_v5, %v177_v10  ;;  %v192_v20 = vmul.f32 %v183_v5, %v178_v11 }
  0x8a   : > { %v197_v16 = vpop.permute.xlu0 %196 }
  0x8b   : > { %v199_v21 = vadd.f32 %v197_v16, %v185_v12  ;;  %v200_v22 = vadd.f32 %v197_v16, %v186_v13  ;;  %v201_v23 = vadd.f32 %v197_v16, %v187_v14  ;;  %v202_v24 = vadd.f32 %v197_v16, %v188_v15 }
  0x8c   : > { %v203_v25 = vadd.f32 %v197_v16, %v189_v17  ;;  %v204_v26 = vadd.f32 %v197_v16, %v190_v18  ;;  %v205_v27 = vadd.f32 %v197_v16, %v191_v19  ;;  %v206_v28 = vadd.f32 %v197_v16, %v192_v20 }
  0x8d   : > { %v207_v29 = vmax.f32 %v199_v21, 0.0  ;;  %v208_v30 = vmax.f32 %v200_v22, 0.0  ;;  %v209_v31 = vmax.f32 %v201_v23, 0.0  ;;  %v210_v32 = vmax.f32 %v202_v24, 0.0 }
  0x8e   : > { %v211_v33 = vmax.f32 %v203_v25, 0.0  ;;  %v212_v34 = vmax.f32 %v204_v26, 0.0  ;;  %v213_v35 = vmax.f32 %v205_v27, 0.0  ;;  %v214_v36 = vmax.f32 %v206_v28, 0.0 }
  0x8f   : > { %215 = vst [vmem:[%s170_s24] sm:$0xff] %v207_v29  ;;  %216 = vst [vmem:[%s170_s24 + $0x8] sm:$0xff] %v208_v30 }
  0x90   : > { %217 = vst [vmem:[%s170_s24 + $0x10] sm:$0xff] %v209_v31  ;;  %218 = vst [vmem:[%s170_s24 + $0x18] sm:$0xff] %v210_v32 }
  0x91   : > { %219 = vst [vmem:[%s170_s24 + $0x20] sm:$0xff] %v211_v33  ;;  %220 = vst [vmem:[%s170_s24 + $0x28] sm:$0xff] %v212_v34 }
  0x92   : > { %221 = vst [vmem:[%s170_s24 + $0x30] sm:$0xff] %v213_v35  ;;  %222 = vst [vmem:[%s170_s24 + $0x38] sm:$0xff] %v214_v36 }
  0x93 PF: > { %s13_s12 = sadd.s32 1, %s307_s12  }
  0x94   : > { %p10_p4 = scmp.ge.s32.totalorder %s13_s12, 4  }
  0x96   :  { %12 = sbr.rel (!%p10_p4) target bundleno = 1 (0x1), region = 62 }

// kernel: trans_conv_forward.2
= control target key start
LH: loop header
LB: loop body
LE: loop exit
PB: predicated region body
PF: predicated region fallthrough
CT: control target
= control target key end

     0   :  { %s17082_s18 = smov 0   ;;  %s25546_s0 = inlined_call_operand.vmem [shape: f32[2,16,16,4], index: 0, kind: input, shape index: {}]   ;;  %s25547_s1 = inlined_call_operand.vmem [shape: bf16[2,2,16,8], index: 1, kind: input, shape index: {}]   ;;  %s25548_s2 = inlined_call_operand.vmem [shape: f32[1,8], index: 2, kind: input, shape index: {}]   ;;  %s25549_s3 = inlined_call_operand.vmem [shape: f32[2,8,1024], index: 3, kind: output, shape index: {0}]   ;;  %s25550_s4 = inlined_call_operand.vmem [shape: f32[2,1,8], index: 4, kind: output, shape index: {1}]   ;;  %s25551_s5 = inlined_call_operand.vmem [shape: f32[2,1,8], index: 5, kind: output, shape index: {2}]  }
   0x1 LB: > { %s16190_s19 = sadd.s32 4294967295, %s17044_s18   ;;  %p16194_p0 = scmp.ge.s32.totalorder %s17044_s18, 1  ;;  %s17044_s18 = sphi %s17082_s18, %s16_s18  }
   0x2   : > { %p192_p1 = scmp.lt.s32.totalorder %s17044_s18, 3 }
   0x4   : > { %p193_p2 = pnand %p16194_p0, %p192_p1 }
   0x6   : > { %196 = sbr.rel (%p193_p2) target bundleno = 1594 (0x63a), region = 32 }
   0xd   : > { %vm243_vm0 = vcmask 31744   ;;  %vm246_vm1 = vcmask 25600   ;;  %p17092_p3 = scmp.lt.s32.totalorder %s16190_s19, 1  ;;  %v17046_v0 = vmov 0.0   ;;  %vm467_vm2 = vcmask 1046528   ;;  %s17047_s25 = smov 4  }
   0xe   : > { %244 = vst.msk [vmem:[#allocation2] sm:$0xff] %vm243_vm0, %v17046_v0  ;;  %245 = vst.msk [vmem:[#allocation2 + $0x8] sm:$0xff] %vm243_vm0, %v17046_v0  ;;  %s17048_s26 = smov 8   ;;  %s17049_s29 = smov 12   ;;  %vm1388_vm3 = vcmask 1045504   ;;  %vm910_vm4 = vcmask 64512  }
   0xf   : > { %247 = vst.msk [vmem:[#allocation2 + $0x10] sm:$0x3] %vm246_vm1, %v17046_v0  ;;  %250 = vst.msk [vmem:[#allocation2 + $0x28] sm:$0x3] %vm246_vm1, %v17046_v0  ;;  %s27699_s19 = smov (!%p17092_p3, %s16190_s19), 1  ;;  %vm943_vm5 = vcmask 97280  }
  0x10   : > { %248 = vst.msk [vmem:[#allocation2 + $0x18] sm:$0xff] %vm243_vm0, %v17046_v0  ;;  %249 = vst.msk [vmem:[#allocation2 + $0x20] sm:$0xff] %vm243_vm0, %v17046_v0  ;;  %s16276_s21 = sshll.u32 %s27699_s19, 8  ;;  %vm1006_vm6 = vcmask 130048   ;;  %vm7753_vm7 = vcmask 1040384   ;;  %vm16082_vm8 = vcmask 57344   ;;  %s238_s27 = scalar_lea.vmem %s25550_s4, %s27699_s19 }
  0x11   : > { %251 = vst.msk [vmem:[#allocation2 + $0x30] sm:$0xff] %vm243_vm0, %v17046_v0  ;;  %252 = vst.msk [vmem:[#allocation2 + $0x38] sm:$0xff] %vm243_vm0, %v17046_v0  ;;  %s17160_s24 = scalar_lea.vmem %s25546_s0, %s16276_s21  ;;  %s241_s30 = scalar_lea.vmem %s25551_s5, %s27699_s19 }
  0x12   : > { %253 = vst.msk [vmem:[#allocation2 + $0x40] sm:$0x3] %vm246_vm1, %v17046_v0  ;;  %256 = vst.msk [vmem:[#allocation2 + $0x58] sm:$0x3] %vm246_vm1, %v17046_v0  ;;  %v301_v1 = vld [vmem:[%s17160_s24 + $0x10] sm:$0xff]  ;;  %v302_v2 = vld [vmem:[%s17160_s24 + $0x18] sm:$0xff] }
  0x13   : > { %254 = vst.msk [vmem:[#allocation2 + $0x48] sm:$0xff] %vm243_vm0, %v17046_v0  ;;  %255 = vst.msk [vmem:[#allocation2 + $0x50] sm:$0xff] %vm243_vm0, %v17046_v0  ;;  %v299_v3 = vld [vmem:[%s17160_s24] sm:$0xff]  ;;  %v300_v4 = vld [vmem:[%s17160_s24 + $0x8] sm:$0xff]  ;;  %s16277_s6 = sshll.u32 %s27699_s19, 6 }
  0x14   : > { %257 = vst.msk [vmem:[#allocation2 + $0x60] sm:$0xff] %vm243_vm0, %v17046_v0  ;;  %258 = vst.msk [vmem:[#allocation2 + $0x68] sm:$0xff] %vm243_vm0, %v17046_v0  ;;  %v303_v5 = vld [vmem:[%s17160_s24 + $0x20] sm:$0xff]  ;;  %v304_v6 = vld [vmem:[%s17160_s24 + $0x28] sm:$0xff]  ;;  %s24745_s9 = scalar_lea.vmem %s25549_s3, %s16277_s6 }
  0x15   : > { %259 = vst.msk [vmem:[#allocation2 + $0x70] sm:$0x3] %vm246_vm1, %v17046_v0  ;;  %262 = vst.msk [vmem:[#allocation2 + $0x88] sm:$0x3] %vm246_vm1, %v17046_v0  ;;  %v17171_v7 = vld [vmem:[#allocation2] sm:$0xff]  ;;  %v17173_v8 = vld [vmem:[#allocation2 + $0x8] sm:$0xff] }
  0x16   : > { %260 = vst.msk [vmem:[#allocation2 + $0x78] sm:$0xff] %vm243_vm0, %v17046_v0  ;;  %261 = vst.msk [vmem:[#allocation2 + $0x80] sm:$0xff] %vm243_vm0, %v17046_v0  ;;  %v17175_v9 = vld [vmem:[#allocation2 + $0x10] sm:$0x3]  ;;  %v468_v10 = vrot.slane %v17171_v7, 1  ;;  %v469_v11 = vrot.slane %v17173_v8, 1 }
  0x17   : > { %263 = vst.msk [vmem:[#allocation2 + $0x90] sm:$0xff] %vm243_vm0, %v17046_v0  ;;  %264 = vst.msk [vmem:[#allocation2 + $0x98] sm:$0xff] %vm243_vm0, %v17046_v0  ;;  %v471_v12 = vrot.slane %v17175_v9, 1  ;;  %v305_v13 = vld [vmem:[%s17160_s24 + $0x30] sm:$0xff]  ;;  %v306_v14 = vld [vmem:[%s17160_s24 + $0x38] sm:$0xff] }
  0x18   : > { %265 = vst.msk [vmem:[#allocation2 + $0xa0] sm:$0x3] %vm246_vm1, %v17046_v0  ;;  %268 = vst.msk [vmem:[#allocation2 + $0xb8] sm:$0x3] %vm246_vm1, %v17046_v0  ;;  %v307_v15 = vld [vmem:[%s17160_s24 + $0x40] sm:$0xff]  ;;  %v308_v16 = vld [vmem:[%s17160_s24 + $0x48] sm:$0xff]  ;;  %v17191_v18 = vsel %vm467_vm2, %v468_v10, %v469_v11 }
  0x19   : > { %266 = vst.msk [vmem:[#allocation2 + $0xa8] sm:$0xff] %vm243_vm0, %v17046_v0  ;;  %267 = vst.msk [vmem:[#allocation2 + $0xb0] sm:$0xff] %vm243_vm0, %v17046_v0  ;;  %v309_v17 = vld [vmem:[%s17160_s24 + $0x50] sm:$0xff]  ;;  %v17194_v19 = vsel %vm467_vm2, %v469_v11, %v471_v12  ;;  %v310_v20 = vld [vmem:[%s17160_s24 + $0x58] sm:$0xff] }
  0x1a   : > { %269 = vst.msk [vmem:[#allocation2 + $0xc0] sm:$0xff] %vm243_vm0, %v17046_v0  ;;  %270 = vst.msk [vmem:[#allocation2 + $0xc8] sm:$0xff] %vm243_vm0, %v17046_v0  ;;  %v311_v21 = vld [vmem:[%s17160_s24 + $0x60] sm:$0xff]  ;;  %v312_v22 = vld [vmem:[%s17160_s24 + $0x68] sm:$0xff]  ;;  %v16496_v23 = vpack.i.bf16 %v17194_v19, %v17191_v18 }
  0x1b   : > { %271 = vst.msk [vmem:[#allocation2 + $0xd0] sm:$0x3] %vm246_vm1, %v17046_v0  ;;  %274 = vst.msk [vmem:[#allocation2 + $0xe8] sm:$0x3] %vm246_vm1, %v17046_v0  ;;  %v313_v24 = vld [vmem:[%s17160_s24 + $0x70] sm:$0xff]  ;;  %v314_v25 = vld [vmem:[%s17160_s24 + $0x78] sm:$0xff] }
  0x1c   : > { %272 = vst.msk [vmem:[#allocation2 + $0xd8] sm:$0xff] %vm243_vm0, %v17046_v0  ;;  %273 = vst.msk [vmem:[#allocation2 + $0xe0] sm:$0xff] %vm243_vm0, %v17046_v0  ;;  %v315_v26 = vld [vmem:[%s17160_s24 + $0x80] sm:$0xff]  ;;  %v316_v27 = vld [vmem:[%s17160_s24 + $0x88] sm:$0xff]  ;;  %16497 = vrot.lane.b32.xlu0 %v16496_v23, %s17047_s25 }
  0x1d   : > { %275 = vst.msk [vmem:[#allocation2 + $0xf0] sm:$0xff] %vm243_vm0, %v17046_v0  ;;  %276 = vst.msk [vmem:[#allocation2 + $0xf8] sm:$0xff] %vm243_vm0, %v17046_v0  ;;  %v317_v28 = vld [vmem:[%s17160_s24 + $0x90] sm:$0xff]  ;;  %v318_v29 = vld [vmem:[%s17160_s24 + $0x98] sm:$0xff] }
  0x1e   : > { %277 = vst.msk [vmem:[#allocation2 + $0x100] sm:$0x3] %vm246_vm1, %v17046_v0  ;;  %280 = vst.msk [vmem:[#allocation2 + $0x118] sm:$0x3] %vm246_vm1, %v17046_v0 }
  0x1f   : > { %278 = vst.msk [vmem:[#allocation2 + $0x108] sm:$0xff] %vm243_vm0, %v17046_v0  ;;  %279 = vst.msk [vmem:[#allocation2 + $0x110] sm:$0xff] %vm243_vm0, %v17046_v0 }
  0x20   : > { %281 = vst.msk [vmem:[#allocation2 + $0x120] sm:$0xff] %vm243_vm0, %v17046_v0  ;;  %282 = vst.msk [vmem:[#allocation2 + $0x128] sm:$0xff] %vm243_vm0, %v17046_v0 }
  0x21   : > { %283 = vst.msk [vmem:[#allocation2 + $0x130] sm:$0x3] %vm246_vm1, %v17046_v0  ;;  %286 = vst.msk [vmem:[#allocation2 + $0x148] sm:$0x3] %vm246_vm1, %v17046_v0 }
  0x22   : > { %284 = vst.msk [vmem:[#allocation2 + $0x138] sm:$0xff] %vm243_vm0, %v17046_v0  ;;  %285 = vst.msk [vmem:[#allocation2 + $0x140] sm:$0xff] %vm243_vm0, %v17046_v0 }
  0x23   : > { %287 = vst.msk [vmem:[#allocation2 + $0x150] sm:$0xff] %vm243_vm0, %v17046_v0  ;;  %288 = vst.msk [vmem:[#allocation2 + $0x158] sm:$0xff] %vm243_vm0, %v17046_v0 }
  0x24   : > { %289 = vst.msk [vmem:[#allocation2 + $0x160] sm:$0x3] %vm246_vm1, %v17046_v0  ;;  %292 = vst.msk [vmem:[#allocation2 + $0x178] sm:$0x3] %vm246_vm1, %v17046_v0 }
  0x25   : > { %290 = vst.msk [vmem:[#allocation2 + $0x168] sm:$0xff] %vm243_vm0, %v17046_v0  ;;  %291 = vst.msk [vmem:[#allocation2 + $0x170] sm:$0xff] %vm243_vm0, %v17046_v0 }
  0x26   : > { %293 = vst.msk [vmem:[#allocation2 + $0x180] sm:$0xff] %vm243_vm0, %v17046_v0  ;;  %294 = vst.msk [vmem:[#allocation2 + $0x188] sm:$0xff] %vm243_vm0, %v17046_v0 }
  0x27   : > { %295 = vst.msk [vmem:[#allocation2 + $0x190] sm:$0x3] %vm246_vm1, %v17046_v0  ;;  %298 = vst.msk [vmem:[#allocation2 + $0x1a8] sm:$0x3] %vm246_vm1, %v17046_v0 }
  0x28   : > { %296 = vst.msk [vmem:[#allocation2 + $0x198] sm:$0xff] %vm243_vm0, %v17046_v0  ;;  %297 = vst.msk [vmem:[#allocation2 + $0x1a0] sm:$0xff] %vm243_vm0, %v17046_v0 }
  0x29   : > { %334 = vst.msk [vmem:[#allocation2 + $0x31] sm:$0xff] %vm243_vm0, %v301_v1  ;;  %335 = vst.msk [vmem:[#allocation2 + $0x39] sm:$0xff] %vm243_vm0, %v302_v2 }
  0x2a   : > { %332 = vst.msk [vmem:[#allocation2 + $0x19] sm:$0xff] %vm243_vm0, %v299_v3  ;;  %333 = vst.msk [vmem:[#allocation2 + $0x21] sm:$0xff] %vm243_vm0, %v300_v4 }
  0x2b   : > { %336 = vst.msk [vmem:[#allocation2 + $0x49] sm:$0xff] %vm243_vm0, %v303_v5  ;;  %337 = vst.msk [vmem:[#allocation2 + $0x51] sm:$0xff] %vm243_vm0, %v304_v6 }
  0x2c   : > { %338 = vst.msk [vmem:[#allocation2 + $0x61] sm:$0xff] %vm243_vm0, %v305_v13  ;;  %339 = vst.msk [vmem:[#allocation2 + $0x69] sm:$0xff] %vm243_vm0, %v306_v14 }
  0x2d   : > { %26305 = vst [vmem:[#allocation3_spill] sm:$0xff] %v17191_v18  ;;  %26306 = vst [vmem:[#allocation4_spill] sm:$0xff] %v17194_v19 }
  0x2e   : > { %340 = vst.msk [vmem:[#allocation2 + $0x79] sm:$0xff] %vm243_vm0, %v307_v15  ;;  %341 = vst.msk [vmem:[#allocation2 + $0x81] sm:$0xff] %vm243_vm0, %v308_v16 }
  0x2f   : > { %342 = vst.msk [vmem:[#allocation2 + $0x91] sm:$0xff] %vm243_vm0, %v309_v17  ;;  %343 = vst.msk [vmem:[#allocation2 + $0x99] sm:$0xff] %vm243_vm0, %v310_v20 }
  0x30   : > { %344 = vst.msk [vmem:[#allocation2 + $0xa9] sm:$0xff] %vm243_vm0, %v311_v21  ;;  %345 = vst.msk [vmem:[#allocation2 + $0xb1] sm:$0xff] %vm243_vm0, %v312_v22  ;;  %v17217_v30 = vld [vmem:[#allocation2 + $0x30] sm:$0xff]  ;;  %v17219_v31 = vld [vmem:[#allocation2 + $0x38] sm:$0xff] }
  0x31   : > { %346 = vst.msk [vmem:[#allocation2 + $0xc1] sm:$0xff] %vm243_vm0, %v313_v24  ;;  %347 = vst.msk [vmem:[#allocation2 + $0xc9] sm:$0xff] %vm243_vm0, %v314_v25  ;;  %v17221_v32 = vld [vmem:[#allocation2 + $0x40] sm:$0x3]  ;;  %v478_v33 = vrot.slane %v17217_v30, 1  ;;  %v479_v34 = vrot.slane %v17219_v31, 1 }
  0x32   : > { %348 = vst.msk [vmem:[#allocation2 + $0xd9] sm:$0xff] %vm243_vm0, %v315_v26  ;;  %26307 = vst [vmem:[#allocation5_spill] sm:$0xff] %v17217_v30  ;;  %v481_v35 = vrot.slane %v17221_v32, 1  ;;  %v17229_v36 = vld [vmem:[#allocation2 + $0x18] sm:$0xff]  ;;  %v17231_v37 = vld [vmem:[#allocation2 + $0x20] sm:$0xff] }
  0x33   : > { %349 = vst.msk [vmem:[#allocation2 + $0xe1] sm:$0xff] %vm243_vm0, %v316_v27  ;;  %350 = vst.msk [vmem:[#allocation2 + $0xf1] sm:$0xff] %vm243_vm0, %v317_v28  ;;  %v17233_v38 = vld [vmem:[#allocation2 + $0x48] sm:$0xff]  ;;  %v473_v40 = vrot.slane %v17229_v36, 1  ;;  %v474_v41 = vrot.slane %v17231_v37, 1  ;;  %v17239_v42 = vld [vmem:[#allocation2 + $0x50] sm:$0xff]  ;;  %v17243_v44 = vsel %vm467_vm2, %v478_v33, %v479_v34 }
  0x34   : > { %351 = vst.msk [vmem:[#allocation2 + $0xf9] sm:$0xff] %vm243_vm0, %v318_v29  ;;  %26308 = vst [vmem:[#allocation6_spill] sm:$0xff] %v17229_v36  ;;  %v17235_v39 = vld [vmem:[#allocation2 + $0x28] sm:$0x3]  ;;  %v483_v43 = vrot.slane %v17233_v38, 1  ;;  %v17246_v45 = vsel %vm467_vm2, %v479_v34, %v481_v35  ;;  %v484_v48 = vrot.slane %v17239_v42, 1 }
  0x35   : > { %26309 = vst [vmem:[#allocation7_spill] sm:$0xff] %v17231_v37  ;;  %26310 = vst [vmem:[#allocation8_spill] sm:$0xff] %v17243_v44  ;;  %v476_v46 = vrot.slane %v17235_v39, 1  ;;  %v17249_v47 = vld [vmem:[#allocation2 + $0x58] sm:$0x3]  ;;  %v17252_v49 = vld [vmem:[#allocation2 + $0x60] sm:$0xff]  ;;  %v17258_v51 = vpack.i.bf16 %v17246_v45, %v17243_v44  ;;  %v17261_v52 = vsel %vm467_vm2, %v473_v40, %v474_v41 }
  0x36   : > { %26311 = vst [vmem:[#allocation9_spill] sm:$0xff] %v17246_v45  ;;  %v17254_v50 = vld [vmem:[#allocation2 + $0x68] sm:$0xff]  ;;  %26312 = vst [vmem:[#allocation10_spill] sm:$0xff] %v17261_v52  ;;  %v486_v53 = vrot.slane %v17249_v47, 1  ;;  %v17264_v54 = vld [vmem:[#allocation2 + $0x70] sm:$0x3]  ;;  %v17275_v59 = vsel %vm467_vm2, %v483_v43, %v484_v48 }
  0x37   : > { %v488_v55 = vrot.slane %v17252_v49, 1  ;;  %v17267_v56 = vld [vmem:[#allocation2 + $0x78] sm:$0xff]  ;;  %v17269_v57 = vld [vmem:[#allocation2 + $0x80] sm:$0xff]  ;;  %v17272_v58 = vsel %vm467_vm2, %v474_v41, %v476_v46  ;;  %26314 = vst [vmem:[#allocation12_spill] sm:$0xff] %v17275_v59  ;;  %v489_v60 = vrot.slane %v17254_v50, 1  ;;  %v491_v61 = vrot.slane %v17264_v54, 1  ;;  %16507 = vrot.lane.b32.xlu1 %v17258_v51, %s17047_s25 }
  0x38   : > { %26313 = vst [vmem:[#allocation11_spill] sm:$0xff] %v17272_v58  ;;  %v17279_v62 = vld [vmem:[#allocation2 + $0x88] sm:$0x3]  ;;  %v17281_v63 = vld [vmem:[#allocation2 + $0x90] sm:$0xff]  ;;  %v17283_v0 = vld [vmem:[#allocation2 + $0x98] sm:$0xff]  ;;  %v17289_v1 = vpack.i.bf16 %v17272_v58, %v17261_v52  ;;  %v17292_v2 = vsel %vm467_vm2, %v484_v48, %v486_v53  ;;  %v493_v3 = vrot.slane %v17267_v56, 1 }
  0x39   : > { %26315 = vst [vmem:[#allocation13_spill] sm:$0xff] %v17292_v2  ;;  %v494_v4 = vrot.slane %v17269_v57, 1  ;;  %v17296_v5 = vld [vmem:[#allocation2 + $0xa0] sm:$0x3]  ;;  %v17298_v6 = vld [vmem:[#allocation2 + $0xa8] sm:$0xff]  ;;  %v17300_v10 = vld [vmem:[#allocation2 + $0xb0] sm:$0xff]  ;;  %v17304_v11 = vpack.i.bf16 %v17292_v2, %v17275_v59  ;;  %v17307_v12 = vsel %vm467_vm2, %v488_v55, %v489_v60  ;;  %v17310_v13 = vsel %vm467_vm2, %v489_v60, %v491_v61 }
  0x3a   : > { %26316 = vst [vmem:[#allocation14_spill] sm:$0xff] %v17296_v5  ;;  %26317 = vst [vmem:[#allocation15_spill] sm:$0xff] %v17307_v12  ;;  %v496_v14 = vrot.slane %v17279_v62, 1  ;;  %v17313_v15 = vld [vmem:[#allocation2 + $0xb8] sm:$0x3]  ;;  %v17315_v16 = vld [vmem:[#allocation2 + $0xc0] sm:$0xff]  ;;  %16502 = vrot.lane.b32.xlu0 %v17289_v1, %s17047_s25  ;;  %v17323_v20 = vpack.i.bf16 %v17310_v13, %v17307_v12 }
  0x3b   : > { %26318 = vst [vmem:[#allocation16_spill] sm:$0xff] %v17310_v13  ;;  %26319 = vst [vmem:[#allocation17_spill] sm:$0xff] %v17313_v15  ;;  %v17317_v17 = vld [vmem:[#allocation2 + $0xc8] sm:$0xff]  ;;  %v17326_v21 = vsel %vm467_vm2, %v493_v3, %v494_v4  ;;  %v498_v22 = vrot.slane %v17281_v63, 1  ;;  %v499_v23 = vrot.slane %v17283_v0, 1  ;;  %v17332_v25 = vld [vmem:[#allocation2 + $0xd8] sm:$0xff]  ;;  %16512 = vrot.lane.b32.xlu1 %v17304_v11, %s17047_s25 }
  0x3c   : > { %26320 = vst [vmem:[#allocation18_spill] sm:$0xff] %v17326_v21  ;;  %v17330_v24 = vld [vmem:[#allocation2 + $0xd0] sm:$0x3]  ;;  %v17334_v26 = vld [vmem:[#allocation2 + $0xe0] sm:$0xff]  ;;  %v17337_v27 = vsel %vm467_vm2, %v494_v4, %v496_v14  ;;  %v501_v28 = vrot.slane %v17296_v5, 1  ;;  %v503_v29 = vrot.slane %v17298_v6, 1 }
  0x3d   : > { %26321 = vst [vmem:[#allocation19_spill] sm:$0xff] %v17330_v24  ;;  %26322 = vst [vmem:[#allocation20_spill] sm:$0xff] %v17337_v27  ;;  %v504_v33 = vrot.slane %v17300_v10, 1  ;;  %v17342_v34 = vld [vmem:[#allocation2 + $0xe8] sm:$0x3]  ;;  %v17344_v35 = vld [vmem:[#allocation2 + $0xf0] sm:$0xff]  ;;  %v17350_v40 = vpack.i.bf16 %v17337_v27, %v17326_v21  ;;  %v17353_v41 = vsel %vm467_vm2, %v498_v22, %v499_v23 }
  0x3e   : > { %26323 = vst [vmem:[#allocation21_spill] sm:$0xff] %v17342_v34  ;;  %26324 = vst [vmem:[#allocation22_spill] sm:$0xff] %v17353_v41  ;;  %v506_v43 = vrot.slane %v17313_v15, 1  ;;  %v508_v46 = vrot.slane %v17315_v16, 1  ;;  %v17357_v48 = vld [vmem:[#allocation2 + $0xf8] sm:$0xff]  ;;  %v319_v55 = vld [vmem:[%s17160_s24 + $0xa0] sm:$0xff]  ;;  %v17363_v60 = vsel %vm467_vm2, %v499_v23, %v501_v28  ;;  %16517 = vrot.lane.b32.xlu0 %v17323_v20, %s17047_s25 }
  0x3f   : > { %v17359_v53 = vld [vmem:[#allocation2 + $0x100] sm:$0x3]  ;;  %26326 = vst [vmem:[#allocation24_spill] sm:$0xff] %v17363_v60  ;;  %v17366_v61 = vsel %vm467_vm2, %v503_v29, %v504_v33  ;;  %v509_v3 = vrot.slane %v17317_v17, 1  ;;  %v511_v4 = vrot.slane %v17330_v24, 1  ;;  %v320_v14 = vld [vmem:[%s17160_s24 + $0xa8] sm:$0xff]  ;;  %v17378_v23 = vpack.i.bf16 %v17363_v60, %v17353_v41  ;;  %16522 = vrot.lane.b32.xlu1 %v17350_v40, %s17047_s25 }
  0x40   : > { %26325 = vst [vmem:[#allocation23_spill] sm:$0xff] %v17359_v53  ;;  %26327 = vst [vmem:[#allocation25_spill] sm:$0xff] %v17366_v61  ;;  %v321_v22 = vld [vmem:[%s17160_s24 + $0xb0] sm:$0xff]  ;;  %v322_v21 = vld [vmem:[%s17160_s24 + $0xb8] sm:$0xff]  ;;  %v17381_v28 = vsel %vm467_vm2, %v504_v33, %v506_v43  ;;  %v513_v29 = vrot.slane %v17332_v25, 1  ;;  %v514_v27 = vrot.slane %v17334_v26, 1 }
  0x41   : > { %352 = vst.msk [vmem:[#allocation2 + $0x109] sm:$0xff] %vm243_vm0, %v319_v55  ;;  %26328 = vst [vmem:[#allocation26_spill] sm:$0xff] %v17381_v28  ;;  %v323_v55 = vld [vmem:[%s17160_s24 + $0xc0] sm:$0xff]  ;;  %v324_v12 = vld [vmem:[%s17160_s24 + $0xc8] sm:$0xff]  ;;  %v17392_v41 = vsel %vm467_vm2, %v508_v46, %v509_v3  ;;  %v17395_v33 = vsel %vm467_vm2, %v509_v3, %v511_v4  ;;  %v516_v43 = vrot.slane %v17342_v34, 1  ;;  %v17408_v46 = vpack.i.bf16 %v17381_v28, %v17366_v61 }
  0x42   : > { %353 = vst.msk [vmem:[#allocation2 + $0x111] sm:$0xff] %vm243_vm0, %v320_v14  ;;  %354 = vst.msk [vmem:[#allocation2 + $0x121] sm:$0xff] %vm243_vm0, %v321_v22  ;;  %v325_v13 = vld [vmem:[%s17160_s24 + $0xd0] sm:$0xff]  ;;  %v326_v14 = vld [vmem:[%s17160_s24 + $0xd8] sm:$0xff]  ;;  %v518_v3 = vrot.slane %v17344_v35, 1  ;;  %v519_v4 = vrot.slane %v17357_v48, 1  ;;  %16527 = vrot.lane.b32.xlu0 %v17378_v23, %s17047_s25 }
  0x43   : > { %355 = vst.msk [vmem:[#allocation2 + $0x129] sm:$0xff] %vm243_vm0, %v322_v21  ;;  %26329 = vst [vmem:[#allocation27_spill] sm:$0xff] %v17392_v41  ;;  %v327_v21 = vld [vmem:[%s17160_s24 + $0xe0] sm:$0xff]  ;;  %v328_v22 = vld [vmem:[%s17160_s24 + $0xe8] sm:$0xff]  ;;  %v17421_v60 = vsel %vm467_vm2, %v514_v27, %v516_v43  ;;  %v521_v61 = vrot.slane %v17359_v53, 1  ;;  %16532 = vrot.lane.b32.xlu1 %v17408_v46, %s17047_s25 }
  0x44   : > { %26330 = vst [vmem:[#allocation28_spill] sm:$0xff] %v17395_v33  ;;  %356 = vst.msk [vmem:[#allocation2 + $0x139] sm:$0xff] %vm243_vm0, %v323_v55  ;;  %v17418_v55 = vsel %vm467_vm2, %v513_v29, %v514_v27 }
  0x45   : > { %357 = vst.msk [vmem:[#allocation2 + $0x141] sm:$0xff] %vm243_vm0, %v324_v12  ;;  %358 = vst.msk [vmem:[#allocation2 + $0x151] sm:$0xff] %vm243_vm0, %v325_v13  ;;  %v329_v12 = vld [vmem:[%s17160_s24 + $0xf0] sm:$0xff]  ;;  %v330_v13 = vld [vmem:[%s17160_s24 + $0xf8] sm:$0xff]  ;;  %v17436_v29 = vsel %vm467_vm2, %v519_v4, %v521_v61  ;;  %v17442_v27 = vpack.i.bf16 %v17421_v60, %v17418_v55 }
  0x46   : > { %359 = vst.msk [vmem:[#allocation2 + $0x159] sm:$0xff] %vm243_vm0, %v326_v14  ;;  %360 = vst.msk [vmem:[#allocation2 + $0x169] sm:$0xff] %vm243_vm0, %v327_v21  ;;  %v17430_v14 = vpack.i.bf16 %v17395_v33, %v17392_v41  ;;  %v17433_v21 = vsel %vm467_vm2, %v518_v3, %v519_v4 }
  0x47   : > { %361 = vst.msk [vmem:[#allocation2 + $0x171] sm:$0xff] %vm243_vm0, %v328_v22  ;;  %26331 = vst [vmem:[#allocation29_spill] sm:$0xff] %v17418_v55  ;;  %v17457_v61 = vpack.i.bf16 %v17436_v29, %v17433_v21  ;;  %16542 = vrot.lane.b32.xlu1 %v17442_v27, %s17047_s25 }
  0x48   : > { %26332 = vst [vmem:[#allocation30_spill] sm:$0xff] %v17421_v60  ;;  %362 = vst.msk [vmem:[#allocation2 + $0x181] sm:$0xff] %vm243_vm0, %v329_v12  ;;  %v17444_v43 = vld [vmem:[#allocation2 + $0x108] sm:$0xff]  ;;  %16537 = vrot.lane.b32.xlu0 %v17430_v14, %s17047_s25 }
  0x49   : > { %363 = vst.msk [vmem:[#allocation2 + $0x189] sm:$0xff] %vm243_vm0, %v330_v13  ;;  %26333 = vst [vmem:[#allocation31_spill] sm:$0xff] %v17433_v21  ;;  %v17446_v22 = vld [vmem:[#allocation2 + $0x110] sm:$0xff]  ;;  %v17448_v12 = vld [vmem:[#allocation2 + $0x118] sm:$0x3]  ;;  %v523_v13 = vrot.slane %v17444_v43, 1 }
  0x4a   : > { %26334 = vst [vmem:[#allocation32_spill] sm:$0xff] %v17436_v29  ;;  %26335 = vst [vmem:[#allocation33_spill] sm:$0xff] %v17448_v12  ;;  %v17451_v3 = vld [vmem:[#allocation2 + $0x120] sm:$0xff]  ;;  %v524_v4 = vrot.slane %v17446_v22, 1  ;;  %v526_v55 = vrot.slane %v17448_v12, 1  ;;  %v17461_v60 = vld [vmem:[#allocation2 + $0x128] sm:$0xff] }
  0x4b   : > { %v17463_v41 = vld [vmem:[#allocation2 + $0x130] sm:$0x3]  ;;  %v528_v33 = vrot.slane %v17451_v3, 1  ;;  %v529_v28 = vrot.slane %v17461_v60, 1  ;;  %v17468_v2 = vld [vmem:[#allocation2 + $0x138] sm:$0xff] }
  0x4c   : > { %26336 = vst [vmem:[#allocation34_spill] sm:$0xff] %v17463_v41  ;;  %v531_v59 = vrot.slane %v17463_v41, 1  ;;  %v17470_v44 = vld [vmem:[#allocation2 + $0x140] sm:$0xff]  ;;  %v17472_v21 = vld [vmem:[#allocation2 + $0x148] sm:$0x3]  ;;  %v17477_v29 = vsel %vm467_vm2, %v523_v13, %v524_v4  ;;  %v17480_v45 = vsel %vm467_vm2, %v524_v4, %v526_v55  ;;  %v533_v52 = vrot.slane %v17468_v2, 1  ;;  %16547 = vrot.lane.b32.xlu0 %v17457_v61, %s17047_s25 }
  0x4d   : > { %26337 = vst [vmem:[#allocation35_spill] sm:$0xff] %v17472_v21  ;;  %26338 = vst [vmem:[#allocation36_spill] sm:$0xff] %v17477_v29  ;;  %v534_v58 = vrot.slane %v17470_v44, 1  ;;  %v17484_v18 = vld [vmem:[#allocation2 + $0x150] sm:$0xff]  ;;  %v17486_v19 = vld [vmem:[#allocation2 + $0x158] sm:$0xff]  ;;  %v17492_v12 = vpack.i.bf16 %v17480_v45, %v17477_v29  ;;  %v17495_v13 = vsel %vm467_vm2, %v528_v33, %v529_v28  ;;  %v536_v4 = vrot.slane %v17472_v21, 1 }
  0x4e   : > { %26339 = vst [vmem:[#allocation37_spill] sm:$0xff] %v17480_v45  ;;  %v17488_v41 = vld [vmem:[#allocation2 + $0x160] sm:$0x3]  ;;  %26341 = vst [vmem:[#allocation39_spill] sm:$0xff] %v17495_v13  ;;  %v17498_v55 = vsel %vm467_vm2, %v529_v28, %v531_v59  ;;  %v17501_v53 = vld [vmem:[#allocation2 + $0x168] sm:$0xff]  ;;  %v538_v59 = vrot.slane %v17484_v18, 1 }
  0x4f   : > { %26340 = vst [vmem:[#allocation38_spill] sm:$0xff] %v17488_v41  ;;  %26342 = vst [vmem:[#allocation40_spill] sm:$0xff] %v17498_v55  ;;  %v17503_v34 = vld [vmem:[#allocation2 + $0x170] sm:$0xff]  ;;  %v17505_v24 = vld [vmem:[#allocation2 + $0x178] sm:$0x3]  ;;  %v17511_v29 = vpack.i.bf16 %v17498_v55, %v17495_v13  ;;  %v17514_v33 = vsel %vm467_vm2, %v533_v52, %v534_v58  ;;  %v539_v28 = vrot.slane %v17486_v19, 1  ;;  %v17519_v45 = vsel %vm467_vm2, %v534_v58, %v536_v4 }
  0x50   : > { %26344 = vst [vmem:[#allocation42_spill] sm:$0xff] %v17514_v33  ;;  %26345 = vst [vmem:[#allocation43_spill] sm:$0xff] %v17519_v45  ;;  %v541_v21 = vrot.slane %v17488_v41, 1  ;;  %v543_v15 = vrot.slane %v17501_v53, 1  ;;  %v544_v5 = vrot.slane %v17503_v34, 1  ;;  %16552 = vrot.lane.b32.xlu1 %v17492_v12, %s17047_s25  ;;  %v17528_v52 = vpack.i.bf16 %v17519_v45, %v17514_v33 }
  0x51   : > { %26343 = vst [vmem:[#allocation41_spill] sm:$0xff] %v17511_v29  ;;  %v17531_v13 = vsel %vm467_vm2, %v538_v59, %v539_v28  ;;  %v546_v55 = vrot.slane %v17505_v24, 1  ;;  %16557 = vrot.lane.b32.xlu0 %v17511_v29, %s17047_s25  ;;  %v16591_v59 = vpack.i.bf16 %v17254_v50, %v17252_v49 }
  0x52   : > { %26346 = vst [vmem:[#allocation44_spill] sm:$0xff] %v17531_v13  ;;  %v17535_v58 = vsel %vm467_vm2, %v539_v28, %v541_v21  ;;  %v17538_v4 = vsel %vm467_vm2, %v543_v15, %v544_v5  ;;  %v16576_v15 = vpack.i.bf16 %v17231_v37, %v17229_v36  ;;  %v16596_v28 = vpack.i.bf16 %v17269_v57, %v17267_v56 }
  0x53   : > { %26347 = vst [vmem:[#allocation45_spill] sm:$0xff] %v17535_v58  ;;  %26348 = vst [vmem:[#allocation46_spill] sm:$0xff] %v17538_v4  ;;  %v17544_v41 = vpack.i.bf16 %v17535_v58, %v17531_v13  ;;  %v17547_v33 = vsel %vm467_vm2, %v544_v5, %v546_v55  ;;  %v16581_v5 = vpack.i.bf16 %v17219_v31, %v17217_v30  ;;  %v1390_v13 = vrot.slane %v17173_v8, 2 }
  0x54   : > { %26349 = vst [vmem:[#allocation47_spill] sm:$0xff] %v17547_v33  ;;  %16562 = vrot.lane.b32.xlu1 %v17528_v52, %s17047_s25  ;;  %v17553_v21 = vpack.i.bf16 %v17547_v33, %v17538_v4  ;;  %v16586_v55 = vpack.i.bf16 %v17239_v42, %v17233_v38  ;;  %v16601_v4 = vpack.i.bf16 %v17283_v0, %v17281_v63  ;;  %v17602_v33 = vld [vmem:[#allocation2 + $0x180] sm:$0xff]  ;;  %v1392_v58 = vrot.slane %v17175_v9, 2 }
  0x55   : > { %16567 = vrot.lane.b32.xlu0 %v17544_v41, %s17047_s25  ;;  %26350 = vst [vmem:[#allocation48_spill] sm:$0xff] %v17602_v33 }
  0x56   : > { %v1393_v9 = vsel %vm1388_vm3, %v1390_v13, %v1392_v58  ;;  %v1407_v58 = vrot.slane %v17249_v47, 2 }
  0x58   : > { %16572 = vrot.lane.b32.xlu1 %v17553_v21, %s17047_s25 }
  0x59   : > { %16577 = vrot.lane.b32.xlu0 %v16576_v15, %s17048_s26  ;;  %v16606_v15 = vpack.i.bf16 %v17300_v10, %v17298_v6 }
  0x5c   : > { %16582 = vrot.lane.b32.xlu1 %v16581_v5, %s17048_s26  ;;  %v16611_v5 = vpack.i.bf16 %v17317_v17, %v17315_v16 }
  0x5d   : > { %16587 = vrot.lane.b32.xlu0 %v16586_v55, %s17048_s26  ;;  %v16616_v55 = vpack.i.bf16 %v17334_v26, %v17332_v25 }
  0x60   : > { %16592 = vrot.lane.b32.xlu1 %v16591_v59, %s17048_s26  ;;  %v16621_v59 = vpack.i.bf16 %v17357_v48, %v17344_v35 }
  0x61   : > { %16597 = vrot.lane.b32.xlu0 %v16596_v28, %s17048_s26  ;;  %v16626_v28 = vpack.i.bf16 %v17446_v22, %v17444_v43 }
  0x64   : > { %16602 = vrot.lane.b32.xlu1 %v16601_v4, %s17048_s26  ;;  %v16631_v4 = vpack.i.bf16 %v17461_v60, %v17451_v3 }
  0x65   : > { %16607 = vrot.lane.b32.xlu0 %v16606_v15, %s17048_s26  ;;  %v16636_v15 = vpack.i.bf16 %v17470_v44, %v17468_v2 }
  0x68   : > { %16612 = vrot.lane.b32.xlu1 %v16611_v5, %s17048_s26  ;;  %v16641_v5 = vpack.i.bf16 %v17486_v19, %v17484_v18 }
  0x69   : > { %16617 = vrot.lane.b32.xlu0 %v16616_v55, %s17048_s26  ;;  %v17006_v55 = vld [vmem:[%s25547_s1] sm:$0xff]  }
  0x6a   : > { %16346 = vmatprep.subr.bf16.mxu0 %v17006_v55 }
  0x6b   : > { %16347 = vmatpush3.bf16.msra.mxu0 %v17006_v55  ;;  %v583_v55 = vrot.slane %v17602_v33, 1 }
  0x6c   : > { %16622 = vrot.lane.b32.xlu1 %v16621_v59, %s17048_s26  ;;  %v17604_v59 = vld [vmem:[#allocation2 + $0x188] sm:$0xff] }
  0x6d   : > { %16627 = vrot.lane.b32.xlu0 %v16626_v28, %s17048_s26  ;;  %26351 = vst [vmem:[#allocation49_spill] sm:$0xff] %v17604_v59  ;;  %v16646_v28 = vpack.i.bf16 %v17503_v34, %v17501_v53 }
  0x70   : > { %16632 = vrot.lane.b32.xlu1 %v16631_v4, %s17048_s26  ;;  %v16651_v4 = vpack.i.bf16 %v17604_v59, %v17602_v33  ;;  %v1395_v33 = vrot.slane %v17231_v37, 2 }
  0x71   : > { %16637 = vrot.lane.b32.xlu0 %v16636_v15, %s17048_s26  ;;  %v17632_v15 = vld [vmem:[#allocation2 + $0x190] sm:$0x3] }
  0x72   : > { %26352 = vst [vmem:[#allocation50_spill] sm:$0xff] %v17632_v15 }
  0x74   : > { %16642 = vrot.lane.b32.xlu1 %v16641_v5, %s17048_s26  ;;  %v584_v5 = vrot.slane %v17604_v59, 1 }
  0x75   : > { %16647 = vrot.lane.b32.xlu0 %v16646_v28, %s17048_s26  ;;  %v586_v28 = vrot.slane %v17632_v15, 1  ;;  %v1394_v15 = vrot.slane %v17229_v36, 2 }
  0x76   : > { %v17647_v45 = vsel %vm467_vm2, %v583_v55, %v584_v5  ;;  %v1400_v55 = vrot.slane %v17219_v31, 2 }
  0x77   : > { %26353 = vst [vmem:[#allocation51_spill] sm:$0xff] %v17647_v45  ;;  %v17650_v59 = vsel %vm467_vm2, %v584_v5, %v586_v28  ;;  %v1402_v5 = vrot.slane %v17221_v32, 2  ;;  %v1396_v36 = vsel %vm1388_vm3, %v1394_v15, %v1395_v33 }
  0x78   : > { %16652 = vrot.lane.b32.xlu1 %v16651_v4, %s17048_s26  ;;  %v1389_v4 = vrot.slane %v17171_v7, 2  ;;  %26354 = vst [vmem:[#allocation52_spill] sm:$0xff] %v17650_v59  ;;  %v1397_v7 = vrot.slane %v17235_v39, 2  ;;  %v17666_v28 = vpack.i.bf16 %v17650_v59, %v17647_v45  ;;  %v1404_v39 = vrot.slane %v17233_v38, 2  ;;  %v17851_v59 = vld [vmem:[#allocation2 + $0x1a0] sm:$0xff] }
  0x79   : > { %16657 = vrot.lane.b32.xlu0 %v17289_v1, %s17049_s29 }
  0x7a   : > { %v1391_v8 = vsel %vm1388_vm3, %v1389_v4, %v1390_v13  ;;  %v1398_v4 = vsel %vm1388_vm3, %v1395_v33, %v1397_v7  ;;  %v1405_v13 = vrot.slane %v17239_v42, 2 }
  0x7b   : > { %v16736_v32 = vpack.i.bf16 %v1393_v9, %v1391_v8  ;;  %v16741_v45 = vpack.i.bf16 %v1398_v4, %v1396_v36  ;;  %v1410_v36 = vrot.slane %v17254_v50, 2  ;;  %v1414_v8 = vrot.slane %v17267_v56, 2 }
  0x7c   : > { %16662 = vrot.lane.b32.xlu1 %v17258_v51, %s17049_s29  ;;  %v1406_v15 = vsel %vm1388_vm3, %v1404_v39, %v1405_v13  ;;  %v1408_v33 = vsel %vm1388_vm3, %v1405_v13, %v1407_v58  ;;  %v1420_v4 = vrot.slane %v17283_v0, 2  ;;  %v26355_v13 = vld [vmem:[#allocation14_spill] sm:$0xff] }
  0x7d   : > { %16667 = vrot.lane.b32.xlu0 %v17304_v11, %s17049_s29  ;;  %v16751_v47 = vpack.i.bf16 %v1408_v33, %v1406_v15  ;;  %v1422_v58 = vrot.slane %v26355_v13, 2  ;;  %v1424_v33 = vrot.slane %v17298_v6, 2 }
  0x7f   : > { %v1423_v0 = vsel %vm1388_vm3, %v1420_v4, %v1422_v58 }
  0x80   : > { %16672 = vrot.lane.b32.xlu1 %v17323_v20, %s17049_s29 }
  0x81   : > { %16677 = vrot.lane.b32.xlu0 %v17350_v40, %s17049_s29 }
  0x84   : > { %16682 = vrot.lane.b32.xlu1 %v17378_v23, %s17049_s29 }
  0x85   : > { %16687 = vrot.lane.b32.xlu0 %v17408_v46, %s17049_s29 }
  0x88   : > { %16692 = vrot.lane.b32.xlu1 %v17430_v14, %s17049_s29 }
  0x89   : > { %16697 = vrot.lane.b32.xlu0 %v17442_v27, %s17049_s29 }
  0x8c   : > { %16702 = vrot.lane.b32.xlu1 %v17457_v61, %s17049_s29 }
  0x8d   : > { %16707 = vrot.lane.b32.xlu0 %v17492_v12, %s17049_s29 }
  0x90   : > { %16712 = vrot.lane.b32.xlu1 %v17511_v29, %s17049_s29  ;;  %v1399_v29 = vrot.slane %v17217_v30, 2  ;;  %v1403_v30 = vsel %vm1388_vm3, %v1400_v55, %v1402_v5  ;;  %v17704_v5 = vpop.permute.xlu0 %16497 }
  0x91   : > { %16717 = vrot.lane.b32.xlu0 %v17528_v52, %s17049_s29 }
  0x92   : > { %v1401_v37 = vsel %vm1388_vm3, %v1399_v29, %v1400_v55  ;;  %v17007_v29 = vld [vmem:[%s25547_s1 + $0x8] sm:$0xff]  }
  0x93   : > { %v16746_v7 = vpack.i.bf16 %v1403_v30, %v1401_v37  ;;  %16380 = vmatprep.subr.bf16.mxu1 %v17007_v29  ;;  %v1409_v30 = vrot.slane %v17252_v49, 2  ;;  %v1412_v37 = vrot.slane %v17264_v54, 2 }
  0x94   : > { %16722 = vrot.lane.b32.xlu1 %v17544_v41, %s17049_s29  ;;  %16381 = vmatpush3.bf16.msra.mxu1 %v17007_v29 }
  0x95   : > { %16727 = vrot.lane.b32.xlu0 %v17553_v21, %s17049_s29  ;;  %v1411_v9 = vsel %vm1388_vm3, %v1409_v30, %v1410_v36  ;;  %v1413_v55 = vsel %vm1388_vm3, %v1410_v36, %v1412_v37 }
  0x98   : > { %16732 = vrot.lane.b32.xlu1 %v17666_v28, %s17049_s29 }
  0x99   : > { %16737 = vrot.lane.b32.xlu0 %v16736_v32, %s17047_s25 }
  0x9c   : > { %16742 = vrot.lane.b32.xlu1 %v16741_v45, %s17047_s25 }
  0x9d   : > { %16747 = vrot.lane.b32.xlu0 %v16746_v7, %s17047_s25 }
  0xa0   : > { %16752 = vrot.lane.b32.xlu1 %v16751_v47, %s17047_s25 }
  0xa1   : > { %16757 = vrot.lane.b32.xlu0 %v17289_v1, %s17048_s26  ;;  %v1415_v1 = vrot.slane %v17269_v57, 2 }
  0xa3   : > { %v1416_v54 = vsel %vm1388_vm3, %v1414_v8, %v1415_v1 }
  0xa4   : > { %16762 = vrot.lane.b32.xlu1 %v17258_v51, %s17048_s26  ;;  %v1417_v51 = vrot.slane %v17279_v62, 2 }
  0xa5   : > { %16767 = vrot.lane.b32.xlu0 %v16741_v45, %s17049_s29  ;;  %v16791_v45 = vpack.i.bf16 %v1413_v55, %v1411_v9  ;;  %v1429_v55 = vrot.slane %v17315_v16, 2 }
  0xa6   : > { %v1418_v56 = vsel %vm1388_vm3, %v1415_v1, %v1417_v51  ;;  %v1430_v1 = vrot.slane %v17317_v17, 2  ;;  %v26358_v51 = vld [vmem:[#allocation19_spill] sm:$0xff] }
  0xa7   : > { %v16801_v62 = vpack.i.bf16 %v1418_v56, %v1416_v54 }
  0xa8   : > { %16772 = vrot.lane.b32.xlu1 %v16746_v7, %s17049_s29  ;;  %v1425_v7 = vrot.slane %v17300_v10, 2  ;;  %v1431_v16 = vsel %vm1388_vm3, %v1429_v55, %v1430_v1 }
  0xa9   : > { %16777 = vrot.lane.b32.xlu0 %v17304_v11, %s17048_s26  ;;  %v17711_v39 = vpop.permute.xlu1 %16507  ;;  %v1419_v11 = vrot.slane %v17281_v63, 2 }
  0xaa   : > { %v1426_v8 = vsel %vm1388_vm3, %v1424_v33, %v1425_v7 }
  0xab   : > { %v1421_v63 = vsel %vm1388_vm3, %v1419_v11, %v1420_v4  ;;  %v1435_v11 = vrot.slane %v17334_v26, 2  ;;  %v26359_v4 = vld [vmem:[#allocation21_spill] sm:$0xff] }
  0xac   : > { %16782 = vrot.lane.b32.xlu1 %v17323_v20, %s17048_s26  ;;  %v17713_v57 = vpop.permute.xlu0 %16502  ;;  %v17721_v20 = vld [vmem:[%s25547_s1 + $0x10] sm:$0xff]   ;;  %v16821_v37 = vpack.i.bf16 %v1423_v0, %v1421_v63  ;;  %v1437_v13 = vrot.slane %v26359_v4, 2 }
  0xad   : > { %16787 = vrot.lane.b32.xlu0 %v16751_v47, %s17049_s29  ;;  %v17725_v32 = vpop.permute.xlu1 %16512  ;;  %16414 = vmatprep.subr.bf16.mxu0 %v17721_v20  ;;  %v26356_v47 = vld [vmem:[#allocation17_spill] sm:$0xff] }
  0xae   : > { %v1427_v29 = vrot.slane %v26356_v47, 2  ;;  %v1439_v47 = vrot.slane %v17344_v35, 2  ;;  %v1445_v35 = vrot.slane %v17446_v22, 2 }
  0xb0   : > { %16792 = vrot.lane.b32.xlu1 %v16791_v45, %s17049_s29  ;;  %v17728_v15 = vpop.permute.xlu0 %16517  ;;  %v1428_v9 = vsel %vm1388_vm3, %v1425_v7, %v1427_v29  ;;  %v1438_v7 = vsel %vm1388_vm3, %v1435_v11, %v1437_v13  ;;  %v1440_v29 = vrot.slane %v17357_v48, 2  ;;  %v1449_v13 = vrot.slane %v17451_v3, 2 }
  0xb1   : > { %16797 = vrot.lane.b32.xlu0 %v16791_v45, %s17047_s25  ;;  %v17738_v30 = vpop.permute.xlu1 %16522  ;;  %v1432_v45 = vrot.slane %v26358_v51, 2  ;;  %v26362_v51 = vld [vmem:[#allocation33_spill] sm:$0xff] }
  0xb2   : > { %v1441_v55 = vsel %vm1388_vm3, %v1439_v47, %v1440_v29  ;;  %v1447_v48 = vrot.slane %v26362_v51, 2  ;;  %v26365_v51 = vld [vmem:[#allocation38_spill] sm:$0xff] }
  0xb3   : > { %v1433_v17 = vsel %vm1388_vm3, %v1430_v1, %v1432_v45 }
  0xb4   : > { %16802 = vrot.lane.b32.xlu1 %v16801_v62, %s17047_s25  ;;  %v17740_v36 = vpop.permute.xlu0 %16527  ;;  %v16851_v0 = vpack.i.bf16 %v1433_v17, %v1431_v16 }
  0xb5   : > { %16807 = vrot.lane.b32.xlu0 %v17350_v40, %s17048_s26  ;;  %v17747_v6 = vpop.permute.xlu1 %16532  ;;  %v16831_v40 = vpack.i.bf16 %v1428_v9, %v1426_v8 }
  0xb8   : > { %16812 = vrot.lane.b32.xlu1 %v17378_v23, %s17048_s26  ;;  %v17757_v23 = vld [vmem:[%s25547_s1 + $0x18] sm:$0xff]  }
  0xb9   : > { %16817 = vrot.lane.b32.xlu0 %v16801_v62, %s17049_s29  ;;  %26357 = vst [vmem:[#allocation14_spill] sm:$0xff] %v17757_v23  ;;  %v17761_v54 = vpop.permute.xlu1 %16542  ;;  %16448 = vmatprep.subr.bf16.mxu1 %v17757_v23  ;;  %v1434_v62 = vrot.slane %v17332_v25, 2 }
  0xba   : > { %v17749_v10 = vpop.permute.xlu0 %16537 }
  0xbb   : > { %v1436_v33 = vsel %vm1388_vm3, %v1434_v62, %v1435_v11  ;;  %v1448_v62 = vsel %vm1388_vm3, %v1445_v35, %v1447_v48  ;;  %v1462_v48 = vrot.slane %v26365_v51, 2 }
  0xbc   : > { %16822 = vrot.lane.b32.xlu1 %v16821_v37, %s17049_s29 }
  0xbd   : > { %16827 = vrot.lane.b32.xlu0 %v16821_v37, %s17047_s25  ;;  %v26360_v37 = vld [vmem:[#allocation23_spill] sm:$0xff] }
  0xbe   : > { %v17764_v56 = vpop.permute.xlu0 %16547 }
  0xc0   : > { %16832 = vrot.lane.b32.xlu1 %v16831_v40, %s17047_s25 }
  0xc1   : > { %16837 = vrot.lane.b32.xlu0 %v17408_v46, %s17048_s26  ;;  %v16861_v46 = vpack.i.bf16 %v1438_v7, %v1436_v33  ;;  %v26363_v33 = vld [vmem:[#allocation34_spill] sm:$0xff] }
  0xc2   : > { %v17774_v58 = vpop.permute.xlu1 %16552 }
  0xc3   : > { %v17776_v63 = vpop.permute.xlu0 %16557 }
  0xc4   : > { %16842 = vrot.lane.b32.xlu1 %v17430_v14, %s17048_s26  ;;  %v1442_v14 = vrot.slane %v26360_v37, 2  ;;  %v26364_v37 = vld [vmem:[#allocation35_spill] sm:$0xff] }
  0xc5   : > { %16847 = vrot.lane.b32.xlu0 %v16831_v40, %s17049_s29  ;;  %v1444_v40 = vrot.slane %v17444_v43, 2 }
  0xc6   : > { %v17783_v25 = vpop.permute.xlu1 %16562  ;;  %v1443_v1 = vsel %vm1388_vm3, %v1440_v29, %v1442_v14  ;;  %v1455_v29 = vrot.slane %v17470_v44, 2  ;;  %v1457_v14 = vrot.slane %v26364_v37, 2  ;;  %v26369_v37 = vld [vmem:[#allocation50_spill] sm:$0xff] }
  0xc7   : > { %v17785_v26 = vpop.permute.xlu0 %16567  ;;  %v16881_v17 = vpack.i.bf16 %v1443_v1, %v1441_v55  ;;  %v1446_v43 = vsel %vm1388_vm3, %v1444_v40, %v1445_v35  ;;  %v1459_v55 = vrot.slane %v17484_v18, 2  ;;  %v1460_v1 = vrot.slane %v17486_v19, 2  ;;  %v26366_v18 = vld [vmem:[#allocation41_spill] sm:$0xff] }
  0xc8   : > { %16852 = vrot.lane.b32.xlu1 %v16851_v0, %s17049_s29  ;;  %v1472_v51 = vrot.slane %v26369_v37, 2 }
  0xc9   : > { %16857 = vrot.lane.b32.xlu0 %v16851_v0, %s17047_s25  ;;  %v1450_v0 = vrot.slane %v17461_v60, 2  ;;  %v1461_v23 = vsel %vm1388_vm3, %v1459_v55, %v1460_v1 }
  0xca   : > { %v17792_v8 = vpop.permute.xlu1 %16572 }
  0xcb   : > { %26361 = vst [vmem:[#allocation17_spill] sm:$0xff] %v17792_v8  ;;  %v17794_v9 = vpop.permute.xlu0 %16577  ;;  %v1451_v3 = vsel %vm1388_vm3, %v1449_v13, %v1450_v0 }
  0xcc   : > { %16862 = vrot.lane.b32.xlu1 %v16861_v46, %s17047_s25 }
  0xcd   : > { %16867 = vrot.lane.b32.xlu0 %v17442_v27, %s17048_s26  ;;  %v16891_v27 = vpack.i.bf16 %v1448_v62, %v1446_v43  ;;  %v1467_v43 = vrot.slane %v17505_v24, 2  ;;  %v17842_v62 = vld [vmem:[#allocation2 + $0x198] sm:$0xff]  ;;  %v1458_v24 = vsel %vm1388_vm3, %v1455_v29, %v1457_v14 }
  0xce   : > { %v17804_v45 = vpop.permute.xlu1 %16582 }
  0xcf   : > { %v17806_v16 = vpop.permute.xlu0 %16587 }
  0xd0   : > { %16872 = vrot.lane.b32.xlu1 %v17457_v61, %s17048_s26  ;;  %v1452_v61 = vrot.slane %v26363_v33, 2  ;;  %v26368_v33 = vld [vmem:[#allocation49_spill] sm:$0xff] }
  0xd1   : > { %16877 = vrot.lane.b32.xlu0 %v16861_v46, %s17049_s29  ;;  %v1454_v46 = vrot.slane %v17468_v2, 2  ;;  %v1464_v2 = vrot.slane %v17501_v53, 2  ;;  %v417_v53 = vld [vmem:[#allocation2 + $0x1a8] sm:$0x3] }
  0xd2   : > { %v17813_v11 = vpop.permute.xlu1 %16592  ;;  %v1453_v40 = vsel %vm1388_vm3, %v1450_v0, %v1452_v61  ;;  %v26367_v0 = vld [vmem:[#allocation48_spill] sm:$0xff]  ;;  %v1470_v61 = vrot.slane %v26368_v33, 2  ;;  %v2268_v33 = vrot.slane %v17851_v59, 1  ;;  %v2270_v37 = vrot.slane %v417_v53, 1 }
  0xd3   : > { %v17815_v4 = vpop.permute.xlu0 %16597  ;;  %v16911_v19 = vpack.i.bf16 %v1453_v40, %v1451_v3  ;;  %v1463_v3 = vsel %vm1388_vm3, %v1460_v1, %v1462_v48  ;;  %v2645_v48 = vrot.slane %v417_v53, 2 }
  0xd4   : > { %16882 = vrot.lane.b32.xlu1 %v16881_v17, %s17049_s29  ;;  %v1473_v1 = vsel %vm1388_vm3, %v1470_v61, %v1472_v51 }
  0xd5   : > { %16887 = vrot.lane.b32.xlu0 %v16881_v17, %s17047_s25  ;;  %v1465_v17 = vrot.slane %v17503_v34, 2  ;;  %v1456_v34 = vsel %vm1388_vm3, %v1454_v46, %v1455_v29  ;;  %v2642_v46 = vrot.slane %v17842_v62, 2  ;;  %v2643_v29 = vrot.slane %v17851_v59, 2 }
  0xd6   : > { %v17822_v7 = vpop.permute.xlu1 %16602 }
  0xd7   : > { %v17824_v47 = vpop.permute.xlu0 %16607  ;;  %v1466_v40 = vsel %vm1388_vm3, %v1464_v2, %v1465_v17  ;;  %v17871_v2 = vpack.i.bf16 %v1463_v3, %v1461_v23  ;;  %v16499_v23 = vunpack.i.l.bf16 %v17704_v5  ;;  %v17892_v53 = vsel %vm1388_vm3, %v2643_v29, %v2645_v48 }
  0xd8   : > { %16892 = vrot.lane.b32.xlu1 %v16891_v27, %s17047_s25  ;;  %v16505_v3 = vunpack.i.h.bf16 %v17713_v57 }
  0xd9   : > { %16897 = vrot.lane.b32.xlu0 %v17492_v12, %s17048_s26  ;;  %v1469_v12 = vrot.slane %v26367_v0, 2  ;;  %v2267_v0 = vrot.slane %v17842_v62, 1 }
  0xda   : > { %v17836_v35 = vpop.permute.xlu1 %16612 }
  0xdb   : > { %v17844_v13 = vpop.permute.xlu0 %16617  ;;  %v1471_v55 = vsel %vm1388_vm3, %v1469_v12, %v1470_v61  ;;  %v17883_v12 = vsel %vm1388_vm3, %v2642_v46, %v2643_v29  ;;  %v16500_v61 = vunpack.i.h.bf16 %v17704_v5  ;;  %v16519_v46 = vunpack.i.l.bf16 %v17728_v15 }
  0xdc   : > { %16902 = vrot.lane.b32.xlu1 %v26366_v18, %s17048_s26  ;;  %v1468_v18 = vsel %vm1388_vm3, %v1465_v17, %v1467_v43 }
  0xdd   : > { %16907 = vrot.lane.b32.xlu0 %v16891_v27, %s17049_s29  ;;  %v16921_v27 = vpack.i.bf16 %v1458_v24, %v1456_v34  ;;  %v17876_v43 = vpack.i.bf16 %v1468_v18, %v1466_v40  ;;  %v2271_v34 = vsel %vm467_vm2, %v2268_v33, %v2270_v37  ;;  %v16509_v24 = vunpack.i.l.bf16 %v17711_v39 }
  0xde   : > { %v17857_v8 = vpop.permute.xlu1 %16622  ;;  %v16504_v40 = vunpack.i.l.bf16 %v17713_v57  ;;  %v16515_v18 = vunpack.i.h.bf16 %v17725_v32  ;;  %v16520_v37 = vunpack.i.h.bf16 %v17728_v15 }
  0xdf   : > { %26370 = vst [vmem:[#allocation19_spill] sm:$0xff] %v17857_v8  ;;  %v17866_v14 = vpop.permute.xlu0 %16627  ;;  %v17878_v8 = vpack.i.bf16 %v1473_v1, %v1471_v55  ;;  %v26373_v1 = vld [vmem:[#allocation5_spill] sm:$0xff] }
  0xe0   : > { %26371 = vst [vmem:[#allocation21_spill] sm:$0xff] %v17866_v14  ;;  %16912 = vrot.lane.b32.xlu1 %v16911_v19, %s17049_s29  ;;  %v2269_v14 = vsel %vm467_vm2, %v2267_v0, %v2268_v33  ;;  %v16514_v33 = vunpack.i.l.bf16 %v17725_v32  ;;  %v17011_v32 = vld [vmem:[#allocation2 + $0x8] sm:$0xff]  ;;  %v882_v48 = vsel %vm243_vm0, %v26373_v1, %v16509_v24  ;;  %v16589_v1 = vunpack.i.l.bf16 %v17806_v16 }
  0xe1   : > { %16917 = vrot.lane.b32.xlu0 %v16911_v19, %s17047_s25  ;;  %v16510_v19 = vunpack.i.h.bf16 %v17711_v39  ;;  %v17902_v0 = vpack.i.bf16 %v2271_v34, %v2269_v14  ;;  %v879_v55 = vsel %vm243_vm0, %v17011_v32, %v16500_v61  ;;  %v26374_v34 = vld [vmem:[#allocation7_spill] sm:$0xff]  ;;  %v16579_v61 = vunpack.i.l.bf16 %v17794_v9 }
  0xe2   : > { %v17874_v17 = vpop.permute.xlu1 %16632  ;;  %v16584_v32 = vunpack.i.l.bf16 %v17804_v45 }
  0xe3   : > { %v17888_v51 = vpop.permute.xlu0 %16637  ;;  %v883_v57 = vsel %vm243_vm0, %v17219_v31, %v16510_v19  ;;  %v881_v31 = vsel %vm243_vm0, %v26374_v34, %v16505_v3  ;;  %v26375_v19 = vld [vmem:[#allocation6_spill] sm:$0xff]  ;;  %v17938_v3 = vsel %vm243_vm0, %v17233_v38, %v16514_v33  ;;  %v16535_v33 = vunpack.i.h.bf16 %v17747_v6 }
  0xe4   : > { %16922 = vrot.lane.b32.xlu1 %v16921_v27, %s17047_s25  ;;  %v880_v39 = vsel %vm243_vm0, %v26375_v19, %v16504_v40  ;;  %v17946_v40 = vsel %vm243_vm0, %v17252_v49, %v16519_v46 }
  0xe5   : > { %16927 = vrot.lane.b32.xlu0 %v17528_v52, %s17048_s26  ;;  %v17010_v52 = vld [vmem:[#allocation2] sm:$0xff]  ;;  %v913_v46 = vsel %vm910_vm4, %v880_v39, %v16584_v32  ;;  %v915_v39 = vsel %vm910_vm4, %v882_v48, %v16589_v1  ;;  %v16594_v32 = vunpack.i.l.bf16 %v17813_v11 }
  0xe6   : > { %v17900_v5 = vpop.permute.xlu1 %16642  ;;  %v878_v14 = vsel %vm243_vm0, %v17010_v52, %v16499_v23  ;;  %v16580_v23 = vunpack.i.h.bf16 %v17794_v9  ;;  %v16585_v52 = vunpack.i.h.bf16 %v17804_v45  ;;  %v16525_v9 = vunpack.i.h.bf16 %v17738_v30 }
  0xe7   : > { %v17911_v29 = vpop.permute.xlu0 %16647  ;;  %v16524_v45 = vunpack.i.l.bf16 %v17738_v30 }
  0xe8   : > { %26372 = vst [vmem:[#allocation23_spill] sm:$0xff] %v17911_v29  ;;  %16932 = vrot.lane.b32.xlu1 %v17544_v41, %s17048_s26  ;;  %v17927_v41 = vsel %vm243_vm0, %v17239_v42, %v16515_v18  ;;  %v17942_v42 = vsel %vm243_vm0, %v17254_v50, %v16520_v37  ;;  %v16590_v18 = vunpack.i.h.bf16 %v17806_v16  ;;  %v16529_v50 = vunpack.i.l.bf16 %v17740_v36 }
  0xe9   : > { %16937 = vrot.lane.b32.xlu0 %v16921_v27, %s17049_s29  ;;  %v16530_v27 = vunpack.i.h.bf16 %v17740_v36  ;;  %v914_v30 = vsel %vm910_vm4, %v881_v31, %v16585_v52  ;;  %v911_v16 = vsel %vm910_vm4, %v878_v14, %v16579_v61  ;;  %v912_v19 = vsel %vm910_vm4, %v879_v55, %v16580_v23 }
  0xea   : > { %v17934_v24 = vpop.permute.xlu1 %16652  ;;  %v16595_v31 = vunpack.i.h.bf16 %v17813_v11 }
  0xeb   : > { %26376 = vst [vmem:[#allocation33_spill] sm:$0xff] %v17934_v24  ;;  %v16658_v38 = vpop.permute.xlu0 %16657 }
  0xec   : > { %16942 = vrot.lane.b32.xlu1 %v17871_v2, %s17049_s29  ;;  %v16660_v49 = vunpack.i.h.bf16 %v16658_v38  ;;  %v16659_v37 = vunpack.i.l.bf16 %v16658_v38  ;;  %v916_v38 = vsel %vm910_vm4, %v883_v57, %v16590_v18  ;;  %v16599_v57 = vunpack.i.l.bf16 %v17815_v4 }
  0xed   : > { %16947 = vrot.lane.b32.xlu0 %v17871_v2, %s17047_s25 }
  0xee   : > { %v16663_v34 = vpop.permute.xlu1 %16662  ;;  %v944_v36 = vsel %vm943_vm5, %v911_v16, %v16659_v37  ;;  %v945_v29 = vsel %vm943_vm5, %v912_v19, %v16660_v49  ;;  %v16600_v49 = vunpack.i.h.bf16 %v17815_v4  ;;  %v17012_v37 = vld [vmem:[#allocation2 + $0x80] sm:$0xff]  ;;  %v17015_v19 = vld [vmem:[#allocation2 + $0x90] sm:$0xff] }
  0xef   : > { %v16665_v15 = vunpack.i.h.bf16 %v16663_v34  ;;  %v16664_v24 = vunpack.i.l.bf16 %v16663_v34  ;;  %v16668_v52 = vpop.permute.xlu0 %16667  ;;  %v976_v2 = vpack.c.bf16 %v945_v29, %v944_v36  ;;  %v17983_v11 = vsel %vm243_vm0, %v17012_v37, %v16525_v9  ;;  %v17014_v34 = vld [vmem:[#allocation2 + $0x98] sm:$0xff] }
  0xf0   : > { %16952 = vrot.lane.b32.xlu1 %v17876_v43, %s17047_s25  ;;  %v16670_v23 = vunpack.i.h.bf16 %v16668_v52  ;;  %v16669_v61 = vunpack.i.l.bf16 %v16668_v52  ;;  %v17995_v16 = vsel %vm243_vm0, %v17014_v34, %v16530_v27  ;;  %v890_v9 = vsel %vm243_vm0, %v17015_v19, %v16529_v50  ;;  %v17020_v19 = vld [vmem:[#allocation2 + $0xe0] sm:$0xff] }
  0xf1   : > { %v946_v14 = vsel %vm943_vm5, %v913_v46, %v16664_v24  ;;  %v947_v55 = vsel %vm943_vm5, %v914_v30, %v16665_v15  ;;  %16957 = vrot.lane.b32.xlu0 %v17553_v21, %s17048_s26  ;;  %16348 = vmatprep.mubr.msk.bf16.mxu0 %vm1006_vm6, %v976_v2  ;;  %v17013_v46 = vld [vmem:[#allocation2 + $0x78] sm:$0xff]  ;;  %v16534_v52 = vunpack.i.l.bf16 %v17747_v6  ;;  %v917_v2 = vsel %vm910_vm4, %v17938_v3, %v16594_v32 }
  0xf2   : > { %v17975_v48 = vpack.c.bf16 %v947_v55, %v946_v14  ;;  %v16673_v29 = vpop.permute.xlu1 %16672  ;;  %v948_v24 = vsel %vm943_vm5, %v915_v39, %v16669_v61  ;;  %v949_v15 = vsel %vm943_vm5, %v916_v38, %v16670_v23  ;;  %v17986_v4 = vsel %vm243_vm0, %v17013_v46, %v16524_v45  ;;  %v17016_v45 = vld [vmem:[#allocation2 + $0xb0] sm:$0xff] }
  0xf3   : > { %v16675_v18 = vunpack.i.h.bf16 %v16673_v29  ;;  %v16674_v1 = vunpack.i.l.bf16 %v16673_v29  ;;  %v17988_v30 = vpack.c.bf16 %v949_v15, %v948_v24  ;;  %v16678_v21 = vpop.permute.xlu0 %16677  ;;  %v18000_v39 = vsel %vm243_vm0, %v17016_v45, %v16535_v33 }
  0xf4   : > { %16962 = vrot.lane.b32.xlu1 %v17666_v28, %s17048_s26  ;;  %16349 = vmatmul.mubr.msk.bf16.vlgmr.msra.gmra.mrb[0].mxu0 %vm1006_vm6, %v17975_v48  ;;  %v16680_v36 = vunpack.i.h.bf16 %v16678_v21  ;;  %v16679_v38 = vunpack.i.l.bf16 %v16678_v21  ;;  %v918_v27 = vsel %vm910_vm4, %v17927_v41, %v16595_v31  ;;  %v920_v33 = vsel %vm910_vm4, %v17942_v42, %v16600_v49 }
  0xf5   : > { %16415 = vmatpush3.bf16.msra.mxu0 %v17721_v20  ;;  %16967 = vrot.lane.b32.xlu0 %v17876_v43, %s17049_s29  ;;  %v919_v20 = vsel %vm910_vm4, %v17946_v40, %v16599_v57  ;;  %v950_v6 = vsel %vm943_vm5, %v917_v2, %v16674_v1  ;;  %v951_v3 = vsel %vm943_vm5, %v918_v27, %v16675_v18  ;;  %v16540_v14 = vunpack.i.h.bf16 %v17749_v10  ;;  %v17022_v2 = vld [vmem:[#allocation2 + $0xf8] sm:$0xff] }
  0xf6   : > { %16352 = vmatprep.mubr.msk.bf16.mxu0 %vm1006_vm6, %v17988_v30  ;;  %v16683_v50 = vpop.permute.xlu1 %16682  ;;  %v16539_v41 = vunpack.i.l.bf16 %v17749_v10  ;;  %v952_v43 = vsel %vm943_vm5, %v919_v20, %v16679_v38  ;;  %v953_v31 = vsel %vm943_vm5, %v920_v33, %v16680_v36  ;;  %v16545_v40 = vunpack.i.h.bf16 %v17761_v54  ;;  %v17021_v38 = vld [vmem:[#allocation2 + $0xd8] sm:$0xff] }
  0xf7   : > { %v16688_v55 = vpop.permute.xlu0 %16687  ;;  %v16544_v42 = vunpack.i.l.bf16 %v17761_v54  ;;  %v16550_v23 = vunpack.i.h.bf16 %v17764_v56  ;;  %v16549_v61 = vunpack.i.l.bf16 %v17764_v56  ;;  %v16605_v32 = vunpack.i.h.bf16 %v17822_v7  ;;  %v17017_v56 = vld [vmem:[#allocation2 + $0xa8] sm:$0xff] }
  0xf8   : > { %16972 = vrot.lane.b32.xlu1 %v17878_v8, %s17049_s29  ;;  %v16604_v10 = vunpack.i.l.bf16 %v17822_v7  ;;  %v16610_v49 = vunpack.i.h.bf16 %v17824_v47  ;;  %v18030_v57 = vpack.c.bf16 %v951_v3, %v950_v6  ;;  %v16609_v24 = vunpack.i.l.bf16 %v17824_v47  ;;  %v17018_v7 = vld [vmem:[#allocation2 + $0xc8] sm:$0xff] }
  0xf9   : > { %16977 = vrot.lane.b32.xlu0 %v17878_v8, %s17047_s25  ;;  %v18037_v54 = vpack.c.bf16 %v953_v31, %v952_v43  ;;  %v16685_v15 = vunpack.i.h.bf16 %v16683_v50  ;;  %v16684_v18 = vunpack.i.l.bf16 %v16683_v50  ;;  %v18040_v1 = vsel %vm243_vm0, %v17017_v56, %v16534_v52  ;;  %v17019_v8 = vld [vmem:[#allocation2 + $0xc0] sm:$0xff]  ;;  %v17023_v50 = vld [vmem:[#allocation2 + $0xf0] sm:$0xff] }
  0xfa   : > { %v18032_v29 = vpop.permute.xlu1 %16692  ;;  %v18043_v37 = vsel %vm243_vm0, %v17018_v7, %v16540_v14  ;;  %v16690_v46 = vunpack.i.h.bf16 %v16688_v55  ;;  %v16689_v21 = vunpack.i.l.bf16 %v16688_v55  ;;  %v894_v47 = vsel %vm243_vm0, %v17019_v8, %v16539_v41 }
  0xfb   : > { %v18045_v34 = vpop.permute.xlu0 %16697  ;;  %v18053_v36 = vsel %vm243_vm0, %v17020_v19, %v16545_v40  ;;  %v18056_v45 = vsel %vm243_vm0, %v17021_v38, %v16544_v42  ;;  %v16555_v52 = vunpack.i.h.bf16 %v17774_v58  ;;  %v18062_v27 = vsel %vm243_vm0, %v17022_v2, %v16550_v23 }
  0xfc   : > { %16982 = vrot.lane.b32.xlu1 %v17902_v0, %s17048_s26  ;;  %16353 = vmatmul.mubr.msk.bf16.gmra.mrb[4].mxu0 %vm1006_vm6, %v18030_v57  ;;  %v18065_v20 = vsel %vm243_vm0, %v17023_v50, %v16549_v61  ;;  %v921_v33 = vsel %vm910_vm4, %v17986_v4, %v16604_v10  ;;  %v922_v6 = vsel %vm910_vm4, %v17983_v11, %v16605_v32  ;;  %v16554_v55 = vunpack.i.l.bf16 %v17774_v58 }
  0xfd   : > { %16356 = vmatprep.mubr.msk.bf16.mxu0 %vm1006_vm6, %v18037_v54  ;;  %16987 = vrot.lane.b32.xlu0 %v17666_v28, %s17047_s25  ;;  %v923_v14 = vsel %vm910_vm4, %v890_v9, %v16609_v24  ;;  %v924_v41 = vsel %vm910_vm4, %v17995_v16, %v16610_v49  ;;  %v954_v43 = vsel %vm943_vm5, %v921_v33, %v16684_v18  ;;  %v16560_v4 = vunpack.i.h.bf16 %v17776_v63  ;;  %v26380_v33 = vld [vmem:[#allocation19_spill] sm:$0xff] }
  0xfe   : > { %v18071_v3 = vpop.permute.xlu1 %16702  ;;  %v955_v31 = vsel %vm943_vm5, %v922_v6, %v16685_v15  ;;  %v956_v11 = vsel %vm943_vm5, %v923_v14, %v16689_v21  ;;  %v957_v40 = vsel %vm943_vm5, %v924_v41, %v16690_v46  ;;  %v26377_v28 = vpack.i.bf16 %v17892_v53, %v17883_v12  ;;  %v17026_v21 = vld [vmem:[#allocation2 + $0x138] sm:$0xff] }
  0xff   : > { %v18084_v42 = vpop.permute.xlu0 %16707  ;;  %v18092_v16 = vsel %vm243_vm0, %v17446_v22, %v16555_v52  ;;  %v16559_v9 = vunpack.i.l.bf16 %v17776_v63  ;;  %v16565_v58 = vunpack.i.h.bf16 %v17783_v25  ;;  %v16564_v23 = vunpack.i.l.bf16 %v17783_v25 }
 0x100   : > { %16992 = vrot.lane.b32.xlu1 %v26377_v28, %s17049_s29  ;;  %v16615_v61 = vunpack.i.h.bf16 %v17836_v35  ;;  %v16614_v32 = vunpack.i.l.bf16 %v17836_v35  ;;  %v16620_v10 = vunpack.i.h.bf16 %v17844_v13  ;;  %v18100_v49 = vpack.c.bf16 %v955_v31, %v954_v43  ;;  %v17024_v35 = vld [vmem:[#allocation2 + $0x108] sm:$0xff]  ;;  %v17027_v43 = vld [vmem:[#allocation2 + $0x158] sm:$0xff]  ;;  %v17028_v31 = vld [vmem:[#allocation2 + $0x150] sm:$0xff] }
 0x101   : > { %v26378_v22 = vpack.i.bf16 %v17851_v59, %v17842_v62  ;;  %v16619_v63 = vunpack.i.l.bf16 %v17844_v13  ;;  %v18109_v53 = vpack.c.bf16 %v957_v40, %v956_v11  ;;  %v16695_v25 = vunpack.i.h.bf16 %v18032_v29  ;;  %v17025_v13 = vld [vmem:[#allocation2 + $0x120] sm:$0xff] }
 0x102   : > { %v18102_v12 = vpop.permute.xlu1 %16712  ;;  %v16694_v24 = vunpack.i.l.bf16 %v18032_v29  ;;  %v18114_v15 = vsel %vm243_vm0, %v17024_v35, %v16554_v55  ;;  %v18118_v18 = vsel %vm243_vm0, %v17461_v60, %v16560_v4  ;;  %v16700_v56 = vunpack.i.h.bf16 %v18045_v34  ;;  %v26381_v55 = vld [vmem:[#allocation21_spill] sm:$0xff] }
 0x103   : > { %16997 = vrot.lane.b32.xlu0 %v26378_v22, %s17048_s26  ;;  %v16699_v59 = vunpack.i.l.bf16 %v18045_v34  ;;  %v18122_v62 = vpop.permute.xlu0 %16717  ;;  %v902_v29 = vsel %vm243_vm0, %v17025_v13, %v16559_v9  ;;  %v18131_v7 = vsel %vm243_vm0, %v17470_v44, %v16565_v58  ;;  %v16570_v60 = vunpack.i.h.bf16 %v17785_v26  ;;  %v26379_v34 = vld [vmem:[#allocation17_spill] sm:$0xff] }
 0x104   : > { %17002 = vrot.lane.b32.xlu1 %v17902_v0, %s17049_s29  ;;  %16357 = vmatmul.mubr.msk.bf16.gmra.mrb[8].mxu0 %vm1006_vm6, %v18100_v49  ;;  %v16569_v46 = vunpack.i.l.bf16 %v17785_v26  ;;  %v904_v0 = vsel %vm243_vm0, %v17026_v21, %v16564_v23  ;;  %v16575_v8 = vunpack.i.h.bf16 %v26379_v34  ;;  %v925_v19 = vsel %vm910_vm4, %v18040_v1, %v16614_v32 }
 0x105   : > { %16360 = vmatprep.mubr.msk.bf16.mxu0 %vm1006_vm6, %v18109_v53  ;;  %v926_v38 = vsel %vm910_vm4, %v18000_v39, %v16615_v61  ;;  %v927_v52 = vsel %vm910_vm4, %v894_v47, %v16619_v63  ;;  %v928_v26 = vsel %vm910_vm4, %v18043_v37, %v16620_v10  ;;  %v958_v2 = vsel %vm943_vm5, %v925_v19, %v16694_v24  ;;  %v17029_v61 = vld [vmem:[#allocation2 + $0x170] sm:$0xff] }
 0x106   : > { %v18143_v44 = vpop.permute.xlu1 %16722  ;;  %v959_v50 = vsel %vm943_vm5, %v926_v38, %v16695_v25  ;;  %v16625_v6 = vunpack.i.h.bf16 %v26380_v33  ;;  %v16624_v14 = vunpack.i.l.bf16 %v26380_v33  ;;  %v960_v1 = vsel %vm943_vm5, %v927_v52, %v16699_v59  ;;  %v26382_v33 = vld [vmem:[#allocation23_spill] sm:$0xff] }
 0x107   : > { %v961_v41 = vsel %vm943_vm5, %v928_v26, %v16700_v56  ;;  %v18154_v39 = vpop.permute.xlu0 %16727  ;;  %v907_v47 = vsel %vm243_vm0, %v17027_v43, %v16570_v60  ;;  %v906_v37 = vsel %vm243_vm0, %v17028_v31, %v16569_v46  ;;  %v16630_v4 = vunpack.i.h.bf16 %v26381_v55 }
 0x108   : > { %v16629_v11 = vunpack.i.l.bf16 %v26381_v55  ;;  %v16574_v40 = vunpack.i.l.bf16 %v26379_v34  ;;  %v18161_v28 = vpack.c.bf16 %v959_v50, %v958_v2  ;;  %v16705_v9 = vunpack.i.h.bf16 %v18071_v3 }
 0x109   : > { %v16704_v58 = vunpack.i.l.bf16 %v18071_v3  ;;  %v18168_v32 = vsel %vm243_vm0, %v17029_v61, %v16575_v8  ;;  %v18170_v10 = vpack.c.bf16 %v961_v41, %v960_v1  ;;  %v16710_v22 = vunpack.i.h.bf16 %v18084_v42 }
 0x10a   : > { %v18165_v23 = vpop.permute.xlu1 %16732  ;;  %v16709_v63 = vunpack.i.l.bf16 %v18084_v42  ;;  %v929_v25 = vsel %vm910_vm4, %v18056_v45, %v16624_v14  ;;  %v930_v24 = vsel %vm910_vm4, %v18053_v36, %v16625_v6  ;;  %v16635_v3 = vunpack.i.h.bf16 %v17874_v17 }
 0x10b   : > { %v16634_v35 = vunpack.i.l.bf16 %v17874_v17  ;;  %v16738_v56 = vpop.permute.xlu0 %16737  ;;  %v931_v59 = vsel %vm910_vm4, %v18065_v20, %v16629_v11  ;;  %v932_v42 = vsel %vm910_vm4, %v18062_v27, %v16630_v4  ;;  %v16640_v13 = vunpack.i.h.bf16 %v17888_v51 }
 0x10c   : > { %16361 = vmatmul.mubr.msk.bf16.gmra.mrb[12].mxu0 %vm1006_vm6, %v18161_v28  ;;  %v16639_v45 = vunpack.i.l.bf16 %v17888_v51  ;;  %v16645_v36 = vunpack.i.h.bf16 %v17900_v5  ;;  %v16644_v17 = vunpack.i.l.bf16 %v17900_v5  ;;  %v962_v60 = vsel %vm943_vm5, %v929_v25, %v16704_v58 }
 0x10d   : > { %16364 = vmatprep.mubr.msk.bf16.mxu0 %vm1006_vm6, %v18170_v10  ;;  %v963_v46 = vsel %vm943_vm5, %v930_v24, %v16705_v9  ;;  %v964_v20 = vsel %vm943_vm5, %v931_v59, %v16709_v63  ;;  %v965_v27 = vsel %vm943_vm5, %v932_v42, %v16710_v22  ;;  %v16715_v8 = vunpack.i.h.bf16 %v18102_v12 }
 0x10e   : > { %v16743_v21 = vpop.permute.xlu1 %16742  ;;  %v16714_v51 = vunpack.i.l.bf16 %v18102_v12  ;;  %v933_v19 = vsel %vm910_vm4, %v18114_v15, %v16634_v35  ;;  %v934_v38 = vsel %vm910_vm4, %v18092_v16, %v16635_v3  ;;  %v16720_v5 = vunpack.i.h.bf16 %v18122_v62 }
 0x10f   : > { %v16719_v52 = vunpack.i.l.bf16 %v18122_v62  ;;  %v18204_v26 = vpop.permute.xlu0 %16747  ;;  %v935_v2 = vsel %vm910_vm4, %v902_v29, %v16639_v45  ;;  %v936_v50 = vsel %vm910_vm4, %v18118_v18, %v16640_v13  ;;  %v16650_v6 = vunpack.i.h.bf16 %v26382_v33  ;;  %v26383_v45 = vld [vmem:[#allocation4_spill] sm:$0xff] }
 0x110   : > { %v16649_v12 = vunpack.i.l.bf16 %v26382_v33  ;;  %v937_v15 = vsel %vm910_vm4, %v904_v0, %v16644_v17  ;;  %v938_v16 = vsel %vm910_vm4, %v18131_v7, %v16645_v36  ;;  %v18214_v14 = vpack.c.bf16 %v963_v46, %v962_v60  ;;  %v26384_v17 = vld [vmem:[#allocation3_spill] sm:$0xff] }
 0x111   : > { %v18216_v1 = vpack.c.bf16 %v965_v27, %v964_v20  ;;  %v966_v29 = vsel %vm943_vm5, %v933_v19, %v16714_v51  ;;  %v967_v41 = vsel %vm943_vm5, %v934_v38, %v16715_v8  ;;  %v16725_v18 = vunpack.i.h.bf16 %v18143_v44  ;;  %v26385_v20 = vld [vmem:[#allocation11_spill] sm:$0xff]  ;;  %v26386_v8 = vld [vmem:[#allocation10_spill] sm:$0xff] }
 0x112   : > { %v18218_v62 = vpop.permute.xlu1 %16752  ;;  %v16724_v43 = vunpack.i.l.bf16 %v18143_v44  ;;  %v968_v31 = vsel %vm943_vm5, %v935_v2, %v16719_v52  ;;  %v969_v0 = vsel %vm943_vm5, %v936_v50, %v16720_v5  ;;  %v16730_v7 = vunpack.i.h.bf16 %v18154_v39 }
 0x113   : > { %v16729_v55 = vunpack.i.l.bf16 %v18154_v39  ;;  %v16758_v4 = vpop.permute.xlu0 %16757  ;;  %v939_v11 = vsel %vm910_vm4, %v906_v37, %v16649_v12  ;;  %v940_v9 = vsel %vm910_vm4, %v907_v47, %v16650_v6  ;;  %v16740_v58 = vunpack.i.h.bf16 %v16738_v56 }
 0x114   : > { %16365 = vmatmul.mubr.msk.bf16.gmra.mrb[16].mxu0 %vm1006_vm6, %v18214_v14  ;;  %v16739_v61 = vunpack.i.l.bf16 %v16738_v56  ;;  %v16745_v44 = vunpack.i.h.bf16 %v16743_v21  ;;  %v16744_v22 = vunpack.i.l.bf16 %v16743_v21  ;;  %v16760_v63 = vunpack.i.h.bf16 %v16758_v4 }
 0x115   : > { %16368 = vmatprep.mubr.msk.bf16.mxu0 %vm1006_vm6, %v18216_v1  ;;  %v16759_v25 = vunpack.i.l.bf16 %v16758_v4  ;;  %v18234_v3 = vpack.c.bf16 %v967_v41, %v966_v29  ;;  %v18236_v39 = vpack.c.bf16 %v969_v0, %v968_v31  ;;  %v970_v35 = vsel %vm943_vm5, %v937_v15, %v16724_v43 }
 0x116   : > { %v16763_v24 = vpop.permute.xlu1 %16762  ;;  %v971_v37 = vsel %vm943_vm5, %v938_v16, %v16725_v18  ;;  %v972_v47 = vsel %vm943_vm5, %v939_v11, %v16729_v55  ;;  %v973_v56 = vsel %vm943_vm5, %v940_v9, %v16730_v7  ;;  %v1763_v36 = vsel %vm243_vm0, %v26383_v45, %v16740_v58  ;;  %v26387_v9 = vld [vmem:[#allocation33_spill] sm:$0xff] }
 0x117   : > { %v16765_v59 = vunpack.i.h.bf16 %v16763_v24  ;;  %v16764_v42 = vunpack.i.l.bf16 %v16763_v24  ;;  %v16768_v13 = vpop.permute.xlu0 %16767  ;;  %v1762_v60 = vsel %vm243_vm0, %v26384_v17, %v16739_v61  ;;  %v1765_v27 = vsel %vm243_vm0, %v26385_v20, %v16745_v44 }
 0x118   : > { %v16770_v46 = vunpack.i.h.bf16 %v16768_v13  ;;  %v16769_v21 = vunpack.i.l.bf16 %v16768_v13  ;;  %v1764_v51 = vsel %vm243_vm0, %v26386_v8, %v16744_v22  ;;  %v1794_v38 = vsel %vm910_vm4, %v1762_v60, %v16759_v25  ;;  %v26389_v13 = vld [vmem:[#allocation8_spill] sm:$0xff] }
 0x119   : > { %v1795_v5 = vsel %vm910_vm4, %v1763_v36, %v16760_v63  ;;  %v16750_v6 = vunpack.i.h.bf16 %v18204_v26  ;;  %v1796_v12 = vsel %vm910_vm4, %v1764_v51, %v16764_v42  ;;  %v1797_v15 = vsel %vm910_vm4, %v1765_v27, %v16765_v59  ;;  %v26388_v59 = vld [vmem:[#allocation9_spill] sm:$0xff]  ;;  %v26390_v36 = vld [vmem:[#allocation14_spill] sm:$0xff] }
 0x11a   : > { %v16773_v19 = vpop.permute.xlu1 %16772  ;;  %v1826_v50 = vsel %vm943_vm5, %v1794_v38, %v16769_v21  ;;  %v1827_v33 = vsel %vm943_vm5, %v1795_v5, %v16770_v46  ;;  %v16749_v41 = vunpack.i.l.bf16 %v18204_v26  ;;  %v16755_v18 = vunpack.i.h.bf16 %v18218_v62 }
 0x11b   : > { %v16775_v52 = vunpack.i.h.bf16 %v16773_v19  ;;  %v16774_v2 = vunpack.i.l.bf16 %v16773_v19  ;;  %v16778_v16 = vpop.permute.xlu0 %16777  ;;  %v1858_v29 = vpack.c.bf16 %v1827_v33, %v1826_v50  ;;  %v16754_v0 = vunpack.i.l.bf16 %v18218_v62  ;;  %v17030_v19 = vld [vmem:[#allocation2 + $0x168] sm:$0xff] }
 0x11c   : > { %16369 = vmatmul.mubr.msk.bf16.gmra.mrb[20].mxu0 %vm1006_vm6, %v18234_v3  ;;  %v16780_v55 = vunpack.i.h.bf16 %v16778_v16  ;;  %v16779_v4 = vunpack.i.l.bf16 %v16778_v16  ;;  %v16655_v26 = vunpack.i.h.bf16 %v26387_v9  ;;  %v16654_v58 = vunpack.i.l.bf16 %v26387_v9  ;;  %v26393_v9 = vld [vmem:[#allocation16_spill] sm:$0xff] }
 0x11d   : > { %v1828_v43 = vsel %vm943_vm5, %v1796_v12, %v16774_v2  ;;  %v1829_v31 = vsel %vm943_vm5, %v1797_v15, %v16775_v52  ;;  %16372 = vmatprep.mubr.msk.bf16.mxu0 %vm1006_vm6, %v18236_v39  ;;  %16382 = vmatprep.mubr.msk.bf16.mxu1 %vm1006_vm6, %v1858_v29  ;;  %v18271_v61 = vpack.c.bf16 %v971_v37, %v970_v35  ;;  %v16735_v44 = vunpack.i.h.bf16 %v18165_v23 }
 0x11e   : > { %v18266_v7 = vpack.c.bf16 %v1829_v31, %v1828_v43  ;;  %v16783_v11 = vpop.permute.xlu1 %16782  ;;  %v18274_v22 = vpack.c.bf16 %v973_v56, %v972_v47  ;;  %v16734_v63 = vunpack.i.l.bf16 %v18165_v23  ;;  %v1767_v42 = vsel %vm243_vm0, %v26388_v59, %v16750_v6  ;;  %v26391_v47 = vld [vmem:[#allocation13_spill] sm:$0xff]  ;;  %v26392_v23 = vld [vmem:[#allocation12_spill] sm:$0xff] }
 0x11f   : > { %v16785_v62 = vunpack.i.h.bf16 %v16783_v11  ;;  %v16784_v25 = vunpack.i.l.bf16 %v16783_v11  ;;  %v16788_v24 = vpop.permute.xlu0 %16787  ;;  %v1766_v45 = vsel %vm243_vm0, %v26389_v13, %v16749_v41  ;;  %v1769_v56 = vsel %vm243_vm0, %v26391_v47, %v16755_v18 }
 0x120   : > { %16383 = vmatmul.mubr.msk.bf16.vlgmr.msra.gmra.mrb[0].mxu1 %vm1006_vm6, %v18266_v7  ;;  %v16790_v35 = vunpack.i.h.bf16 %v16788_v24  ;;  %v16789_v37 = vunpack.i.l.bf16 %v16788_v24  ;;  %v1768_v17 = vsel %vm243_vm0, %v26392_v23, %v16754_v0  ;;  %v1798_v60 = vsel %vm910_vm4, %v1766_v45, %v16779_v4  ;;  %v26396_v45 = vld [vmem:[#allocation18_spill] sm:$0xff] }
 0x121   : > { %16449 = vmatpush3.bf16.msra.mxu1 %v26390_v36  ;;  %v1799_v46 = vsel %vm910_vm4, %v1767_v42, %v16780_v55  ;;  %v908_v38 = vsel %vm243_vm0, %v17030_v19, %v16574_v40  ;;  %v1800_v5 = vsel %vm910_vm4, %v1768_v17, %v16784_v25  ;;  %v1801_v52 = vsel %vm910_vm4, %v1769_v56, %v16785_v62  ;;  %v26395_v42 = vld [vmem:[#allocation20_spill] sm:$0xff] }
 0x122   : > { %v16793_v21 = vpop.permute.xlu1 %16792  ;;  %v1830_v20 = vsel %vm943_vm5, %v1798_v60, %v16789_v37  ;;  %v1831_v27 = vsel %vm943_vm5, %v1799_v46, %v16790_v35  ;;  %v941_v33 = vsel %vm910_vm4, %v908_v38, %v16654_v58  ;;  %v942_v6 = vsel %vm910_vm4, %v18168_v32, %v16655_v26  ;;  %v26394_v58 = vld [vmem:[#allocation15_spill] sm:$0xff] }
 0x123   : > { %v16795_v8 = vunpack.i.h.bf16 %v16793_v21  ;;  %v16794_v51 = vunpack.i.l.bf16 %v16793_v21  ;;  %v18297_v2 = vpack.c.bf16 %v1831_v27, %v1830_v20  ;;  %v16798_v50 = vpop.permute.xlu0 %16797  ;;  %v974_v40 = vsel %vm943_vm5, %v941_v33, %v16734_v63 }
 0x124   : > { %16373 = vmatmul.mubr.msk.bf16.gmra.mrb[24].mxu0 %vm1006_vm6, %v18271_v61  ;;  %v975_v15 = vsel %vm943_vm5, %v942_v6, %v16735_v44  ;;  %v16800_v41 = vunpack.i.h.bf16 %v16798_v50  ;;  %v16799_v18 = vunpack.i.l.bf16 %v16798_v50 }
 0x125   : > { %v1832_v12 = vsel %vm943_vm5, %v1800_v5, %v16794_v51  ;;  %v1833_v34 = vsel %vm943_vm5, %v1801_v52, %v16795_v8  ;;  %16376 = vmatprep.mubr.msk.bf16.mxu0 %vm1006_vm6, %v18274_v22  ;;  %16386 = vmatprep.mubr.msk.bf16.mxu1 %vm1006_vm6, %v18297_v2  ;;  %v18316_v43 = vpack.c.bf16 %v975_v15, %v974_v40  ;;  %v26397_v40 = vld [vmem:[#allocation24_spill] sm:$0xff] }
 0x126   : > { %v18310_v16 = vpack.c.bf16 %v1833_v34, %v1832_v12  ;;  %v16803_v29 = vpop.permute.xlu1 %16802  ;;  %v1771_v26 = vsel %vm243_vm0, %v26393_v9, %v16800_v41  ;;  %v1770_v44 = vsel %vm243_vm0, %v26394_v58, %v16799_v18 }
 0x127   : > { %v16808_v32 = vpop.permute.xlu0 %16807  ;;  %v16805_v31 = vunpack.i.h.bf16 %v16803_v29  ;;  %v16804_v0 = vunpack.i.l.bf16 %v16803_v29  ;;  %v26398_v29 = vld [vmem:[#allocation22_spill] sm:$0xff] }
 0x128   : > { %16387 = vmatmul.mubr.msk.bf16.gmra.mrb[4].mxu1 %vm1006_vm6, %v18310_v16  ;;  %v16810_v55 = vunpack.i.h.bf16 %v16808_v32  ;;  %v16809_v4 = vunpack.i.l.bf16 %v16808_v32 }
 0x129   : > { %v1773_v13 = vsel %vm243_vm0, %v26395_v42, %v16805_v31  ;;  %v1772_v35 = vsel %vm243_vm0, %v26396_v45, %v16804_v0 }
 0x12a   : > { %v16813_v11 = vpop.permute.xlu1 %16812  ;;  %v1802_v37 = vsel %vm910_vm4, %v1770_v44, %v16809_v4  ;;  %v1803_v36 = vsel %vm910_vm4, %v1771_v26, %v16810_v55 }
 0x12b   : > { %v16815_v63 = vunpack.i.h.bf16 %v16813_v11  ;;  %v16814_v62 = vunpack.i.l.bf16 %v16813_v11  ;;  %v16818_v25 = vpop.permute.xlu0 %16817 }
 0x12c   : > { %16377 = vmatmul.mubr.msk.bf16.gmra.mrb[28].mxu0 %vm1006_vm6, %v18316_v43  ;;  %v16820_v24 = vunpack.i.h.bf16 %v16818_v25  ;;  %v16819_v59 = vunpack.i.l.bf16 %v16818_v25 }
 0x12d   : > { %16416 = vmatprep.mubr.msk.bf16.mxu0 %vm1006_vm6, %v17975_v48  ;;  %v1804_v46 = vsel %vm910_vm4, %v1772_v35, %v16814_v62  ;;  %v1805_v48 = vsel %vm910_vm4, %v1773_v13, %v16815_v63 }
 0x12e   : > { %v16823_v47 = vpop.permute.xlu1 %16822  ;;  %v1834_v56 = vsel %vm943_vm5, %v1802_v37, %v16819_v59  ;;  %v1835_v23 = vsel %vm943_vm5, %v1803_v36, %v16820_v24 }
 0x12f   : > { %v16825_v17 = vunpack.i.h.bf16 %v16823_v47  ;;  %v16824_v60 = vunpack.i.l.bf16 %v16823_v47  ;;  %v18336_v21 = vpack.c.bf16 %v1835_v23, %v1834_v56  ;;  %v16828_v20 = vpop.permute.xlu0 %16827 }
 0x130   : > { %v16830_v38 = vunpack.i.h.bf16 %v16828_v20  ;;  %v16829_v5 = vunpack.i.l.bf16 %v16828_v20  ;;  %v26401_v20 = vld [vmem:[#allocation28_spill] sm:$0xff] }
 0x131   : > { %v1836_v27 = vsel %vm943_vm5, %v1804_v46, %v16824_v60  ;;  %v1837_v8 = vsel %vm943_vm5, %v1805_v48, %v16825_v17  ;;  %16390 = vmatprep.mubr.msk.bf16.mxu1 %vm1006_vm6, %v18336_v21 }
 0x132   : > { %v18340_v51 = vpack.c.bf16 %v1837_v8, %v1836_v27  ;;  %v16833_v19 = vpop.permute.xlu1 %16832  ;;  %v1775_v15 = vsel %vm243_vm0, %v26397_v40, %v16830_v38  ;;  %v1774_v41 = vsel %vm243_vm0, %v26398_v29, %v16829_v5  ;;  %v26402_v27 = vld [vmem:[#allocation27_spill] sm:$0xff] }
 0x133   : > { %v16838_v52 = vpop.permute.xlu0 %16837  ;;  %v16835_v50 = vunpack.i.h.bf16 %v16833_v19  ;;  %v16834_v33 = vunpack.i.l.bf16 %v16833_v19 }
 0x134   : > { %16391 = vmatmul.mubr.msk.bf16.gmra.mrb[8].mxu1 %vm1006_vm6, %v18340_v51  ;;  %16417 = vmatmul.mubr.msk.bf16.vlgmr.msra.gmra.mrb[32].mxu0 %vm1006_vm6, %v17988_v30  ;;  %v16840_v6 = vunpack.i.h.bf16 %v16838_v52  ;;  %v16839_v12 = vunpack.i.l.bf16 %v16838_v52  ;;  %v26399_v30 = vld [vmem:[#allocation26_spill] sm:$0xff] }
 0x135   : > { %16420 = vmatprep.mubr.msk.bf16.mxu0 %vm1006_vm6, %v18030_v57  ;;  %v1777_v4 = vsel %vm243_vm0, %v26399_v30, %v16835_v50  ;;  %v26400_v57 = vld [vmem:[#allocation25_spill] sm:$0xff] }
 0x136   : > { %v16843_v34 = vpop.permute.xlu1 %16842  ;;  %v1776_v11 = vsel %vm243_vm0, %v26400_v57, %v16834_v33  ;;  %v1806_v9 = vsel %vm910_vm4, %v1774_v41, %v16839_v12  ;;  %v1807_v26 = vsel %vm910_vm4, %v1775_v15, %v16840_v6  ;;  %v26403_v33 = vld [vmem:[#allocation30_spill] sm:$0xff]  ;;  %v26404_v12 = vld [vmem:[#allocation29_spill] sm:$0xff] }
 0x137   : > { %v16845_v18 = vunpack.i.h.bf16 %v16843_v34  ;;  %v16844_v32 = vunpack.i.l.bf16 %v16843_v34  ;;  %v16848_v31 = vpop.permute.xlu0 %16847 }
 0x138   : > { %v16850_v0 = vunpack.i.h.bf16 %v16848_v31  ;;  %v16849_v55 = vunpack.i.l.bf16 %v16848_v31 }
 0x139   : > { %v1808_v24 = vsel %vm910_vm4, %v1776_v11, %v16844_v32  ;;  %v1809_v59 = vsel %vm910_vm4, %v1777_v4, %v16845_v18 }
 0x13a   : > { %v16853_v58 = vpop.permute.xlu1 %16852  ;;  %v1838_v44 = vsel %vm943_vm5, %v1806_v9, %v16849_v55  ;;  %v1839_v63 = vsel %vm943_vm5, %v1807_v26, %v16850_v0 }
 0x13b   : > { %v16855_v62 = vunpack.i.h.bf16 %v16853_v58  ;;  %v16854_v25 = vunpack.i.l.bf16 %v16853_v58  ;;  %v18364_v42 = vpack.c.bf16 %v1839_v63, %v1838_v44  ;;  %v16858_v13 = vpop.permute.xlu0 %16857 }
 0x13c   : > { %16421 = vmatmul.mubr.msk.bf16.gmra.mrb[36].mxu0 %vm1006_vm6, %v18037_v54  ;;  %v16860_v47 = vunpack.i.h.bf16 %v16858_v13  ;;  %v16859_v56 = vunpack.i.l.bf16 %v16858_v13 }
 0x13d   : > { %v1840_v45 = vsel %vm943_vm5, %v1808_v24, %v16854_v25  ;;  %v1841_v35 = vsel %vm943_vm5, %v1809_v59, %v16855_v62  ;;  %16424 = vmatprep.mubr.msk.bf16.mxu0 %vm1006_vm6, %v18100_v49  ;;  %16394 = vmatprep.mubr.msk.bf16.mxu1 %vm1006_vm6, %v18364_v42  ;;  %v26405_v59 = vld [vmem:[#allocation32_spill] sm:$0xff] }
 0x13e   : > { %v18372_v37 = vpack.c.bf16 %v1841_v35, %v1840_v45  ;;  %v16863_v36 = vpop.permute.xlu1 %16862  ;;  %v1779_v49 = vsel %vm243_vm0, %v26401_v20, %v16860_v47  ;;  %v1778_v8 = vsel %vm243_vm0, %v26402_v27, %v16859_v56  ;;  %v26406_v45 = vld [vmem:[#allocation31_spill] sm:$0xff] }
 0x13f   : > { %v16868_v23 = vpop.permute.xlu0 %16867  ;;  %v16865_v54 = vunpack.i.h.bf16 %v16863_v36  ;;  %v16864_v17 = vunpack.i.l.bf16 %v16863_v36 }
 0x140   : > { %16395 = vmatmul.mubr.msk.bf16.gmra.mrb[12].mxu1 %vm1006_vm6, %v18372_v37  ;;  %v16870_v60 = vunpack.i.h.bf16 %v16868_v23  ;;  %v16869_v46 = vunpack.i.l.bf16 %v16868_v23 }
 0x141   : > { %v1781_v6 = vsel %vm243_vm0, %v26403_v33, %v16865_v54  ;;  %v1780_v34 = vsel %vm243_vm0, %v26404_v12, %v16864_v17 }
 0x142   : > { %v16873_v48 = vpop.permute.xlu1 %16872  ;;  %v1810_v40 = vsel %vm910_vm4, %v1778_v8, %v16869_v46  ;;  %v1811_v15 = vsel %vm910_vm4, %v1779_v49, %v16870_v60 }
 0x143   : > { %v16875_v19 = vunpack.i.h.bf16 %v16873_v48  ;;  %v16874_v38 = vunpack.i.l.bf16 %v16873_v48  ;;  %v16878_v5 = vpop.permute.xlu0 %16877 }
 0x144   : > { %16425 = vmatmul.mubr.msk.bf16.gmra.mrb[40].mxu0 %vm1006_vm6, %v18109_v53  ;;  %v16880_v52 = vunpack.i.h.bf16 %v16878_v5  ;;  %v16879_v50 = vunpack.i.l.bf16 %v16878_v5 }
 0x145   : > { %16428 = vmatprep.mubr.msk.bf16.mxu0 %vm1006_vm6, %v18161_v28  ;;  %v1812_v31 = vsel %vm910_vm4, %v1780_v34, %v16874_v38  ;;  %v1813_v28 = vsel %vm910_vm4, %v1781_v6, %v16875_v19 }
 0x146   : > { %v16883_v29 = vpop.permute.xlu1 %16882  ;;  %v1842_v41 = vsel %vm943_vm5, %v1810_v40, %v16879_v50  ;;  %v1843_v53 = vsel %vm943_vm5, %v1811_v15, %v16880_v52 }
 0x147   : > { %v16885_v18 = vunpack.i.h.bf16 %v16883_v29  ;;  %v16884_v32 = vunpack.i.l.bf16 %v16883_v29  ;;  %v18396_v0 = vpack.c.bf16 %v1843_v53, %v1842_v41  ;;  %v16888_v55 = vpop.permute.xlu0 %16887 }
 0x148   : > { %v16890_v9 = vunpack.i.h.bf16 %v16888_v55  ;;  %v16889_v26 = vunpack.i.l.bf16 %v16888_v55 }
 0x149   : > { %v1844_v30 = vsel %vm943_vm5, %v1812_v31, %v16884_v32  ;;  %v1845_v4 = vsel %vm943_vm5, %v1813_v28, %v16885_v18  ;;  %16398 = vmatprep.mubr.msk.bf16.mxu1 %vm1006_vm6, %v18396_v0  ;;  %v26409_v31 = vld [vmem:[#allocation40_spill] sm:$0xff]  ;;  %v26410_v28 = vld [vmem:[#allocation39_spill] sm:$0xff] }
 0x14a   : > { %v18400_v57 = vpack.c.bf16 %v1845_v4, %v1844_v30  ;;  %v16893_v11 = vpop.permute.xlu1 %16892  ;;  %v1783_v13 = vsel %vm243_vm0, %v26405_v59, %v16890_v9  ;;  %v1782_v35 = vsel %vm243_vm0, %v26406_v45, %v16889_v26 }
 0x14b   : > { %v16898_v58 = vpop.permute.xlu0 %16897  ;;  %v16895_v44 = vunpack.i.h.bf16 %v16893_v11  ;;  %v16894_v63 = vunpack.i.l.bf16 %v16893_v11 }
 0x14c   : > { %16399 = vmatmul.mubr.msk.bf16.gmra.mrb[16].mxu1 %vm1006_vm6, %v18400_v57  ;;  %16429 = vmatmul.mubr.msk.bf16.gmra.mrb[44].mxu0 %vm1006_vm6, %v18170_v10  ;;  %v16900_v62 = vunpack.i.h.bf16 %v16898_v58  ;;  %v16899_v25 = vunpack.i.l.bf16 %v16898_v58  ;;  %v26407_v10 = vld [vmem:[#allocation37_spill] sm:$0xff]  ;;  %v26411_v58 = vld [vmem:[#allocation43_spill] sm:$0xff] }
 0x14d   : > { %16432 = vmatprep.mubr.msk.bf16.mxu0 %vm1006_vm6, %v18214_v14  ;;  %v1785_v17 = vsel %vm243_vm0, %v26407_v10, %v16895_v44  ;;  %v26408_v14 = vld [vmem:[#allocation36_spill] sm:$0xff] }
 0x14e   : > { %v16903_v24 = vpop.permute.xlu1 %16902  ;;  %v1784_v60 = vsel %vm243_vm0, %v26408_v14, %v16894_v63  ;;  %v1814_v46 = vsel %vm910_vm4, %v1782_v35, %v16899_v25  ;;  %v1815_v48 = vsel %vm910_vm4, %v1783_v13, %v16900_v62  ;;  %v26412_v63 = vld [vmem:[#allocation42_spill] sm:$0xff] }
 0x14f   : > { %v16905_v36 = vunpack.i.h.bf16 %v16903_v24  ;;  %v16904_v47 = vunpack.i.l.bf16 %v16903_v24  ;;  %v16908_v56 = vpop.permute.xlu0 %16907 }
 0x150   : > { %v16910_v23 = vunpack.i.h.bf16 %v16908_v56  ;;  %v16909_v54 = vunpack.i.l.bf16 %v16908_v56 }
 0x151   : > { %v1816_v38 = vsel %vm910_vm4, %v1784_v60, %v16904_v47  ;;  %v1817_v5 = vsel %vm910_vm4, %v1785_v17, %v16905_v36 }
 0x152   : > { %v16913_v20 = vpop.permute.xlu1 %16912  ;;  %v1846_v49 = vsel %vm943_vm5, %v1814_v46, %v16909_v54  ;;  %v1847_v27 = vsel %vm943_vm5, %v1815_v48, %v16910_v23 }
 0x153   : > { %v16915_v8 = vunpack.i.h.bf16 %v16913_v20  ;;  %v16914_v19 = vunpack.i.l.bf16 %v16913_v20  ;;  %v18424_v52 = vpack.c.bf16 %v1847_v27, %v1846_v49  ;;  %v16918_v50 = vpop.permute.xlu0 %16917 }
 0x154   : > { %16433 = vmatmul.mubr.msk.bf16.gmra.mrb[48].mxu0 %vm1006_vm6, %v18216_v1  ;;  %v16920_v40 = vunpack.i.h.bf16 %v16918_v50  ;;  %v16919_v15 = vunpack.i.l.bf16 %v16918_v50 }
 0x155   : > { %v1848_v33 = vsel %vm943_vm5, %v1816_v38, %v16914_v19  ;;  %v1849_v6 = vsel %vm943_vm5, %v1817_v5, %v16915_v8  ;;  %16436 = vmatprep.mubr.msk.bf16.mxu0 %vm1006_vm6, %v18234_v3  ;;  %16402 = vmatprep.mubr.msk.bf16.mxu1 %vm1006_vm6, %v18424_v52  ;;  %v26413_v19 = vld [vmem:[#allocation45_spill] sm:$0xff]  ;;  %v26414_v5 = vld [vmem:[#allocation44_spill] sm:$0xff] }
 0x156   : > { %v18432_v12 = vpack.c.bf16 %v1849_v6, %v1848_v33  ;;  %v16923_v34 = vpop.permute.xlu1 %16922  ;;  %v1787_v3 = vsel %vm243_vm0, %v26409_v31, %v16920_v40  ;;  %v1786_v55 = vsel %vm243_vm0, %v26410_v28, %v16919_v15 }
 0x157   : > { %v16928_v29 = vpop.permute.xlu0 %16927  ;;  %v16925_v1 = vunpack.i.h.bf16 %v16923_v34  ;;  %v16924_v41 = vunpack.i.l.bf16 %v16923_v34 }
 0x158   : > { %16403 = vmatmul.mubr.msk.bf16.gmra.mrb[20].mxu1 %vm1006_vm6, %v18432_v12  ;;  %v16930_v53 = vunpack.i.h.bf16 %v16928_v29  ;;  %v16929_v18 = vunpack.i.l.bf16 %v16928_v29 }
 0x159   : > { %v1789_v44 = vsel %vm243_vm0, %v26411_v58, %v16925_v1  ;;  %v1788_v62 = vsel %vm243_vm0, %v26412_v63, %v16924_v41 }
 0x15a   : > { %v16933_v32 = vpop.permute.xlu1 %16932  ;;  %v1818_v25 = vsel %vm910_vm4, %v1786_v55, %v16929_v18  ;;  %v1819_v24 = vsel %vm910_vm4, %v1787_v3, %v16930_v53 }
 0x15b   : > { %v16935_v30 = vunpack.i.h.bf16 %v16933_v32  ;;  %v16934_v4 = vunpack.i.l.bf16 %v16933_v32  ;;  %v16938_v11 = vpop.permute.xlu0 %16937 }
 0x15c   : > { %16437 = vmatmul.mubr.msk.bf16.gmra.mrb[52].mxu0 %vm1006_vm6, %v18236_v39  ;;  %v16940_v9 = vunpack.i.h.bf16 %v16938_v11  ;;  %v16939_v26 = vunpack.i.l.bf16 %v16938_v11 }
 0x15d   : > { %16440 = vmatprep.mubr.msk.bf16.mxu0 %vm1006_vm6, %v18271_v61  ;;  %v1820_v36 = vsel %vm910_vm4, %v1788_v62, %v16934_v4  ;;  %v1821_v61 = vsel %vm910_vm4, %v1789_v44, %v16935_v30 }
 0x15e   : > { %v16943_v59 = vpop.permute.xlu1 %16942  ;;  %v1850_v13 = vsel %vm943_vm5, %v1818_v25, %v16939_v26  ;;  %v1851_v39 = vsel %vm943_vm5, %v1819_v24, %v16940_v9 }
 0x15f   : > { %v16945_v45 = vunpack.i.h.bf16 %v16943_v59  ;;  %v16944_v35 = vunpack.i.l.bf16 %v16943_v59  ;;  %v18456_v47 = vpack.c.bf16 %v1851_v39, %v1850_v13  ;;  %v16948_v56 = vpop.permute.xlu0 %16947  ;;  %v17031_v59 = vld [vmem:[#allocation2 + $0x188] sm:$0xff]  ;;  %v17032_v39 = vld [vmem:[#allocation2 + $0x180] sm:$0xff] }
 0x160   : > { %v16950_v14 = vunpack.i.h.bf16 %v16948_v56  ;;  %v16949_v60 = vunpack.i.l.bf16 %v16948_v56 }
 0x161   : > { %v1852_v23 = vsel %vm943_vm5, %v1820_v36, %v16944_v35  ;;  %v1853_v54 = vsel %vm943_vm5, %v1821_v61, %v16945_v45  ;;  %16406 = vmatprep.mubr.msk.bf16.mxu1 %vm1006_vm6, %v18456_v47 }
 0x162   : > { %v18460_v10 = vpack.c.bf16 %v1853_v54, %v1852_v23  ;;  %v16953_v17 = vpop.permute.xlu1 %16952  ;;  %v1791_v38 = vsel %vm243_vm0, %v26413_v19, %v16950_v14  ;;  %v1790_v50 = vsel %vm243_vm0, %v26414_v5, %v16949_v60  ;;  %v3053_v19 = vlaneseq }
 0x163   : > { %v16958_v46 = vpop.permute.xlu0 %16957  ;;  %v16955_v48 = vunpack.i.h.bf16 %v16953_v17  ;;  %v16954_v20 = vunpack.i.l.bf16 %v16953_v17 }
 0x164   : > { %16407 = vmatmul.mubr.msk.bf16.gmra.mrb[24].mxu1 %vm1006_vm6, %v18460_v10  ;;  %16441 = vmatmul.mubr.msk.bf16.gmra.mrb[56].mxu0 %vm1006_vm6, %v18274_v22  ;;  %v16960_v49 = vunpack.i.h.bf16 %v16958_v46  ;;  %v16959_v27 = vunpack.i.l.bf16 %v16958_v46  ;;  %v26415_v22 = vld [vmem:[#allocation47_spill] sm:$0xff]  ;;  %v18532_v5 = vshrl.u32 %v3053_v19, 7 }
 0x165   : > { %16444 = vmatprep.mubr.msk.bf16.mxu0 %vm1006_vm6, %v18316_v43  ;;  %v1793_v29 = vsel %vm243_vm0, %v26415_v22, %v16955_v48  ;;  %v26416_v43 = vld [vmem:[#allocation46_spill] sm:$0xff] }
 0x166   : > { %v16963_v8 = vpop.permute.xlu1 %16962  ;;  %v1792_v1 = vsel %vm243_vm0, %v26416_v43, %v16954_v20  ;;  %v1822_v41 = vsel %vm910_vm4, %v1790_v50, %v16959_v27  ;;  %v1823_v53 = vsel %vm910_vm4, %v1791_v38, %v16960_v49  ;;  %v17050_v27 = vmov 1966171168   ;;  %v18537_v50 = vld [vmem:[%s25548_s2] ss:$0 sm:$0xff] }
 0x167   : > { %v16965_v33 = vunpack.i.h.bf16 %v16963_v8  ;;  %v16964_v6 = vunpack.i.l.bf16 %v16963_v8  ;;  %v16968_v34 = vpop.permute.xlu0 %16967  ;;  %v3051_v8 = vunpack.c.l.s4 %v17050_v27 }
 0x168   : > { %v16970_v40 = vunpack.i.h.bf16 %v16968_v34  ;;  %v16969_v15 = vunpack.i.l.bf16 %v16968_v34 }
 0x169   : > { %v1824_v55 = vsel %vm910_vm4, %v1792_v1, %v16964_v6  ;;  %v1825_v30 = vsel %vm910_vm4, %v1793_v29, %v16965_v33  ;;  %v3052_v38 = vunpack.c.0.s8 %v3051_v8 }
 0x16a   : > { %v16973_v18 = vpop.permute.xlu1 %16972  ;;  %v1854_v32 = vsel %vm943_vm5, %v1822_v41, %v16969_v15  ;;  %v1855_v31 = vsel %vm943_vm5, %v1823_v53, %v16970_v40 }
 0x16b   : > { %v16975_v3 = vunpack.i.h.bf16 %v16973_v18  ;;  %v16974_v28 = vunpack.i.l.bf16 %v16973_v18  ;;  %v1872_v4 = vpack.c.bf16 %v1855_v31, %v1854_v32  ;;  %v16978_v11 = vpop.permute.xlu0 %16977  ;;  %v18540_v33 = vsub.s32 %v3052_v38, %v18532_v5 }
 0x16d   : > { %v1856_v9 = vsel %vm943_vm5, %v1824_v55, %v16974_v28  ;;  %v1857_v26 = vsel %vm943_vm5, %v1825_v30, %v16975_v3  ;;  %16410 = vmatprep.mubr.msk.bf16.mxu1 %vm1006_vm6, %v1872_v4 }
 0x16e   : > { %v1873_v58 = vpack.c.bf16 %v1857_v26, %v1856_v9  ;;  %v16983_v44 = vpop.permute.xlu1 %16982 }
 0x16f   : > { %v16988_v63 = vpop.permute.xlu0 %16987 }
 0x170   : > { %16411 = vmatmul.mubr.msk.bf16.gmra.mrb[28].mxu1 %vm1006_vm6, %v1873_v58  ;;  %v16990_v62 = vunpack.i.h.bf16 %v16988_v63  ;;  %v16989_v25 = vunpack.i.l.bf16 %v16988_v63 }
 0x171   : > { %16450 = vmatprep.mubr.msk.bf16.mxu1 %vm1006_vm6, %v18266_v7 }
 0x172   : > { %v16993_v24 = vpop.permute.xlu1 %16992  ;;  %v2291_v13 = vsel %vm243_vm0, %v17031_v59, %v16990_v62  ;;  %v2290_v45 = vsel %vm243_vm0, %v17032_v39, %v16989_v25 }
 0x173   : > { %v16994_v48 = vunpack.i.l.bf16 %v16993_v24 }
 0x175   : > { %v16998_v35 = vpop.permute.xlu0 %16997 }
 0x176   : > { %v17000_v36 = vunpack.i.h.bf16 %v16998_v35  ;;  %v16999_v61 = vunpack.i.l.bf16 %v16998_v35  ;;  %v17003_v56 = vpop.permute.xlu1 %17002 }
 0x177   : > { %v17005_v17 = vunpack.i.h.bf16 %v17003_v56  ;;  %v17004_v14 = vunpack.i.l.bf16 %v17003_v56 }
 0x178   : > { %v2292_v23 = vsel %vm910_vm4, %v2290_v45, %v16999_v61  ;;  %v2293_v54 = vsel %vm910_vm4, %v2291_v13, %v17000_v36  ;;  %16451 = vmatmul.mubr.msk.bf16.vlgmr.msra.gmra.mrb[32].mxu1 %vm1006_vm6, %v18297_v2  ;;  %v16980_v2 = vunpack.i.h.bf16 %v16978_v11 }
 0x179   : > { %v2294_v7 = vsel %vm943_vm5, %v2292_v23, %v17004_v14  ;;  %v2295_v60 = vsel %vm943_vm5, %v2293_v54, %v17005_v17  ;;  %16454 = vmatprep.mubr.msk.bf16.mxu1 %vm1006_vm6, %v18310_v16  ;;  %v16979_v16 = vunpack.i.l.bf16 %v16978_v11  ;;  %v18559_v11 = vsub.s32 0, %v18532_v5 }
 0x17a   : > { %v2296_v46 = vpack.c.bf16 %v2295_v60, %v2294_v7 }
 0x17c   : > { %16445 = vmatmul.mubr.msk.bf16.gmra.mrb[60].mxu0 %vm1006_vm6, %v2296_v46 }
 0x180   : > { %16455 = vmatmul.mubr.msk.bf16.gmra.mrb[36].mxu1 %vm1006_vm6, %v18336_v21  ;;  %v16985_v21 = vunpack.i.h.bf16 %v16983_v44 }
 0x181   : > { %16458 = vmatprep.mubr.msk.bf16.mxu1 %vm1006_vm6, %v18340_v51  ;;  %v16984_v51 = vunpack.i.l.bf16 %v16983_v44 }
 0x188   : > { %16459 = vmatmul.mubr.msk.bf16.gmra.mrb[40].mxu1 %vm1006_vm6, %v18364_v42  ;;  %v26417_v42 = vld [vmem:[#allocation52_spill] sm:$0xff] }
 0x189   : > { %16462 = vmatprep.mubr.msk.bf16.mxu1 %vm1006_vm6, %v18372_v37  ;;  %v2666_v37 = vsel %vm243_vm0, %v26417_v42, %v16980_v2 }
 0x18a   : > { %v2668_v20 = vsel %vm910_vm4, %v2666_v37, %v16985_v21 }
 0x190   : > { %16463 = vmatmul.mubr.msk.bf16.gmra.mrb[44].mxu1 %vm1006_vm6, %v18396_v0  ;;  %v26418_v0 = vld [vmem:[#allocation51_spill] sm:$0xff] }
 0x191   : > { %16466 = vmatprep.mubr.msk.bf16.mxu1 %vm1006_vm6, %v18400_v57  ;;  %v2665_v57 = vsel %vm243_vm0, %v26418_v0, %v16979_v16 }
 0x198   : > { %16467 = vmatmul.mubr.msk.bf16.gmra.mrb[48].mxu1 %vm1006_vm6, %v18424_v52  ;;  %v16995_v52 = vunpack.i.h.bf16 %v16993_v24 }
 0x199   : > { %16470 = vmatprep.mubr.msk.bf16.mxu1 %vm1006_vm6, %v18432_v12  ;;  %v2667_v12 = vsel %vm910_vm4, %v2665_v57, %v16984_v51 }
 0x1a0   : > { %16471 = vmatmul.mubr.msk.bf16.gmra.mrb[52].mxu1 %vm1006_vm6, %v18456_v47  ;;  %v2669_v47 = vsel %vm943_vm5, %v2667_v12, %v16994_v48 }
 0x1a1   : > { %16474 = vmatprep.mubr.msk.bf16.mxu1 %vm1006_vm6, %v18460_v10  ;;  %v2670_v10 = vsel %vm943_vm5, %v2668_v20, %v16995_v52 }
 0x1a2   : > { %v2671_v49 = vpack.c.bf16 %v2670_v10, %v2669_v47 }
 0x1a8   : > { %16475 = vmatmul.mubr.msk.bf16.gmra.mrb[56].mxu1 %vm1006_vm6, %v1872_v4 }
 0x1a9   : > { %16478 = vmatprep.mubr.msk.bf16.mxu1 %vm1006_vm6, %v1873_v58 }
 0x1b0   : > { %16479 = vmatmul.mubr.msk.bf16.gmra.mrb[60].mxu1 %vm1006_vm6, %v2671_v49 }
 0x1c7   : > { %v16350_v6 = vpop.f32.mrb[0].mxu0 }
 0x1c8   : > { %v1098_v34 = vadd.f32 %v16350_v6, %v18537_v50  ;;  %v1089_v40 = vpop.f32.mrb[1].mxu0 }
 0x1c9   : > { %v1090_v15 = vadd.f32 %v18537_v50, %v1089_v40  ;;  %v16351_v22 = vpop.f32.mrb[2].mxu0 }
 0x1ca   : > { %v1288_v29 = vmul.f32 %v1098_v34, %v1098_v34  ;;  %v3147_v43 = vcombine.high %v1098_v34, %v1098_v34  ;;  %v3154_v1 = vrot.slane %v1098_v34, %v18540_v33  ;;  %v1092_v41 = vpop.f32.mrb[3].mxu0  ;;  %v1219_v9 = vsel %vm910_vm4, %v1098_v34, 0.0 }
 0x1cb   : > { %v1286_v53 = vmul.f32 %v1090_v15, %v1090_v15  ;;  %v3049_v18 = vcombine.high %v1090_v15, %v1090_v15  ;;  %v3056_v32 = vrot.slane %v1090_v15, %v18540_v33  ;;  %v1216_v58 = vsel %vm910_vm4, %v1090_v15, 0.0 }
 0x1cc   : > { %v18547_v31 = vrot.slane %v3147_v43, %v18540_v33  ;;  %v3162_v3 = vcombine.high %v3154_v1, %v3154_v1  ;;  %v18550_v28 = vrot.slane %v3154_v1, %v18540_v33  ;;  %v1321_v26 = vsel %vm910_vm4, %v1288_v29, 0.0 }
 0x1cd   : > { %v18553_v55 = vrot.slane %v3049_v18, %v18540_v33  ;;  %v3064_v30 = vcombine.high %v3056_v32, %v3056_v32  ;;  %v18556_v4 = vrot.slane %v3056_v32, %v18540_v33  ;;  %v1318_v44 = vsel %vm910_vm4, %v1286_v53, 0.0 }
 0x1ce   : > { %26419 = vst [vmem:[#allocation34_spill] sm:$0xff] %v18547_v31  ;;  %26420 = vst [vmem:[#allocation35_spill] sm:$0xff] %v18550_v28  ;;  %v18569_v62 = vrot.slane %v18547_v31, %v18540_v33  ;;  %v18572_v25 = vrot.slane %v3162_v3, %v18540_v33  ;;  %v1101_v45 = vadd.f32 %v16351_v22, %v18537_v50 }
 0x1cf   : > { %v18575_v24 = vrot.slane %v3064_v30, %v18540_v33  ;;  %v16354_v59 = vpop.f32.mrb[4].mxu0  ;;  %v1093_v35 = vadd.f32 %v18537_v50, %v1092_v41  ;;  %v18585_v61 = vrot.slane %v18553_v55, %v18540_v33 }
 0x1d0   : > { %26421 = vst [vmem:[#allocation38_spill] sm:$0xff] %v18569_v62  ;;  %26422 = vst [vmem:[#allocation41_spill] sm:$0xff] %v18572_v25  ;;  %v1105_v36 = vpop.f32.mrb[5].mxu0  ;;  %v1114_v23 = vadd.f32 %v16354_v59, %v18537_v50  ;;  %v1289_v14 = vmul.f32 %v1101_v45, %v1101_v45  ;;  %v3196_v7 = vcombine.high %v1101_v45, %v1101_v45  ;;  %v1221_v37 = vsel %vm910_vm4, %v1101_v45, 0.0 }
 0x1d1   : > { %v1106_v54 = vadd.f32 %v18537_v50, %v1105_v36  ;;  %v16355_v17 = vpop.f32.mrb[6].mxu0  ;;  %v3203_v60 = vrot.slane %v1101_v45, %v18540_v33  ;;  %v1217_v16 = vsel %vm910_vm4, %v1093_v35, 0.0  ;;  %v1287_v21 = vmul.f32 %v1093_v35, %v1093_v35 }
 0x1d2   : > { %v1108_v46 = vpop.f32.mrb[7].mxu0  ;;  %v3098_v51 = vcombine.high %v1093_v35, %v1093_v35  ;;  %v3105_v42 = vrot.slane %v1093_v35, %v18540_v33  ;;  %v18598_v0 = vrot.slane %v3196_v7, %v18540_v33  ;;  %v1218_v48 = vadd.f32 %v1217_v16, %v1216_v58 }
 0x1d3   : > { %v3211_v57 = vcombine.high %v3203_v60, %v3203_v60  ;;  %v18601_v52 = vrot.slane %v3203_v60, %v18540_v33  ;;  %v1319_v12 = vsel %vm910_vm4, %v1287_v21, 0.0  ;;  %v1323_v10 = vsel %vm910_vm4, %v1289_v14, 0.0 }
 0x1d4   : > { %26423 = vst [vmem:[#allocation48_spill] sm:$0xff] %v18598_v0  ;;  %v18605_v20 = vrot.slane %v3098_v51, %v18540_v33  ;;  %v3113_v47 = vcombine.high %v3105_v42, %v3105_v42  ;;  %v18612_v27 = vrot.slane %v18598_v0, %v18540_v33  ;;  %v1220_v38 = vadd.f32 %v1219_v9, %v1218_v48 }
 0x1d5   : > { %26424 = vst [vmem:[#allocation49_spill] sm:$0xff] %v18601_v52  ;;  %v18615_v8 = vrot.slane %v3211_v57, %v18540_v33  ;;  %v1320_v6 = vadd.f32 %v1319_v12, %v1318_v44  ;;  %v18620_v34 = vrot.slane %v3105_v42, %v18540_v33  ;;  %v1227_v43 = vsel %vm910_vm4, %v1114_v23, 0.0 }
 0x1d6   : > { %26425 = vst [vmem:[#allocation50_spill] sm:$0xff] %v18605_v20  ;;  %26426 = vst [vmem:[#allocation5_spill] sm:$0xff] %v18612_v27  ;;  %v18626_v22 = vrot.slane %v18605_v20, %v18540_v33  ;;  %v18629_v29 = vrot.slane %v3113_v47, %v18540_v33  ;;  %v1292_v53 = vmul.f32 %v1114_v23, %v1114_v23  ;;  %v1223_v58 = vsel %vm910_vm4, %v1106_v54, 0.0 }
 0x1d7   : > { %26427 = vst [vmem:[#allocation7_spill] sm:$0xff] %v18615_v8  ;;  %26428 = vst [vmem:[#allocation6_spill] sm:$0xff] %v18620_v34  ;;  %v16358_v40 = vpop.f32.mrb[8].mxu0  ;;  %v1322_v41 = vadd.f32 %v1321_v26, %v1320_v6  ;;  %v3343_v18 = vcombine.high %v1114_v23, %v1114_v23  ;;  %v3350_v32 = vrot.slane %v1114_v23, %v18540_v33 }
 0x1d8   : > { %26429 = vst [vmem:[#allocation17_spill] sm:$0xff] %v18626_v22  ;;  %v1121_v1 = vpop.f32.mrb[9].mxu0  ;;  %v1222_v9 = vadd.f32 %v1221_v37, %v1220_v38  ;;  %v1290_v44 = vmul.f32 %v1106_v54, %v1106_v54  ;;  %v3245_v7 = vcombine.high %v1106_v54, %v1106_v54  ;;  %v3252_v60 = vrot.slane %v1106_v54, %v18540_v33 }
 0x1d9   : > { %v18633_v3 = vpop.f32.mrb[10].mxu0  ;;  %v18641_v45 = vrot.slane %v3343_v18, %v18540_v33  ;;  %v3358_v35 = vcombine.high %v3350_v32, %v3350_v32  ;;  %v18644_v26 = vrot.slane %v3350_v32, %v18540_v33  ;;  %v1324_v36 = vadd.f32 %v1323_v10, %v1322_v41 }
 0x1da   : > { %v18638_v59 = vpop.f32.mrb[11].mxu0  ;;  %v1224_v23 = vadd.f32 %v1223_v58, %v1222_v9  ;;  %v1325_v14 = vsel %vm910_vm4, %v1290_v44, 0.0  ;;  %v1329_v16 = vsel %vm910_vm4, %v1292_v53, 0.0  ;;  %v18659_v57 = vrot.slane %v3245_v7, %v18540_v33 }
 0x1db   : > { %26430 = vst [vmem:[#allocation19_spill] sm:$0xff] %v18641_v45  ;;  %26431 = vst [vmem:[#allocation21_spill] sm:$0xff] %v18644_v26  ;;  %v18653_v51 = vrot.slane %v18641_v45, %v18540_v33  ;;  %v18656_v42 = vrot.slane %v3358_v35, %v18540_v33  ;;  %v1326_v37 = vadd.f32 %v1325_v14, %v1324_v36 }
 0x1dc   : > { %26434 = vst [vmem:[#allocation3_spill] sm:$0xff] %v18659_v57  ;;  %v3260_v48 = vcombine.high %v3252_v60, %v3252_v60  ;;  %v18662_v12 = vrot.slane %v3252_v60, %v18540_v33  ;;  %v1117_v47 = vadd.f32 %v16355_v17, %v18537_v50  ;;  %v1109_v10 = vadd.f32 %v18537_v50, %v1108_v46 }
 0x1dd   : > { %26432 = vst [vmem:[#allocation23_spill] sm:$0xff] %v18653_v51  ;;  %26433 = vst [vmem:[#allocation4_spill] sm:$0xff] %v18656_v42  ;;  %v1130_v38 = vadd.f32 %v16358_v40, %v18537_v50  ;;  %v18675_v53 = vrot.slane %v18659_v57, %v18540_v33  ;;  %v1122_v32 = vadd.f32 %v18537_v50, %v1121_v1 }
 0x1de   : > { %v18678_v18 = vrot.slane %v3260_v48, %v18540_v33  ;;  %v1293_v46 = vmul.f32 %v1117_v47, %v1117_v47  ;;  %v3392_v40 = vcombine.high %v1117_v47, %v1117_v47  ;;  %v3399_v58 = vrot.slane %v1117_v47, %v18540_v33 }
 0x1df   : > { %v18669_v6 = vpop.f32.mrb[12].mxu0  ;;  %26435 = vst [vmem:[#allocation11_spill] sm:$0xff] %v18675_v53  ;;  %v1225_v35 = vsel %vm910_vm4, %v1109_v10, 0.0  ;;  %v1291_v36 = vmul.f32 %v1109_v10, %v1109_v10  ;;  %v3294_v14 = vcombine.high %v1109_v10, %v1109_v10  ;;  %v3301_v7 = vrot.slane %v1109_v10, %v18540_v33 }
 0x1e0   : > { %v18681_v9 = vpop.f32.mrb[13].mxu0  ;;  %v1229_v1 = vsel %vm910_vm4, %v1117_v47, 0.0  ;;  %v18694_v48 = vrot.slane %v3392_v40, %v18540_v33  ;;  %v3407_v49 = vcombine.high %v3399_v58, %v3399_v58  ;;  %v18697_v21 = vrot.slane %v3399_v58, %v18540_v33 }
 0x1e1   : > { %v18686_v44 = vpop.f32.mrb[14].mxu0  ;;  %v1226_v19 = vadd.f32 %v1225_v35, %v1224_v23  ;;  %v1327_v54 = vsel %vm910_vm4, %v1291_v36, 0.0  ;;  %v18701_v63 = vrot.slane %v3294_v14, %v18540_v33  ;;  %v3309_v13 = vcombine.high %v3301_v7, %v3301_v7 }
 0x1e2   : > { %v18690_v60 = vpop.f32.mrb[15].mxu0  ;;  %26436 = vst [vmem:[#allocation10_spill] sm:$0xff] %v18694_v48  ;;  %26437 = vst [vmem:[#allocation33_spill] sm:$0xff] %v18697_v21  ;;  %v1331_v10 = vsel %vm910_vm4, %v1293_v46, 0.0  ;;  %v18708_v47 = vrot.slane %v18694_v48, %v18540_v33  ;;  %v18711_v40 = vrot.slane %v3407_v49, %v18540_v33  ;;  %v1328_v35 = vadd.f32 %v1327_v54, %v1326_v37 }
 0x1e3   : > { %26438 = vst [vmem:[#allocation9_spill] sm:$0xff] %v18701_v63  ;;  %v1228_v58 = vadd.f32 %v1227_v43, %v1226_v19  ;;  %v18716_v36 = vrot.slane %v3301_v7, %v18540_v33  ;;  %v18722_v14 = vrot.slane %v18701_v63, %v18540_v33  ;;  %v18725_v15 = vrot.slane %v3309_v13, %v18540_v33 }
 0x1e4   : > { %26439 = vst [vmem:[#allocation8_spill] sm:$0xff] %v18708_v47  ;;  %26440 = vst [vmem:[#allocation14_spill] sm:$0xff] %v18711_v40  ;;  %v18728_v49 = vsel %vm910_vm4, %v1130_v38, 0.0  ;;  %v1330_v19 = vadd.f32 %v1329_v16, %v1328_v35  ;;  %v1296_v43 = vmul.f32 %v1130_v38, %v1130_v38  ;;  %v3539_v37 = vcombine.high %v1130_v38, %v1130_v38 }
 0x1e5   : > { %26441 = vst [vmem:[#allocation13_spill] sm:$0xff] %v18716_v36  ;;  %26442 = vst [vmem:[#allocation12_spill] sm:$0xff] %v18722_v14  ;;  %v3546_v54 = vrot.slane %v1130_v38, %v18540_v33  ;;  %v1230_v46 = vadd.f32 %v1229_v1, %v1228_v58  ;;  %v1231_v30 = vsel %vm910_vm4, %v1122_v32, 0.0  ;;  %v1294_v13 = vmul.f32 %v1122_v32, %v1122_v32 }
 0x1e6   : > { %26443 = vst [vmem:[#allocation16_spill] sm:$0xff] %v18725_v15  ;;  %v18741_v39 = vrot.slane %v3539_v37, %v18540_v33  ;;  %v1332_v35 = vadd.f32 %v1331_v10, %v1330_v19  ;;  %v3441_v23 = vcombine.high %v1122_v32, %v1122_v32  ;;  %v3448_v1 = vrot.slane %v1122_v32, %v18540_v33 }
 0x1e7   : > { %v18730_v41 = vpop.f32.mrb[16].mxu0  ;;  %v3554_v2 = vcombine.high %v3546_v54, %v3546_v54  ;;  %v18744_v16 = vrot.slane %v3546_v54, %v18540_v33  ;;  %v1232_v56 = vadd.f32 %v1231_v30, %v1230_v46  ;;  %v1333_v47 = vsel %vm910_vm4, %v1294_v13, 0.0 }
 0x1e8   : > { %v18733_v7 = vpop.f32.mrb[17].mxu0  ;;  %26444 = vst [vmem:[#allocation15_spill] sm:$0xff] %v18741_v39  ;;  %v1337_v58 = vsel %vm910_vm4, %v1296_v43, 0.0  ;;  %v18755_v37 = vrot.slane %v18741_v39, %v18540_v33  ;;  %v1334_v10 = vadd.f32 %v1333_v47, %v1332_v35  ;;  %v18761_v30 = vrot.slane %v3441_v23, %v18540_v33 }
 0x1e9   : > { %v18738_v17 = vpop.f32.mrb[18].mxu0  ;;  %26445 = vst [vmem:[#allocation20_spill] sm:$0xff] %v18744_v16  ;;  %v18758_v54 = vrot.slane %v3554_v2, %v18540_v33  ;;  %v3456_v46 = vcombine.high %v3448_v1, %v3448_v1  ;;  %v18764_v19 = vrot.slane %v3448_v1, %v18540_v33  ;;  %v1133_v43 = vadd.f32 %v18633_v3, %v18537_v50 }
 0x1ea   : > { %v18746_v38 = vpop.f32.mrb[19].mxu0  ;;  %26446 = vst [vmem:[#allocation18_spill] sm:$0xff] %v18755_v37  ;;  %26448 = vst [vmem:[#allocation22_spill] sm:$0xff] %v18761_v30  ;;  %v1125_v13 = vadd.f32 %v18537_v50, %v18638_v59  ;;  %v1146_v2 = vadd.f32 %v18669_v6, %v18537_v50  ;;  %v18778_v23 = vrot.slane %v18761_v30, %v18540_v33 }
 0x1eb   : > { %26447 = vst [vmem:[#allocation24_spill] sm:$0xff] %v18758_v54  ;;  %26449 = vst [vmem:[#allocation26_spill] sm:$0xff] %v18764_v19  ;;  %v18781_v35 = vrot.slane %v3456_v46, %v18540_v33  ;;  %v18785_v1 = vadd.f32 %v18537_v50, %v18681_v9  ;;  %v1297_v6 = vmul.f32 %v1133_v43, %v1133_v43  ;;  %v1237_v9 = vsel %vm910_vm4, %v1133_v43, 0.0 }
 0x1ec   : > { %26450 = vst [vmem:[#allocation25_spill] sm:$0xff] %v18778_v23  ;;  %v3588_v48 = vcombine.high %v1133_v43, %v1133_v43  ;;  %v3595_v32 = vrot.slane %v1133_v43, %v18540_v33  ;;  %v1233_v37 = vsel %vm910_vm4, %v1125_v13, 0.0  ;;  %v1295_v39 = vmul.f32 %v1125_v13, %v1125_v13 }
 0x1ed   : > { %26451 = vst [vmem:[#allocation28_spill] sm:$0xff] %v18781_v35  ;;  %v3490_v46 = vcombine.high %v1125_v13, %v1125_v13  ;;  %v3497_v16 = vrot.slane %v1125_v13, %v18540_v33  ;;  %v1234_v35 = vadd.f32 %v1233_v37, %v1232_v56  ;;  %v1339_v43 = vsel %vm910_vm4, %v1297_v6, 0.0 }
 0x1ee   : > { %v18800_v23 = vrot.slane %v3588_v48, %v18540_v33  ;;  %v3603_v59 = vcombine.high %v3595_v32, %v3595_v32  ;;  %v18803_v30 = vrot.slane %v3595_v32, %v18540_v33  ;;  %v1335_v21 = vsel %vm910_vm4, %v1295_v39, 0.0 }
 0x1ef   : > { %v18787_v3 = vpop.f32.mrb[20].mxu0  ;;  %v18809_v40 = vrot.slane %v3490_v46, %v18540_v33  ;;  %v3505_v13 = vcombine.high %v3497_v16, %v3497_v16  ;;  %v1236_v37 = vadd.f32 %v18728_v49, %v1234_v35  ;;  %v1336_v46 = vadd.f32 %v1335_v21, %v1334_v10 }
 0x1f0   : > { %v18792_v47 = vpop.f32.mrb[21].mxu0  ;;  %26452 = vst [vmem:[#allocation27_spill] sm:$0xff] %v18800_v23  ;;  %26453 = vst [vmem:[#allocation30_spill] sm:$0xff] %v18803_v30  ;;  %v18818_v32 = vrot.slane %v18800_v23, %v18540_v33  ;;  %v18821_v0 = vrot.slane %v3603_v59, %v18540_v33  ;;  %v18829_v6 = vrot.slane %v3497_v16, %v18540_v33  ;;  %v18843_v39 = vsel %vm910_vm4, %v1146_v2, 0.0 }
 0x1f1   : > { %v18796_v54 = vpop.f32.mrb[22].mxu0  ;;  %26454 = vst [vmem:[#allocation29_spill] sm:$0xff] %v18809_v40  ;;  %v18837_v59 = vrot.slane %v18809_v40, %v18540_v33  ;;  %v1338_v21 = vadd.f32 %v1337_v58, %v1336_v46  ;;  %v1300_v16 = vmul.f32 %v1146_v2, %v1146_v2  ;;  %v3735_v10 = vcombine.high %v1146_v2, %v1146_v2 }
 0x1f2   : > { %v18805_v19 = vpop.f32.mrb[23].mxu0  ;;  %26455 = vst [vmem:[#allocation32_spill] sm:$0xff] %v18818_v32  ;;  %26456 = vst [vmem:[#allocation31_spill] sm:$0xff] %v18821_v0  ;;  %v18840_v32 = vrot.slane %v3505_v13, %v18540_v33  ;;  %v3742_v35 = vrot.slane %v1146_v2, %v18540_v33  ;;  %v1238_v30 = vadd.f32 %v1237_v9, %v1236_v37  ;;  %v1239_v13 = vsel %vm910_vm4, %v18785_v1, 0.0 }
 0x1f3   : > { %v18811_v27 = vpop.f32.mrb[0].mxu1  ;;  %26457 = vst [vmem:[#allocation37_spill] sm:$0xff] %v18829_v6  ;;  %26458 = vst [vmem:[#allocation36_spill] sm:$0xff] %v18837_v59  ;;  %v1298_v0 = vmul.f32 %v18785_v1, %v18785_v1  ;;  %v18859_v58 = vrot.slane %v3735_v10, %v18540_v33  ;;  %v1340_v40 = vadd.f32 %v1339_v43, %v1338_v21  ;;  %v1345_v10 = vsel %vm910_vm4, %v1300_v16, 0.0 }
 0x1f4   : > { %v18823_v56 = vpop.f32.mrb[1].mxu1  ;;  %26459 = vst [vmem:[#allocation40_spill] sm:$0xff] %v18840_v32  ;;  %v3750_v46 = vcombine.high %v3742_v35, %v3742_v35  ;;  %v18862_v2 = vrot.slane %v3742_v35, %v18540_v33  ;;  %v1240_v48 = vadd.f32 %v1239_v13, %v1238_v30  ;;  %v3637_v37 = vcombine.high %v18785_v1, %v18785_v1 }
 0x1f5   : > { %v18831_v51 = vpop.f32.mrb[2].mxu1  ;;  %26460 = vst [vmem:[#allocation39_spill] sm:$0xff] %v18859_v58  ;;  %v1341_v9 = vsel %vm910_vm4, %v1298_v0, 0.0  ;;  %v3644_v6 = vrot.slane %v18785_v1, %v18540_v33  ;;  %v18878_v43 = vrot.slane %v18859_v58, %v18540_v33 }
 0x1f6   : > { %v18845_v49 = vpop.f32.mrb[3].mxu1  ;;  %26461 = vst [vmem:[#allocation43_spill] sm:$0xff] %v18862_v2  ;;  %v18881_v30 = vrot.slane %v3750_v46, %v18540_v33  ;;  %v1342_v21 = vadd.f32 %v1341_v9, %v1340_v40  ;;  %v18886_v13 = vrot.slane %v3637_v37, %v18540_v33  ;;  %v1141_v46 = vadd.f32 %v18537_v50, %v18690_v60 }
 0x1f7   : > { %v18848_v23 = vpop.f32.mrb[24].mxu0  ;;  %26462 = vst [vmem:[#allocation42_spill] sm:$0xff] %v18878_v43  ;;  %v3652_v1 = vcombine.high %v3644_v6, %v3644_v6  ;;  %v18889_v52 = vrot.slane %v3644_v6, %v18540_v33  ;;  %v1149_v43 = vadd.f32 %v18686_v44, %v18537_v50  ;;  %v1162_v40 = vadd.f32 %v18730_v41, %v18537_v50 }
 0x1f8   : > { %v18856_v59 = vpop.f32.mrb[25].mxu0  ;;  %26463 = vst [vmem:[#allocation45_spill] sm:$0xff] %v18881_v30  ;;  %26464 = vst [vmem:[#allocation44_spill] sm:$0xff] %v18886_v13  ;;  %v18907_v37 = vrot.slane %v18886_v13, %v18540_v33  ;;  %v18914_v44 = vadd.f32 %v18537_v50, %v18733_v7  ;;  %v1299_v13 = vmul.f32 %v1141_v46, %v1141_v46 }
 0x1f9   : > { %v18864_v32 = vpop.f32.mrb[26].mxu0  ;;  %26465 = vst [vmem:[#allocation47_spill] sm:$0xff] %v18889_v52  ;;  %v18910_v35 = vrot.slane %v3652_v1, %v18540_v33  ;;  %v1301_v58 = vmul.f32 %v1149_v43, %v1149_v43  ;;  %v3784_v2 = vcombine.high %v1149_v43, %v1149_v43  ;;  %v3791_v6 = vrot.slane %v1149_v43, %v18540_v33 }
 0x1fa   : > { %v18871_v45 = vpop.f32.mrb[27].mxu0  ;;  %26466 = vst [vmem:[#allocation46_spill] sm:$0xff] %v18907_v37  ;;  %v1241_v37 = vsel %vm910_vm4, %v1141_v46, 0.0  ;;  %v3686_v1 = vcombine.high %v1141_v46, %v1141_v46  ;;  %v1245_v7 = vsel %vm910_vm4, %v1149_v43, 0.0  ;;  %v1343_v31 = vsel %vm910_vm4, %v1299_v13, 0.0 }
 0x1fb   : > { %v18883_v0 = vpop.f32.mrb[4].mxu1  ;;  %26467 = vst [vmem:[#allocation52_spill] sm:$0xff] %v18910_v35  ;;  %v3693_v35 = vrot.slane %v1141_v46, %v18540_v33  ;;  %v18929_v26 = vrot.slane %v3784_v2, %v18540_v33  ;;  %v3799_v41 = vcombine.high %v3791_v6, %v3791_v6  ;;  %v18932_v52 = vrot.slane %v3791_v6, %v18540_v33 }
 0x1fc   : > { %v18891_v16 = vpop.f32.mrb[5].mxu1  ;;  %v1242_v62 = vadd.f32 %v1241_v37, %v1240_v48  ;;  %v18938_v28 = vrot.slane %v3686_v1, %v18540_v33  ;;  %v1347_v43 = vsel %vm910_vm4, %v1301_v58, 0.0  ;;  %v1344_v37 = vadd.f32 %v1343_v31, %v1342_v21 }
 0x1fd   : > { %v18901_v9 = vpop.f32.mrb[6].mxu1  ;;  %26468 = vst [vmem:[#allocation51_spill] sm:$0xff] %v18929_v26  ;;  %26469 = vst [vmem:[#allocation53_spill] sm:$0xff] %v18932_v52  ;;  %v3701_v46 = vcombine.high %v3693_v35, %v3693_v35  ;;  %v18947_v6 = vrot.slane %v18929_v26, %v18540_v33  ;;  %v18950_v14 = vrot.slane %v3799_v41, %v18540_v33  ;;  %v1251_v41 = vsel %vm910_vm4, %v1162_v40, 0.0 }
 0x1fe   : > { %v18916_v60 = vpop.f32.mrb[7].mxu1  ;;  %26470 = vst [vmem:[#allocation54_spill] sm:$0xff] %v18938_v28  ;;  %v1244_v13 = vadd.f32 %v18843_v39, %v1242_v62  ;;  %v18956_v1 = vrot.slane %v3693_v35, %v18540_v33  ;;  %v18962_v2 = vrot.slane %v18938_v28, %v18540_v33  ;;  %v1346_v26 = vadd.f32 %v1345_v10, %v1344_v37 }
 0x1ff   : > { %v18921_v30 = vpop.f32.mrb[28].mxu0  ;;  %26471 = vst [vmem:[#allocation55_spill] sm:$0xff] %v18947_v6  ;;  %26472 = vst [vmem:[#allocation56_spill] sm:$0xff] %v18950_v14  ;;  %v18965_v6 = vrot.slane %v3701_v46, %v18540_v33  ;;  %v1304_v48 = vmul.f32 %v1162_v40, %v1162_v40  ;;  %v3931_v52 = vcombine.high %v1162_v40, %v1162_v40  ;;  %v1247_v35 = vsel %vm910_vm4, %v18914_v44, 0.0 }
 0x200   : > { %v18925_v8 = vpop.f32.mrb[29].mxu0  ;;  %26473 = vst [vmem:[#allocation57_spill] sm:$0xff] %v18956_v1  ;;  %26474 = vst [vmem:[#allocation58_spill] sm:$0xff] %v18962_v2  ;;  %v3938_v31 = vrot.slane %v1162_v40, %v18540_v33  ;;  %v1246_v39 = vadd.f32 %v1245_v7, %v1244_v13  ;;  %v1302_v21 = vmul.f32 %v18914_v44, %v18914_v44 }
 0x201   : > { %v18934_v42 = vpop.f32.mrb[30].mxu0  ;;  %26475 = vst [vmem:[#allocation59_spill] sm:$0xff] %v18965_v6  ;;  %v18980_v10 = vrot.slane %v3931_v52, %v18540_v33  ;;  %v1348_v14 = vadd.f32 %v1347_v43, %v1346_v26  ;;  %v3833_v28 = vcombine.high %v18914_v44, %v18914_v44  ;;  %v3840_v1 = vrot.slane %v18914_v44, %v18540_v33 }
 0x202   : > { %v18940_v25 = vpop.f32.mrb[31].mxu0  ;;  %v3946_v37 = vcombine.high %v3938_v31, %v3938_v31  ;;  %v18983_v40 = vrot.slane %v3938_v31, %v18540_v33  ;;  %v1248_v13 = vadd.f32 %v1247_v35, %v1246_v39  ;;  %v1349_v2 = vsel %vm910_vm4, %v1302_v21, 0.0 }
 0x203   : > { %26476 = vst [vmem:[#allocation60_spill] sm:$0xff] %v18980_v10  ;;  %v1353_v31 = vsel %vm910_vm4, %v1304_v48, 0.0  ;;  %v19003_v43 = vrot.slane %v18980_v10, %v18540_v33  ;;  %v1350_v21 = vadd.f32 %v1349_v2, %v1348_v14  ;;  %v19011_v44 = vrot.slane %v3833_v28, %v18540_v33 }
 0x204   : > { %26477 = vst [vmem:[#allocation61_spill] sm:$0xff] %v18983_v40  ;;  %v19006_v39 = vrot.slane %v3946_v37, %v18540_v33  ;;  %v3848_v63 = vcombine.high %v3840_v1, %v3840_v1  ;;  %v19014_v36 = vrot.slane %v3840_v1, %v18540_v33  ;;  %v1165_v26 = vadd.f32 %v18738_v17, %v18537_v50 }
 0x205   : > { %26478 = vst [vmem:[#allocation62_spill] sm:$0xff] %v19003_v43  ;;  %26480 = vst [vmem:[#allocation64_spill] sm:$0xff] %v19011_v44  ;;  %v1157_v37 = vadd.f32 %v18537_v50, %v18746_v38  ;;  %v1178_v43 = vadd.f32 %v18787_v3, %v18537_v50  ;;  %v19030_v2 = vrot.slane %v19011_v44, %v18540_v33 }
 0x206   : > { %26479 = vst [vmem:[#allocation63_spill] sm:$0xff] %v19006_v39  ;;  %26481 = vst [vmem:[#allocation65_spill] sm:$0xff] %v19014_v36  ;;  %v19033_v1 = vrot.slane %v3848_v63, %v18540_v33  ;;  %v1170_v17 = vadd.f32 %v18537_v50, %v18792_v47  ;;  %v1305_v48 = vmul.f32 %v1165_v26, %v1165_v26 }
 0x207   : > { %v18975_v58 = vpop.f32.mrb[8].mxu1  ;;  %v18977_v46 = vpop.f32.mrb[32].mxu0  ;;  %26482 = vst [vmem:[#allocation66_spill] sm:$0xff] %v19030_v2  ;;  %v3980_v3 = vcombine.high %v1165_v26, %v1165_v26  ;;  %v3987_v10 = vrot.slane %v1165_v26, %v18540_v33  ;;  %v1249_v40 = vsel %vm910_vm4, %v1157_v37, 0.0  ;;  %v1303_v28 = vmul.f32 %v1157_v37, %v1157_v37 }
 0x208   : > { %v18985_v62 = vpop.f32.mrb[9].mxu1  ;;  %v18987_v7 = vpop.f32.mrb[33].mxu0  ;;  %26483 = vst [vmem:[#allocation67_spill] sm:$0xff] %v19033_v1  ;;  %v3882_v39 = vcombine.high %v1157_v37, %v1157_v37  ;;  %v3889_v44 = vrot.slane %v1157_v37, %v18540_v33  ;;  %v1253_v2 = vsel %vm910_vm4, %v1165_v26, 0.0  ;;  %v1250_v38 = vadd.f32 %v1249_v40, %v1248_v13 }
 0x209   : > { %v18994_v52 = vpop.f32.mrb[10].mxu1  ;;  %v18996_v6 = vpop.f32.mrb[34].mxu0  ;;  %v19044_v63 = vrot.slane %v3980_v3, %v18540_v33  ;;  %v3995_v1 = vcombine.high %v3987_v10, %v3987_v10  ;;  %v19047_v47 = vrot.slane %v3987_v10, %v18540_v33  ;;  %v1351_v36 = vsel %vm910_vm4, %v1303_v28, 0.0 }
 0x20a   : > { %v19008_v35 = vpop.f32.mrb[11].mxu1  ;;  %v19024_v14 = vpop.f32.mrb[35].mxu0  ;;  %v19051_v15 = vrot.slane %v3882_v39, %v18540_v33  ;;  %v3897_v22 = vcombine.high %v3889_v44, %v3889_v44  ;;  %v1355_v20 = vsel %vm910_vm4, %v1305_v48, 0.0  ;;  %v1252_v40 = vadd.f32 %v1251_v41, %v1250_v38 }
 0x20b   : > { %26484 = vst [vmem:[#allocation68_spill] sm:$0xff] %v19044_v63  ;;  %26485 = vst [vmem:[#allocation69_spill] sm:$0xff] %v19047_v47  ;;  %v19058_v26 = vrot.slane %v19044_v63, %v18540_v33  ;;  %v19061_v3 = vrot.slane %v3995_v1, %v18540_v33  ;;  %v1352_v13 = vadd.f32 %v1351_v36, %v1350_v21  ;;  %v1259_v1 = vsel %vm910_vm4, %v1178_v43, 0.0 }
 0x20c   : > { %26486 = vst [vmem:[#allocation70_spill] sm:$0xff] %v19051_v15  ;;  %v19066_v39 = vrot.slane %v3889_v44, %v18540_v33  ;;  %v19072_v28 = vrot.slane %v19051_v15, %v18540_v33  ;;  %v19075_v37 = vrot.slane %v3897_v22, %v18540_v33  ;;  %v1308_v63 = vmul.f32 %v1178_v43, %v1178_v43 }
 0x20d   : > { %26487 = vst [vmem:[#allocation71_spill] sm:$0xff] %v19058_v26  ;;  %26488 = vst [vmem:[#allocation72_spill] sm:$0xff] %v19061_v3  ;;  %v1354_v26 = vadd.f32 %v1353_v31, %v1352_v13  ;;  %v4127_v10 = vcombine.high %v1178_v43, %v1178_v43  ;;  %v4134_v36 = vrot.slane %v1178_v43, %v18540_v33  ;;  %v1255_v44 = vsel %vm910_vm4, %v1170_v17, 0.0 }
 0x20e   : > { %26489 = vst [vmem:[#allocation73_spill] sm:$0xff] %v19066_v39  ;;  %26490 = vst [vmem:[#allocation74_spill] sm:$0xff] %v19072_v28  ;;  %v1254_v21 = vadd.f32 %v1253_v2, %v1252_v40  ;;  %v1306_v38 = vmul.f32 %v1170_v17, %v1170_v17  ;;  %v4029_v28 = vcombine.high %v1170_v17, %v1170_v17  ;;  %v1361_v41 = vsel %vm910_vm4, %v1308_v63, 0.0 }
 0x20f   : > { %26491 = vst [vmem:[#allocation75_spill] sm:$0xff] %v19075_v37  ;;  %v19083_v48 = vrot.slane %v4127_v10, %v18540_v33  ;;  %v4142_v47 = vcombine.high %v4134_v36, %v4134_v36  ;;  %v19086_v22 = vrot.slane %v4134_v36, %v18540_v33  ;;  %v1356_v3 = vadd.f32 %v1355_v20, %v1354_v26 }
 0x210   : > { %v1256_v31 = vadd.f32 %v1255_v44, %v1254_v21  ;;  %v1357_v13 = vsel %vm910_vm4, %v1306_v38, 0.0  ;;  %v4036_v43 = vrot.slane %v1170_v17, %v18540_v33  ;;  %v19101_v20 = vrot.slane %v4029_v28, %v18540_v33  ;;  %v19106_v17 = vpop.f32.mrb[36].mxu0 }
 0x211   : > { %26492 = vst [vmem:[#allocation76_spill] sm:$0xff] %v19083_v48  ;;  %26493 = vst [vmem:[#allocation77_spill] sm:$0xff] %v19086_v22  ;;  %v19095_v10 = vrot.slane %v19083_v48, %v18540_v33  ;;  %v19098_v40 = vrot.slane %v4142_v47, %v18540_v33  ;;  %v1358_v36 = vadd.f32 %v1357_v13, %v1356_v3  ;;  %v19116_v28 = vpop.f32.mrb[37].mxu0 }
 0x212   : > { %26496 = vst [vmem:[#allocation80_spill] sm:$0xff] %v19101_v20  ;;  %v4044_v26 = vcombine.high %v4036_v43, %v4036_v43  ;;  %v19104_v21 = vrot.slane %v4036_v43, %v18540_v33  ;;  %v1181_v44 = vadd.f32 %v18796_v54, %v18537_v50  ;;  %v1173_v47 = vadd.f32 %v18537_v50, %v18805_v19 }
 0x213   : > { %26494 = vst [vmem:[#allocation78_spill] sm:$0xff] %v19095_v10  ;;  %26495 = vst [vmem:[#allocation79_spill] sm:$0xff] %v19098_v40  ;;  %v1974_v3 = vadd.f32 %v18811_v27, %v18537_v50  ;;  %v19122_v13 = vrot.slane %v19101_v20, %v18540_v33  ;;  %v1966_v54 = vadd.f32 %v18537_v50, %v18823_v56 }
 0x214   : > { %26497 = vst [vmem:[#allocation81_spill] sm:$0xff] %v19104_v21  ;;  %v19125_v43 = vrot.slane %v4044_v26, %v18540_v33  ;;  %v1309_v2 = vmul.f32 %v1181_v44, %v1181_v44  ;;  %v4176_v27 = vcombine.high %v1181_v44, %v1181_v44  ;;  %v4183_v63 = vrot.slane %v1181_v44, %v18540_v33  ;;  %v19219_v21 = vpop.f32.mrb[12].mxu1 }
 0x215   : > { %26498 = vst [vmem:[#allocation82_spill] sm:$0xff] %v19122_v13  ;;  %v1257_v10 = vsel %vm910_vm4, %v1173_v47, 0.0  ;;  %v1307_v38 = vmul.f32 %v1173_v47, %v1173_v47  ;;  %v4078_v48 = vcombine.high %v1173_v47, %v1173_v47  ;;  %v4085_v22 = vrot.slane %v1173_v47, %v18540_v33  ;;  %26514 = vst [vmem:[#allocation98_spill] sm:$0xff] %v19219_v21 }
 0x216   : > { %26499 = vst [vmem:[#allocation83_spill] sm:$0xff] %v19125_v43  ;;  %v19135_v40 = vsel %vm910_vm4, %v1181_v44, 0.0  ;;  %v19138_v26 = vrot.slane %v4176_v27, %v18540_v33  ;;  %v4191_v56 = vcombine.high %v4183_v63, %v4183_v63  ;;  %v19141_v15 = vrot.slane %v4183_v63, %v18540_v33 }
 0x217   : > { %v1258_v19 = vadd.f32 %v1257_v10, %v1256_v31  ;;  %v1359_v13 = vsel %vm910_vm4, %v1307_v38, 0.0  ;;  %v19145_v20 = vrot.slane %v4078_v48, %v18540_v33  ;;  %v4093_v39 = vcombine.high %v4085_v22, %v4085_v22 }
 0x218   : > { %26500 = vst [vmem:[#allocation84_spill] sm:$0xff] %v19138_v26  ;;  %26501 = vst [vmem:[#allocation85_spill] sm:$0xff] %v19141_v15  ;;  %v19148_v37 = vsel %vm910_vm4, %v1309_v2, 0.0  ;;  %v19154_v47 = vrot.slane %v19138_v26, %v18540_v33  ;;  %v19157_v63 = vrot.slane %v4191_v56, %v18540_v33  ;;  %v1360_v48 = vadd.f32 %v1359_v13, %v1358_v36 }
 0x219   : > { %26502 = vst [vmem:[#allocation86_spill] sm:$0xff] %v19145_v20  ;;  %v19161_v10 = vadd.f32 %v1259_v1, %v1258_v19  ;;  %v19164_v38 = vrot.slane %v4085_v22, %v18540_v33  ;;  %v19170_v27 = vrot.slane %v19145_v20, %v18540_v33  ;;  %v19173_v44 = vrot.slane %v4093_v39, %v18540_v33 }
 0x21a   : > { %26503 = vst [vmem:[#allocation87_spill] sm:$0xff] %v19154_v47  ;;  %26504 = vst [vmem:[#allocation88_spill] sm:$0xff] %v19157_v63  ;;  %v2164_v56 = vmul.f32 %v1974_v3, %v1974_v3  ;;  %v19175_v47 = vadd.f32 %v1361_v41, %v1360_v48  ;;  %v2095_v1 = vsel %vm910_vm4, %v1974_v3, 0.0  ;;  %v5003_v19 = vcombine.high %v1974_v3, %v1974_v3 }
 0x21b   : > { %26505 = vst [vmem:[#allocation89_spill] sm:$0xff] %v19164_v38  ;;  %26506 = vst [vmem:[#allocation90_spill] sm:$0xff] %v19170_v27  ;;  %v5010_v36 = vrot.slane %v1974_v3, %v18540_v33  ;;  %v2162_v31 = vmul.f32 %v1966_v54, %v1966_v54  ;;  %v4905_v2 = vcombine.high %v1966_v54, %v1966_v54  ;;  %v2092_v48 = vsel %vm910_vm4, %v1966_v54, 0.0 }
 0x21c   : > { %26507 = vst [vmem:[#allocation91_spill] sm:$0xff] %v19173_v44  ;;  %v2197_v13 = vsel %vm910_vm4, %v2164_v56, 0.0  ;;  %v5017_v26 = vrot.slane %v5003_v19, %v18540_v33  ;;  %v4912_v41 = vrot.slane %v1966_v54, %v18540_v33  ;;  %v1977_v22 = vadd.f32 %v18831_v51, %v18537_v50  ;;  %v19192_v56 = vpop.f32.mrb[38].mxu0 }
 0x21d   : > { %v5018_v15 = vcombine.high %v5010_v36, %v5010_v36  ;;  %v19184_v39 = vrot.slane %v5010_v36, %v18540_v33  ;;  %v2194_v63 = vsel %vm910_vm4, %v2162_v31, 0.0  ;;  %v4919_v3 = vrot.slane %v4905_v2, %v18540_v33  ;;  %26509 = vst [vmem:[#allocation93_spill] sm:$0xff] %v19192_v56  ;;  %v19202_v54 = vpop.f32.mrb[39].mxu0 }
 0x21e   : > { %v5019_v27 = vcombine.high %v5017_v26, %v5017_v26  ;;  %v19195_v19 = vrot.slane %v5017_v26, %v18540_v33  ;;  %v1969_v20 = vadd.f32 %v18537_v50, %v18845_v49  ;;  %26512 = vst [vmem:[#allocation96_spill] sm:$0xff] %v19202_v54  ;;  %v4920_v2 = vcombine.high %v4912_v41, %v4912_v41 }
 0x21f   : > { %26508 = vst [vmem:[#allocation92_spill] sm:$0xff] %v19184_v39  ;;  %v19198_v36 = vrot.slane %v5018_v15, %v18540_v33  ;;  %v4921_v38 = vcombine.high %v4919_v3, %v4919_v3  ;;  %v19207_v51 = vrot.slane %v4912_v41, %v18540_v33  ;;  %v19217_v49 = vrot.slane %v4919_v3, %v18540_v33  ;;  %v19253_v39 = vpop.f32.mrb[13].mxu1 }
 0x220   : > { %26510 = vst [vmem:[#allocation94_spill] sm:$0xff] %v19195_v19  ;;  %v19210_v44 = vrot.slane %v5019_v27, %v18540_v33  ;;  %v19224_v41 = vrot.slane %v4920_v2, %v18540_v33  ;;  %v19236_v43 = vsel %vm910_vm4, %v1977_v22, 0.0  ;;  %v5052_v19 = vcombine.high %v1977_v22, %v1977_v22 }
 0x221   : > { %26511 = vst [vmem:[#allocation95_spill] sm:$0xff] %v19198_v36  ;;  %v19227_v27 = vrot.slane %v4921_v38, %v18540_v33  ;;  %v2165_v31 = vmul.f32 %v1977_v22, %v1977_v22  ;;  %v5059_v2 = vrot.slane %v1977_v22, %v18540_v33  ;;  %v2163_v38 = vmul.f32 %v1969_v20, %v1969_v20 }
 0x222   : > { %26513 = vst [vmem:[#allocation97_spill] sm:$0xff] %v19210_v44  ;;  %v2093_v44 = vsel %vm910_vm4, %v1969_v20, 0.0  ;;  %v5066_v15 = vrot.slane %v5052_v19, %v18540_v33  ;;  %v4954_v26 = vcombine.high %v1969_v20, %v1969_v20  ;;  %v4961_v21 = vrot.slane %v1969_v20, %v18540_v33 }
 0x223   : > { %v2094_v36 = vadd.f32 %v2093_v44, %v2092_v48  ;;  %v5067_v53 = vcombine.high %v5059_v2, %v5059_v2  ;;  %v19244_v3 = vrot.slane %v5059_v2, %v18540_v33  ;;  %v2195_v57 = vsel %vm910_vm4, %v2163_v38, 0.0 }
 0x224   : > { %v5068_v54 = vcombine.high %v5066_v15, %v5066_v15  ;;  %v19249_v22 = vrot.slane %v5066_v15, %v18540_v33  ;;  %v2196_v34 = vadd.f32 %v2195_v57, %v2194_v63  ;;  %v19256_v44 = vsel %vm910_vm4, %v2165_v31, 0.0 }
 0x225   : > { %26515 = vst [vmem:[#allocation99_spill] sm:$0xff] %v19244_v3  ;;  %v19251_v56 = vadd.f32 %v2095_v1, %v2094_v36  ;;  %v19259_v48 = vrot.slane %v5067_v53, %v18540_v33  ;;  %v4968_v20 = vrot.slane %v4954_v26, %v18540_v33  ;;  %v4969_v63 = vcombine.high %v4961_v21, %v4961_v21 }
 0x226   : > { %26516 = vst [vmem:[#allocation100_spill] sm:$0xff] %v19249_v22  ;;  %v19265_v2 = vrot.slane %v5068_v54, %v18540_v33  ;;  %v19269_v57 = vadd.f32 %v2197_v13, %v2196_v34  ;;  %v19274_v53 = vrot.slane %v4961_v21, %v18540_v33  ;;  %v1194_v54 = vadd.f32 %v18848_v23, %v18537_v50 }
 0x227   : > { %26517 = vst [vmem:[#allocation101_spill] sm:$0xff] %v19259_v48  ;;  %v4970_v31 = vcombine.high %v4968_v20, %v4968_v20  ;;  %v19277_v15 = vrot.slane %v4968_v20, %v18540_v33  ;;  %v19280_v26 = vrot.slane %v4969_v63, %v18540_v33  ;;  %v1186_v34 = vadd.f32 %v18537_v50, %v18856_v59 }
 0x228   : > { %26518 = vst [vmem:[#allocation102_spill] sm:$0xff] %v19265_v2  ;;  %v1262_v13 = vadd.f32 %v19135_v40, %v19161_v10  ;;  %v1312_v59 = vmul.f32 %v1194_v54, %v1194_v54  ;;  %v4323_v40 = vcombine.high %v1194_v54, %v1194_v54  ;;  %v4330_v10 = vrot.slane %v1194_v54, %v18540_v33 }
 0x229   : > { %v19291_v21 = vrot.slane %v4970_v31, %v18540_v33  ;;  %v1263_v36 = vsel %vm910_vm4, %v1186_v34, 0.0  ;;  %v1310_v31 = vmul.f32 %v1186_v34, %v1186_v34  ;;  %v1364_v1 = vadd.f32 %v19148_v37, %v19175_v47 }
 0x22a   : > { %v1267_v38 = vsel %vm910_vm4, %v1194_v54, 0.0  ;;  %v19307_v19 = vrot.slane %v4323_v40, %v18540_v33  ;;  %v1264_v63 = vadd.f32 %v1263_v36, %v1262_v13  ;;  %v4225_v23 = vcombine.high %v1186_v34, %v1186_v34 }
 0x22b   : > { %v4338_v20 = vcombine.high %v4330_v10, %v4330_v10  ;;  %v19310_v50 = vrot.slane %v4330_v10, %v18540_v33  ;;  %v1365_v22 = vsel %vm910_vm4, %v1310_v31, 0.0  ;;  %v4232_v2 = vrot.slane %v1186_v34, %v18540_v33 }
 0x22c   : > { %26519 = vst [vmem:[#allocation103_spill] sm:$0xff] %v19307_v19  ;;  %v1369_v3 = vsel %vm910_vm4, %v1312_v59, 0.0  ;;  %v1366_v47 = vadd.f32 %v1365_v22, %v1364_v1  ;;  %v19318_v54 = vrot.slane %v4225_v23, %v18540_v33  ;;  %v19322_v36 = vrot.slane %v19307_v19, %v18540_v33  ;;  %v19337_v1 = vld [vmem:[%s25548_s2] ss:$0 sm:$0xff] }
 0x22d   : > { %26520 = vst [vmem:[#allocation104_spill] sm:$0xff] %v19310_v50  ;;  %v19325_v13 = vrot.slane %v4338_v20, %v18540_v33  ;;  %v4240_v40 = vcombine.high %v4232_v2, %v4232_v2  ;;  %v19328_v10 = vrot.slane %v4232_v2, %v18540_v33  ;;  %v1197_v23 = vadd.f32 %v19337_v1, %v18864_v32 }
 0x22e   : > { %26521 = vst [vmem:[#allocation105_spill] sm:$0xff] %v19318_v54  ;;  %26522 = vst [vmem:[#allocation106_spill] sm:$0xff] %v19322_v36  ;;  %v1189_v20 = vadd.f32 %v19337_v1, %v18871_v45  ;;  %v19345_v2 = vrot.slane %v19318_v54, %v18540_v33  ;;  %v1990_v37 = vadd.f32 %v19337_v1, %v18883_v0  ;;  %v19368_v54 = vpop.f32.mrb[14].mxu1 }
 0x22f   : > { %26523 = vst [vmem:[#allocation107_spill] sm:$0xff] %v19325_v13  ;;  %26524 = vst [vmem:[#allocation108_spill] sm:$0xff] %v19328_v10  ;;  %v19348_v59 = vrot.slane %v4240_v40, %v18540_v33  ;;  %v1313_v34 = vmul.f32 %v1197_v23, %v1197_v23  ;;  %v4372_v22 = vcombine.high %v1197_v23, %v1197_v23  ;;  %v19360_v13 = vsel %vm910_vm4, %v1197_v23, 0.0 }
 0x230   : > { %26525 = vst [vmem:[#allocation109_spill] sm:$0xff] %v19345_v2  ;;  %v4379_v32 = vrot.slane %v1197_v23, %v18540_v33  ;;  %v1982_v45 = vadd.f32 %v19337_v1, %v18891_v16  ;;  %v1265_v36 = vsel %vm910_vm4, %v1189_v20, 0.0  ;;  %v1311_v19 = vmul.f32 %v1189_v20, %v1189_v20  ;;  %26529 = vst [vmem:[#allocation113_spill] sm:$0xff] %v19368_v54 }
 0x231   : > { %26526 = vst [vmem:[#allocation110_spill] sm:$0xff] %v19348_v59  ;;  %v4274_v50 = vcombine.high %v1189_v20, %v1189_v20  ;;  %v4281_v40 = vrot.slane %v1189_v20, %v18540_v33  ;;  %v19363_v31 = vrot.slane %v4372_v22, %v18540_v33  ;;  %v1266_v10 = vadd.f32 %v1265_v36, %v1264_v63  ;;  %v19374_v20 = vpop.f32.mrb[15].mxu1 }
 0x232   : > { %v4387_v0 = vcombine.high %v4379_v32, %v4379_v32  ;;  %v19366_v2 = vrot.slane %v4379_v32, %v18540_v33  ;;  %v1367_v16 = vsel %vm910_vm4, %v1311_v19, 0.0  ;;  %26531 = vst [vmem:[#allocation115_spill] sm:$0xff] %v19374_v20  ;;  %v19377_v23 = vsel %vm910_vm4, %v1313_v34, 0.0 }
 0x233   : > { %26527 = vst [vmem:[#allocation111_spill] sm:$0xff] %v19363_v31  ;;  %v19372_v59 = vrot.slane %v4274_v50, %v18540_v33  ;;  %v4289_v48 = vcombine.high %v4281_v40, %v4281_v40  ;;  %v19383_v32 = vrot.slane %v19363_v31, %v18540_v33  ;;  %v19390_v50 = vadd.f32 %v1267_v38, %v1266_v10 }
 0x234   : > { %26528 = vst [vmem:[#allocation112_spill] sm:$0xff] %v19366_v2  ;;  %v19386_v63 = vrot.slane %v4387_v0, %v18540_v33  ;;  %v1368_v36 = vadd.f32 %v1367_v16, %v1366_v47  ;;  %v19393_v20 = vrot.slane %v4281_v40, %v18540_v33  ;;  %v2103_v0 = vsel %vm910_vm4, %v1990_v37, 0.0  ;;  %v19408_v40 = vpop.f32.mrb[40].mxu0 }
 0x235   : > { %26530 = vst [vmem:[#allocation114_spill] sm:$0xff] %v19372_v59  ;;  %26532 = vst [vmem:[#allocation116_spill] sm:$0xff] %v19383_v32  ;;  %v19399_v22 = vrot.slane %v19372_v59, %v18540_v33  ;;  %v19402_v32 = vrot.slane %v4289_v48, %v18540_v33  ;;  %v2168_v38 = vmul.f32 %v1990_v37, %v1990_v37  ;;  %v2099_v34 = vsel %vm910_vm4, %v1982_v45, 0.0 }
 0x236   : > { %26533 = vst [vmem:[#allocation117_spill] sm:$0xff] %v19386_v63  ;;  %26534 = vst [vmem:[#allocation118_spill] sm:$0xff] %v19393_v20  ;;  %v19405_v31 = vadd.f32 %v1369_v3, %v1368_v36  ;;  %v5199_v10 = vcombine.high %v1990_v37, %v1990_v37  ;;  %v5206_v47 = vrot.slane %v1990_v37, %v18540_v33 }
 0x237   : > { %26535 = vst [vmem:[#allocation119_spill] sm:$0xff] %v19399_v22  ;;  %26536 = vst [vmem:[#allocation120_spill] sm:$0xff] %v19402_v32  ;;  %v2098_v19 = vadd.f32 %v19236_v43, %v19251_v56  ;;  %v2166_v48 = vmul.f32 %v1982_v45, %v1982_v45  ;;  %v2200_v37 = vadd.f32 %v19256_v44, %v19269_v57  ;;  %v2205_v43 = vsel %vm910_vm4, %v2168_v38, 0.0 }
 0x238   : > { %26537 = vst [vmem:[#allocation121_spill] sm:$0xff] %v19408_v40  ;;  %v5213_v2 = vrot.slane %v5199_v10, %v18540_v33  ;;  %v5214_v63 = vcombine.high %v5206_v47, %v5206_v47  ;;  %v19417_v3 = vrot.slane %v5206_v47, %v18540_v33  ;;  %v5101_v59 = vcombine.high %v1982_v45, %v1982_v45 }
 0x239   : > { %v2100_v36 = vadd.f32 %v2099_v34, %v2098_v19  ;;  %v2201_v22 = vsel %vm910_vm4, %v2166_v48, 0.0  ;;  %v5108_v16 = vrot.slane %v1982_v45, %v18540_v33  ;;  %v19433_v19 = vpop.f32.mrb[41].mxu0  ;;  %v1993_v48 = vadd.f32 %v19337_v1, %v18901_v9 }
 0x23a   : > { %26538 = vst [vmem:[#allocation122_spill] sm:$0xff] %v19417_v3  ;;  %v5215_v56 = vcombine.high %v5213_v2, %v5213_v2  ;;  %v19425_v20 = vrot.slane %v5213_v2, %v18540_v33  ;;  %v19428_v10 = vrot.slane %v5214_v63, %v18540_v33  ;;  %v2202_v32 = vadd.f32 %v2201_v22, %v2200_v37  ;;  %v19508_v54 = vpop.f32.mrb[42].mxu0 }
 0x23b   : > { %v5115_v44 = vrot.slane %v5101_v59, %v18540_v33  ;;  %v5116_v57 = vcombine.high %v5108_v16, %v5108_v16  ;;  %26541 = vst [vmem:[#allocation125_spill] sm:$0xff] %v19433_v19  ;;  %v19443_v63 = vrot.slane %v5108_v16, %v18540_v33  ;;  %v1985_v34 = vadd.f32 %v19337_v1, %v18916_v60 }
 0x23c   : > { %26539 = vst [vmem:[#allocation123_spill] sm:$0xff] %v19425_v20  ;;  %26540 = vst [vmem:[#allocation124_spill] sm:$0xff] %v19428_v10  ;;  %v19436_v45 = vrot.slane %v5215_v56, %v18540_v33  ;;  %v1210_v2 = vadd.f32 %v19337_v1, %v18921_v30  ;;  %v2169_v37 = vmul.f32 %v1993_v48, %v1993_v48  ;;  %v19474_v3 = vsel %vm910_vm4, %v1993_v48, 0.0 }
 0x23d   : > { %v5117_v38 = vcombine.high %v5115_v44, %v5115_v44  ;;  %v19446_v22 = vrot.slane %v5115_v44, %v18540_v33  ;;  %v19449_v59 = vrot.slane %v5116_v57, %v18540_v33  ;;  %v5248_v47 = vcombine.high %v1993_v48, %v1993_v48 }
 0x23e   : > { %26542 = vst [vmem:[#allocation126_spill] sm:$0xff] %v19436_v45  ;;  %v5255_v56 = vrot.slane %v1993_v48, %v18540_v33  ;;  %v2101_v16 = vsel %vm910_vm4, %v1985_v34, 0.0  ;;  %v2167_v60 = vmul.f32 %v1985_v34, %v1985_v34  ;;  %v5150_v45 = vcombine.high %v1985_v34, %v1985_v34 }
 0x23f   : > { %v19462_v44 = vrot.slane %v5117_v38, %v18540_v33  ;;  %v2102_v20 = vadd.f32 %v2101_v16, %v2100_v36  ;;  %v5157_v38 = vrot.slane %v1985_v34, %v18540_v33  ;;  %v5262_v57 = vrot.slane %v5248_v47, %v18540_v33 }
 0x240   : > { %v5263_v9 = vcombine.high %v5255_v56, %v5255_v56  ;;  %v19478_v10 = vrot.slane %v5255_v56, %v18540_v33  ;;  %v2203_v19 = vsel %vm910_vm4, %v2167_v60, 0.0  ;;  %v5164_v40 = vrot.slane %v5150_v45, %v18540_v33 }
 0x241   : > { %v19480_v30 = vadd.f32 %v2103_v0, %v2102_v20  ;;  %v5165_v36 = vcombine.high %v5157_v38, %v5157_v38  ;;  %v19485_v16 = vsel %vm910_vm4, %v2169_v37, 0.0  ;;  %v5264_v34 = vcombine.high %v5262_v57, %v5262_v57  ;;  %v19520_v37 = vpop.f32.mrb[43].mxu0 }
 0x242   : > { %26543 = vst [vmem:[#allocation127_spill] sm:$0xff] %v19478_v10  ;;  %v19488_v48 = vrot.slane %v5262_v57, %v18540_v33  ;;  %v19491_v47 = vrot.slane %v5263_v9, %v18540_v33  ;;  %v2204_v20 = vadd.f32 %v2203_v19, %v2202_v32  ;;  %v5166_v0 = vcombine.high %v5164_v40, %v5164_v40 }
 0x243   : > { %v19496_v60 = vrot.slane %v5157_v38, %v18540_v33  ;;  %v19499_v45 = vrot.slane %v5264_v34, %v18540_v33  ;;  %v19506_v9 = vrot.slane %v5164_v40, %v18540_v33  ;;  %v19515_v38 = vrot.slane %v5165_v36, %v18540_v33 }
 0x244   : > { %26544 = vst [vmem:[#allocation128_spill] sm:$0xff] %v19488_v48  ;;  %26545 = vst [vmem:[#allocation129_spill] sm:$0xff] %v19491_v47  ;;  %v19512_v19 = vadd.f32 %v2205_v43, %v2204_v20  ;;  %v19518_v34 = vrot.slane %v5166_v0, %v18540_v33  ;;  %v1275_v43 = vsel %vm910_vm4, %v1210_v2, 0.0  ;;  %v1316_v20 = vmul.f32 %v1210_v2, %v1210_v2 }
 0x245   : > { %26546 = vst [vmem:[#allocation130_spill] sm:$0xff] %v19499_v45  ;;  %26547 = vst [vmem:[#allocation131_spill] sm:$0xff] %v19506_v9  ;;  %v4519_v32 = vcombine.high %v1210_v2, %v1210_v2  ;;  %v4526_v36 = vrot.slane %v1210_v2, %v18540_v33  ;;  %v1202_v0 = vadd.f32 %v19337_v1, %v18925_v8 }
 0x246   : > { %26548 = vst [vmem:[#allocation132_spill] sm:$0xff] %v19518_v34  ;;  %v1270_v57 = vadd.f32 %v19360_v13, %v19390_v50  ;;  %v1372_v40 = vadd.f32 %v19377_v23, %v19405_v31  ;;  %v1213_v56 = vadd.f32 %v19337_v1, %v18934_v42  ;;  %v1377_v50 = vsel %vm910_vm4, %v1316_v20, 0.0 }
 0x247   : > { %v19541_v45 = vrot.slane %v4519_v32, %v18540_v33  ;;  %v4534_v10 = vcombine.high %v4526_v36, %v4526_v36  ;;  %v19544_v2 = vrot.slane %v4526_v36, %v18540_v33  ;;  %v1271_v8 = vsel %vm910_vm4, %v1202_v0, 0.0 }
 0x248   : > { %v1272_v47 = vadd.f32 %v1271_v8, %v1270_v57  ;;  %v1314_v48 = vmul.f32 %v1202_v0, %v1202_v0  ;;  %v4421_v9 = vcombine.high %v1202_v0, %v1202_v0  ;;  %v4428_v13 = vrot.slane %v1202_v0, %v18540_v33 }
 0x249   : > { %26549 = vst [vmem:[#allocation133_spill] sm:$0xff] %v19541_v45  ;;  %26550 = vst [vmem:[#allocation134_spill] sm:$0xff] %v19544_v2  ;;  %v19553_v42 = vrot.slane %v19541_v45, %v18540_v33  ;;  %v19556_v23 = vrot.slane %v4534_v10, %v18540_v33  ;;  %v1317_v31 = vmul.f32 %v1213_v56, %v1213_v56 }
 0x24a   : > { %v1373_v32 = vsel %vm910_vm4, %v1314_v48, 0.0  ;;  %v19560_v57 = vrot.slane %v4421_v9, %v18540_v33  ;;  %v4436_v36 = vcombine.high %v4428_v13, %v4428_v13  ;;  %v19563_v0 = vrot.slane %v4428_v13, %v18540_v33  ;;  %v19594_v13 = vpop.f32.mrb[16].mxu1 }
 0x24b   : > { %26551 = vst [vmem:[#allocation135_spill] sm:$0xff] %v19553_v42  ;;  %26552 = vst [vmem:[#allocation136_spill] sm:$0xff] %v19556_v23  ;;  %v1374_v8 = vadd.f32 %v1373_v32, %v1372_v40  ;;  %v4568_v34 = vcombine.high %v1213_v56, %v1213_v56  ;;  %v1277_v9 = vsel %vm910_vm4, %v1213_v56, 0.0  ;;  %v4575_v20 = vrot.slane %v1213_v56, %v18540_v33 }
 0x24c   : > { %26553 = vst [vmem:[#allocation137_spill] sm:$0xff] %v19560_v57  ;;  %26554 = vst [vmem:[#allocation138_spill] sm:$0xff] %v19563_v0  ;;  %v19571_v10 = vrot.slane %v19560_v57, %v18540_v33  ;;  %v19574_v48 = vrot.slane %v4436_v36, %v18540_v33  ;;  %v1205_v32 = vadd.f32 %v19337_v1, %v18940_v25  ;;  %v1379_v42 = vsel %vm910_vm4, %v1317_v31, 0.0 }
 0x24d   : > { %v19581_v40 = vrot.slane %v4568_v34, %v18540_v33  ;;  %v2006_v45 = vadd.f32 %v19337_v1, %v18975_v58  ;;  %v2352_v36 = vadd.f32 %v19337_v1, %v18977_v46  ;;  %v19592_v2 = vadd.f32 %v19474_v3, %v19480_v30  ;;  %26558 = vst [vmem:[#allocation142_spill] sm:$0xff] %v19594_v13  ;;  %v19605_v58 = vpop.f32.mrb[44].mxu0 }
 0x24e   : > { %26555 = vst [vmem:[#allocation139_spill] sm:$0xff] %v19571_v10  ;;  %26556 = vst [vmem:[#allocation140_spill] sm:$0xff] %v19574_v48  ;;  %v4583_v56 = vcombine.high %v4575_v20, %v4575_v20  ;;  %v19599_v25 = vrot.slane %v4575_v20, %v18540_v33  ;;  %v19603_v31 = vadd.f32 %v19337_v1, %v18985_v62  ;;  %v1273_v46 = vsel %vm910_vm4, %v1205_v32, 0.0  ;;  %v19609_v10 = vpop.f32.mrb[17].mxu1 }
 0x24f   : > { %26557 = vst [vmem:[#allocation141_spill] sm:$0xff] %v19581_v40  ;;  %26560 = vst [vmem:[#allocation144_spill] sm:$0xff] %v19605_v58  ;;  %v1315_v23 = vmul.f32 %v1205_v32, %v1205_v32  ;;  %v4470_v3 = vcombine.high %v1205_v32, %v1205_v32  ;;  %v4477_v30 = vrot.slane %v1205_v32, %v18540_v33 }
 0x250   : > { %26559 = vst [vmem:[#allocation143_spill] sm:$0xff] %v19599_v25  ;;  %26561 = vst [vmem:[#allocation145_spill] sm:$0xff] %v19609_v10  ;;  %v19613_v34 = vrot.slane %v19581_v40, %v18540_v33  ;;  %v19616_v20 = vrot.slane %v4583_v56, %v18540_v33  ;;  %v1274_v57 = vadd.f32 %v1273_v46, %v1272_v47 }
 0x251   : > { %v1375_v0 = vsel %vm910_vm4, %v1315_v23, 0.0  ;;  %v19622_v48 = vrot.slane %v4470_v3, %v18540_v33  ;;  %v4485_v58 = vcombine.high %v4477_v30, %v4477_v30  ;;  %v19625_v32 = vrot.slane %v4477_v30, %v18540_v33 }
 0x252   : > { %26562 = vst [vmem:[#allocation146_spill] sm:$0xff] %v19613_v34  ;;  %26563 = vst [vmem:[#allocation147_spill] sm:$0xff] %v19616_v20  ;;  %v1276_v10 = vadd.f32 %v1275_v43, %v1274_v57  ;;  %v1376_v13 = vadd.f32 %v1375_v0, %v1374_v8  ;;  %v2172_v40 = vmul.f32 %v2006_v45, %v2006_v45  ;;  %v19637_v23 = vsel %vm910_vm4, %v2006_v45, 0.0 }
 0x253   : > { %26564 = vst [vmem:[#allocation148_spill] sm:$0xff] %v19622_v48  ;;  %26565 = vst [vmem:[#allocation149_spill] sm:$0xff] %v19625_v32  ;;  %v5395_v34 = vcombine.high %v2006_v45, %v2006_v45  ;;  %v19631_v62 = vrot.slane %v19622_v48, %v18540_v33  ;;  %v19634_v47 = vrot.slane %v4485_v58, %v18540_v33 }
 0x254   : > { %v1278_v46 = vadd.f32 %v1277_v9, %v1276_v10  ;;  %v1378_v3 = vadd.f32 %v1377_v50, %v1376_v13  ;;  %v5402_v57 = vrot.slane %v2006_v45, %v18540_v33  ;;  %v19643_v0 = vsel %vm910_vm4, %v2172_v40, 0.0  ;;  %v19649_v10 = vpop.f32.mrb[45].mxu0 }
 0x255   : > { %26566 = vst [vmem:[#allocation150_spill] sm:$0xff] %v19631_v62  ;;  %26567 = vst [vmem:[#allocation151_spill] sm:$0xff] %v19634_v47  ;;  %v5409_v8 = vrot.slane %v5395_v34, %v18540_v33  ;;  %v2542_v30 = vmul.f32 %v2352_v36, %v2352_v36  ;;  %v8140_v56 = vcombine.high %v2352_v36, %v2352_v36  ;;  %v19655_v45 = vsel %vm910_vm4, %v2352_v36, 0.0 }
 0x256   : > { %v1279_v25 = vrot.slane %v1278_v46, 4  ;;  %v1380_v58 = vadd.f32 %v1379_v42, %v1378_v3  ;;  %v5410_v20 = vcombine.high %v5402_v57, %v5402_v57  ;;  %v19647_v62 = vrot.slane %v5402_v57, %v18540_v33 }
 0x257   : > { %v5411_v50 = vcombine.high %v5409_v8, %v5409_v8  ;;  %v19652_v9 = vrot.slane %v5409_v8, %v18540_v33  ;;  %v8147_v13 = vrot.slane %v2352_v36, %v18540_v33  ;;  %v19662_v42 = vsel %vm910_vm4, %v2542_v30, 0.0  ;;  %v19674_v36 = vpop.f32.mrb[18].mxu1 }
 0x258   : > { %26568 = vst [vmem:[#allocation152_spill] sm:$0xff] %v19647_v62  ;;  %v1280_v40 = vadd.f32 %v1279_v25, %v1278_v46  ;;  %v1381_v34 = vrot.slane %v1380_v58, 4  ;;  %v19659_v43 = vrot.slane %v5410_v20, %v18540_v33  ;;  %v19672_v48 = vrot.slane %v8140_v56, %v18540_v33  ;;  %v19715_v62 = vpop.f32.mrb[19].mxu1 }
 0x259   : > { %26569 = vst [vmem:[#allocation153_spill] sm:$0xff] %v19652_v9  ;;  %v19665_v3 = vrot.slane %v5411_v50, %v18540_v33  ;;  %v8155_v30 = vcombine.high %v8147_v13, %v8147_v13  ;;  %v19683_v32 = vrot.slane %v8147_v13, %v18540_v33  ;;  %v2107_v56 = vsel %vm910_vm4, %v19603_v31, 0.0 }
 0x25a   : > { %26570 = vst [vmem:[#allocation154_spill] sm:$0xff] %v19659_v43  ;;  %26572 = vst [vmem:[#allocation156_spill] sm:$0xff] %v19672_v48  ;;  %v1281_v25 = vrot.slane %v1280_v40, 2  ;;  %v1382_v20 = vadd.f32 %v1381_v34, %v1380_v58  ;;  %v19689_v58 = vrot.slane %v19672_v48, %v18540_v33  ;;  %v19692_v34 = vadd.f32 %v2107_v56, %v19592_v2  ;;  %v19707_v56 = vpop.f32.mrb[46].mxu0 }
 0x25b   : > { %26571 = vst [vmem:[#allocation155_spill] sm:$0xff] %v19665_v3  ;;  %26573 = vst [vmem:[#allocation157_spill] sm:$0xff] %v19683_v32  ;;  %v19695_v46 = vrot.slane %v8155_v30, %v18540_v33  ;;  %v2170_v50 = vmul.f32 %v19603_v31, %v19603_v31  ;;  %v2208_v13 = vadd.f32 %v19485_v16, %v19512_v19 }
 0x25c   : > { %v1282_v8 = vadd.f32 %v1281_v25, %v1280_v40  ;;  %v1383_v47 = vrot.slane %v1382_v20, 2  ;;  %26574 = vst [vmem:[#allocation158_spill] sm:$0xff] %v19689_v58  ;;  %v5297_v40 = vcombine.high %v19603_v31, %v19603_v31  ;;  %v5304_v9 = vrot.slane %v19603_v31, %v18540_v33 }
 0x25d   : > { %26575 = vst [vmem:[#allocation159_spill] sm:$0xff] %v19695_v46  ;;  %v2344_v2 = vadd.f32 %v19337_v1, %v18987_v7  ;;  %v2209_v3 = vsel %vm910_vm4, %v2170_v50, 0.0  ;;  %v6480_v19 = vrot.slane %v19224_v41, %v18559_v11  ;;  %v26576_v7 = vcombine.high %v19207_v51, %v19207_v51 }
 0x25e   : > { %v1283_v25 = vrot.slane %v1282_v8, 1  ;;  %v1384_v57 = vadd.f32 %v1383_v47, %v1382_v20  ;;  %v5311_v16 = vrot.slane %v5297_v40, %v18540_v33  ;;  %v19717_v20 = vadd.f32 %v2209_v3, %v2208_v13 }
 0x25f   : > { %v5312_v31 = vcombine.high %v5304_v9, %v5304_v9  ;;  %v6484_v43 = vrot.slane %v26576_v7, %v18559_v11  ;;  %v19726_v50 = vrot.slane %v5304_v9, %v18540_v33  ;;  %v19735_v3 = vsel %vm910_vm4, %v2344_v2, 0.0 }
 0x260   : > { %v1385_v47 = vrot.slane %v1384_v57, 1  ;;  %v19723_v58 = vadd.f32 %v1283_v25, %v1282_v8  ;;  %v5313_v30 = vcombine.high %v5311_v16, %v5311_v16  ;;  %v19729_v40 = vrot.slane %v5311_v16, %v18540_v33 }
 0x261   : > { %26578 = vst [vmem:[#allocation161_spill] sm:$0xff] %v19726_v50  ;;  %v19732_v48 = vrot.slane %v5312_v31, %v18540_v33  ;;  %v2540_v13 = vmul.f32 %v2344_v2, %v2344_v2  ;;  %v8042_v32 = vcombine.high %v2344_v2, %v2344_v2  ;;  %v8049_v7 = vrot.slane %v2344_v2, %v18540_v33 }
 0x262   : > { %26577 = vst [vmem:[#allocation160_spill] sm:$0xff] %v19723_v58  ;;  %26579 = vst [vmem:[#allocation162_spill] sm:$0xff] %v19729_v40  ;;  %v19737_v46 = vadd.f32 %v1385_v47, %v1384_v57  ;;  %v19740_v8 = vrot.slane %v5313_v30, %v18540_v33  ;;  %v26584_v47 = vcombine.high %v19224_v41, %v19224_v41 }
 0x263   : > { %26580 = vst [vmem:[#allocation163_spill] sm:$0xff] %v19732_v48  ;;  %v19752_v57 = vrot.slane %v8042_v32, %v18540_v33  ;;  %v19755_v30 = vsel %vm910_vm4, %v2540_v13, 0.0  ;;  %v2009_v25 = vadd.f32 %v19337_v1, %v18994_v52  ;;  %v8057_v16 = vcombine.high %v8049_v7, %v8049_v7  ;;  %v19768_v32 = vpop.f32.mrb[47].mxu0 }
 0x264   : > { %26581 = vst [vmem:[#allocation164_spill] sm:$0xff] %v19737_v46  ;;  %26582 = vst [vmem:[#allocation165_spill] sm:$0xff] %v19740_v8  ;;  %v6488_v9 = vrot.slane %v26584_v47, %v18559_v11  ;;  %v19766_v2 = vrot.slane %v8049_v7, %v18540_v33  ;;  %v26586_v13 = vrot.slane %v19207_v51, %v18559_v11 }
 0x265   : > { %26583 = vst [vmem:[#allocation166_spill] sm:$0xff] %v19752_v57  ;;  %v7755_v47 = vsel %vm7753_vm7, %v18575_v24, %v6480_v19  ;;  %v26587_v52 = vcombine.high %v18556_v4, %v18556_v4  ;;  %v26588_v7 = vcombine.high %v18575_v24, %v18575_v24  ;;  %v19787_v8 = vrot.slane %v19752_v57, %v18540_v33 }
 0x266   : > { %26585 = vst [vmem:[#allocation167_spill] sm:$0xff] %v19766_v2  ;;  %v7754_v41 = vsel %vm7753_vm7, %v18556_v4, %v26586_v13  ;;  %v19790_v51 = vrot.slane %v8057_v16, %v18540_v33  ;;  %v17051_v4 = vmov 1983009808   ;;  %v19795_v24 = vsel %vm910_vm4, %v2009_v25, 0.0 }
 0x267   : > { %v7756_v40 = vsel %vm7753_vm7, %v26587_v52, %v6484_v43  ;;  %v7757_v31 = vsel %vm7753_vm7, %v26588_v7, %v6488_v9  ;;  %26589 = vst [vmem:[#allocation168_spill] sm:$0xff] %v19787_v8  ;;  %v13514_v13 = vcombine.low %v7754_v41, %v7755_v47  ;;  %v13517_v48 = vunpack.c.l.s4 %v17051_v4  ;;  %v19808_v4 = vpop.f32.mrb[48].mxu0 }
 0x268   : > { %26590 = vst [vmem:[#allocation169_spill] sm:$0xff] %v19790_v51  ;;  %v13515_v50 = vcombine.low %v7756_v40, %v7757_v31  ;;  %v2173_v43 = vmul.f32 %v2009_v25, %v2009_v25  ;;  %v5444_v52 = vcombine.high %v2009_v25, %v2009_v25  ;;  %v5451_v9 = vrot.slane %v2009_v25, %v18540_v33 }
 0x269   : > { %v2355_v7 = vadd.f32 %v19337_v1, %v18996_v6  ;;  %v2001_v16 = vadd.f32 %v19337_v1, %v19008_v35  ;;  %v13518_v41 = vunpack.c.0.s8 %v13517_v48  ;;  %v2347_v47 = vadd.f32 %v19337_v1, %v19024_v14  ;;  %v19819_v48 = vpop.f32.mrb[49].mxu0 }
 0x26a   : > { %v19803_v40 = vsel %vm910_vm4, %v2173_v43, 0.0  ;;  %v5458_v31 = vrot.slane %v5444_v52, %v18540_v33  ;;  %v5459_v19 = vcombine.high %v5451_v9, %v5451_v9  ;;  %v19811_v25 = vrot.slane %v5451_v9, %v18540_v33 }
 0x26b   : > { %v2543_v8 = vmul.f32 %v2355_v7, %v2355_v7  ;;  %v26592_v6 = vcombine.high %v18553_v55, %v18553_v55  ;;  %v19822_v43 = vsub.s32 %v13518_v41, %v18532_v5  ;;  %v8189_v57 = vcombine.high %v2355_v7, %v2355_v7 }
 0x26c   : > { %26591 = vst [vmem:[#allocation170_spill] sm:$0xff] %v19811_v25  ;;  %v5460_v52 = vcombine.high %v5458_v31, %v5458_v31  ;;  %v19825_v14 = vrot.slane %v5458_v31, %v18540_v33  ;;  %v19828_v9 = vrot.slane %v5459_v19, %v18540_v33  ;;  %v8196_v2 = vrot.slane %v2355_v7, %v18540_v33 }
 0x26d   : > { %v19817_v35 = vrot.slane %v26592_v6, %v18540_v33  ;;  %v19835_v6 = vsel %vm910_vm4, %v2355_v7, 0.0  ;;  %v13522_v5 = vrot.slane %v13514_v13, %v19822_v43  ;;  %v13529_v41 = vrot.slane %v13515_v50, %v19822_v43  ;;  %v19860_v7 = vpop.f32.mrb[50].mxu0 }
 0x26e   : > { %26593 = vst [vmem:[#allocation171_spill] sm:$0xff] %v19825_v14  ;;  %26594 = vst [vmem:[#allocation172_spill] sm:$0xff] %v19828_v9  ;;  %v19840_v31 = vrot.slane %v5460_v52, %v18540_v33  ;;  %v19843_v51 = vsel %vm910_vm4, %v2543_v8, 0.0  ;;  %v19849_v55 = vrot.slane %v8189_v57, %v18540_v33  ;;  %v2109_v25 = vsel %vm910_vm4, %v2001_v16, 0.0 }
 0x26f   : > { %v13530_v46 = vcombine.low %v13522_v5, %v13529_v41  ;;  %v2110_v13 = vadd.f32 %v2109_v25, %v19692_v34  ;;  %v2171_v50 = vmul.f32 %v2001_v16, %v2001_v16  ;;  %v5346_v58 = vcombine.high %v2001_v16, %v2001_v16 }
 0x270   : > { %26595 = vst [vmem:[#allocation173_spill] sm:$0xff] %v19840_v31  ;;  %26596 = vst [vmem:[#allocation174_spill] sm:$0xff] %v19849_v55  ;;  %v8204_v8 = vcombine.high %v8196_v2, %v8196_v2  ;;  %v19858_v19 = vrot.slane %v8196_v2, %v18540_v33  ;;  %v5353_v25 = vrot.slane %v2001_v16, %v18540_v33  ;;  %v19877_v31 = vpop.f32.mrb[51].mxu0 }
 0x271   : > { %15818 = vxpose.xlu0.b32.start [1/16] (narrow) %v13530_v46, 8  ;;  %v19863_v57 = vadd.f32 %v19637_v23, %v2110_v13  ;;  %v2211_v34 = vsel %vm910_vm4, %v2171_v50, 0.0  ;;  %v5360_v5 = vrot.slane %v5346_v58, %v18540_v33  ;;  %v19870_v41 = vrot.slane %v19849_v55, %v18540_v33 }
 0x272   : > { %26597 = vst [vmem:[#allocation175_spill] sm:$0xff] %v19858_v19  ;;  %v19873_v52 = vrot.slane %v8204_v8, %v18540_v33  ;;  %v2212_v2 = vadd.f32 %v2211_v34, %v19717_v20  ;;  %v2471_v46 = vsel %vm910_vm4, %v2347_v47, 0.0  ;;  %v5361_v23 = vcombine.high %v5353_v25, %v5353_v25 }
 0x273   : > { %26598 = vst [vmem:[#allocation176_spill] sm:$0xff] %v19870_v41  ;;  %v5362_v13 = vcombine.high %v5360_v5, %v5360_v5  ;;  %v19880_v50 = vrot.slane %v5353_v25, %v18540_v33  ;;  %v19883_v58 = vrot.slane %v5360_v5, %v18540_v33  ;;  %v2472_v8 = vadd.f32 %v2471_v46, %v19735_v3  ;;  %v19912_v25 = vpop.f32.mrb[20].mxu1 }
 0x274   : > { %26599 = vst [vmem:[#allocation177_spill] sm:$0xff] %v19873_v52  ;;  %v19886_v16 = vadd.f32 %v19643_v0, %v2212_v2  ;;  %v2541_v14 = vmul.f32 %v2347_v47, %v2347_v47  ;;  %v8091_v9 = vcombine.high %v2347_v47, %v2347_v47  ;;  %v19892_v34 = vrot.slane %v5361_v23, %v18540_v33 }
 0x275   : > { %26600 = vst [vmem:[#allocation178_spill] sm:$0xff] %v19880_v50  ;;  %26601 = vst [vmem:[#allocation179_spill] sm:$0xff] %v19883_v58  ;;  %v19895_v41 = vrot.slane %v5362_v13, %v18540_v33  ;;  %v2474_v5 = vadd.f32 %v19655_v45, %v2472_v8  ;;  %v8098_v2 = vrot.slane %v2347_v47, %v18540_v33  ;;  %v19948_v50 = vpop.f32.mrb[21].mxu1 }
 0x276   : > { %26602 = vst [vmem:[#allocation180_spill] sm:$0xff] %v19892_v34  ;;  %v2573_v3 = vsel %vm910_vm4, %v2541_v14, 0.0  ;;  %v19910_v20 = vrot.slane %v8091_v9, %v18540_v33  ;;  %v3095_v47 = vcombine.high %v18585_v61, %v18585_v61  ;;  %v4953_v14 = vcombine.high %v19227_v27, %v19227_v27 }
 0x277   : > { %26603 = vst [vmem:[#allocation181_spill] sm:$0xff] %v19895_v41  ;;  %v2574_v13 = vadd.f32 %v2573_v3, %v19755_v30  ;;  %v8106_v0 = vcombine.high %v8098_v2, %v8098_v2  ;;  %v19915_v45 = vrot.slane %v8098_v2, %v18540_v33  ;;  %v3097_v9 = vcombine.high %v19817_v35, %v19817_v35 }
 0x278   : > { %26604 = vst [vmem:[#allocation182_spill] sm:$0xff] %v19910_v20  ;;  %v6492_v3 = vrot.slane %v19217_v49, %v18559_v11  ;;  %v19930_v2 = vrot.slane %v19910_v20, %v18540_v33  ;;  %v6496_v46 = vrot.slane %v19227_v27, %v18559_v11  ;;  %v6504_v30 = vrot.slane %v4953_v14, %v18559_v11 }
 0x279   : > { %26605 = vst [vmem:[#allocation183_spill] sm:$0xff] %v19915_v45  ;;  %v2576_v8 = vadd.f32 %v19662_v42, %v2574_v13  ;;  %v19933_v23 = vrot.slane %v8106_v0, %v18540_v33  ;;  %v26608_v42 = vcombine.high %v19217_v49, %v19217_v49  ;;  %v2368_v41 = vadd.f32 %v19337_v1, %v19106_v17 }
 0x27a   : > { %26606 = vst [vmem:[#allocation184_spill] sm:$0xff] %v19930_v2  ;;  %v7758_v58 = vsel %vm7753_vm7, %v18585_v61, %v6492_v3  ;;  %v2360_v0 = vadd.f32 %v19337_v1, %v19116_v28  ;;  %v7759_v27 = vsel %vm7753_vm7, %v19817_v35, %v6496_v46  ;;  %v2476_v49 = vadd.f32 %v19835_v6, %v2474_v5  ;;  %v20062_v2 = vpop.f32.mrb[52].mxu0 }
 0x27b   : > { %26607 = vst [vmem:[#allocation185_spill] sm:$0xff] %v19933_v23  ;;  %v6500_v13 = vrot.slane %v26608_v42, %v18559_v11  ;;  %v2578_v14 = vadd.f32 %v19843_v51, %v2576_v8  ;;  %v7761_v3 = vsel %vm7753_vm7, %v3097_v9, %v6504_v30  ;;  %v13531_v17 = vcombine.low %v7758_v58, %v7759_v27  ;;  %v19984_v27 = vpop.f32.mrb[22].mxu1 }
 0x27c   : > { %v2546_v42 = vmul.f32 %v2368_v41, %v2368_v41  ;;  %v8336_v28 = vcombine.high %v2368_v41, %v2368_v41  ;;  %v8343_v19 = vrot.slane %v2368_v41, %v18540_v33  ;;  %v2477_v52 = vsel %vm910_vm4, %v2360_v0, 0.0 }
 0x27d   : > { %v7760_v34 = vsel %vm7753_vm7, %v3095_v47, %v6500_v13  ;;  %v13539_v35 = vrot.slane %v13531_v17, %v19822_v43  ;;  %v19962_v46 = vsel %vm910_vm4, %v2368_v41, 0.0  ;;  %v2478_v6 = vadd.f32 %v2477_v52, %v2476_v49 }
 0x27e   : > { %v13532_v55 = vcombine.low %v7760_v34, %v7761_v3  ;;  %v2544_v51 = vmul.f32 %v2360_v0, %v2360_v0  ;;  %v19966_v47 = vrot.slane %v8336_v28, %v18540_v33  ;;  %v8351_v58 = vcombine.high %v8343_v19, %v8343_v19 }
 0x27f   : > { %v19969_v34 = vrot.slane %v8343_v19, %v18540_v33  ;;  %v19972_v8 = vsel %vm910_vm4, %v2546_v42, 0.0  ;;  %v8238_v9 = vcombine.high %v2360_v0, %v2360_v0  ;;  %v8245_v41 = vrot.slane %v2360_v0, %v18540_v33 }
 0x280   : > { %v13546_v5 = vrot.slane %v13532_v55, %v19822_v43  ;;  %26609 = vst [vmem:[#allocation186_spill] sm:$0xff] %v19966_v47  ;;  %v2579_v30 = vsel %vm910_vm4, %v2544_v51, 0.0  ;;  %v19980_v55 = vrot.slane %v19966_v47, %v18540_v33  ;;  %v3292_v19 = vcombine.high %v18678_v18, %v18678_v18 }
 0x281   : > { %26610 = vst [vmem:[#allocation187_spill] sm:$0xff] %v19969_v34  ;;  %v19987_v49 = vrot.slane %v8351_v58, %v18540_v33  ;;  %v2580_v3 = vadd.f32 %v2579_v30, %v2578_v14  ;;  %v19990_v17 = vrot.slane %v8238_v9, %v18540_v33  ;;  %v8253_v0 = vcombine.high %v8245_v41, %v8245_v41  ;;  %v20004_v58 = vpop.f32.mrb[23].mxu1 }
 0x282   : > { %v13547_v13 = vcombine.low %v13539_v35, %v13546_v5  ;;  %26611 = vst [vmem:[#allocation188_spill] sm:$0xff] %v19980_v55  ;;  %v6608_v28 = vrot.slane %v19449_v59, %v18559_v11  ;;  %v26614_v35 = vcombine.high %v19443_v63, %v19443_v63  ;;  %v26615_v14 = vcombine.high %v19449_v59, %v19449_v59 }
 0x283   : > { %26612 = vst [vmem:[#allocation189_spill] sm:$0xff] %v19987_v49  ;;  %26613 = vst [vmem:[#allocation190_spill] sm:$0xff] %v19990_v17  ;;  %v20009_v9 = vrot.slane %v8245_v41, %v18540_v33  ;;  %v20021_v59 = vrot.slane %v8253_v0, %v18540_v33  ;;  %v26618_v41 = vcombine.high %v18662_v12, %v18662_v12 }
 0x284   : > { %15819 = vxpose.xlu0.b32.cont [2/16] (narrow) %v13547_v13, 8  ;;  %v6612_v51 = vrot.slane %v26614_v35, %v18559_v11  ;;  %v6616_v5 = vrot.slane %v26615_v14, %v18559_v11  ;;  %v20013_v13 = vrot.slane %v19990_v17, %v18540_v33  ;;  %v26617_v35 = vrot.slane %v19443_v63, %v18559_v11 }
 0x285   : > { %v7787_v14 = vsel %vm7753_vm7, %v18678_v18, %v6608_v28  ;;  %v3145_v63 = vcombine.high %v18629_v29, %v18629_v29  ;;  %v26619_v0 = vcombine.high %v19274_v53, %v19274_v53 }
 0x286   : > { %26616 = vst [vmem:[#allocation191_spill] sm:$0xff] %v20013_v13  ;;  %v7786_v52 = vsel %vm7753_vm7, %v18662_v12, %v26617_v35  ;;  %v7788_v42 = vsel %vm7753_vm7, %v26618_v41, %v6612_v51  ;;  %v7789_v30 = vsel %vm7753_vm7, %v3292_v19, %v6616_v5  ;;  %v6512_v35 = vrot.slane %v19280_v26, %v18559_v11  ;;  %v26622_v19 = vld [vmem:[#allocation6_spill] sm:$0xff]  ;;  %v26623_v51 = vld [vmem:[#allocation93_spill] sm:$0xff] }
 0x287   : > { %v13786_v61 = vcombine.low %v7786_v52, %v7787_v14  ;;  %v13787_v55 = vcombine.low %v7788_v42, %v7789_v30  ;;  %v6516_v18 = vrot.slane %v26619_v0, %v18559_v11  ;;  %v26620_v12 = vcombine.high %v19280_v26, %v19280_v26  ;;  %v26624_v0 = vld [vmem:[#allocation96_spill] sm:$0xff] }
 0x288   : > { %v26621_v52 = vrot.slane %v19274_v53, %v18559_v11  ;;  %v2371_v5 = vadd.f32 %v19337_v1, %v26623_v51  ;;  %v7763_v41 = vsel %vm7753_vm7, %v18629_v29, %v6512_v35  ;;  %v2363_v26 = vadd.f32 %v19337_v1, %v26624_v0 }
 0x289   : > { %v6520_v28 = vrot.slane %v26620_v12, %v18559_v11  ;;  %v13794_v30 = vrot.slane %v13786_v61, %v19822_v43  ;;  %v13801_v14 = vrot.slane %v13787_v55, %v19822_v43  ;;  %v26625_v53 = vcombine.high %v26622_v19, %v26622_v19 }
 0x28a   : > { %v7762_v42 = vsel %vm7753_vm7, %v26622_v19, %v26621_v52  ;;  %v2547_v55 = vmul.f32 %v2371_v5, %v2371_v5  ;;  %v8385_v49 = vcombine.high %v2371_v5, %v2371_v5  ;;  %v20065_v29 = vsel %vm910_vm4, %v2371_v5, 0.0 }
 0x28b   : > { %v7764_v52 = vsel %vm7753_vm7, %v26625_v53, %v6516_v18  ;;  %v7765_v51 = vsel %vm7753_vm7, %v3145_v63, %v6520_v28  ;;  %v13548_v47 = vcombine.low %v7762_v42, %v7763_v41  ;;  %v13802_v61 = vcombine.low %v13794_v30, %v13801_v14  ;;  %v20074_v42 = vpop.f32.mrb[53].mxu0 }
 0x28c   : > { %v13549_v34 = vcombine.low %v7764_v52, %v7765_v51  ;;  %v8392_v35 = vrot.slane %v2371_v5, %v18540_v33  ;;  %v2479_v0 = vsel %vm910_vm4, %v2363_v26, 0.0  ;;  %v2545_v12 = vmul.f32 %v2363_v26, %v2363_v26 }
 0x28d   : > { %15850 = vxpose.xlu1.b32.start [1/16] (narrow) %v13802_v61, 8  ;;  %v13556_v18 = vrot.slane %v13548_v47, %v19822_v43  ;;  %v20072_v28 = vrot.slane %v8385_v49, %v18540_v33  ;;  %v2480_v19 = vadd.f32 %v2479_v0, %v2478_v6  ;;  %v20077_v30 = vsel %vm910_vm4, %v2547_v55, 0.0  ;;  %v26631_v55 = vld [vmem:[#allocation98_spill] sm:$0xff] }
 0x28e   : > { %v13563_v63 = vrot.slane %v13549_v34, %v19822_v43  ;;  %v8400_v14 = vcombine.high %v8392_v35, %v8392_v35  ;;  %v2581_v5 = vsel %vm910_vm4, %v2545_v12, 0.0  ;;  %v8287_v41 = vcombine.high %v2363_v26, %v2363_v26 }
 0x28f   : > { %26626 = vst [vmem:[#allocation6_spill] sm:$0xff] %v20072_v28  ;;  %v20083_v47 = vrot.slane %v8392_v35, %v18540_v33  ;;  %v20086_v34 = vadd.f32 %v19962_v46, %v2480_v19  ;;  %v20090_v6 = vrot.slane %v20072_v28, %v18540_v33  ;;  %v2582_v51 = vadd.f32 %v2581_v5, %v2580_v3  ;;  %v20113_v19 = vpop.f32.mrb[54].mxu0 }
 0x290   : > { %v13564_v53 = vcombine.low %v13556_v18, %v13563_v63  ;;  %v20093_v49 = vrot.slane %v8400_v14, %v18540_v33  ;;  %v8294_v12 = vrot.slane %v2363_v26, %v18540_v33  ;;  %v20097_v61 = vrot.slane %v8287_v41, %v18540_v33  ;;  %v20139_v14 = vpop.f32.mrb[55].mxu0 }
 0x291   : > { %26627 = vst [vmem:[#allocation93_spill] sm:$0xff] %v20083_v47  ;;  %26628 = vst [vmem:[#allocation96_spill] sm:$0xff] %v20090_v6  ;;  %v2022_v35 = vadd.f32 %v19337_v1, %v26631_v55  ;;  %v2014_v46 = vadd.f32 %v19337_v1, %v19253_v39  ;;  %v2114_v0 = vadd.f32 %v19795_v24, %v19863_v57 }
 0x292   : > { %26629 = vst [vmem:[#allocation192_spill] sm:$0xff] %v20093_v49  ;;  %15820 = vxpose.xlu0.b32.cont [3/16] (narrow) %v13564_v53, 8  ;;  %26630 = vst [vmem:[#allocation193_spill] sm:$0xff] %v20097_v61  ;;  %v20106_v18 = vadd.f32 %v19972_v8, %v2582_v51  ;;  %v8302_v63 = vcombine.high %v8294_v12, %v8294_v12  ;;  %v20109_v3 = vrot.slane %v8294_v12, %v18540_v33 }
 0x293   : > { %v2216_v26 = vadd.f32 %v19803_v40, %v19886_v16  ;;  %v20121_v1 = vrot.slane %v20097_v61, %v18540_v33  ;;  %v2176_v24 = vmul.f32 %v2022_v35, %v2022_v35  ;;  %v20127_v8 = vsel %vm910_vm4, %v2022_v35, 0.0 }
 0x294   : > { %26632 = vst [vmem:[#allocation98_spill] sm:$0xff] %v20109_v3  ;;  %v20124_v57 = vrot.slane %v8302_v63, %v18540_v33  ;;  %v5591_v40 = vcombine.high %v2022_v35, %v2022_v35  ;;  %v5598_v16 = vrot.slane %v2022_v35, %v18540_v33  ;;  %v2115_v41 = vsel %vm910_vm4, %v2014_v46, 0.0 }
 0x295   : > { %26633 = vst [vmem:[#allocation194_spill] sm:$0xff] %v20121_v1  ;;  %v2174_v53 = vmul.f32 %v2014_v46, %v2014_v46  ;;  %v5493_v51 = vcombine.high %v2014_v46, %v2014_v46  ;;  %v20137_v63 = vadd.f32 %v2115_v41, %v2114_v0  ;;  %v20142_v39 = vsel %vm910_vm4, %v2176_v24, 0.0  ;;  %v26638_v0 = vld [vmem:[#allocation3_spill] sm:$0xff]  ;;  %v20184_v24 = vpop.f32.mrb[56].mxu0 }
 0x296   : > { %26634 = vst [vmem:[#allocation195_spill] sm:$0xff] %v20124_v57  ;;  %v5605_v12 = vrot.slane %v5591_v40, %v18540_v33  ;;  %v5606_v55 = vcombine.high %v5598_v16, %v5598_v16  ;;  %v20135_v52 = vrot.slane %v5598_v16, %v18540_v33  ;;  %v5500_v5 = vrot.slane %v2014_v46, %v18540_v33  ;;  %v26645_v1 = vld [vmem:[#allocation11_spill] sm:$0xff]  ;;  %v20222_v20 = vpop.f32.mrb[57].mxu0 }
 0x297   : > { %v2217_v35 = vsel %vm910_vm4, %v2174_v53, 0.0  ;;  %v5507_v6 = vrot.slane %v5493_v51, %v18540_v33  ;;  %v26639_v41 = vcombine.high %v26638_v0, %v26638_v0  ;;  %v20161_v51 = vpop.f32.mrb[24].mxu1  ;;  %v5002_v57 = vcombine.high %v19291_v21, %v19291_v21 }
 0x298   : > { %26635 = vst [vmem:[#allocation196_spill] sm:$0xff] %v20135_v52  ;;  %v5607_v28 = vcombine.high %v5605_v12, %v5605_v12  ;;  %v20148_v40 = vrot.slane %v5605_v12, %v18540_v33  ;;  %v20151_v16 = vrot.slane %v5606_v55, %v18540_v33  ;;  %v20159_v53 = vadd.f32 %v2217_v35, %v2216_v26 }
 0x299   : > { %v3289_v47 = vrot.slane %v26639_v41, %v18540_v33  ;;  %v5508_v46 = vcombine.high %v5500_v5, %v5500_v5  ;;  %v5509_v49 = vcombine.high %v5507_v6, %v5507_v6  ;;  %v20171_v0 = vrot.slane %v5500_v5, %v18540_v33 }
 0x29a   : > { %26636 = vst [vmem:[#allocation197_spill] sm:$0xff] %v20148_v40  ;;  %26637 = vst [vmem:[#allocation198_spill] sm:$0xff] %v20151_v16  ;;  %v20164_v12 = vrot.slane %v5607_v28, %v18540_v33  ;;  %v20176_v35 = vrot.slane %v5507_v6, %v18540_v33  ;;  %v3291_v26 = vcombine.high %v26645_v1, %v26645_v1  ;;  %v20194_v40 = vpop.f32.mrb[25].mxu1 }
 0x29b   : > { %26641 = vst [vmem:[#allocation199_spill] sm:$0xff] %v20171_v0  ;;  %v20179_v41 = vrot.slane %v5508_v46, %v18540_v33  ;;  %v20182_v28 = vrot.slane %v5509_v49, %v18540_v33  ;;  %v5149_v6 = vcombine.high %v19462_v44, %v19462_v44  ;;  %v3293_v46 = vcombine.high %v3289_v47, %v3289_v47  ;;  %v26649_v49 = vld [vmem:[#allocation17_spill] sm:$0xff] }
 0x29c   : > { %26640 = vst [vmem:[#allocation3_spill] sm:$0xff] %v20164_v12  ;;  %26642 = vst [vmem:[#allocation200_spill] sm:$0xff] %v20176_v35  ;;  %v6620_v12 = vrot.slane %v19446_v22, %v18559_v11  ;;  %v6624_v55 = vrot.slane %v19462_v44, %v18559_v11  ;;  %v26646_v5 = vcombine.high %v19446_v22, %v19446_v22 }
 0x29d   : > { %26643 = vst [vmem:[#allocation201_spill] sm:$0xff] %v20179_v41  ;;  %26644 = vst [vmem:[#allocation202_spill] sm:$0xff] %v20182_v28  ;;  %v6632_v16 = vrot.slane %v5149_v6, %v18559_v11  ;;  %v26647_v28 = vld [vmem:[#allocation50_spill] sm:$0xff]  ;;  %v3144_v35 = vcombine.high %v26649_v49, %v26649_v49  ;;  %v6524_v22 = vrot.slane %v19277_v15, %v18559_v11  ;;  %v26692_v41 = vld [vmem:[#allocation144_spill] sm:$0xff] }
 0x29e   : > { %v6628_v52 = vrot.slane %v26646_v5, %v18559_v11  ;;  %v26648_v0 = vcombine.high %v26647_v28, %v26647_v28  ;;  %v7790_v3 = vsel %vm7753_vm7, %v26645_v1, %v6620_v12  ;;  %v7791_v44 = vsel %vm7753_vm7, %v3289_v47, %v6624_v55 }
 0x29f   : > { %v7793_v6 = vsel %vm7753_vm7, %v3293_v46, %v6632_v16  ;;  %v13803_v28 = vcombine.low %v7790_v3, %v7791_v44  ;;  %v6528_v1 = vrot.slane %v19291_v21, %v18559_v11  ;;  %v26650_v47 = vcombine.high %v19277_v15, %v19277_v15  ;;  %v20237_v3 = vld [vmem:[%s25548_s2] ss:$0 sm:$0xff] }
 0x2a0   : > { %v3142_v61 = vrot.slane %v26648_v0, %v18540_v33  ;;  %v7792_v5 = vsel %vm7753_vm7, %v3291_v26, %v6628_v52  ;;  %v6536_v55 = vrot.slane %v5002_v57, %v18559_v11  ;;  %v7766_v52 = vsel %vm7753_vm7, %v26649_v49, %v6524_v22  ;;  %v26651_v16 = vld [vmem:[#allocation113_spill] sm:$0xff]  ;;  %v26652_v26 = vld [vmem:[#allocation115_spill] sm:$0xff] }
 0x2a1   : > { %v13804_v13 = vcombine.low %v7792_v5, %v7793_v6  ;;  %v6532_v12 = vrot.slane %v26650_v47, %v18559_v11  ;;  %v13811_v17 = vrot.slane %v13803_v28, %v19822_v43  ;;  %v2025_v21 = vadd.f32 %v20237_v3, %v26651_v16  ;;  %v20249_v47 = vpop.f32.mrb[26].mxu1 }
 0x2a2   : > { %v3146_v0 = vcombine.high %v3142_v61, %v3142_v61  ;;  %v2017_v46 = vadd.f32 %v20237_v3, %v26652_v26  ;;  %v7767_v57 = vsel %vm7753_vm7, %v3142_v61, %v6528_v1  ;;  %v2400_v23 = vadd.f32 %v20237_v3, %v26692_v41 }
 0x2a3   : > { %v13818_v15 = vrot.slane %v13804_v13, %v19822_v43  ;;  %v7768_v44 = vsel %vm7753_vm7, %v3144_v35, %v6532_v12  ;;  %v13565_v22 = vcombine.low %v7766_v52, %v7767_v57  ;;  %v2177_v28 = vmul.f32 %v2025_v21, %v2025_v21 }
 0x2a4   : > { %v7769_v5 = vsel %vm7753_vm7, %v3146_v0, %v6536_v55  ;;  %v5640_v45 = vcombine.high %v2025_v21, %v2025_v21  ;;  %v5647_v26 = vrot.slane %v2025_v21, %v18540_v33  ;;  %v2117_v13 = vsel %vm910_vm4, %v2017_v46, 0.0 }
 0x2a5   : > { %v13566_v6 = vcombine.low %v7768_v44, %v7769_v5  ;;  %v13819_v16 = vcombine.low %v13811_v17, %v13818_v15  ;;  %v13573_v61 = vrot.slane %v13565_v22, %v19822_v43  ;;  %v20256_v0 = vsel %vm910_vm4, %v2025_v21, 0.0  ;;  %v20263_v15 = vpop.f32.mrb[58].mxu0 }
 0x2a6   : > { %v2118_v1 = vadd.f32 %v2117_v13, %v20137_v63  ;;  %v5654_v12 = vrot.slane %v5640_v45, %v18540_v33  ;;  %v5655_v55 = vcombine.high %v5647_v26, %v5647_v26  ;;  %v20261_v17 = vrot.slane %v5647_v26, %v18540_v33 }
 0x2a7   : > { %v13580_v35 = vrot.slane %v13566_v6, %v19822_v43  ;;  %15851 = vxpose.xlu1.b32.cont [2/16] (narrow) %v13819_v16, 8  ;;  %v2175_v52 = vmul.f32 %v2017_v46, %v2017_v46  ;;  %v5542_v5 = vcombine.high %v2017_v46, %v2017_v46  ;;  %v5549_v21 = vrot.slane %v2017_v46, %v18540_v33  ;;  %v20282_v46 = vpop.f32.mrb[27].mxu1  ;;  %v26661_v16 = vld [vmem:[#allocation125_spill] sm:$0xff] }
 0x2a8   : > { %26653 = vst [vmem:[#allocation11_spill] sm:$0xff] %v20261_v17  ;;  %v20266_v44 = vadd.f32 %v20127_v8, %v2118_v1  ;;  %v20270_v22 = vsel %vm910_vm4, %v2177_v28, 0.0  ;;  %v5656_v63 = vcombine.high %v5654_v12, %v5654_v12  ;;  %v20273_v45 = vrot.slane %v5654_v12, %v18540_v33 }
 0x2a9   : > { %v13581_v57 = vcombine.low %v13573_v61, %v13580_v35  ;;  %v20276_v6 = vrot.slane %v5655_v55, %v18540_v33  ;;  %v2219_v8 = vsel %vm910_vm4, %v2175_v52, 0.0  ;;  %v5556_v26 = vrot.slane %v5542_v5, %v18540_v33 }
 0x2aa   : > { %26654 = vst [vmem:[#allocation50_spill] sm:$0xff] %v20273_v45  ;;  %v5557_v13 = vcombine.high %v5549_v21, %v5549_v21  ;;  %v20285_v28 = vrot.slane %v5656_v63, %v18540_v33  ;;  %v2220_v1 = vadd.f32 %v2219_v8, %v20159_v53  ;;  %v20293_v55 = vrot.slane %v5549_v21, %v18540_v33  ;;  %v26660_v63 = vld [vmem:[#allocation121_spill] sm:$0xff] }
 0x2ab   : > { %26655 = vst [vmem:[#allocation17_spill] sm:$0xff] %v20276_v6  ;;  %15821 = vxpose.xlu0.b32.cont [4/16] (narrow) %v13581_v57, 8  ;;  %v5558_v12 = vcombine.high %v5556_v26, %v5556_v26  ;;  %v20296_v52 = vrot.slane %v5556_v26, %v18540_v33  ;;  %v2384_v61 = vadd.f32 %v20237_v3, %v26660_v63 }
 0x2ac   : > { %26656 = vst [vmem:[#allocation113_spill] sm:$0xff] %v20285_v28  ;;  %26657 = vst [vmem:[#allocation115_spill] sm:$0xff] %v20293_v55  ;;  %v20299_v57 = vrot.slane %v5557_v13, %v18540_v33  ;;  %v20302_v5 = vadd.f32 %v20142_v39, %v2220_v1  ;;  %v2376_v35 = vadd.f32 %v20237_v3, %v26661_v16 }
 0x2ad   : > { %26658 = vst [vmem:[#allocation203_spill] sm:$0xff] %v20296_v52  ;;  %v2484_v53 = vadd.f32 %v20065_v29, %v20086_v34  ;;  %v20313_v8 = vrot.slane %v5558_v12, %v18540_v33  ;;  %v2550_v1 = vmul.f32 %v2384_v61, %v2384_v61  ;;  %v8532_v29 = vcombine.high %v2384_v61, %v2384_v61  ;;  %v20323_v34 = vpop.f32.mrb[59].mxu0 }
 0x2ae   : > { %26659 = vst [vmem:[#allocation204_spill] sm:$0xff] %v20299_v57  ;;  %v8539_v63 = vrot.slane %v2384_v61, %v18540_v33  ;;  %v2485_v12 = vsel %vm910_vm4, %v2376_v35, 0.0  ;;  %v2548_v21 = vmul.f32 %v2376_v35, %v2376_v35  ;;  %v2586_v26 = vadd.f32 %v20077_v30, %v20106_v18 }
 0x2af   : > { %26662 = vst [vmem:[#allocation121_spill] sm:$0xff] %v20313_v8  ;;  %v2489_v39 = vsel %vm910_vm4, %v2384_v61, 0.0  ;;  %v20331_v49 = vrot.slane %v8532_v29, %v18540_v33  ;;  %v2486_v13 = vadd.f32 %v2485_v12, %v2484_v53  ;;  %v8434_v45 = vcombine.high %v2376_v35, %v2376_v35 }
 0x2b0   : > { %v8547_v16 = vcombine.high %v8539_v63, %v8539_v63  ;;  %v20334_v28 = vrot.slane %v8539_v63, %v18540_v33  ;;  %v2587_v17 = vsel %vm910_vm4, %v2548_v21, 0.0  ;;  %v8441_v6 = vrot.slane %v2376_v35, %v18540_v33 }
 0x2b1   : > { %26663 = vst [vmem:[#allocation125_spill] sm:$0xff] %v20331_v49  ;;  %v2591_v52 = vsel %vm910_vm4, %v2550_v1, 0.0  ;;  %v2588_v18 = vadd.f32 %v2587_v17, %v2586_v26  ;;  %v20342_v61 = vrot.slane %v8434_v45, %v18540_v33  ;;  %v20346_v53 = vrot.slane %v20331_v49, %v18540_v33  ;;  %v26671_v1 = vld [vmem:[#allocation16_spill] sm:$0xff]  ;;  %v26675_v49 = vld [vmem:[#allocation13_spill] sm:$0xff] }
 0x2b2   : > { %26664 = vst [vmem:[#allocation205_spill] sm:$0xff] %v20334_v28  ;;  %v20349_v29 = vrot.slane %v8547_v16, %v18540_v33  ;;  %v8449_v63 = vcombine.high %v8441_v6, %v8441_v6  ;;  %v20352_v21 = vrot.slane %v8441_v6, %v18540_v33  ;;  %v6640_v26 = vrot.slane %v19515_v38, %v18559_v11 }
 0x2b3   : > { %26665 = vst [vmem:[#allocation206_spill] sm:$0xff] %v20342_v61  ;;  %26666 = vst [vmem:[#allocation207_spill] sm:$0xff] %v20346_v53  ;;  %v20360_v45 = vrot.slane %v20342_v61, %v18540_v33  ;;  %v3341_v6 = vcombine.high %v26671_v1, %v26671_v1  ;;  %v26672_v12 = vcombine.high %v19496_v60, %v19496_v60 }
 0x2b4   : > { %26667 = vst [vmem:[#allocation208_spill] sm:$0xff] %v20349_v29  ;;  %26668 = vst [vmem:[#allocation209_spill] sm:$0xff] %v20352_v21  ;;  %v20365_v16 = vrot.slane %v8449_v63, %v18540_v33  ;;  %v26673_v35 = vcombine.high %v19515_v38, %v19515_v38  ;;  %v26674_v53 = vrot.slane %v19496_v60, %v18559_v11 }
 0x2b5   : > { %26669 = vst [vmem:[#allocation210_spill] sm:$0xff] %v20360_v45  ;;  %v6644_v30 = vrot.slane %v26672_v12, %v18559_v11  ;;  %v7795_v28 = vsel %vm7753_vm7, %v26671_v1, %v6640_v26  ;;  %v2387_v29 = vadd.f32 %v20237_v3, %v19508_v54  ;;  %v2379_v12 = vadd.f32 %v20237_v3, %v19520_v37  ;;  %v26677_v1 = vld [vmem:[#allocation9_spill] sm:$0xff] }
 0x2b6   : > { %26670 = vst [vmem:[#allocation211_spill] sm:$0xff] %v20365_v16  ;;  %v6648_v17 = vrot.slane %v26673_v35, %v18559_v11  ;;  %v7794_v63 = vsel %vm7753_vm7, %v26675_v49, %v26674_v53  ;;  %v26676_v38 = vcombine.high %v26675_v49, %v26675_v49  ;;  %v26678_v54 = vcombine.high %v26677_v1, %v26677_v1  ;;  %v20413_v1 = vpop.f32.mrb[28].mxu1 }
 0x2b7   : > { %v13820_v53 = vcombine.low %v7794_v63, %v7795_v28  ;;  %v2551_v8 = vmul.f32 %v2387_v29, %v2387_v29  ;;  %v8581_v26 = vcombine.high %v2387_v29, %v2387_v29  ;;  %v20400_v37 = vsel %vm910_vm4, %v2387_v29, 0.0 }
 0x2b8   : > { %v7796_v60 = vsel %vm7753_vm7, %v26676_v38, %v6644_v30  ;;  %v7797_v35 = vsel %vm7753_vm7, %v3341_v6, %v6648_v17  ;;  %v3338_v16 = vrot.slane %v26678_v54, %v18540_v33  ;;  %v8588_v45 = vrot.slane %v2387_v29, %v18540_v33 }
 0x2b9   : > { %v13821_v61 = vcombine.low %v7796_v60, %v7797_v35  ;;  %v2487_v49 = vsel %vm910_vm4, %v2379_v12, 0.0  ;;  %v2549_v21 = vmul.f32 %v2379_v12, %v2379_v12  ;;  %v13828_v30 = vrot.slane %v13820_v53, %v19822_v43 }
 0x2ba   : > { %v20407_v17 = vrot.slane %v8581_v26, %v18540_v33  ;;  %v2488_v6 = vadd.f32 %v2487_v49, %v2486_v13  ;;  %v8596_v63 = vcombine.high %v8588_v45, %v8588_v45  ;;  %v20410_v38 = vrot.slane %v8588_v45, %v18540_v33 }
 0x2bb   : > { %v13835_v28 = vrot.slane %v13821_v61, %v19822_v43  ;;  %v2589_v60 = vsel %vm910_vm4, %v2549_v21, 0.0  ;;  %v8483_v35 = vcombine.high %v2379_v12, %v2379_v12  ;;  %v20416_v54 = vsel %vm910_vm4, %v2551_v8, 0.0  ;;  %v20439_v61 = vpop.f32.mrb[29].mxu1 }
 0x2bc   : > { %26679 = vst [vmem:[#allocation16_spill] sm:$0xff] %v20407_v17  ;;  %26680 = vst [vmem:[#allocation13_spill] sm:$0xff] %v20410_v38  ;;  %v20420_v53 = vadd.f32 %v2489_v39, %v2488_v6  ;;  %v20424_v13 = vrot.slane %v20407_v17, %v18540_v33  ;;  %v20427_v45 = vrot.slane %v8596_v63, %v18540_v33  ;;  %v20448_v8 = vpop.f32.mrb[30].mxu1 }
 0x2bd   : > { %v13836_v29 = vcombine.low %v13828_v30, %v13835_v28  ;;  %v2590_v21 = vadd.f32 %v2589_v60, %v2588_v18  ;;  %v8490_v26 = vrot.slane %v2379_v12, %v18540_v33  ;;  %v20433_v49 = vrot.slane %v8483_v35, %v18540_v33  ;;  %v26684_v30 = vld [vmem:[#allocation12_spill] sm:$0xff]  ;;  %v26687_v60 = vld [vmem:[#allocation131_spill] sm:$0xff]  ;;  %v20458_v38 = vpop.f32.mrb[31].mxu1 }
 0x2be   : > { %26681 = vst [vmem:[#allocation9_spill] sm:$0xff] %v20424_v13  ;;  %26682 = vst [vmem:[#allocation212_spill] sm:$0xff] %v20427_v45  ;;  %v3340_v39 = vcombine.high %v26684_v30, %v26684_v30  ;;  %v26685_v28 = vld [vmem:[#allocation132_spill] sm:$0xff]  ;;  %v3342_v13 = vcombine.high %v3338_v16, %v3338_v16 }
 0x2bf   : > { %15852 = vxpose.xlu1.b32.cont [3/16] (narrow) %v13836_v29, 8  ;;  %26683 = vst [vmem:[#allocation213_spill] sm:$0xff] %v20433_v49  ;;  %v5198_v6 = vcombine.high %v26685_v28, %v26685_v28  ;;  %v20441_v63 = vadd.f32 %v2591_v52, %v2590_v21  ;;  %v8498_v18 = vcombine.high %v8490_v26, %v8490_v26 }
 0x2c0   : > { %v20444_v12 = vrot.slane %v8490_v26, %v18540_v33  ;;  %v6652_v29 = vrot.slane %v26687_v60, %v18559_v11  ;;  %v6656_v17 = vrot.slane %v26685_v28, %v18559_v11  ;;  %v26688_v52 = vcombine.high %v26687_v60, %v26687_v60  ;;  %v26691_v60 = vld [vmem:[#allocation142_spill] sm:$0xff] }
 0x2c1   : > { %v20462_v26 = vrot.slane %v20433_v49, %v18540_v33  ;;  %v20465_v45 = vrot.slane %v8498_v18, %v18540_v33  ;;  %v6664_v35 = vrot.slane %v5198_v6, %v18559_v11  ;;  %v2122_v6 = vadd.f32 %v20256_v0, %v20266_v44 }
 0x2c2   : > { %26686 = vst [vmem:[#allocation12_spill] sm:$0xff] %v20444_v12  ;;  %v6660_v21 = vrot.slane %v26688_v52, %v18559_v11  ;;  %v7798_v55 = vsel %vm7753_vm7, %v26684_v30, %v6652_v29  ;;  %v7799_v28 = vsel %vm7753_vm7, %v3338_v16, %v6656_v17  ;;  %v2038_v52 = vadd.f32 %v20237_v3, %v26691_v60  ;;  %v26693_v17 = vld [vmem:[#allocation145_spill] sm:$0xff] }
 0x2c3   : > { %26689 = vst [vmem:[#allocation132_spill] sm:$0xff] %v20462_v26  ;;  %26690 = vst [vmem:[#allocation131_spill] sm:$0xff] %v20465_v45  ;;  %v7801_v18 = vsel %vm7753_vm7, %v3342_v13, %v6664_v35  ;;  %v13837_v49 = vcombine.low %v7798_v55, %v7799_v28  ;;  %v2554_v26 = vmul.f32 %v2400_v23, %v2400_v23  ;;  %v20491_v0 = vsel %vm910_vm4, %v2400_v23, 0.0 }
 0x2c4   : > { %v7800_v57 = vsel %vm7753_vm7, %v3340_v39, %v6660_v21  ;;  %v2180_v29 = vmul.f32 %v2038_v52, %v2038_v52  ;;  %v5787_v16 = vcombine.high %v2038_v52, %v2038_v52  ;;  %v2030_v39 = vadd.f32 %v20237_v3, %v26693_v17 }
 0x2c5   : > { %v13838_v30 = vcombine.low %v7800_v57, %v7801_v18  ;;  %v13845_v21 = vrot.slane %v13837_v49, %v19822_v43  ;;  %v20485_v60 = vsel %vm910_vm4, %v2038_v52, 0.0  ;;  %v5794_v41 = vrot.slane %v2038_v52, %v18540_v33 }
 0x2c6   : > { %v5801_v55 = vrot.slane %v5787_v16, %v18540_v33  ;;  %v8728_v44 = vcombine.high %v2400_v23, %v2400_v23  ;;  %v20494_v57 = vsel %vm910_vm4, %v2180_v29, 0.0  ;;  %v8735_v28 = vrot.slane %v2400_v23, %v18540_v33 }
 0x2c7   : > { %v13852_v13 = vrot.slane %v13838_v30, %v19822_v43  ;;  %v5802_v35 = vcombine.high %v5794_v41, %v5794_v41  ;;  %v20497_v49 = vrot.slane %v5794_v41, %v18540_v33  ;;  %v20512_v12 = vsel %vm910_vm4, %v2554_v26, 0.0 }
 0x2c8   : > { %v5803_v52 = vcombine.high %v5801_v55, %v5801_v55  ;;  %v20501_v17 = vrot.slane %v5801_v55, %v18540_v33  ;;  %v20504_v30 = vrot.slane %v8728_v44, %v18540_v33  ;;  %v8743_v41 = vcombine.high %v8735_v28, %v8735_v28  ;;  %v20524_v44 = vpop.f32.mrb[32].mxu1 }
 0x2c9   : > { %26694 = vst [vmem:[#allocation142_spill] sm:$0xff] %v20497_v49  ;;  %v13853_v18 = vcombine.low %v13845_v21, %v13852_v13  ;;  %v20507_v16 = vrot.slane %v5802_v35, %v18540_v33  ;;  %v20522_v55 = vrot.slane %v8735_v28, %v18540_v33  ;;  %v2178_v28 = vmul.f32 %v2030_v39, %v2030_v39  ;;  %v20547_v49 = vpop.f32.mrb[33].mxu1 }
 0x2ca   : > { %26695 = vst [vmem:[#allocation144_spill] sm:$0xff] %v20501_v17  ;;  %26696 = vst [vmem:[#allocation145_spill] sm:$0xff] %v20504_v30  ;;  %v20515_v23 = vrot.slane %v5803_v52, %v18540_v33  ;;  %v2123_v52 = vsel %vm910_vm4, %v2030_v39, 0.0  ;;  %v20536_v21 = vrot.slane %v8743_v41, %v18540_v33  ;;  %v2224_v29 = vadd.f32 %v20270_v22, %v20302_v5 }
 0x2cb   : > { %26697 = vst [vmem:[#allocation214_spill] sm:$0xff] %v20507_v16  ;;  %15853 = vxpose.xlu1.b32.cont [4/16] (narrow) %v13853_v18, 8  ;;  %26699 = vst [vmem:[#allocation216_spill] sm:$0xff] %v20522_v55  ;;  %v20532_v18 = vrot.slane %v20504_v30, %v18540_v33  ;;  %v20538_v13 = vadd.f32 %v2123_v52, %v2122_v6  ;;  %v5689_v17 = vcombine.high %v2030_v39, %v2030_v39 }
 0x2cc   : > { %26698 = vst [vmem:[#allocation215_spill] sm:$0xff] %v20515_v23  ;;  %26701 = vst [vmem:[#allocation218_spill] sm:$0xff] %v20536_v21  ;;  %v5696_v26 = vrot.slane %v2030_v39, %v18540_v33  ;;  %v2392_v35 = vadd.f32 %v20237_v3, %v19649_v10  ;;  %v2492_v23 = vadd.f32 %v20400_v37, %v20420_v53  ;;  %v2225_v6 = vsel %vm910_vm4, %v2178_v28, 0.0 }
 0x2cd   : > { %26700 = vst [vmem:[#allocation217_spill] sm:$0xff] %v20532_v18  ;;  %v2594_v52 = vadd.f32 %v20416_v54, %v20441_v63  ;;  %v2041_v22 = vadd.f32 %v20237_v3, %v19674_v36  ;;  %v20556_v5 = vadd.f32 %v2225_v6, %v2224_v29  ;;  %v5703_v10 = vrot.slane %v5689_v17, %v18540_v33  ;;  %v20572_v17 = vpop.f32.mrb[34].mxu1 }
 0x2ce   : > { %v5704_v39 = vcombine.high %v5696_v26, %v5696_v26  ;;  %v20560_v37 = vrot.slane %v5696_v26, %v18540_v33  ;;  %v2493_v53 = vsel %vm910_vm4, %v2392_v35, 0.0  ;;  %v2552_v16 = vmul.f32 %v2392_v35, %v2392_v35 }
 0x2cf   : > { %v8630_v41 = vcombine.high %v2392_v35, %v2392_v35  ;;  %v8637_v28 = vrot.slane %v2392_v35, %v18540_v33  ;;  %v5705_v18 = vcombine.high %v5703_v10, %v5703_v10  ;;  %v20565_v54 = vrot.slane %v5703_v10, %v18540_v33 }
 0x2d0   : > { %26702 = vst [vmem:[#allocation219_spill] sm:$0xff] %v20560_v37  ;;  %v20568_v36 = vrot.slane %v5704_v39, %v18540_v33  ;;  %v2403_v63 = vadd.f32 %v20237_v3, %v19707_v56  ;;  %v20576_v26 = vadd.f32 %v2493_v53, %v2492_v23  ;;  %v2595_v6 = vsel %vm910_vm4, %v2552_v16, 0.0 }
 0x2d1   : > { %26703 = vst [vmem:[#allocation220_spill] sm:$0xff] %v20565_v54  ;;  %v20580_v35 = vrot.slane %v8630_v41, %v18540_v33  ;;  %v20583_v10 = vrot.slane %v5705_v18, %v18540_v33  ;;  %v20589_v30 = vadd.f32 %v2595_v6, %v2594_v52  ;;  %v8645_v53 = vcombine.high %v8637_v28, %v8637_v28 }
 0x2d2   : > { %26704 = vst [vmem:[#allocation221_spill] sm:$0xff] %v20568_v36  ;;  %v20596_v41 = vrot.slane %v8637_v28, %v18540_v33  ;;  %v2181_v39 = vmul.f32 %v2041_v22, %v2041_v22  ;;  %v5836_v29 = vcombine.high %v2041_v22, %v2041_v22  ;;  %v5843_v56 = vrot.slane %v2041_v22, %v18540_v33  ;;  %v20616_v36 = vpop.f32.mrb[35].mxu1 }
 0x2d3   : > { %26705 = vst [vmem:[#allocation222_spill] sm:$0xff] %v20580_v35  ;;  %26706 = vst [vmem:[#allocation223_spill] sm:$0xff] %v20583_v10  ;;  %v20600_v18 = vrot.slane %v20580_v35, %v18540_v33  ;;  %v20604_v52 = vrot.slane %v8645_v53, %v18540_v33  ;;  %v20609_v23 = vsel %vm910_vm4, %v2041_v22, 0.0  ;;  %v2555_v16 = vmul.f32 %v2403_v63, %v2403_v63 }
 0x2d4   : > { %26707 = vst [vmem:[#allocation224_spill] sm:$0xff] %v20596_v41  ;;  %v5850_v28 = vrot.slane %v5836_v29, %v18540_v33  ;;  %v5851_v54 = vcombine.high %v5843_v56, %v5843_v56  ;;  %v20613_v10 = vrot.slane %v5843_v56, %v18540_v33  ;;  %v2499_v37 = vsel %vm910_vm4, %v2403_v63, 0.0 }
 0x2d5   : > { %26708 = vst [vmem:[#allocation225_spill] sm:$0xff] %v20600_v18  ;;  %26709 = vst [vmem:[#allocation226_spill] sm:$0xff] %v20604_v52  ;;  %v20619_v53 = vsel %vm910_vm4, %v2181_v39, 0.0  ;;  %v8777_v55 = vcombine.high %v2403_v63, %v2403_v63  ;;  %v8784_v6 = vrot.slane %v2403_v63, %v18540_v33  ;;  %v2033_v22 = vadd.f32 %v20237_v3, %v19715_v62 }
 0x2d6   : > { %26710 = vst [vmem:[#allocation227_spill] sm:$0xff] %v20613_v10  ;;  %v5852_v21 = vcombine.high %v5850_v28, %v5850_v28  ;;  %v20625_v29 = vrot.slane %v5850_v28, %v18540_v33  ;;  %v20628_v56 = vrot.slane %v5851_v54, %v18540_v33  ;;  %v20631_v18 = vsel %vm910_vm4, %v2555_v16, 0.0 }
 0x2d7   : > { %v20636_v35 = vrot.slane %v8777_v55, %v18540_v33  ;;  %v8792_v63 = vcombine.high %v8784_v6, %v8784_v6  ;;  %v20639_v45 = vrot.slane %v8784_v6, %v18540_v33  ;;  %v2125_v28 = vsel %vm910_vm4, %v2033_v22, 0.0 }
 0x2d8   : > { %26711 = vst [vmem:[#allocation228_spill] sm:$0xff] %v20625_v29  ;;  %26712 = vst [vmem:[#allocation229_spill] sm:$0xff] %v20628_v56  ;;  %v20642_v62 = vrot.slane %v5852_v21, %v18540_v33  ;;  %v2126_v54 = vadd.f32 %v2125_v28, %v20538_v13  ;;  %v2179_v29 = vmul.f32 %v2033_v22, %v2033_v22 }
 0x2d9   : > { %26713 = vst [vmem:[#allocation230_spill] sm:$0xff] %v20636_v35  ;;  %26714 = vst [vmem:[#allocation231_spill] sm:$0xff] %v20639_v45  ;;  %v20655_v6 = vrot.slane %v20636_v35, %v18540_v33  ;;  %v20658_v21 = vrot.slane %v8792_v63, %v18540_v33  ;;  %v5745_v16 = vrot.slane %v2033_v22, %v18540_v33  ;;  %v20670_v63 = vpop.f32.mrb[60].mxu0 }
 0x2da   : > { %26715 = vst [vmem:[#allocation232_spill] sm:$0xff] %v20642_v62  ;;  %v5738_v62 = vcombine.high %v2033_v22, %v2033_v22  ;;  %v2395_v39 = vadd.f32 %v20237_v3, %v19768_v32  ;;  %v2416_v55 = vadd.f32 %v20237_v3, %v19808_v4  ;;  %v2408_v56 = vadd.f32 %v20237_v3, %v19819_v48  ;;  %v20677_v10 = vpop.f32.mrb[61].mxu0 }
 0x2db   : > { %26716 = vst [vmem:[#allocation233_spill] sm:$0xff] %v20655_v6  ;;  %26717 = vst [vmem:[#allocation234_spill] sm:$0xff] %v20658_v21  ;;  %v20673_v13 = vadd.f32 %v20485_v60, %v2126_v54  ;;  %v2227_v28 = vsel %vm910_vm4, %v2179_v29, 0.0  ;;  %v5753_v6 = vcombine.high %v5745_v16, %v5745_v16  ;;  %v20681_v35 = vrot.slane %v5745_v16, %v18540_v33 }
 0x2dc   : > { %v5752_v22 = vrot.slane %v5738_v62, %v18540_v33  ;;  %v2228_v32 = vadd.f32 %v2227_v28, %v20556_v5  ;;  %v2495_v4 = vsel %vm910_vm4, %v2395_v39, 0.0  ;;  %v2553_v48 = vmul.f32 %v2395_v39, %v2395_v39 }
 0x2dd   : > { %26718 = vst [vmem:[#allocation235_spill] sm:$0xff] %v20681_v35  ;;  %v20688_v60 = vrot.slane %v5753_v6, %v18540_v33  ;;  %v2496_v29 = vadd.f32 %v2495_v4, %v20576_v26  ;;  %v2419_v16 = vadd.f32 %v20237_v3, %v19860_v7  ;;  %v8679_v4 = vcombine.high %v2395_v39, %v2395_v39 }
 0x2de   : > { %v5754_v45 = vcombine.high %v5752_v22, %v5752_v22  ;;  %v20685_v21 = vrot.slane %v5752_v22, %v18540_v33  ;;  %v20692_v62 = vadd.f32 %v20494_v57, %v2228_v32  ;;  %v2597_v54 = vsel %vm910_vm4, %v2553_v48, 0.0 }
 0x2df   : > { %26720 = vst [vmem:[#allocation237_spill] sm:$0xff] %v20688_v60  ;;  %v2498_v57 = vadd.f32 %v20491_v0, %v2496_v29  ;;  %v2598_v32 = vadd.f32 %v2597_v54, %v20589_v30  ;;  %v8686_v48 = vrot.slane %v2395_v39, %v18540_v33  ;;  %v2558_v7 = vmul.f32 %v2416_v55, %v2416_v55  ;;  %v20752_v60 = vpop.f32.mrb[62].mxu0 }
 0x2e0   : > { %26719 = vst [vmem:[#allocation236_spill] sm:$0xff] %v20685_v21  ;;  %v20700_v28 = vrot.slane %v5754_v45, %v18540_v33  ;;  %v8924_v5 = vcombine.high %v2416_v55, %v2416_v55  ;;  %v8931_v45 = vrot.slane %v2416_v55, %v18540_v33  ;;  %v20714_v21 = vrot.slane %v8679_v4, %v18540_v33 }
 0x2e1   : > { %v2600_v6 = vadd.f32 %v20512_v12, %v2598_v32  ;;  %v8694_v26 = vcombine.high %v8686_v48, %v8686_v48  ;;  %v20717_v0 = vrot.slane %v8686_v48, %v18540_v33  ;;  %v2505_v29 = vsel %vm910_vm4, %v2416_v55, 0.0 }
 0x2e2   : > { %26721 = vst [vmem:[#allocation238_spill] sm:$0xff] %v20700_v28  ;;  %v2500_v28 = vadd.f32 %v2499_v37, %v2498_v57  ;;  %26722 = vst [vmem:[#allocation239_spill] sm:$0xff] %v20714_v21  ;;  %v20721_v30 = vrot.slane %v8924_v5, %v18540_v33  ;;  %v8939_v39 = vcombine.high %v8931_v45, %v8931_v45  ;;  %v2607_v32 = vsel %vm910_vm4, %v2558_v7, 0.0  ;;  %v20785_v7 = vpop.f32.mrb[63].mxu0 }
 0x2e3   : > { %26723 = vst [vmem:[#allocation240_spill] sm:$0xff] %v20717_v0  ;;  %v20724_v54 = vrot.slane %v8931_v45, %v18540_v33  ;;  %v20730_v12 = vrot.slane %v20714_v21, %v18540_v33  ;;  %v20733_v57 = vrot.slane %v8694_v26, %v18540_v33  ;;  %v2501_v45 = vsel %vm910_vm4, %v2408_v56, 0.0 }
 0x2e4   : > { %26724 = vst [vmem:[#allocation241_spill] sm:$0xff] %v20721_v30  ;;  %v20742_v4 = vrot.slane %v20721_v30, %v18540_v33  ;;  %v20745_v48 = vrot.slane %v8939_v39, %v18540_v33  ;;  %v2556_v22 = vmul.f32 %v2408_v56, %v2408_v56  ;;  %v2602_v26 = vadd.f32 %v20631_v18, %v2600_v6 }
 0x2e5   : > { %26725 = vst [vmem:[#allocation242_spill] sm:$0xff] %v20724_v54  ;;  %26726 = vst [vmem:[#allocation243_spill] sm:$0xff] %v20730_v12  ;;  %v8826_v37 = vcombine.high %v2408_v56, %v2408_v56  ;;  %v2502_v55 = vadd.f32 %v2501_v45, %v2500_v28  ;;  %v8833_v35 = vrot.slane %v2408_v56, %v18540_v33  ;;  %v20763_v28 = vsel %vm910_vm4, %v2419_v16, 0.0 }
 0x2e6   : > { %26727 = vst [vmem:[#allocation244_spill] sm:$0xff] %v20733_v57  ;;  %26728 = vst [vmem:[#allocation245_spill] sm:$0xff] %v20742_v4  ;;  %v2559_v5 = vmul.f32 %v2419_v16, %v2419_v16  ;;  %v2603_v4 = vsel %vm910_vm4, %v2556_v22, 0.0  ;;  %v8973_v30 = vcombine.high %v2419_v16, %v2419_v16 }
 0x2e7   : > { %26729 = vst [vmem:[#allocation246_spill] sm:$0xff] %v20745_v48  ;;  %v20756_v39 = vrot.slane %v8826_v37, %v18540_v33  ;;  %v8980_v48 = vrot.slane %v2419_v16, %v18540_v33  ;;  %v2604_v12 = vadd.f32 %v2603_v4, %v2602_v26  ;;  %v8841_v18 = vcombine.high %v8833_v35, %v8833_v35 }
 0x2e8   : > { %v20760_v6 = vrot.slane %v8833_v35, %v18540_v33  ;;  %v20768_v45 = vsel %vm910_vm4, %v2559_v5, 0.0  ;;  %v20771_v22 = vrot.slane %v8973_v30, %v18540_v33  ;;  %v2411_v26 = vadd.f32 %v20237_v3, %v19877_v31 }
 0x2e9   : > { %26730 = vst [vmem:[#allocation247_spill] sm:$0xff] %v20756_v39  ;;  %v8988_v37 = vcombine.high %v8980_v48, %v8980_v48  ;;  %v20775_v4 = vrot.slane %v20756_v39, %v18540_v33  ;;  %v20778_v35 = vrot.slane %v8841_v18, %v18540_v33  ;;  %v20781_v16 = vrot.slane %v8980_v48, %v18540_v33 }
 0x2ea   : > { %26731 = vst [vmem:[#allocation248_spill] sm:$0xff] %v20760_v6  ;;  %26732 = vst [vmem:[#allocation249_spill] sm:$0xff] %v20771_v22  ;;  %v20793_v56 = vrot.slane %v20771_v22, %v18540_v33  ;;  %v2054_v18 = vadd.f32 %v20237_v3, %v19912_v25  ;;  %v2503_v31 = vsel %vm910_vm4, %v2411_v26, 0.0  ;;  %v2557_v54 = vmul.f32 %v2411_v26, %v2411_v26 }
 0x2eb   : > { %26733 = vst [vmem:[#allocation250_spill] sm:$0xff] %v20775_v4  ;;  %26734 = vst [vmem:[#allocation251_spill] sm:$0xff] %v20778_v35  ;;  %v20798_v48 = vrot.slane %v8988_v37, %v18540_v33  ;;  %v8875_v4 = vcombine.high %v2411_v26, %v2411_v26  ;;  %v2504_v39 = vadd.f32 %v2503_v31, %v2502_v55  ;;  %v20824_v31 = vpop.f32.mrb[36].mxu1 }
 0x2ec   : > { %26735 = vst [vmem:[#allocation252_spill] sm:$0xff] %v20781_v16  ;;  %26736 = vst [vmem:[#allocation253_spill] sm:$0xff] %v20793_v56  ;;  %v8882_v5 = vrot.slane %v2411_v26, %v18540_v33  ;;  %v2184_v6 = vmul.f32 %v2054_v18, %v2054_v18  ;;  %v2605_v22 = vsel %vm910_vm4, %v2557_v54, 0.0  ;;  %v5983_v25 = vcombine.high %v2054_v18, %v2054_v18 }
 0x2ed   : > { %26737 = vst [vmem:[#allocation254_spill] sm:$0xff] %v20798_v48  ;;  %v20806_v56 = vrot.slane %v8875_v4, %v18540_v33  ;;  %v5990_v37 = vrot.slane %v2054_v18, %v18540_v33  ;;  %v20809_v48 = vadd.f32 %v2505_v29, %v2504_v39  ;;  %v2606_v35 = vadd.f32 %v2605_v22, %v2604_v12 }
 0x2ee   : > { %v8890_v21 = vcombine.high %v8882_v5, %v8882_v5  ;;  %v20812_v0 = vsel %vm910_vm4, %v2054_v18, 0.0  ;;  %v20817_v26 = vrot.slane %v8882_v5, %v18540_v33  ;;  %v5997_v4 = vrot.slane %v5983_v25, %v18540_v33  ;;  %v20832_v18 = vpop.f32.mrb[37].mxu1 }
 0x2ef   : > { %26738 = vst [vmem:[#allocation255_spill] sm:$0xff] %v20806_v56  ;;  %v20821_v54 = vrot.slane %v20806_v56, %v18540_v33  ;;  %v2608_v29 = vadd.f32 %v2607_v32, %v2606_v35  ;;  %v20830_v39 = vsel %vm910_vm4, %v2184_v6, 0.0  ;;  %v5998_v22 = vcombine.high %v5990_v37, %v5990_v37 }
 0x2f0   : > { %26739 = vst [vmem:[#allocation256_spill] sm:$0xff] %v20817_v26  ;;  %v20827_v12 = vrot.slane %v8890_v21, %v18540_v33  ;;  %v5999_v5 = vcombine.high %v5997_v4, %v5997_v4  ;;  %v20835_v30 = vrot.slane %v5990_v37, %v18540_v33  ;;  %v20838_v55 = vrot.slane %v5997_v4, %v18540_v33  ;;  %v20851_v37 = vpop.f32.mrb[38].mxu1 }
 0x2f1   : > { %26740 = vst [vmem:[#allocation257_spill] sm:$0xff] %v20821_v54  ;;  %v2046_v25 = vadd.f32 %v20237_v3, %v19948_v50  ;;  %v20843_v32 = vrot.slane %v5998_v22, %v18540_v33  ;;  %v2130_v21 = vadd.f32 %v20609_v23, %v20673_v13  ;;  %v2232_v6 = vadd.f32 %v20619_v53, %v20692_v62 }
 0x2f2   : > { %26741 = vst [vmem:[#allocation258_spill] sm:$0xff] %v20827_v12  ;;  %26742 = vst [vmem:[#allocation259_spill] sm:$0xff] %v20835_v30  ;;  %v2057_v35 = vadd.f32 %v20237_v3, %v19984_v27  ;;  %v20856_v16 = vrot.slane %v5999_v5, %v18540_v33 }
 0x2f3   : > { %26743 = vst [vmem:[#allocation260_spill] sm:$0xff] %v20838_v55  ;;  %26744 = vst [vmem:[#allocation261_spill] sm:$0xff] %v20843_v32  ;;  %v2131_v13 = vsel %vm910_vm4, %v2046_v25, 0.0  ;;  %v2182_v27 = vmul.f32 %v2046_v25, %v2046_v25  ;;  %v5885_v62 = vcombine.high %v2046_v25, %v2046_v25  ;;  %v5892_v5 = vrot.slane %v2046_v25, %v18540_v33 }
 0x2f4   : > { %26745 = vst [vmem:[#allocation262_spill] sm:$0xff] %v20856_v16  ;;  %v2132_v4 = vadd.f32 %v2131_v13, %v2130_v21  ;;  %v2185_v16 = vmul.f32 %v2057_v35, %v2057_v35  ;;  %v6032_v56 = vcombine.high %v2057_v35, %v2057_v35  ;;  %v6039_v23 = vrot.slane %v2057_v35, %v18540_v33 }
 0x2f5   : > { %v2233_v54 = vsel %vm910_vm4, %v2182_v27, 0.0  ;;  %v5899_v50 = vrot.slane %v5885_v62, %v18540_v33  ;;  %v5900_v53 = vcombine.high %v5892_v5, %v5892_v5  ;;  %v20872_v30 = vrot.slane %v5892_v5, %v18540_v33 }
 0x2f6   : > { %v2234_v55 = vadd.f32 %v2233_v54, %v2232_v6  ;;  %v20875_v26 = vsel %vm910_vm4, %v2057_v35, 0.0  ;;  %v6046_v25 = vrot.slane %v6032_v56, %v18540_v33  ;;  %v6047_v13 = vcombine.high %v6039_v23, %v6039_v23  ;;  %v20892_v35 = vpop.f32.mrb[39].mxu1 }
 0x2f7   : > { %26746 = vst [vmem:[#allocation263_spill] sm:$0xff] %v20872_v30  ;;  %v5901_v22 = vcombine.high %v5899_v50, %v5899_v50  ;;  %v20878_v21 = vrot.slane %v5899_v50, %v18540_v33  ;;  %v20882_v27 = vrot.slane %v5900_v53, %v18540_v33  ;;  %v20887_v6 = vsel %vm910_vm4, %v2185_v16, 0.0 }
 0x2f8   : > { %v20890_v62 = vrot.slane %v6039_v23, %v18540_v33  ;;  %v6048_v5 = vcombine.high %v6046_v25, %v6046_v25  ;;  %v20900_v53 = vrot.slane %v6046_v25, %v18540_v33  ;;  %v20907_v23 = vrot.slane %v6047_v13, %v18540_v33 }
 0x2f9   : > { %26747 = vst [vmem:[#allocation264_spill] sm:$0xff] %v20878_v21  ;;  %26748 = vst [vmem:[#allocation265_spill] sm:$0xff] %v20882_v27  ;;  %v20895_v50 = vrot.slane %v5901_v22, %v18540_v33  ;;  %v2049_v25 = vadd.f32 %v20237_v3, %v20004_v58  ;;  %v2432_v54 = vadd.f32 %v20237_v3, %v20062_v2 }
 0x2fa   : > { %26749 = vst [vmem:[#allocation266_spill] sm:$0xff] %v20890_v62  ;;  %26751 = vst [vmem:[#allocation268_spill] sm:$0xff] %v20900_v53  ;;  %v20912_v32 = vrot.slane %v6048_v5, %v18540_v33  ;;  %v2508_v22 = vadd.f32 %v20763_v28, %v20809_v48  ;;  %v2610_v5 = vadd.f32 %v20768_v45, %v2608_v29  ;;  %v20931_v53 = vpop.f32.mrb[40].mxu1 }
 0x2fb   : > { %26750 = vst [vmem:[#allocation267_spill] sm:$0xff] %v20895_v50  ;;  %26752 = vst [vmem:[#allocation269_spill] sm:$0xff] %v20907_v23  ;;  %v2183_v56 = vmul.f32 %v2049_v25, %v2049_v25  ;;  %v5934_v62 = vcombine.high %v2049_v25, %v2049_v25  ;;  %v5941_v58 = vrot.slane %v2049_v25, %v18540_v33  ;;  %v20943_v23 = vpop.f32.mrb[41].mxu1 }
 0x2fc   : > { %26753 = vst [vmem:[#allocation270_spill] sm:$0xff] %v20912_v32  ;;  %v2133_v32 = vsel %vm910_vm4, %v2049_v25, 0.0  ;;  %v2562_v21 = vmul.f32 %v2432_v54, %v2432_v54  ;;  %v9120_v2 = vcombine.high %v2432_v54, %v2432_v54  ;;  %v2424_v16 = vadd.f32 %v20237_v3, %v20074_v42 }
 0x2fd   : > { %v2134_v12 = vadd.f32 %v2133_v32, %v2132_v4  ;;  %v2235_v13 = vsel %vm910_vm4, %v2183_v56, 0.0  ;;  %v5948_v28 = vrot.slane %v5934_v62, %v18540_v33  ;;  %v5949_v48 = vcombine.high %v5941_v58, %v5941_v58 }
 0x2fe   : > { %v20936_v45 = vrot.slane %v5941_v58, %v18540_v33  ;;  %v2236_v25 = vadd.f32 %v2235_v13, %v2234_v55  ;;  %v2513_v32 = vsel %vm910_vm4, %v2432_v54, 0.0  ;;  %v9127_v4 = vrot.slane %v2432_v54, %v18540_v33 }
 0x2ff   : > { %v20939_v29 = vadd.f32 %v20812_v0, %v2134_v12  ;;  %v5950_v42 = vcombine.high %v5948_v28, %v5948_v28  ;;  %v20946_v50 = vrot.slane %v5948_v28, %v18540_v33  ;;  %v20949_v62 = vrot.slane %v5949_v48, %v18540_v33 }
 0x300   : > { %26754 = vst [vmem:[#allocation271_spill] sm:$0xff] %v20936_v45  ;;  %v2615_v56 = vsel %vm910_vm4, %v2562_v21, 0.0  ;;  %v20953_v58 = vadd.f32 %v20830_v39, %v2236_v25  ;;  %v20958_v55 = vrot.slane %v9120_v2, %v18540_v33  ;;  %v9135_v12 = vcombine.high %v9127_v4, %v9127_v4 }
 0x301   : > { %26755 = vst [vmem:[#allocation272_spill] sm:$0xff] %v20946_v50  ;;  %26756 = vst [vmem:[#allocation273_spill] sm:$0xff] %v20949_v62  ;;  %v20961_v54 = vrot.slane %v5950_v42, %v18540_v33  ;;  %v20968_v21 = vrot.slane %v9127_v4, %v18540_v33  ;;  %v2509_v25 = vsel %vm910_vm4, %v2424_v16, 0.0  ;;  %v2560_v28 = vmul.f32 %v2424_v16, %v2424_v16  ;;  %v20982_v4 = vpop.f32.mrb[42].mxu1 }
 0x302   : > { %26757 = vst [vmem:[#allocation274_spill] sm:$0xff] %v20958_v55  ;;  %v20976_v48 = vrot.slane %v20958_v55, %v18540_v33  ;;  %v20980_v42 = vrot.slane %v9135_v12, %v18540_v33  ;;  %v2510_v13 = vadd.f32 %v2509_v25, %v2508_v22  ;;  %v9022_v0 = vcombine.high %v2424_v16, %v2424_v16 }
 0x303   : > { %26758 = vst [vmem:[#allocation275_spill] sm:$0xff] %v20961_v54  ;;  %26759 = vst [vmem:[#allocation276_spill] sm:$0xff] %v20968_v21  ;;  %v9029_v50 = vrot.slane %v2424_v16, %v18540_v33  ;;  %v2435_v2 = vadd.f32 %v20237_v3, %v20113_v19  ;;  %v2611_v55 = vsel %vm910_vm4, %v2560_v28, 0.0  ;;  %v2070_v22 = vadd.f32 %v20237_v3, %v20161_v51 }
 0x304   : > { %26760 = vst [vmem:[#allocation277_spill] sm:$0xff] %v20976_v48  ;;  %26761 = vst [vmem:[#allocation278_spill] sm:$0xff] %v20980_v42  ;;  %v2427_v48 = vadd.f32 %v20237_v3, %v20139_v14  ;;  %v20993_v12 = vrot.slane %v9022_v0, %v18540_v33  ;;  %v2448_v25 = vadd.f32 %v20237_v3, %v20184_v24  ;;  %v21006_v14 = vpop.f32.mrb[43].mxu1 }
 0x305   : > { %v2612_v39 = vadd.f32 %v2611_v55, %v2610_v5  ;;  %v9037_v21 = vcombine.high %v9029_v50, %v9029_v50  ;;  %v21000_v16 = vrot.slane %v9029_v50, %v18540_v33  ;;  %v21004_v19 = vadd.f32 %v20237_v3, %v20194_v40 }
 0x306   : > { %26762 = vst [vmem:[#allocation279_spill] sm:$0xff] %v20993_v12  ;;  %v21011_v28 = vsel %vm910_vm4, %v2435_v2, 0.0  ;;  %v2563_v51 = vmul.f32 %v2435_v2, %v2435_v2  ;;  %v9169_v42 = vcombine.high %v2435_v2, %v2435_v2  ;;  %v21015_v24 = vrot.slane %v20993_v12, %v18540_v33 }
 0x307   : > { %26763 = vst [vmem:[#allocation280_spill] sm:$0xff] %v21000_v16  ;;  %v21018_v50 = vrot.slane %v9037_v21, %v18540_v33  ;;  %v9176_v40 = vrot.slane %v2435_v2, %v18540_v33  ;;  %v2511_v3 = vsel %vm910_vm4, %v2427_v48, 0.0  ;;  %v2561_v54 = vmul.f32 %v2427_v48, %v2427_v48 }
 0x308   : > { %26764 = vst [vmem:[#allocation281_spill] sm:$0xff] %v21015_v24  ;;  %v21025_v55 = vrot.slane %v9169_v42, %v18540_v33  ;;  %v2512_v0 = vadd.f32 %v2511_v3, %v2510_v13  ;;  %v9071_v24 = vcombine.high %v2427_v48, %v2427_v48  ;;  %v9078_v21 = vrot.slane %v2427_v48, %v18540_v33 }
 0x309   : > { %26765 = vst [vmem:[#allocation282_spill] sm:$0xff] %v21018_v50  ;;  %v9184_v45 = vcombine.high %v9176_v40, %v9176_v40  ;;  %v21028_v62 = vrot.slane %v9176_v40, %v18540_v33  ;;  %v2617_v12 = vsel %vm910_vm4, %v2563_v51, 0.0  ;;  %v2613_v5 = vsel %vm910_vm4, %v2561_v54, 0.0 }
 0x30a   : > { %26766 = vst [vmem:[#allocation283_spill] sm:$0xff] %v21025_v55  ;;  %v2514_v50 = vadd.f32 %v2513_v32, %v2512_v0  ;;  %v21037_v42 = vrot.slane %v21025_v55, %v18540_v33  ;;  %v2614_v40 = vadd.f32 %v2613_v5, %v2612_v39  ;;  %v21043_v3 = vrot.slane %v9071_v24, %v18540_v33 }
 0x30b   : > { %26767 = vst [vmem:[#allocation284_spill] sm:$0xff] %v21028_v62  ;;  %v21040_v13 = vrot.slane %v9184_v45, %v18540_v33  ;;  %v9086_v51 = vcombine.high %v9078_v21, %v9078_v21  ;;  %v21048_v2 = vrot.slane %v9078_v21, %v18540_v33  ;;  %v2188_v32 = vmul.f32 %v2070_v22, %v2070_v22 }
 0x30c   : > { %26768 = vst [vmem:[#allocation285_spill] sm:$0xff] %v21037_v42  ;;  %26770 = vst [vmem:[#allocation287_spill] sm:$0xff] %v21043_v3  ;;  %v2616_v54 = vadd.f32 %v2615_v56, %v2614_v40  ;;  %v21053_v42 = vsel %vm910_vm4, %v2070_v22, 0.0  ;;  %v6179_v45 = vcombine.high %v2070_v22, %v2070_v22  ;;  %v21057_v39 = vrot.slane %v21043_v3, %v18540_v33 }
 0x30d   : > { %26769 = vst [vmem:[#allocation286_spill] sm:$0xff] %v21040_v13  ;;  %26771 = vst [vmem:[#allocation288_spill] sm:$0xff] %v21048_v2  ;;  %v21060_v24 = vrot.slane %v9086_v51, %v18540_v33  ;;  %v6186_v21 = vrot.slane %v2070_v22, %v18540_v33  ;;  %v21066_v56 = vsel %vm910_vm4, %v2188_v32, 0.0  ;;  %v2566_v48 = vmul.f32 %v2448_v25, %v2448_v25 }
 0x30e   : > { %26772 = vst [vmem:[#allocation289_spill] sm:$0xff] %v21057_v39  ;;  %v6193_v40 = vrot.slane %v6179_v45, %v18540_v33  ;;  %v9316_v0 = vcombine.high %v2448_v25, %v2448_v25  ;;  %v9323_v13 = vrot.slane %v2448_v25, %v18540_v33  ;;  %v2138_v51 = vadd.f32 %v20875_v26, %v20939_v29 }
 0x30f   : > { %26773 = vst [vmem:[#allocation290_spill] sm:$0xff] %v21060_v24  ;;  %v6194_v55 = vcombine.high %v6186_v21, %v6186_v21  ;;  %v21070_v62 = vrot.slane %v6186_v21, %v18540_v33  ;;  %v21079_v22 = vsel %vm910_vm4, %v2448_v25, 0.0  ;;  %v21090_v3 = vsel %vm910_vm4, %v2566_v48, 0.0 }
 0x310   : > { %v6195_v39 = vcombine.high %v6193_v40, %v6193_v40  ;;  %v21076_v5 = vrot.slane %v6193_v40, %v18540_v33  ;;  %v21082_v32 = vrot.slane %v9316_v0, %v18540_v33  ;;  %v9331_v26 = vcombine.high %v9323_v13, %v9323_v13 }
 0x311   : > { %26774 = vst [vmem:[#allocation291_spill] sm:$0xff] %v21070_v62  ;;  %v21085_v45 = vrot.slane %v6194_v55, %v18540_v33  ;;  %v21100_v40 = vrot.slane %v9323_v13, %v18540_v33  ;;  %v2186_v13 = vmul.f32 %v21004_v19, %v21004_v19  ;;  %v2240_v55 = vadd.f32 %v20887_v6, %v20953_v58 }
 0x312   : > { %26775 = vst [vmem:[#allocation292_spill] sm:$0xff] %v21076_v5  ;;  %26776 = vst [vmem:[#allocation293_spill] sm:$0xff] %v21082_v32  ;;  %v21093_v29 = vrot.slane %v6195_v39, %v18540_v33  ;;  %v21108_v21 = vrot.slane %v21082_v32, %v18540_v33  ;;  %v2139_v39 = vsel %vm910_vm4, %v21004_v19, 0.0  ;;  %v21113_v25 = vrot.slane %v9331_v26, %v18540_v33  ;;  %v21128_v32 = vld [vmem:[%s25548_s2] ss:$0 sm:$0xff] }
 0x313   : > { %26777 = vst [vmem:[#allocation294_spill] sm:$0xff] %v21085_v45  ;;  %26779 = vst [vmem:[#allocation296_spill] sm:$0xff] %v21100_v40  ;;  %v21115_v0 = vadd.f32 %v2139_v39, %v2138_v51  ;;  %v6081_v48 = vcombine.high %v21004_v19, %v21004_v19  ;;  %v2440_v51 = vadd.f32 %v21128_v32, %v20222_v20  ;;  %v2241_v6 = vsel %vm910_vm4, %v2186_v13, 0.0  ;;  %v21146_v40 = vpop.f32.mrb[44].mxu1 }
 0x314   : > { %26778 = vst [vmem:[#allocation295_spill] sm:$0xff] %v21093_v29  ;;  %26780 = vst [vmem:[#allocation297_spill] sm:$0xff] %v21108_v21  ;;  %v6088_v21 = vrot.slane %v21004_v19, %v18540_v33  ;;  %v2516_v26 = vadd.f32 %v21011_v28, %v2514_v50  ;;  %v2618_v58 = vadd.f32 %v2617_v12, %v2616_v54  ;;  %v21173_v45 = vpop.f32.mrb[45].mxu1 }
 0x315   : > { %26781 = vst [vmem:[#allocation298_spill] sm:$0xff] %v21113_v25  ;;  %v2073_v25 = vadd.f32 %v21128_v32, %v20249_v47  ;;  %v21138_v19 = vadd.f32 %v2241_v6, %v2240_v55  ;;  %v6095_v5 = vrot.slane %v6081_v48, %v18540_v33  ;;  %v2517_v20 = vsel %vm910_vm4, %v2440_v51, 0.0 }
 0x316   : > { %v6096_v29 = vcombine.high %v6088_v21, %v6088_v21  ;;  %v21142_v62 = vrot.slane %v6088_v21, %v18540_v33  ;;  %v2564_v28 = vmul.f32 %v2440_v51, %v2440_v51  ;;  %v9218_v50 = vcombine.high %v2440_v51, %v2440_v51 }
 0x317   : > { %v9225_v39 = vrot.slane %v2440_v51, %v18540_v33  ;;  %v6097_v12 = vcombine.high %v6095_v5, %v6095_v5  ;;  %v21149_v54 = vrot.slane %v6095_v5, %v18540_v33  ;;  %v2451_v55 = vadd.f32 %v21128_v32, %v20263_v15 }
 0x318   : > { %26782 = vst [vmem:[#allocation299_spill] sm:$0xff] %v21142_v62  ;;  %v21152_v47 = vrot.slane %v6096_v29, %v18540_v33  ;;  %v21158_v48 = vadd.f32 %v2517_v20, %v2516_v26  ;;  %v2619_v13 = vsel %vm910_vm4, %v2564_v28, 0.0  ;;  %v21162_v51 = vrot.slane %v9218_v50, %v18540_v33 }
 0x319   : > { %26783 = vst [vmem:[#allocation300_spill] sm:$0xff] %v21149_v54  ;;  %v21165_v6 = vrot.slane %v6097_v12, %v18540_v33  ;;  %v21171_v15 = vadd.f32 %v2619_v13, %v2618_v58  ;;  %v9233_v20 = vcombine.high %v9225_v39, %v9225_v39  ;;  %v21180_v50 = vrot.slane %v9225_v39, %v18540_v33 }
 0x31a   : > { %26784 = vst [vmem:[#allocation301_spill] sm:$0xff] %v21152_v47  ;;  %26785 = vst [vmem:[#allocation302_spill] sm:$0xff] %v21162_v51  ;;  %v21184_v12 = vrot.slane %v21162_v51, %v18540_v33  ;;  %v2189_v5 = vmul.f32 %v2073_v25, %v2073_v25  ;;  %v6228_v29 = vcombine.high %v2073_v25, %v2073_v25  ;;  %v21193_v21 = vsel %vm910_vm4, %v2073_v25, 0.0 }
 0x31b   : > { %26786 = vst [vmem:[#allocation303_spill] sm:$0xff] %v21165_v6  ;;  %26787 = vst [vmem:[#allocation304_spill] sm:$0xff] %v21180_v50  ;;  %v6235_v58 = vrot.slane %v2073_v25, %v18540_v33  ;;  %v21188_v13 = vrot.slane %v9233_v20, %v18540_v33  ;;  %v2567_v28 = vmul.f32 %v2451_v55, %v2451_v55 }
 0x31c   : > { %26788 = vst [vmem:[#allocation305_spill] sm:$0xff] %v21184_v12  ;;  %v6242_v39 = vrot.slane %v6228_v29, %v18540_v33  ;;  %v21200_v12 = vsel %vm910_vm4, %v2451_v55, 0.0  ;;  %v21203_v6 = vsel %vm910_vm4, %v2189_v5, 0.0  ;;  %v9365_v20 = vcombine.high %v2451_v55, %v2451_v55 }
 0x31d   : > { %26789 = vst [vmem:[#allocation306_spill] sm:$0xff] %v21188_v13  ;;  %v6243_v54 = vcombine.high %v6235_v58, %v6235_v58  ;;  %v21197_v51 = vrot.slane %v6235_v58, %v18540_v33  ;;  %v9372_v13 = vrot.slane %v2451_v55, %v18540_v33  ;;  %v2065_v25 = vadd.f32 %v21128_v32, %v20282_v46 }
 0x31e   : > { %v6244_v26 = vcombine.high %v6242_v39, %v6242_v39  ;;  %v21209_v50 = vrot.slane %v6242_v39, %v18540_v33  ;;  %v21215_v58 = vsel %vm910_vm4, %v2567_v28, 0.0  ;;  %v21220_v62 = vrot.slane %v9365_v20, %v18540_v33 }
 0x31f   : > { %26790 = vst [vmem:[#allocation307_spill] sm:$0xff] %v21197_v51  ;;  %v21212_v29 = vrot.slane %v6243_v54, %v18540_v33  ;;  %v9380_v55 = vcombine.high %v9372_v13, %v9372_v13  ;;  %v21223_v47 = vrot.slane %v9372_v13, %v18540_v33  ;;  %v2141_v39 = vsel %vm910_vm4, %v2065_v25, 0.0 }
 0x320   : > { %26791 = vst [vmem:[#allocation308_spill] sm:$0xff] %v21209_v50  ;;  %26793 = vst [vmem:[#allocation310_spill] sm:$0xff] %v21220_v62  ;;  %v21226_v46 = vrot.slane %v6244_v26, %v18540_v33  ;;  %v21239_v13 = vrot.slane %v21220_v62, %v18540_v33  ;;  %v2142_v54 = vadd.f32 %v2141_v39, %v21115_v0 }
 0x321   : > { %26792 = vst [vmem:[#allocation309_spill] sm:$0xff] %v21212_v29  ;;  %26794 = vst [vmem:[#allocation311_spill] sm:$0xff] %v21223_v47  ;;  %v21242_v26 = vrot.slane %v9380_v55, %v18540_v33  ;;  %v2187_v50 = vmul.f32 %v2065_v25, %v2065_v25  ;;  %v6137_v28 = vrot.slane %v2065_v25, %v18540_v33 }
 0x322   : > { %26795 = vst [vmem:[#allocation312_spill] sm:$0xff] %v21226_v46  ;;  %26796 = vst [vmem:[#allocation313_spill] sm:$0xff] %v21239_v13  ;;  %v6130_v46 = vcombine.high %v2065_v25, %v2065_v25  ;;  %v2443_v5 = vadd.f32 %v21128_v32, %v20323_v34  ;;  %v2086_v20 = vadd.f32 %v21128_v32, %v20413_v1  ;;  %v21264_v1 = vpop.f32.mrb[46].mxu1 }
 0x323   : > { %26797 = vst [vmem:[#allocation314_spill] sm:$0xff] %v21242_v26  ;;  %v21254_v13 = vadd.f32 %v21128_v32, %v20439_v61  ;;  %v2144_v55 = vadd.f32 %v21053_v42, %v2142_v54  ;;  %v2243_v0 = vsel %vm910_vm4, %v2187_v50, 0.0  ;;  %v6145_v25 = vcombine.high %v6137_v28, %v6137_v28 }
 0x324   : > { %v6144_v39 = vrot.slane %v6130_v46, %v18540_v33  ;;  %v2244_v62 = vadd.f32 %v2243_v0, %v21138_v19  ;;  %v21261_v51 = vrot.slane %v6137_v28, %v18540_v33  ;;  %v2519_v34 = vsel %vm910_vm4, %v2443_v5, 0.0  ;;  %v21273_v46 = vpop.f32.mrb[47].mxu1 }
 0x325   : > { %v2565_v47 = vmul.f32 %v2443_v5, %v2443_v5  ;;  %v21270_v42 = vrot.slane %v6145_v25, %v18540_v33  ;;  %v2520_v50 = vadd.f32 %v2519_v34, %v21158_v48  ;;  %v2089_v0 = vadd.f32 %v21128_v32, %v20448_v8 }
 0x326   : > { %26798 = vst [vmem:[#allocation315_spill] sm:$0xff] %v21261_v51  ;;  %v6146_v26 = vcombine.high %v6144_v39, %v6144_v39  ;;  %v21267_v61 = vrot.slane %v6144_v39, %v18540_v33  ;;  %v2246_v19 = vadd.f32 %v21066_v56, %v2244_v62  ;;  %v9274_v8 = vrot.slane %v2443_v5, %v18540_v33 }
 0x327   : > { %26800 = vst [vmem:[#allocation317_spill] sm:$0xff] %v21270_v42  ;;  %v2621_v28 = vsel %vm910_vm4, %v2565_v47, 0.0  ;;  %v21289_v34 = vadd.f32 %v21079_v22, %v2520_v50  ;;  %v9267_v47 = vcombine.high %v2443_v5, %v2443_v5  ;;  %v2192_v54 = vmul.f32 %v2086_v20, %v2086_v20 }
 0x328   : > { %26799 = vst [vmem:[#allocation316_spill] sm:$0xff] %v21267_v61  ;;  %v21282_v39 = vrot.slane %v6146_v26, %v18540_v33  ;;  %v2622_v56 = vadd.f32 %v2621_v28, %v21171_v15  ;;  %v6375_v26 = vcombine.high %v2086_v20, %v2086_v20  ;;  %v6382_v29 = vrot.slane %v2086_v20, %v18540_v33 }
 0x329   : > { %v2146_v25 = vadd.f32 %v21193_v21, %v2144_v55  ;;  %v21301_v22 = vrot.slane %v9267_v47, %v18540_v33  ;;  %v9282_v50 = vcombine.high %v9274_v8, %v9274_v8  ;;  %v21304_v48 = vrot.slane %v9274_v8, %v18540_v33 }
 0x32a   : > { %26801 = vst [vmem:[#allocation318_spill] sm:$0xff] %v21282_v39  ;;  %v21298_v61 = vadd.f32 %v21090_v3, %v2622_v56  ;;  %v21307_v15 = vsel %vm910_vm4, %v2086_v20, 0.0  ;;  %v6389_v5 = vrot.slane %v6375_v26, %v18540_v33  ;;  %v6390_v28 = vcombine.high %v6382_v29, %v6382_v29 }
 0x32b   : > { %26802 = vst [vmem:[#allocation319_spill] sm:$0xff] %v21301_v22  ;;  %26803 = vst [vmem:[#allocation320_spill] sm:$0xff] %v21304_v48  ;;  %v21311_v62 = vrot.slane %v6382_v29, %v18540_v33  ;;  %v21317_v21 = vrot.slane %v21301_v22, %v18540_v33  ;;  %v21320_v55 = vrot.slane %v9282_v50, %v18540_v33  ;;  %v21323_v56 = vsel %vm910_vm4, %v2192_v54, 0.0 }
 0x32c   : > { %v6391_v47 = vcombine.high %v6389_v5, %v6389_v5  ;;  %v21328_v29 = vrot.slane %v6389_v5, %v18540_v33  ;;  %v21331_v8 = vrot.slane %v6390_v28, %v18540_v33  ;;  %v2147_v50 = vsel %vm910_vm4, %v21254_v13, 0.0 }
 0x32d   : > { %26804 = vst [vmem:[#allocation321_spill] sm:$0xff] %v21311_v62  ;;  %26805 = vst [vmem:[#allocation322_spill] sm:$0xff] %v21317_v21  ;;  %v2190_v54 = vmul.f32 %v21254_v13, %v21254_v13  ;;  %v2248_v3 = vadd.f32 %v21203_v6, %v2246_v19  ;;  %v2148_v21 = vadd.f32 %v2147_v50, %v2146_v25  ;;  %v2153_v50 = vsel %vm910_vm4, %v2089_v0, 0.0 }
 0x32e   : > { %26806 = vst [vmem:[#allocation323_spill] sm:$0xff] %v21320_v55  ;;  %26807 = vst [vmem:[#allocation324_spill] sm:$0xff] %v21328_v29  ;;  %v21341_v20 = vrot.slane %v6391_v47, %v18540_v33  ;;  %v6277_v48 = vcombine.high %v21254_v13, %v21254_v13  ;;  %v6284_v6 = vrot.slane %v21254_v13, %v18540_v33 }
 0x32f   : > { %26808 = vst [vmem:[#allocation325_spill] sm:$0xff] %v21331_v8  ;;  %v2249_v22 = vsel %vm910_vm4, %v2190_v54, 0.0  ;;  %v2193_v47 = vmul.f32 %v2089_v0, %v2089_v0  ;;  %v6431_v5 = vrot.slane %v2089_v0, %v18540_v33  ;;  %v2081_v13 = vadd.f32 %v21128_v32, %v20458_v38 }
 0x330   : > { %26809 = vst [vmem:[#allocation326_spill] sm:$0xff] %v21341_v20  ;;  %v2250_v19 = vadd.f32 %v2249_v22, %v2248_v3  ;;  %v6424_v20 = vcombine.high %v2089_v0, %v2089_v0  ;;  %v6291_v29 = vrot.slane %v6277_v48, %v18540_v33  ;;  %v6292_v28 = vcombine.high %v6284_v6, %v6284_v6  ;;  %v21366_v22 = vpop.f32.mrb[48].mxu1 }
 0x331   : > { %v21357_v25 = vrot.slane %v6284_v6, %v18540_v33  ;;  %v6439_v26 = vcombine.high %v6431_v5, %v6431_v5  ;;  %v21362_v62 = vrot.slane %v6431_v5, %v18540_v33  ;;  %v2255_v0 = vsel %vm910_vm4, %v2193_v47, 0.0  ;;  %v21375_v8 = vpop.f32.mrb[49].mxu1 }
 0x332   : > { %v6438_v54 = vrot.slane %v6424_v20, %v18540_v33  ;;  %v6293_v3 = vcombine.high %v6291_v29, %v6291_v29  ;;  %v21369_v48 = vrot.slane %v6291_v29, %v18540_v33  ;;  %v21372_v6 = vrot.slane %v6292_v28, %v18540_v33 }
 0x333   : > { %26810 = vst [vmem:[#allocation327_spill] sm:$0xff] %v21357_v25  ;;  %26811 = vst [vmem:[#allocation328_spill] sm:$0xff] %v21362_v62  ;;  %v21383_v38 = vrot.slane %v6439_v26, %v18540_v33  ;;  %v2149_v28 = vsel %vm910_vm4, %v2081_v13, 0.0  ;;  %v6333_v47 = vrot.slane %v2081_v13, %v18540_v33  ;;  %v2524_v16 = vadd.f32 %v21200_v12, %v21289_v34 }
 0x334   : > { %26812 = vst [vmem:[#allocation329_spill] sm:$0xff] %v21369_v48  ;;  %26813 = vst [vmem:[#allocation330_spill] sm:$0xff] %v21372_v6  ;;  %v6440_v5 = vcombine.high %v6438_v54, %v6438_v54  ;;  %v21380_v55 = vrot.slane %v6438_v54, %v18540_v33  ;;  %v21386_v29 = vrot.slane %v6293_v3, %v18540_v33 }
 0x335   : > { %26815 = vst [vmem:[#allocation332_spill] sm:$0xff] %v21383_v38  ;;  %v2191_v48 = vmul.f32 %v2081_v13, %v2081_v13  ;;  %v2719_v54 = vadd.f32 %v21128_v32, %v20547_v49  ;;  %v21414_v38 = vrot.slane %v6333_v47, %v18540_v33  ;;  %v2467_v52 = vadd.f32 %v21128_v32, %v20752_v60 }
 0x336   : > { %26814 = vst [vmem:[#allocation331_spill] sm:$0xff] %v21380_v55  ;;  %26816 = vst [vmem:[#allocation333_spill] sm:$0xff] %v21386_v29  ;;  %v21395_v20 = vrot.slane %v6440_v5, %v18540_v33  ;;  %v6326_v29 = vcombine.high %v2081_v13, %v2081_v13  ;;  %v2150_v5 = vadd.f32 %v2149_v28, %v2148_v21 }
 0x337   : > { %v2251_v26 = vsel %vm910_vm4, %v2191_v48, 0.0  ;;  %v6341_v55 = vcombine.high %v6333_v47, %v6333_v47  ;;  %26818 = vst [vmem:[#allocation335_spill] sm:$0xff] %v21414_v38  ;;  %v21419_v21 = vadd.f32 %v21128_v32, %v20572_v17  ;;  %v2915_v39 = vmul.f32 %v2719_v54, %v2719_v54 }
 0x338   : > { %26817 = vst [vmem:[#allocation334_spill] sm:$0xff] %v21395_v20  ;;  %v2727_v20 = vadd.f32 %v21128_v32, %v20524_v44  ;;  %v6340_v3 = vrot.slane %v6326_v29, %v18540_v33  ;;  %v2152_v13 = vadd.f32 %v21307_v15, %v2150_v5  ;;  %v2252_v51 = vadd.f32 %v2251_v26, %v2250_v19 }
 0x339   : > { %v21425_v49 = vrot.slane %v6341_v55, %v18540_v33  ;;  %v9898_v17 = vcombine.high %v2719_v54, %v2719_v54  ;;  %v2918_v25 = vmul.f32 %v21419_v21, %v21419_v21  ;;  %v10045_v2 = vcombine.high %v21419_v21, %v21419_v21 }
 0x33a   : > { %v2917_v42 = vmul.f32 %v2727_v20, %v2727_v20  ;;  %v6342_v44 = vcombine.high %v6340_v3, %v6340_v3  ;;  %v21422_v28 = vrot.slane %v6340_v3, %v18540_v33  ;;  %v21428_v48 = vsel %vm910_vm4, %v2727_v20, 0.0 }
 0x33b   : > { %26820 = vst [vmem:[#allocation337_spill] sm:$0xff] %v21425_v49  ;;  %v2154_v29 = vadd.f32 %v2153_v50, %v2152_v13  ;;  %v2254_v47 = vadd.f32 %v21323_v56, %v2252_v51  ;;  %v9996_v3 = vcombine.high %v2727_v20, %v2727_v20  ;;  %v10003_v56 = vrot.slane %v2727_v20, %v18540_v33 }
 0x33c   : > { %26819 = vst [vmem:[#allocation336_spill] sm:$0xff] %v21422_v28  ;;  %v21436_v19 = vrot.slane %v6342_v44, %v18540_v33  ;;  %v21441_v55 = vsel %vm910_vm4, %v2917_v42, 0.0  ;;  %v9905_v44 = vrot.slane %v2719_v54, %v18540_v33  ;;  %v9912_v20 = vrot.slane %v9898_v17, %v18540_v33 }
 0x33d   : > { %v2155_v5 = vrot.slane %v2154_v29, 4  ;;  %v2256_v50 = vadd.f32 %v2255_v0, %v2254_v47  ;;  %v10010_v13 = vrot.slane %v9996_v3, %v18540_v33  ;;  %v10011_v26 = vcombine.high %v10003_v56, %v10003_v56 }
 0x33e   : > { %26821 = vst [vmem:[#allocation338_spill] sm:$0xff] %v21436_v19  ;;  %v21449_v42 = vrot.slane %v10003_v56, %v18540_v33  ;;  %v2845_v47 = vsel %vm910_vm4, %v2719_v54, 0.0  ;;  %v9913_v38 = vcombine.high %v9905_v44, %v9905_v44  ;;  %v21467_v54 = vpop.f32.mrb[50].mxu1  ;;  %v21479_v56 = vrot.slane %v9912_v20, %v18540_v33 }
 0x33f   : > { %v2156_v15 = vadd.f32 %v2155_v5, %v2154_v29  ;;  %v2257_v62 = vrot.slane %v2256_v50, 4  ;;  %v10012_v28 = vcombine.high %v10010_v13, %v10010_v13  ;;  %v21452_v0 = vrot.slane %v10010_v13, %v18540_v33 }
 0x340   : > { %v21457_v19 = vrot.slane %v10011_v26, %v18540_v33  ;;  %v2947_v29 = vsel %vm910_vm4, %v2915_v39, 0.0  ;;  %v9914_v26 = vcombine.high %v9912_v20, %v9912_v20  ;;  %v21482_v13 = vrot.slane %v9913_v38, %v18540_v33 }
 0x341   : > { %v2157_v51 = vrot.slane %v2156_v15, 2  ;;  %v2258_v3 = vadd.f32 %v2257_v62, %v2256_v50  ;;  %v21461_v5 = vrot.slane %v10012_v28, %v18540_v33  ;;  %v21471_v50 = vpop.f32.mrb[51].mxu1  ;;  %v21476_v28 = vrot.slane %v9905_v44, %v18540_v33 }
 0x342   : > { %v21486_v62 = vsel %vm910_vm4, %v21419_v21, 0.0  ;;  %v21491_v39 = vrot.slane %v9914_v26, %v18540_v33  ;;  %v21504_v26 = vsel %vm910_vm4, %v2918_v25, 0.0  ;;  %v10052_v44 = vrot.slane %v21419_v21, %v18540_v33  ;;  %v21570_v41 = vpop.f32.mrb[52].mxu1 }
 0x343   : > { %v2158_v17 = vadd.f32 %v2157_v51, %v2156_v15  ;;  %v2259_v49 = vrot.slane %v2258_v3, 2  ;;  %v2722_v20 = vadd.f32 %v21128_v32, %v20616_v36  ;;  %v2464_v38 = vadd.f32 %v21128_v32, %v20670_v63  ;;  %v26824_v36 = vld [vmem:[#allocation164_spill] sm:$0xff] }
 0x344   : > { %v10059_v6 = vrot.slane %v10045_v2, %v18540_v33  ;;  %v10060_v25 = vcombine.high %v10052_v44, %v10052_v44  ;;  %v21519_v30 = vrot.slane %v10052_v44, %v18540_v33  ;;  %v2456_v44 = vadd.f32 %v21128_v32, %v20677_v10 }
 0x345   : > { %v2159_v15 = vrot.slane %v2158_v17, 1  ;;  %v2260_v51 = vadd.f32 %v2259_v49, %v2258_v3  ;;  %v2846_v21 = vsel %vm910_vm4, %v2722_v20, 0.0  ;;  %v2916_v27 = vmul.f32 %v2722_v20, %v2722_v20 }
 0x346   : > { %v10061_v63 = vcombine.high %v10059_v6, %v10059_v6  ;;  %v21529_v2 = vrot.slane %v10060_v25, %v18540_v33  ;;  %v9519_v12 = vrot.slane %v2464_v38, %v18540_v33  ;;  %v21615_v60 = vadd.f32 %v21128_v32, %v20832_v18 }
 0x347   : > { %v2160_v49 = vadd.f32 %v2159_v15, %v2158_v17  ;;  %v2261_v3 = vrot.slane %v2260_v51, 1  ;;  %v26822_v17 = vld [vmem:[#allocation160_spill] sm:$0xff]  ;;  %v2948_v34 = vsel %vm910_vm4, %v2916_v27, 0.0  ;;  %v9954_v27 = vrot.slane %v2722_v20, %v18540_v33 }
 0x348   : > { %26823 = vst [vmem:[#allocation160_spill] sm:$0xff] %v21519_v30  ;;  %26826 = vst [vmem:[#allocation339_spill] sm:$0xff] %v21529_v2 }
 0x349   : > { %v21513_v15 = vadd.f32 %v2160_v49, %v26822_v17  ;;  %v2262_v24 = vadd.f32 %v2261_v3, %v2260_v51  ;;  %v21526_v49 = vrot.slane %v10059_v6, %v18540_v33  ;;  %v2847_v51 = vadd.f32 %v2846_v21, %v2845_v47 }
 0x34a   : > { %v21537_v3 = vrot.slane %v10061_v63, %v18540_v33  ;;  %v2949_v47 = vadd.f32 %v2948_v34, %v2947_v29  ;;  %v9947_v21 = vcombine.high %v2722_v20, %v2722_v20  ;;  %v9512_v63 = vcombine.high %v2464_v38, %v2464_v38 }
 0x34b   : > { %v21523_v57 = vadd.f32 %v2262_v24, %v26824_v36  ;;  %26825 = vst [vmem:[#allocation164_spill] sm:$0xff] %v21526_v49  ;;  %v2849_v6 = vadd.f32 %v21428_v48, %v2847_v51  ;;  %v2570_v36 = vmul.f32 %v2464_v38, %v2464_v38  ;;  %v9962_v48 = vcombine.high %v9954_v27, %v9954_v27 }
 0x34c   : > { %26827 = vst [vmem:[#allocation340_spill] sm:$0xff] %v21537_v3  ;;  %v21548_v10 = vadd.f32 %v21441_v55, %v2949_v47  ;;  %v9961_v24 = vrot.slane %v9947_v21, %v18540_v33  ;;  %v21553_v29 = vrot.slane %v9954_v27, %v18540_v33  ;;  %v2529_v51 = vsel %vm910_vm4, %v2464_v38, 0.0 }
 0x34d   : > { %v2631_v34 = vsel %vm910_vm4, %v2570_v36, 0.0  ;;  %v21558_v17 = vrot.slane %v9512_v63, %v18540_v33  ;;  %v9527_v20 = vcombine.high %v9519_v12, %v9519_v12  ;;  %v2525_v55 = vsel %vm910_vm4, %v2456_v44, 0.0 }
 0x34e   : > { %v9963_v47 = vcombine.high %v9961_v24, %v9961_v24  ;;  %v21562_v25 = vrot.slane %v9961_v24, %v18540_v33  ;;  %v21565_v21 = vrot.slane %v9962_v48, %v18540_v33  ;;  %v21568_v27 = vrot.slane %v9519_v12, %v18540_v33  ;;  %v21582_v48 = vpop.f32.mrb[53].mxu1 }
 0x34f   : > { %26828 = vst [vmem:[#allocation341_spill] sm:$0xff] %v21558_v17  ;;  %v21580_v24 = vrot.slane %v21558_v17, %v18540_v33  ;;  %v21592_v36 = vrot.slane %v9527_v20, %v18540_v33  ;;  %v2526_v49 = vadd.f32 %v2525_v55, %v2524_v16  ;;  %v2568_v63 = vmul.f32 %v2456_v44, %v2456_v44 }
 0x350   : > { %26829 = vst [vmem:[#allocation342_spill] sm:$0xff] %v21568_v27  ;;  %v21585_v12 = vrot.slane %v9963_v47, %v18540_v33  ;;  %v2626_v17 = vadd.f32 %v21215_v58, %v21298_v61  ;;  %v9421_v47 = vrot.slane %v2456_v44, %v18540_v33  ;;  %v2459_v38 = vadd.f32 %v21128_v32, %v20785_v7 }
 0x351   : > { %26830 = vst [vmem:[#allocation343_spill] sm:$0xff] %v21580_v24  ;;  %26831 = vst [vmem:[#allocation344_spill] sm:$0xff] %v21592_v36  ;;  %v9414_v24 = vcombine.high %v2456_v44, %v2456_v44  ;;  %v2627_v20 = vsel %vm910_vm4, %v2568_v63, 0.0  ;;  %v2743_v58 = vadd.f32 %v21128_v32, %v20824_v31  ;;  %v2851_v61 = vadd.f32 %v21486_v62, %v2849_v6 }
 0x352   : > { %v2628_v55 = vadd.f32 %v2627_v20, %v2626_v17  ;;  %v9429_v3 = vcombine.high %v9421_v47, %v9421_v47  ;;  %v21611_v44 = vrot.slane %v9421_v47, %v18540_v33  ;;  %v2531_v63 = vsel %vm910_vm4, %v2467_v52, 0.0 }
 0x353   : > { %v21605_v16 = vrot.slane %v9414_v24, %v18540_v33  ;;  %v2571_v24 = vmul.f32 %v2467_v52, %v2467_v52  ;;  %v9561_v27 = vcombine.high %v2467_v52, %v2467_v52  ;;  %v9568_v6 = vrot.slane %v2467_v52, %v18540_v33 }
 0x354   : > { %26833 = vst [vmem:[#allocation346_spill] sm:$0xff] %v21611_v44  ;;  %v21625_v62 = vrot.slane %v9429_v3, %v18540_v33  ;;  %v2527_v17 = vsel %vm910_vm4, %v2459_v38, 0.0  ;;  %v2569_v7 = vmul.f32 %v2459_v38, %v2459_v38  ;;  %v9470_v3 = vrot.slane %v2459_v38, %v18540_v33 }
 0x355   : > { %26832 = vst [vmem:[#allocation345_spill] sm:$0xff] %v21605_v16  ;;  %v21622_v31 = vrot.slane %v21605_v16, %v18540_v33  ;;  %v21632_v47 = vrot.slane %v9561_v27, %v18540_v33  ;;  %v2528_v20 = vadd.f32 %v2527_v17, %v2526_v49  ;;  %v9576_v36 = vcombine.high %v9568_v6, %v9568_v6 }
 0x356   : > { %26835 = vst [vmem:[#allocation348_spill] sm:$0xff] %v21625_v62  ;;  %v21635_v30 = vrot.slane %v9568_v6, %v18540_v33  ;;  %v2633_v16 = vsel %vm910_vm4, %v2571_v24, 0.0  ;;  %v2629_v18 = vsel %vm910_vm4, %v2569_v7, 0.0  ;;  %v9478_v44 = vcombine.high %v9470_v3, %v9470_v3 }
 0x357   : > { %26834 = vst [vmem:[#allocation347_spill] sm:$0xff] %v21622_v31  ;;  %26836 = vst [vmem:[#allocation349_spill] sm:$0xff] %v21632_v47  ;;  %v9463_v31 = vcombine.high %v2459_v38, %v2459_v38  ;;  %v2530_v62 = vadd.f32 %v2529_v51, %v2528_v20  ;;  %v21644_v27 = vrot.slane %v21632_v47, %v18540_v33 }
 0x358   : > { %26837 = vst [vmem:[#allocation350_spill] sm:$0xff] %v21635_v30  ;;  %v21647_v49 = vrot.slane %v9576_v36, %v18540_v33  ;;  %v2630_v6 = vadd.f32 %v2629_v18, %v2628_v55  ;;  %v21655_v51 = vrot.slane %v9470_v3, %v18540_v33  ;;  %v21664_v55 = vsel %vm910_vm4, %v2743_v58, 0.0 }
 0x359   : > { %26838 = vst [vmem:[#allocation351_spill] sm:$0xff] %v21644_v27  ;;  %v21650_v17 = vrot.slane %v9463_v31, %v18540_v33  ;;  %v2532_v24 = vadd.f32 %v2531_v63, %v2530_v62  ;;  %v21667_v18 = vrot.slane %v9478_v44, %v18540_v33  ;;  %v2921_v63 = vmul.f32 %v2743_v58, %v2743_v58 }
 0x35a   : > { %26839 = vst [vmem:[#allocation352_spill] sm:$0xff] %v21647_v49  ;;  %26841 = vst [vmem:[#allocation354_spill] sm:$0xff] %v21655_v51  ;;  %v2632_v7 = vadd.f32 %v2631_v34, %v2630_v6  ;;  %v10192_v62 = vcombine.high %v2743_v58, %v2743_v58  ;;  %v10199_v3 = vrot.slane %v2743_v58, %v18540_v33  ;;  %v2852_v6 = vsel %vm910_vm4, %v21615_v60, 0.0 }
 0x35b   : > { %26840 = vst [vmem:[#allocation353_spill] sm:$0xff] %v21650_v17  ;;  %v21661_v36 = vrot.slane %v21650_v17, %v18540_v33  ;;  %v2533_v31 = vrot.slane %v2532_v24, 4  ;;  %26843 = vst [vmem:[#allocation356_spill] sm:$0xff] %v21667_v18  ;;  %v2853_v27 = vadd.f32 %v2852_v6, %v2851_v61  ;;  %v2919_v47 = vmul.f32 %v21615_v60, %v21615_v60 }
 0x35c   : > { %v2634_v52 = vadd.f32 %v2633_v16, %v2632_v7  ;;  %v10206_v20 = vrot.slane %v10192_v62, %v18540_v33  ;;  %v10207_v30 = vcombine.high %v10199_v3, %v10199_v3  ;;  %v21678_v49 = vrot.slane %v10199_v3, %v18540_v33  ;;  %v21682_v7 = vpop.f32.mrb[54].mxu1 }
 0x35d   : > { %26842 = vst [vmem:[#allocation355_spill] sm:$0xff] %v21661_v36  ;;  %v2534_v38 = vadd.f32 %v2533_v31, %v2532_v24  ;;  %v2953_v16 = vadd.f32 %v21504_v26, %v21548_v10  ;;  %v2954_v61 = vsel %vm910_vm4, %v2919_v47, 0.0  ;;  %v21688_v31 = vpop.f32.mrb[55].mxu1  ;;  %v21691_v6 = vsel %vm910_vm4, %v2921_v63, 0.0 }
 0x35e   : > { %v2635_v44 = vrot.slane %v2634_v52, 4  ;;  %26844 = vst [vmem:[#allocation357_spill] sm:$0xff] %v21678_v49  ;;  %v10208_v34 = vcombine.high %v10206_v20, %v10206_v20  ;;  %v21685_v24 = vrot.slane %v10206_v20, %v18540_v33  ;;  %v21694_v3 = vrot.slane %v10207_v30, %v18540_v33 }
 0x35f   : > { %v2535_v58 = vrot.slane %v2534_v38, 2  ;;  %v2955_v47 = vadd.f32 %v2954_v61, %v2953_v16  ;;  %v10094_v63 = vcombine.high %v21615_v60, %v21615_v60  ;;  %v10101_v30 = vrot.slane %v21615_v60, %v18540_v33 }
 0x360   : > { %26845 = vst [vmem:[#allocation358_spill] sm:$0xff] %v21685_v24  ;;  %v2636_v62 = vadd.f32 %v2635_v44, %v2634_v52  ;;  %26846 = vst [vmem:[#allocation359_spill] sm:$0xff] %v21694_v3  ;;  %v21699_v36 = vrot.slane %v10208_v34, %v18540_v33  ;;  %v2746_v34 = vadd.f32 %v21128_v32, %v20851_v37  ;;  %v21932_v3 = vld [vmem:[%s25548_s2] ss:$0 sm:$0xff] }
 0x361   : > { %v2536_v10 = vadd.f32 %v2535_v58, %v2534_v38  ;;  %v2738_v16 = vadd.f32 %v21128_v32, %v20892_v35  ;;  %v10108_v61 = vrot.slane %v10094_v63, %v18540_v33  ;;  %v10109_v52 = vcombine.high %v10101_v30, %v10101_v30 }
 0x362   : > { %26847 = vst [vmem:[#allocation360_spill] sm:$0xff] %v21699_v36  ;;  %v2637_v17 = vrot.slane %v2636_v62, 2  ;;  %v21717_v20 = vrot.slane %v10101_v30, %v18540_v33  ;;  %v2922_v51 = vmul.f32 %v2746_v34, %v2746_v34  ;;  %v10241_v60 = vcombine.high %v2746_v34, %v2746_v34 }
 0x363   : > { %v2537_v44 = vrot.slane %v2536_v10, 1  ;;  %v2759_v18 = vadd.f32 %v21128_v32, %v20931_v53  ;;  %v10110_v24 = vcombine.high %v10108_v61, %v10108_v61  ;;  %v21722_v37 = vrot.slane %v10108_v61, %v18540_v33 }
 0x364   : > { %v2638_v58 = vadd.f32 %v2637_v17, %v2636_v62  ;;  %v2858_v35 = vsel %vm910_vm4, %v2746_v34, 0.0  ;;  %v21729_v62 = vrot.slane %v10109_v52, %v18540_v33  ;;  %v2960_v61 = vsel %vm910_vm4, %v2922_v51, 0.0 }
 0x365   : > { %v2538_v26 = vadd.f32 %v2537_v44, %v2536_v10  ;;  %v21736_v30 = vrot.slane %v10110_v24, %v18540_v33  ;;  %v2854_v52 = vsel %vm910_vm4, %v2738_v16, 0.0  ;;  %v2920_v36 = vmul.f32 %v2738_v16, %v2738_v16 }
 0x366   : > { %v2639_v38 = vrot.slane %v2638_v58, 1  ;;  %v2855_v63 = vadd.f32 %v2854_v52, %v2853_v27  ;;  %v10150_v24 = vrot.slane %v2738_v16, %v18540_v33  ;;  %v21772_v52 = vpop.f32.mrb[56].mxu1  ;;  %v10388_v27 = vcombine.high %v2759_v18, %v2759_v18 }
 0x367   : > { %v21726_v17 = vadd.f32 %v2538_v26, %v21513_v15  ;;  %v10248_v15 = vrot.slane %v2746_v34, %v18540_v33  ;;  %v10255_v26 = vrot.slane %v10241_v60, %v18540_v33  ;;  %v2956_v60 = vsel %vm910_vm4, %v2920_v36, 0.0 }
 0x368   : > { %v2640_v53 = vadd.f32 %v2639_v38, %v2638_v58  ;;  %v10143_v38 = vcombine.high %v2738_v16, %v2738_v16  ;;  %v2857_v34 = vadd.f32 %v21664_v55, %v2855_v63  ;;  %v2957_v63 = vadd.f32 %v2956_v60, %v2955_v47  ;;  %v21784_v55 = vpop.f32.mrb[57].mxu1 }
 0x369   : > { %26848 = vst [vmem:[#allocation361_spill] sm:$0xff] %v21726_v17  ;;  %v10256_v58 = vcombine.high %v10248_v15, %v10248_v15  ;;  %v10257_v17 = vcombine.high %v10255_v26, %v10255_v26  ;;  %v21749_v44 = vrot.slane %v10248_v15, %v18540_v33  ;;  %v21752_v51 = vrot.slane %v10255_v26, %v18540_v33 }
 0x36a   : > { %v21745_v10 = vadd.f32 %v2640_v53, %v21523_v57  ;;  %v10157_v2 = vrot.slane %v10143_v38, %v18540_v33  ;;  %v10158_v57 = vcombine.high %v10150_v24, %v10150_v24  ;;  %v21770_v26 = vrot.slane %v10150_v24, %v18540_v33 }
 0x36b   : > { %26850 = vst [vmem:[#allocation363_spill] sm:$0xff] %v21749_v44  ;;  %26851 = vst [vmem:[#allocation364_spill] sm:$0xff] %v21752_v51  ;;  %v21760_v16 = vrot.slane %v10256_v58, %v18540_v33  ;;  %v21763_v53 = vrot.slane %v10257_v17, %v18540_v33  ;;  %v2959_v47 = vadd.f32 %v21691_v6, %v2957_v63  ;;  %v2864_v38 = vsel %vm910_vm4, %v2759_v18, 0.0 }
 0x36c   : > { %26849 = vst [vmem:[#allocation362_spill] sm:$0xff] %v21745_v10  ;;  %v10159_v36 = vcombine.high %v10157_v2, %v10157_v2  ;;  %v21779_v58 = vrot.slane %v10157_v2, %v18540_v33  ;;  %v21782_v15 = vrot.slane %v10158_v57, %v18540_v33  ;;  %v2925_v57 = vmul.f32 %v2759_v18, %v2759_v18 }
 0x36d   : > { %26852 = vst [vmem:[#allocation365_spill] sm:$0xff] %v21760_v16  ;;  %26853 = vst [vmem:[#allocation366_spill] sm:$0xff] %v21763_v53  ;;  %v10395_v51 = vrot.slane %v2759_v18, %v18540_v33  ;;  %v2751_v6 = vadd.f32 %v21128_v32, %v20943_v23  ;;  %v2859_v63 = vadd.f32 %v2858_v35, %v2857_v34 }
 0x36e   : > { %v21788_v24 = vrot.slane %v10159_v36, %v18540_v33  ;;  %v2961_v36 = vadd.f32 %v2960_v61, %v2959_v47  ;;  %v21803_v53 = vsel %vm910_vm4, %v2925_v57, 0.0  ;;  %v10402_v17 = vrot.slane %v10388_v27, %v18540_v33 }
 0x36f   : > { %v2762_v2 = vadd.f32 %v21128_v32, %v20982_v4  ;;  %v10403_v44 = vcombine.high %v10395_v51, %v10395_v51  ;;  %v21809_v16 = vrot.slane %v10395_v51, %v18540_v33  ;;  %v2860_v18 = vsel %vm910_vm4, %v2751_v6, 0.0 }
 0x370   : > { %v2923_v23 = vmul.f32 %v2751_v6, %v2751_v6  ;;  %v10404_v35 = vcombine.high %v10402_v17, %v10402_v17  ;;  %v21813_v61 = vrot.slane %v10402_v17, %v18540_v33  ;;  %v2861_v34 = vadd.f32 %v2860_v18, %v2859_v63 }
 0x371   : > { %26854 = vst [vmem:[#allocation367_spill] sm:$0xff] %v21809_v16  ;;  %v10290_v47 = vcombine.high %v2751_v6, %v2751_v6  ;;  %v21816_v57 = vrot.slane %v10403_v44, %v18540_v33  ;;  %v2754_v51 = vadd.f32 %v21128_v32, %v21006_v14  ;;  %v10297_v63 = vrot.slane %v2751_v6, %v18540_v33 }
 0x372   : > { %26855 = vst [vmem:[#allocation368_spill] sm:$0xff] %v21813_v61  ;;  %v2962_v4 = vsel %vm910_vm4, %v2923_v23, 0.0  ;;  %v21824_v60 = vrot.slane %v10404_v35, %v18540_v33  ;;  %v2926_v27 = vmul.f32 %v2762_v2, %v2762_v2  ;;  %v10437_v32 = vcombine.high %v2762_v2, %v2762_v2 }
 0x373   : > { %26856 = vst [vmem:[#allocation369_spill] sm:$0xff] %v21816_v57  ;;  %v2963_v10 = vadd.f32 %v2962_v4, %v2961_v36  ;;  %v10304_v23 = vrot.slane %v10290_v47, %v18540_v33  ;;  %v10305_v49 = vcombine.high %v10297_v63, %v10297_v63  ;;  %v21835_v14 = vrot.slane %v10297_v63, %v18540_v33 }
 0x374   : > { %26857 = vst [vmem:[#allocation370_spill] sm:$0xff] %v21824_v60  ;;  %v10444_v35 = vrot.slane %v2762_v2, %v18540_v33  ;;  %v2866_v6 = vsel %vm910_vm4, %v2762_v2, 0.0  ;;  %v2862_v4 = vsel %vm910_vm4, %v2754_v51, 0.0  ;;  %v2968_v63 = vsel %vm910_vm4, %v2926_v27, 0.0 }
 0x375   : > { %26858 = vst [vmem:[#allocation371_spill] sm:$0xff] %v21835_v14  ;;  %v10306_v17 = vcombine.high %v10304_v23, %v10304_v23  ;;  %v21839_v36 = vrot.slane %v10304_v23, %v18540_v33  ;;  %v21844_v44 = vrot.slane %v10305_v49, %v18540_v33  ;;  %v10451_v18 = vrot.slane %v10437_v32, %v18540_v33  ;;  %v26866_v32 = vld [vmem:[#allocation169_spill] sm:$0xff]  ;;  %v21881_v23 = vpop.f32.mrb[58].mxu1 }
 0x376   : > { %v10452_v60 = vcombine.high %v10444_v35, %v10444_v35  ;;  %v21856_v2 = vrot.slane %v10444_v35, %v18540_v33  ;;  %v2863_v27 = vadd.f32 %v2862_v4, %v2861_v34  ;;  %v2924_v57 = vmul.f32 %v2754_v51, %v2754_v51  ;;  %v21890_v34 = vpop.f32.mrb[59].mxu1 }
 0x377   : > { %26859 = vst [vmem:[#allocation372_spill] sm:$0xff] %v21839_v36  ;;  %26860 = vst [vmem:[#allocation373_spill] sm:$0xff] %v21844_v44  ;;  %v21851_v61 = vrot.slane %v10306_v17, %v18540_v33  ;;  %v10453_v16 = vcombine.high %v10451_v18, %v10451_v18  ;;  %v21861_v47 = vrot.slane %v10451_v18, %v18540_v33 }
 0x378   : > { %26862 = vst [vmem:[#allocation375_spill] sm:$0xff] %v21856_v2  ;;  %v21866_v17 = vrot.slane %v10452_v60, %v18540_v33  ;;  %v2865_v36 = vadd.f32 %v2864_v38, %v2863_v27  ;;  %v10339_v18 = vcombine.high %v2754_v51, %v2754_v51  ;;  %v2964_v4 = vsel %vm910_vm4, %v2924_v57, 0.0 }
 0x379   : > { %26861 = vst [vmem:[#allocation374_spill] sm:$0xff] %v21851_v61  ;;  %26863 = vst [vmem:[#allocation376_spill] sm:$0xff] %v21861_v47  ;;  %v21871_v35 = vrot.slane %v10453_v16, %v18540_v33  ;;  %v10346_v60 = vrot.slane %v2754_v51, %v18540_v33  ;;  %v8089_v61 = vcombine.high %v26866_v32, %v26866_v32  ;;  %v26871_v47 = vld [vmem:[#allocation167_spill] sm:$0xff] }
 0x37a   : > { %26864 = vst [vmem:[#allocation377_spill] sm:$0xff] %v21866_v17  ;;  %v2965_v14 = vadd.f32 %v2964_v4, %v2963_v10  ;;  %v10353_v16 = vrot.slane %v10339_v18, %v18540_v33  ;;  %v11473_v49 = vrot.slane %v21482_v13, %v18559_v11  ;;  %v26867_v38 = vcombine.high %v21476_v28, %v21476_v28 }
 0x37b   : > { %26865 = vst [vmem:[#allocation378_spill] sm:$0xff] %v21871_v35  ;;  %v10354_v57 = vcombine.high %v10346_v60, %v10346_v60  ;;  %v21893_v51 = vrot.slane %v10346_v60, %v18540_v33  ;;  %v26869_v10 = vcombine.high %v21482_v13, %v21482_v13  ;;  %v26870_v18 = vrot.slane %v21476_v28, %v18559_v11 }
 0x37c   : > { %v11477_v27 = vrot.slane %v26867_v38, %v18559_v11  ;;  %v2967_v2 = vadd.f32 %v21803_v53, %v2965_v14  ;;  %v10355_v38 = vcombine.high %v10353_v16, %v10353_v16  ;;  %v21906_v44 = vrot.slane %v10353_v16, %v18540_v33 }
 0x37d   : > { %26868 = vst [vmem:[#allocation169_spill] sm:$0xff] %v21893_v51  ;;  %v11481_v4 = vrot.slane %v26869_v10, %v18559_v11  ;;  %v12746_v35 = vsel %vm7753_vm7, %v26871_v47, %v26870_v18  ;;  %v12747_v60 = vsel %vm7753_vm7, %v26866_v32, %v11473_v49  ;;  %v21913_v13 = vrot.slane %v10354_v57, %v18540_v33 }
 0x37e   : > { %26872 = vst [vmem:[#allocation167_spill] sm:$0xff] %v21906_v44  ;;  %v26874_v10 = vcombine.high %v26871_v47, %v26871_v47  ;;  %v21922_v14 = vrot.slane %v10355_v38, %v18540_v33  ;;  %v13582_v16 = vcombine.low %v12746_v35, %v12747_v60  ;;  %v2775_v47 = vadd.f32 %v21932_v3, %v21146_v40 }
 0x37f   : > { %26873 = vst [vmem:[#allocation379_spill] sm:$0xff] %v21913_v13  ;;  %v12749_v32 = vsel %vm7753_vm7, %v8089_v61, %v11481_v4  ;;  %v2867_v35 = vadd.f32 %v2866_v6, %v2865_v36  ;;  %v2969_v4 = vadd.f32 %v2968_v63, %v2967_v2 }
 0x380   : > { %v12748_v53 = vsel %vm7753_vm7, %v26874_v10, %v11477_v27  ;;  %26875 = vst [vmem:[#allocation380_spill] sm:$0xff] %v21922_v14  ;;  %v2767_v27 = vadd.f32 %v21932_v3, %v21173_v45  ;;  %v13590_v61 = vrot.slane %v13582_v16, %v19822_v43  ;;  %v2929_v10 = vmul.f32 %v2775_v47, %v2775_v47 }
 0x381   : > { %v13583_v18 = vcombine.low %v12748_v53, %v12749_v32  ;;  %v10584_v53 = vcombine.high %v2775_v47, %v2775_v47  ;;  %v26876_v32 = vld [vmem:[#allocation166_spill] sm:$0xff]  ;;  %v10591_v40 = vrot.slane %v2775_v47, %v18540_v33  ;;  %v21949_v16 = vsel %vm910_vm4, %v2775_v47, 0.0 }
 0x382   : > { %v26877_v57 = vcombine.high %v26876_v32, %v26876_v32  ;;  %v2868_v45 = vsel %vm910_vm4, %v2767_v27, 0.0  ;;  %v2927_v28 = vmul.f32 %v2767_v27, %v2767_v27  ;;  %v10486_v17 = vcombine.high %v2767_v27, %v2767_v27 }
 0x383   : > { %v13597_v60 = vrot.slane %v13583_v18, %v19822_v43  ;;  %v10598_v36 = vrot.slane %v10584_v53, %v18540_v33  ;;  %v2869_v6 = vadd.f32 %v2868_v45, %v2867_v35  ;;  %v10599_v63 = vcombine.high %v10591_v40, %v10591_v40 }
 0x384   : > { %v8086_v49 = vrot.slane %v26877_v57, %v18540_v33  ;;  %v21953_v2 = vrot.slane %v10591_v40, %v18540_v33  ;;  %v2970_v18 = vsel %vm910_vm4, %v2927_v28, 0.0  ;;  %v10493_v57 = vrot.slane %v2767_v27, %v18540_v33 }
 0x385   : > { %v13598_v38 = vcombine.low %v13590_v61, %v13597_v60  ;;  %v10600_v32 = vcombine.high %v10598_v36, %v10598_v36  ;;  %v21958_v44 = vrot.slane %v10598_v36, %v18540_v33  ;;  %v2971_v61 = vadd.f32 %v2970_v18, %v2969_v4 }
 0x386   : > { %26878 = vst [vmem:[#allocation166_spill] sm:$0xff] %v21953_v2  ;;  %v10500_v47 = vrot.slane %v10486_v17, %v18540_v33  ;;  %v21962_v60 = vsel %vm910_vm4, %v2929_v10, 0.0  ;;  %v21965_v35 = vrot.slane %v10599_v63, %v18540_v33  ;;  %v10501_v28 = vcombine.high %v10493_v57, %v10493_v57 }
 0x387   : > { %15822 = vxpose.xlu0.b32.cont [5/16] (narrow) %v13598_v38, 8  ;;  %26879 = vst [vmem:[#allocation381_spill] sm:$0xff] %v21958_v44  ;;  %v21970_v27 = vrot.slane %v10600_v32, %v18540_v33  ;;  %v21975_v4 = vrot.slane %v10493_v57, %v18540_v33  ;;  %v26885_v32 = vld [vmem:[#allocation168_spill] sm:$0xff]  ;;  %v21996_v38 = vpop.f32.mrb[60].mxu1  ;;  %v8090_v10 = vcombine.high %v8086_v49, %v8086_v49 }
 0x388   : > { %26880 = vst [vmem:[#allocation382_spill] sm:$0xff] %v21965_v35  ;;  %v10502_v40 = vcombine.high %v10500_v47, %v10500_v47  ;;  %v21982_v45 = vrot.slane %v10500_v47, %v18540_v33  ;;  %v21985_v36 = vrot.slane %v10501_v28, %v18540_v33  ;;  %v8088_v17 = vcombine.high %v26885_v32, %v26885_v32  ;;  %v22004_v53 = vpop.f32.mrb[61].mxu1 }
 0x389   : > { %26881 = vst [vmem:[#allocation383_spill] sm:$0xff] %v21970_v27  ;;  %26882 = vst [vmem:[#allocation384_spill] sm:$0xff] %v21975_v4  ;;  %v9946_v28 = vcombine.high %v21491_v39, %v21491_v39  ;;  %v11489_v57 = vrot.slane %v21491_v39, %v18559_v11  ;;  %v26886_v18 = vcombine.high %v21479_v56, %v21479_v56 }
 0x38a   : > { %26883 = vst [vmem:[#allocation385_spill] sm:$0xff] %v21982_v45  ;;  %v21988_v63 = vrot.slane %v10502_v40, %v18540_v33  ;;  %v11485_v40 = vrot.slane %v21479_v56, %v18559_v11  ;;  %v2778_v47 = vadd.f32 %v21932_v3, %v21264_v1  ;;  %v2770_v27 = vadd.f32 %v21932_v3, %v21273_v46 }
 0x38b   : > { %v11493_v44 = vrot.slane %v26886_v18, %v18559_v11  ;;  %v11497_v35 = vrot.slane %v9946_v28, %v18559_v11  ;;  %v8285_v39 = vcombine.high %v20021_v59, %v20021_v59  ;;  %v12751_v56 = vsel %vm7753_vm7, %v8086_v49, %v11489_v57 }
 0x38c   : > { %26884 = vst [vmem:[#allocation386_spill] sm:$0xff] %v21988_v63  ;;  %v12750_v14 = vsel %vm7753_vm7, %v26885_v32, %v11485_v40  ;;  %v2930_v45 = vmul.f32 %v2778_v47, %v2778_v47  ;;  %v11601_v1 = vrot.slane %v21729_v62, %v18559_v11  ;;  %v10633_v2 = vcombine.high %v2778_v47, %v2778_v47 }
 0x38d   : > { %v12752_v18 = vsel %vm7753_vm7, %v8088_v17, %v11493_v44  ;;  %v12753_v46 = vsel %vm7753_vm7, %v8090_v10, %v11497_v35  ;;  %v13599_v63 = vcombine.low %v12750_v14, %v12751_v56  ;;  %v10640_v28 = vrot.slane %v2778_v47, %v18540_v33 }
 0x38e   : > { %v13600_v51 = vcombine.low %v12752_v18, %v12753_v46  ;;  %v2874_v32 = vsel %vm910_vm4, %v2778_v47, 0.0  ;;  %v2870_v40 = vsel %vm910_vm4, %v2770_v27, 0.0  ;;  %v2928_v13 = vmul.f32 %v2770_v27, %v2770_v27 }
 0x38f   : > { %v13607_v49 = vrot.slane %v13599_v63, %v19822_v43  ;;  %v10647_v44 = vrot.slane %v10633_v2, %v18540_v33  ;;  %v10648_v17 = vcombine.high %v10640_v28, %v10640_v28  ;;  %v22034_v57 = vrot.slane %v10640_v28, %v18540_v33 }
 0x390   : > { %v13614_v35 = vrot.slane %v13600_v51, %v19822_v43  ;;  %v2871_v14 = vadd.f32 %v2870_v40, %v2869_v6  ;;  %v2972_v10 = vsel %vm910_vm4, %v2928_v13, 0.0  ;;  %v10535_v56 = vcombine.high %v2770_v27, %v2770_v27 }
 0x391   : > { %v2976_v18 = vsel %vm910_vm4, %v2930_v45, 0.0  ;;  %v10649_v47 = vcombine.high %v10647_v44, %v10647_v44  ;;  %v22040_v46 = vrot.slane %v10647_v44, %v18540_v33  ;;  %v22043_v63 = vrot.slane %v10648_v17, %v18540_v33 }
 0x392   : > { %v13615_v2 = vcombine.low %v13607_v49, %v13614_v35  ;;  %v2873_v4 = vadd.f32 %v21949_v16, %v2871_v14  ;;  %v2973_v51 = vadd.f32 %v2972_v10, %v2971_v61  ;;  %v10542_v40 = vrot.slane %v2770_v27, %v18540_v33 }
 0x393   : > { %v22049_v6 = vrot.slane %v10649_v47, %v18540_v33  ;;  %v10549_v44 = vrot.slane %v10535_v56, %v18540_v33  ;;  %v26887_v16 = vcombine.high %v21717_v20, %v21717_v20  ;;  %v26888_v17 = vcombine.high %v21729_v62, %v21729_v62 }
 0x394   : > { %15823 = vxpose.xlu0.b32.cont [6/16] (narrow) %v13615_v2, 8  ;;  %v2975_v49 = vadd.f32 %v21962_v60, %v2973_v51  ;;  %v10550_v14 = vcombine.high %v10542_v40, %v10542_v40  ;;  %v22067_v10 = vrot.slane %v10542_v40, %v18540_v33  ;;  %v26889_v27 = vrot.slane %v21717_v20, %v18559_v11  ;;  %v22119_v20 = vpop.f32.mrb[62].mxu1 }
 0x395   : > { %v11605_v61 = vrot.slane %v26887_v16, %v18559_v11  ;;  %v11609_v35 = vrot.slane %v26888_v17, %v18559_v11  ;;  %v12779_v56 = vsel %vm7753_vm7, %v20021_v59, %v11601_v1  ;;  %v10551_v47 = vcombine.high %v10549_v44, %v10549_v44  ;;  %v22129_v28 = vpop.f32.mrb[63].mxu1 }
 0x396   : > { %v12778_v60 = vsel %vm7753_vm7, %v20009_v9, %v26889_v27  ;;  %v22077_v2 = vrot.slane %v10549_v44, %v18540_v33  ;;  %v26890_v62 = vcombine.high %v20009_v9, %v20009_v9  ;;  %v22087_v16 = vrot.slane %v10550_v14, %v18540_v33 }
 0x397   : > { %v12781_v40 = vsel %vm7753_vm7, %v8285_v39, %v11609_v35  ;;  %v13854_v1 = vcombine.low %v12778_v60, %v12779_v56  ;;  %v22092_v44 = vrot.slane %v10551_v47, %v18540_v33  ;;  %v26891_v35 = vld [vmem:[#allocation185_spill] sm:$0xff]  ;;  %v11505_v27 = vrot.slane %v21565_v21, %v18559_v11 }
 0x398   : > { %v12780_v51 = vsel %vm7753_vm7, %v26890_v62, %v11605_v61  ;;  %v8138_v14 = vcombine.high %v26891_v35, %v26891_v35  ;;  %v26892_v60 = vcombine.high %v21553_v29, %v21553_v29  ;;  %v26893_v62 = vcombine.high %v21565_v21, %v21565_v21 }
 0x399   : > { %v13855_v39 = vcombine.low %v12780_v51, %v12781_v40  ;;  %v13862_v17 = vrot.slane %v13854_v1, %v19822_v43  ;;  %v26894_v40 = vrot.slane %v21553_v29, %v18559_v11  ;;  %v26895_v1 = vld [vmem:[#allocation183_spill] sm:$0xff]  ;;  %v2791_v45 = vadd.f32 %v21932_v3, %v21366_v22 }
 0x39a   : > { %v11509_v56 = vrot.slane %v26892_v60, %v18559_v11  ;;  %v11513_v51 = vrot.slane %v26893_v62, %v18559_v11  ;;  %v12755_v60 = vsel %vm7753_vm7, %v26891_v35, %v11505_v27  ;;  %v2783_v62 = vadd.f32 %v21932_v3, %v21375_v8 }
 0x39b   : > { %v13869_v47 = vrot.slane %v13855_v39, %v19822_v43  ;;  %v12754_v13 = vsel %vm7753_vm7, %v26895_v1, %v26894_v40  ;;  %v26896_v39 = vcombine.high %v26895_v1, %v26895_v1  ;;  %v2875_v29 = vadd.f32 %v2874_v32, %v2873_v4 }
 0x39c   : > { %v12757_v9 = vsel %vm7753_vm7, %v8138_v14, %v11513_v51  ;;  %v13616_v61 = vcombine.low %v12754_v13, %v12755_v60  ;;  %v22135_v35 = vsel %vm910_vm4, %v2791_v45, 0.0  ;;  %v10780_v27 = vcombine.high %v2791_v45, %v2791_v45 }
 0x39d   : > { %v12756_v21 = vsel %vm7753_vm7, %v26896_v39, %v11509_v56  ;;  %v13870_v22 = vcombine.low %v13862_v17, %v13869_v47  ;;  %v10787_v56 = vrot.slane %v2791_v45, %v18540_v33  ;;  %v2933_v1 = vmul.f32 %v2791_v45, %v2791_v45 }
 0x39e   : > { %v13617_v59 = vcombine.low %v12756_v21, %v12757_v9  ;;  %v2876_v8 = vsel %vm910_vm4, %v2783_v62, 0.0  ;;  %v2931_v4 = vmul.f32 %v2783_v62, %v2783_v62  ;;  %v2977_v32 = vadd.f32 %v2976_v18, %v2975_v49 }
 0x39f   : > { %15854 = vxpose.xlu1.b32.cont [5/16] (narrow) %v13870_v22, 8  ;;  %v13624_v39 = vrot.slane %v13616_v61, %v19822_v43  ;;  %v10794_v14 = vrot.slane %v10780_v27, %v18540_v33  ;;  %v10795_v13 = vcombine.high %v10787_v56, %v10787_v56  ;;  %v22143_v9 = vrot.slane %v10787_v56, %v18540_v33 }
 0x3a0   : > { %v13631_v17 = vrot.slane %v13617_v59, %v19822_v43  ;;  %v22145_v47 = vadd.f32 %v2876_v8, %v2875_v29  ;;  %v2978_v51 = vsel %vm910_vm4, %v2931_v4, 0.0  ;;  %v10682_v60 = vcombine.high %v2783_v62, %v2783_v62 }
 0x3a1   : > { %26897 = vst [vmem:[#allocation168_spill] sm:$0xff] %v22143_v9  ;;  %v10796_v21 = vcombine.high %v10794_v14, %v10794_v14  ;;  %v22149_v22 = vrot.slane %v10794_v14, %v18540_v33  ;;  %v22152_v18 = vrot.slane %v10795_v13, %v18540_v33  ;;  %v22155_v49 = vsel %vm910_vm4, %v2933_v1, 0.0 }
 0x3a2   : > { %v13632_v45 = vcombine.low %v13624_v39, %v13631_v17  ;;  %v22159_v61 = vadd.f32 %v2978_v51, %v2977_v32  ;;  %v10689_v29 = vrot.slane %v2783_v62, %v18540_v33  ;;  %v10696_v1 = vrot.slane %v10682_v60, %v18540_v33  ;;  %v26901_v62 = vld [vmem:[#allocation190_spill] sm:$0xff] }
 0x3a3   : > { %26898 = vst [vmem:[#allocation185_spill] sm:$0xff] %v22149_v22  ;;  %26899 = vst [vmem:[#allocation183_spill] sm:$0xff] %v22152_v18  ;;  %v22163_v27 = vrot.slane %v10796_v21, %v18540_v33  ;;  %v26902_v17 = vcombine.high %v26901_v62, %v26901_v62  ;;  %v11613_v60 = vrot.slane %v21722_v37, %v18559_v11  ;;  %v26908_v18 = vld [vmem:[#allocation184_spill] sm:$0xff] }
 0x3a4   : > { %15824 = vxpose.xlu0.b32.cont [7/16] (narrow) %v13632_v45, 8  ;;  %v10697_v39 = vcombine.high %v10689_v29, %v10689_v29  ;;  %v22173_v32 = vrot.slane %v10689_v29, %v18540_v33  ;;  %v10698_v13 = vcombine.high %v10696_v1, %v10696_v1  ;;  %v22180_v51 = vrot.slane %v10696_v1, %v18540_v33 }
 0x3a5   : > { %26900 = vst [vmem:[#allocation387_spill] sm:$0xff] %v22163_v27  ;;  %v8282_v14 = vrot.slane %v26902_v17, %v18540_v33  ;;  %v10142_v45 = vcombine.high %v21736_v30, %v21736_v30  ;;  %v26904_v17 = vld [vmem:[#allocation191_spill] sm:$0xff]  ;;  %v11617_v4 = vrot.slane %v21736_v30, %v18559_v11 }
 0x3a6   : > { %26903 = vst [vmem:[#allocation190_spill] sm:$0xff] %v22180_v51  ;;  %v22187_v21 = vrot.slane %v10697_v39, %v18540_v33  ;;  %v8284_v56 = vcombine.high %v26904_v17, %v26904_v17  ;;  %v22196_v1 = vrot.slane %v10698_v13, %v18540_v33  ;;  %v26905_v39 = vcombine.high %v21722_v37, %v21722_v37  ;;  %v26906_v13 = vld [vmem:[#allocation182_spill] sm:$0xff] }
 0x3a7   : > { %v8286_v8 = vcombine.high %v8282_v14, %v8282_v14  ;;  %v11625_v62 = vrot.slane %v10142_v45, %v18559_v11  ;;  %v12782_v40 = vsel %vm7753_vm7, %v26904_v17, %v11613_v60  ;;  %v26907_v22 = vcombine.high %v26906_v13, %v26906_v13 }
 0x3a8   : > { %v11621_v59 = vrot.slane %v26905_v39, %v18559_v11  ;;  %v12783_v30 = vsel %vm7753_vm7, %v8282_v14, %v11617_v4  ;;  %v8137_v37 = vcombine.high %v26908_v18, %v26908_v18  ;;  %v9995_v39 = vcombine.high %v21585_v12, %v21585_v12 }
 0x3a9   : > { %v8135_v27 = vrot.slane %v26907_v22, %v18540_v33  ;;  %v12785_v45 = vsel %vm7753_vm7, %v8286_v8, %v11625_v62  ;;  %v13871_v29 = vcombine.low %v12782_v40, %v12783_v30  ;;  %v11517_v60 = vrot.slane %v21562_v25, %v18559_v11 }
 0x3aa   : > { %v12784_v9 = vsel %vm7753_vm7, %v8284_v56, %v11621_v59  ;;  %v11521_v22 = vrot.slane %v21585_v12, %v18559_v11  ;;  %v26909_v59 = vcombine.high %v21562_v25, %v21562_v25  ;;  %v11529_v4 = vrot.slane %v9995_v39, %v18559_v11 }
 0x3ab   : > { %v8139_v51 = vcombine.high %v8135_v27, %v8135_v27  ;;  %v13872_v17 = vcombine.low %v12784_v9, %v12785_v45  ;;  %v13879_v14 = vrot.slane %v13871_v29, %v19822_v43  ;;  %v12758_v40 = vsel %vm7753_vm7, %v26908_v18, %v11517_v60  ;;  %v26922_v29 = vld [vmem:[#allocation92_spill] sm:$0xff] }
 0x3ac   : > { %v11525_v56 = vrot.slane %v26909_v59, %v18559_v11  ;;  %v2794_v8 = vadd.f32 %v21932_v3, %v21467_v54  ;;  %v2786_v9 = vadd.f32 %v21932_v3, %v21471_v50  ;;  %v12759_v62 = vsel %vm7753_vm7, %v8135_v27, %v11521_v22 }
 0x3ad   : > { %v13886_v12 = vrot.slane %v13872_v17, %v19822_v43  ;;  %v12761_v13 = vsel %vm7753_vm7, %v8139_v51, %v11529_v4  ;;  %v13633_v30 = vcombine.low %v12758_v40, %v12759_v62 }
 0x3ae   : > { %v12760_v25 = vsel %vm7753_vm7, %v8137_v37, %v11525_v56  ;;  %v2934_v18 = vmul.f32 %v2794_v8, %v2794_v8  ;;  %v10829_v60 = vcombine.high %v2794_v8, %v2794_v8  ;;  %v10836_v54 = vrot.slane %v2794_v8, %v18540_v33 }
 0x3af   : > { %v13634_v39 = vcombine.low %v12760_v25, %v12761_v13  ;;  %v13887_v45 = vcombine.low %v13879_v14, %v13886_v12  ;;  %v2878_v50 = vsel %vm910_vm4, %v2786_v9, 0.0  ;;  %v13641_v17 = vrot.slane %v13633_v30, %v19822_v43 }
 0x3b0   : > { %v22247_v37 = vsel %vm910_vm4, %v2794_v8, 0.0  ;;  %v2879_v51 = vadd.f32 %v2878_v50, %v22145_v47  ;;  %v10843_v22 = vrot.slane %v10829_v60, %v18540_v33  ;;  %v10844_v59 = vcombine.high %v10836_v54, %v10836_v54 }
 0x3b1   : > { %v13648_v27 = vrot.slane %v13634_v39, %v19822_v43  ;;  %15855 = vxpose.xlu1.b32.cont [6/16] (narrow) %v13887_v45, 8  ;;  %v22252_v56 = vrot.slane %v10836_v54, %v18540_v33  ;;  %v2932_v4 = vmul.f32 %v2786_v9, %v2786_v9  ;;  %v10731_v12 = vcombine.high %v2786_v9, %v2786_v9 }
 0x3b2   : > { %v2881_v40 = vadd.f32 %v22135_v35, %v2879_v51  ;;  %v10738_v62 = vrot.slane %v2786_v9, %v18540_v33  ;;  %v22257_v25 = vsel %vm910_vm4, %v2934_v18, 0.0  ;;  %v10845_v8 = vcombine.high %v10843_v22, %v10843_v22 }
 0x3b3   : > { %26910 = vst [vmem:[#allocation191_spill] sm:$0xff] %v22252_v56  ;;  %v13649_v14 = vcombine.low %v13641_v17, %v13648_v27  ;;  %v22260_v47 = vrot.slane %v10843_v22, %v18540_v33  ;;  %v22263_v13 = vrot.slane %v10844_v59, %v18540_v33  ;;  %v2980_v39 = vsel %vm910_vm4, %v2932_v4, 0.0 }
 0x3b4   : > { %v10745_v35 = vrot.slane %v10731_v12, %v18540_v33  ;;  %v10746_v45 = vcombine.high %v10738_v62, %v10738_v62  ;;  %v22270_v9 = vrot.slane %v10845_v8, %v18540_v33  ;;  %v2981_v54 = vadd.f32 %v2980_v39, %v22159_v61  ;;  %v26915_v39 = vld [vmem:[#allocation195_spill] sm:$0xff] }
 0x3b5   : > { %26911 = vst [vmem:[#allocation182_spill] sm:$0xff] %v22260_v47  ;;  %26912 = vst [vmem:[#allocation184_spill] sm:$0xff] %v22263_v13  ;;  %15825 = vxpose.xlu0.b32.cont [8/16] (narrow) %v13649_v14, 8  ;;  %v22278_v17 = vrot.slane %v10738_v62, %v18540_v33  ;;  %v11633_v4 = vrot.slane %v21782_v15, %v18559_v11  ;;  %v26914_v61 = vcombine.high %v21770_v26, %v21770_v26 }
 0x3b6   : > { %26913 = vst [vmem:[#allocation388_spill] sm:$0xff] %v22270_v9  ;;  %v10747_v50 = vcombine.high %v10745_v35, %v10745_v35  ;;  %v22281_v27 = vrot.slane %v10745_v35, %v18540_v33  ;;  %v22284_v51 = vrot.slane %v10746_v45, %v18540_v33  ;;  %v2983_v59 = vadd.f32 %v22155_v49, %v2981_v54  ;;  %v26920_v35 = vld [vmem:[#allocation41_spill] sm:$0xff]  ;;  %v26936_v9 = vld [vmem:[#allocation34_spill] sm:$0xff] }
 0x3b7   : > { %v11637_v14 = vrot.slane %v26914_v61, %v18559_v11  ;;  %v8334_v49 = vcombine.high %v26915_v39, %v26915_v39  ;;  %v26916_v45 = vcombine.high %v21782_v15, %v21782_v15  ;;  %v26918_v61 = vld [vmem:[#allocation98_spill] sm:$0xff]  ;;  %v12787_v60 = vsel %vm7753_vm7, %v26915_v39, %v11633_v4  ;;  %v26921_v15 = vld [vmem:[#allocation95_spill] sm:$0xff] }
 0x3b8   : > { %v22296_v12 = vrot.slane %v10747_v50, %v18540_v33  ;;  %v26917_v50 = vrot.slane %v21770_v26, %v18559_v11  ;;  %v26919_v22 = vcombine.high %v26918_v61, %v26918_v61  ;;  %v3194_v62 = vcombine.high %v26920_v35, %v26920_v35 }
 0x3b9   : > { %v11641_v54 = vrot.slane %v26916_v45, %v18559_v11  ;;  %v6544_v45 = vrot.slane %v26921_v15, %v18559_v11  ;;  %v26924_v4 = vcombine.high %v26921_v15, %v26921_v15 }
 0x3ba   : > { %v12786_v18 = vsel %vm7753_vm7, %v26918_v61, %v26917_v50  ;;  %v12788_v30 = vsel %vm7753_vm7, %v26919_v22, %v11637_v14  ;;  %v26923_v50 = vcombine.high %v26922_v29, %v26922_v29  ;;  %v2807_v61 = vadd.f32 %v21932_v3, %v21570_v41 }
 0x3bb   : > { %v13888_v8 = vcombine.low %v12786_v18, %v12787_v60  ;;  %v12789_v26 = vsel %vm7753_vm7, %v8334_v49, %v11641_v54  ;;  %v6552_v39 = vrot.slane %v26924_v4, %v18559_v11  ;;  %v26925_v18 = vrot.slane %v26922_v29, %v18559_v11  ;;  %v26926_v60 = vld [vmem:[#allocation35_spill] sm:$0xff] }
 0x3bc   : > { %v6548_v47 = vrot.slane %v26923_v50, %v18559_v11  ;;  %v13889_v49 = vcombine.low %v12788_v30, %v12789_v26  ;;  %v7771_v54 = vsel %vm7753_vm7, %v26920_v35, %v6544_v45  ;;  %v26927_v15 = vcombine.high %v26926_v60, %v26926_v60 }
 0x3bd   : > { %v7770_v22 = vsel %vm7753_vm7, %v26926_v60, %v26925_v18  ;;  %v7773_v29 = vsel %vm7753_vm7, %v3194_v62, %v6552_v39  ;;  %v2799_v18 = vadd.f32 %v21932_v3, %v21582_v48  ;;  %v13896_v14 = vrot.slane %v13888_v8, %v19822_v43 }
 0x3be   : > { %v7772_v50 = vsel %vm7753_vm7, %v26927_v15, %v6548_v47  ;;  %v13650_v4 = vcombine.low %v7770_v22, %v7771_v54  ;;  %v13903_v30 = vrot.slane %v13889_v49, %v19822_v43  ;;  %v22355_v35 = vsel %vm910_vm4, %v2807_v61, 0.0 }
 0x3bf   : > { %v13651_v26 = vcombine.low %v7772_v50, %v7773_v29  ;;  %v2937_v41 = vmul.f32 %v2807_v61, %v2807_v61  ;;  %v10976_v45 = vcombine.high %v2807_v61, %v2807_v61  ;;  %v10983_v60 = vrot.slane %v2807_v61, %v18540_v33 }
 0x3c0   : > { %v2883_v47 = vadd.f32 %v22247_v37, %v2881_v40  ;;  %v13904_v15 = vcombine.low %v13896_v14, %v13903_v30  ;;  %v13658_v62 = vrot.slane %v13650_v4, %v19822_v43  ;;  %v2884_v48 = vsel %vm910_vm4, %v2799_v18, 0.0 }
 0x3c1   : > { %v13665_v39 = vrot.slane %v13651_v26, %v19822_v43  ;;  %v10990_v8 = vrot.slane %v10976_v45, %v18540_v33  ;;  %v10991_v22 = vcombine.high %v10983_v60, %v10983_v60  ;;  %v22364_v49 = vrot.slane %v10983_v60, %v18540_v33 }
 0x3c2   : > { %v22366_v54 = vadd.f32 %v2884_v48, %v2883_v47  ;;  %15856 = vxpose.xlu1.b32.cont [7/16] (narrow) %v13904_v15, 8  ;;  %v2935_v61 = vmul.f32 %v2799_v18, %v2799_v18  ;;  %v2985_v37 = vadd.f32 %v22257_v25, %v2983_v59  ;;  %v10878_v40 = vcombine.high %v2799_v18, %v2799_v18 }
 0x3c3   : > { %26928 = vst [vmem:[#allocation195_spill] sm:$0xff] %v22364_v49  ;;  %v13666_v50 = vcombine.low %v13658_v62, %v13665_v39  ;;  %v22370_v14 = vsel %vm910_vm4, %v2937_v41, 0.0  ;;  %v10992_v29 = vcombine.high %v10990_v8, %v10990_v8  ;;  %v22373_v4 = vrot.slane %v10990_v8, %v18540_v33 }
 0x3c4   : > { %v22376_v30 = vrot.slane %v10991_v22, %v18540_v33  ;;  %v2986_v45 = vsel %vm910_vm4, %v2935_v61, 0.0  ;;  %v10885_v60 = vrot.slane %v2799_v18, %v18540_v33  ;;  %v10892_v25 = vrot.slane %v10878_v40, %v18540_v33  ;;  %v26932_v22 = vld [vmem:[#allocation193_spill] sm:$0xff] }
 0x3c5   : > { %26929 = vst [vmem:[#allocation98_spill] sm:$0xff] %v22373_v4  ;;  %15826 = vxpose.xlu0.b32.cont [9/16] (narrow) %v13666_v50, 8  ;;  %v22384_v59 = vrot.slane %v10992_v29, %v18540_v33  ;;  %v22390_v15 = vadd.f32 %v2986_v45, %v2985_v37  ;;  %v26933_v50 = vcombine.high %v26932_v22, %v26932_v22 }
 0x3c6   : > { %26930 = vst [vmem:[#allocation41_spill] sm:$0xff] %v22376_v30  ;;  %v10893_v62 = vcombine.high %v10885_v60, %v10885_v60  ;;  %v10894_v39 = vcombine.high %v10892_v25, %v10892_v25  ;;  %v22393_v48 = vrot.slane %v10885_v60, %v18540_v33  ;;  %v22396_v18 = vrot.slane %v10892_v25, %v18540_v33  ;;  %v26934_v25 = vld [vmem:[#allocation194_spill] sm:$0xff] }
 0x3c7   : > { %26931 = vst [vmem:[#allocation95_spill] sm:$0xff] %v22384_v59  ;;  %v8331_v61 = vrot.slane %v26933_v50, %v18540_v33  ;;  %v10191_v37 = vcombine.high %v21788_v24, %v21788_v24  ;;  %v11645_v40 = vrot.slane %v21779_v58, %v18559_v11  ;;  %v8333_v41 = vcombine.high %v26934_v25, %v26934_v25  ;;  %v26938_v59 = vld [vmem:[#allocation38_spill] sm:$0xff] }
 0x3c8   : > { %v22409_v29 = vrot.slane %v10893_v62, %v18540_v33  ;;  %v22412_v45 = vrot.slane %v10894_v39, %v18540_v33  ;;  %v11649_v47 = vrot.slane %v21788_v24, %v18559_v11  ;;  %v26935_v62 = vcombine.high %v21779_v58, %v21779_v58  ;;  %v26939_v58 = vld [vmem:[#allocation97_spill] sm:$0xff] }
 0x3c9   : > { %v8335_v8 = vcombine.high %v8331_v61, %v8331_v61  ;;  %v11657_v26 = vrot.slane %v10191_v37, %v18559_v11  ;;  %v12790_v60 = vsel %vm7753_vm7, %v26934_v25, %v11645_v40  ;;  %v26937_v22 = vcombine.high %v26936_v9, %v26936_v9  ;;  %v26940_v40 = vld [vmem:[#allocation94_spill] sm:$0xff] }
 0x3ca   : > { %v11653_v39 = vrot.slane %v26935_v62, %v18559_v11  ;;  %v12791_v50 = vsel %vm7753_vm7, %v8331_v61, %v11649_v47  ;;  %v3193_v56 = vcombine.high %v26938_v59, %v26938_v59  ;;  %v5051_v62 = vcombine.high %v26939_v58, %v26939_v58 }
 0x3cb   : > { %v3191_v4 = vrot.slane %v26937_v22, %v18540_v33  ;;  %v12793_v37 = vsel %vm7753_vm7, %v8335_v8, %v11657_v26  ;;  %v13905_v13 = vcombine.low %v12790_v60, %v12791_v50  ;;  %v6556_v25 = vrot.slane %v26940_v40, %v18559_v11 }
 0x3cc   : > { %v12792_v24 = vsel %vm7753_vm7, %v8333_v41, %v11653_v39  ;;  %v6560_v9 = vrot.slane %v26939_v58, %v18559_v11  ;;  %v26941_v41 = vcombine.high %v26940_v40, %v26940_v40  ;;  %v6568_v61 = vrot.slane %v5051_v62, %v18559_v11 }
 0x3cd   : > { %v3195_v49 = vcombine.high %v3191_v4, %v3191_v4  ;;  %v13906_v30 = vcombine.low %v12792_v24, %v12793_v37  ;;  %v13913_v22 = vrot.slane %v13905_v13, %v19822_v43  ;;  %v7774_v26 = vsel %vm7753_vm7, %v26938_v59, %v6556_v25  ;;  %v26955_v13 = vld [vmem:[#allocation7_spill] sm:$0xff] }
 0x3ce   : > { %v6564_v47 = vrot.slane %v26941_v41, %v18559_v11  ;;  %v2810_v8 = vadd.f32 %v21932_v3, %v21682_v7  ;;  %v2802_v60 = vadd.f32 %v21932_v3, %v21688_v31  ;;  %v7775_v39 = vsel %vm7753_vm7, %v3191_v4, %v6560_v9 }
 0x3cf   : > { %v13920_v50 = vrot.slane %v13906_v30, %v19822_v43  ;;  %v7777_v58 = vsel %vm7753_vm7, %v3195_v49, %v6568_v61  ;;  %v13667_v62 = vcombine.low %v7774_v26, %v7775_v39 }
 0x3d0   : > { %v7776_v24 = vsel %vm7753_vm7, %v3193_v56, %v6564_v47  ;;  %v2938_v59 = vmul.f32 %v2810_v8, %v2810_v8  ;;  %v11025_v25 = vcombine.high %v2810_v8, %v2810_v8  ;;  %v11032_v7 = vrot.slane %v2810_v8, %v18540_v33 }
 0x3d1   : > { %v13668_v37 = vcombine.low %v7776_v24, %v7777_v58  ;;  %v13921_v40 = vcombine.low %v13913_v22, %v13920_v50  ;;  %v2886_v31 = vsel %vm910_vm4, %v2802_v60, 0.0  ;;  %v13675_v30 = vrot.slane %v13667_v62, %v19822_v43 }
 0x3d2   : > { %v22469_v56 = vsel %vm910_vm4, %v2810_v8, 0.0  ;;  %v2887_v49 = vadd.f32 %v2886_v31, %v22366_v54  ;;  %v11039_v9 = vrot.slane %v11025_v25, %v18540_v33  ;;  %v11040_v41 = vcombine.high %v11032_v7, %v11032_v7  ;;  %v26953_v25 = vld [vmem:[#allocation21_spill] sm:$0xff] }
 0x3d3   : > { %v13682_v4 = vrot.slane %v13668_v37, %v19822_v43  ;;  %15857 = vxpose.xlu1.b32.cont [8/16] (narrow) %v13921_v40, 8  ;;  %v22474_v47 = vrot.slane %v11032_v7, %v18540_v33  ;;  %v2936_v61 = vmul.f32 %v2802_v60, %v2802_v60  ;;  %v10927_v50 = vcombine.high %v2802_v60, %v2802_v60 }
 0x3d4   : > { %v2889_v26 = vadd.f32 %v22355_v35, %v2887_v49  ;;  %v10934_v39 = vrot.slane %v2802_v60, %v18540_v33  ;;  %v22479_v24 = vsel %vm910_vm4, %v2938_v59, 0.0  ;;  %v11041_v8 = vcombine.high %v11039_v9, %v11039_v9 }
 0x3d5   : > { %26942 = vst [vmem:[#allocation92_spill] sm:$0xff] %v22474_v47  ;;  %v13683_v22 = vcombine.low %v13675_v30, %v13682_v4  ;;  %v22482_v54 = vrot.slane %v11039_v9, %v18540_v33  ;;  %v22485_v58 = vrot.slane %v11040_v41, %v18540_v33  ;;  %v2988_v37 = vsel %vm910_vm4, %v2936_v61, 0.0  ;;  %v26947_v61 = vld [vmem:[#allocation124_spill] sm:$0xff] }
 0x3d6   : > { %v10941_v35 = vrot.slane %v10927_v50, %v18540_v33  ;;  %v10942_v40 = vcombine.high %v10934_v39, %v10934_v39  ;;  %v22492_v60 = vrot.slane %v11041_v8, %v18540_v33  ;;  %v2989_v7 = vadd.f32 %v2988_v37, %v22390_v15  ;;  %v26948_v15 = vld [vmem:[#allocation122_spill] sm:$0xff] }
 0x3d7   : > { %26943 = vst [vmem:[#allocation35_spill] sm:$0xff] %v22482_v54  ;;  %26944 = vst [vmem:[#allocation193_spill] sm:$0xff] %v22485_v58  ;;  %15827 = vxpose.xlu0.b32.cont [10/16] (narrow) %v13683_v22, 8  ;;  %v22500_v30 = vrot.slane %v10934_v39, %v18540_v33  ;;  %v6672_v22 = vrot.slane %v26947_v61, %v18559_v11  ;;  %v26949_v50 = vcombine.high %v26948_v15, %v26948_v15 }
 0x3d8   : > { %26945 = vst [vmem:[#allocation194_spill] sm:$0xff] %v22492_v60  ;;  %v10943_v31 = vcombine.high %v10941_v35, %v10941_v35  ;;  %v22503_v4 = vrot.slane %v10941_v35, %v18540_v33  ;;  %v22506_v49 = vrot.slane %v10942_v40, %v18540_v33  ;;  %v2991_v41 = vadd.f32 %v22370_v14, %v2989_v7  ;;  %v26950_v40 = vld [vmem:[#allocation4_spill] sm:$0xff]  ;;  %v26957_v60 = vld [vmem:[#allocation99_spill] sm:$0xff] }
 0x3d9   : > { %v6676_v39 = vrot.slane %v26949_v50, %v18559_v11  ;;  %v3390_v14 = vcombine.high %v26950_v40, %v26950_v40  ;;  %v26951_v59 = vcombine.high %v26947_v61, %v26947_v61  ;;  %v7803_v62 = vsel %vm7753_vm7, %v26950_v40, %v6672_v22 }
 0x3da   : > { %26946 = vst [vmem:[#allocation34_spill] sm:$0xff] %v22503_v4  ;;  %v22518_v8 = vrot.slane %v10943_v31, %v18540_v33  ;;  %v26952_v31 = vrot.slane %v26948_v15, %v18559_v11  ;;  %v26954_v35 = vcombine.high %v26953_v25, %v26953_v25  ;;  %v3243_v54 = vcombine.high %v26955_v13, %v26955_v13 }
 0x3db   : > { %v6680_v50 = vrot.slane %v26951_v59, %v18559_v11  ;;  %v26956_v59 = vld [vmem:[#allocation101_spill] sm:$0xff] }
 0x3dc   : > { %v7802_v9 = vsel %vm7753_vm7, %v26953_v25, %v26952_v31  ;;  %v7804_v37 = vsel %vm7753_vm7, %v26954_v35, %v6676_v39  ;;  %v6576_v61 = vrot.slane %v26956_v59, %v18559_v11  ;;  %v26958_v31 = vcombine.high %v26957_v60, %v26957_v60 }
 0x3dd   : > { %v13922_v7 = vcombine.low %v7802_v9, %v7803_v62  ;;  %v7805_v15 = vsel %vm7753_vm7, %v3390_v14, %v6680_v50  ;;  %v26959_v25 = vcombine.high %v26956_v59, %v26956_v59  ;;  %v26960_v62 = vrot.slane %v26957_v60, %v18559_v11  ;;  %v26961_v9 = vld [vmem:[#allocation49_spill] sm:$0xff] }
 0x3de   : > { %v6580_v47 = vrot.slane %v26958_v31, %v18559_v11  ;;  %v13923_v40 = vcombine.low %v7804_v37, %v7805_v15  ;;  %v7779_v14 = vsel %vm7753_vm7, %v26955_v13, %v6576_v61  ;;  %v2823_v50 = vadd.f32 %v21932_v3, %v21772_v52 }
 0x3df   : > { %v6584_v22 = vrot.slane %v26959_v25, %v18559_v11  ;;  %v7778_v39 = vsel %vm7753_vm7, %v26961_v9, %v26960_v62  ;;  %v26962_v59 = vcombine.high %v26961_v9, %v26961_v9  ;;  %v2815_v62 = vadd.f32 %v21932_v3, %v21784_v55 }
 0x3e0   : > { %v13684_v25 = vcombine.low %v7778_v39, %v7779_v14  ;;  %v13930_v35 = vrot.slane %v13922_v7, %v19822_v43  ;;  %v13937_v37 = vrot.slane %v13923_v40, %v19822_v43  ;;  %v22577_v13 = vsel %vm910_vm4, %v2823_v50, 0.0 }
 0x3e1   : > { %v7780_v31 = vsel %vm7753_vm7, %v26962_v59, %v6580_v47  ;;  %v7781_v60 = vsel %vm7753_vm7, %v3243_v54, %v6584_v22  ;;  %v2941_v52 = vmul.f32 %v2823_v50, %v2823_v50  ;;  %v11172_v61 = vcombine.high %v2823_v50, %v2823_v50 }
 0x3e2   : > { %v13685_v15 = vcombine.low %v7780_v31, %v7781_v60  ;;  %v11179_v9 = vrot.slane %v2823_v50, %v18540_v33  ;;  %v2891_v47 = vadd.f32 %v22469_v56, %v2889_v26  ;;  %v13938_v59 = vcombine.low %v13930_v35, %v13937_v37 }
 0x3e3   : > { %v13692_v54 = vrot.slane %v13684_v25, %v19822_v43  ;;  %v2892_v55 = vsel %vm910_vm4, %v2815_v62, 0.0  ;;  %v11186_v7 = vrot.slane %v11172_v61, %v18540_v33  ;;  %v2939_v50 = vmul.f32 %v2815_v62, %v2815_v62 }
 0x3e4   : > { %v13699_v22 = vrot.slane %v13685_v15, %v19822_v43  ;;  %v11187_v39 = vcombine.high %v11179_v9, %v11179_v9  ;;  %v22586_v40 = vrot.slane %v11179_v9, %v18540_v33  ;;  %v22588_v14 = vadd.f32 %v2892_v55, %v2891_v47  ;;  %15858 = vxpose.xlu1.b32.cont [9/16] (narrow) %v13938_v59, 8  ;;  %v26974_v47 = vld [vmem:[#allocation23_spill] sm:$0xff] }
 0x3e5   : > { %v2993_v56 = vadd.f32 %v22479_v24, %v2991_v41  ;;  %v11074_v26 = vcombine.high %v2815_v62, %v2815_v62  ;;  %v22592_v35 = vsel %vm910_vm4, %v2941_v52, 0.0  ;;  %v11188_v60 = vcombine.high %v11186_v7, %v11186_v7 }
 0x3e6   : > { %26963 = vst [vmem:[#allocation38_spill] sm:$0xff] %v22586_v40  ;;  %v13700_v31 = vcombine.low %v13692_v54, %v13699_v22  ;;  %v22595_v25 = vrot.slane %v11186_v7, %v18540_v33  ;;  %v22598_v37 = vrot.slane %v11187_v39, %v18540_v33  ;;  %v2994_v61 = vsel %vm910_vm4, %v2939_v50, 0.0  ;;  %v26969_v39 = vld [vmem:[#allocation19_spill] sm:$0xff]  ;;  %v26976_v40 = vld [vmem:[#allocation48_spill] sm:$0xff] }
 0x3e7   : > { %v11081_v9 = vrot.slane %v2815_v62, %v18540_v33  ;;  %v11088_v24 = vrot.slane %v11074_v26, %v18540_v33  ;;  %v22606_v41 = vrot.slane %v11188_v60, %v18540_v33  ;;  %v22612_v59 = vadd.f32 %v2994_v61, %v2993_v56  ;;  %v26971_v26 = vld [vmem:[#allocation126_spill] sm:$0xff]  ;;  %v26972_v60 = vld [vmem:[#allocation123_spill] sm:$0xff] }
 0x3e8   : > { %26964 = vst [vmem:[#allocation97_spill] sm:$0xff] %v22595_v25  ;;  %26965 = vst [vmem:[#allocation94_spill] sm:$0xff] %v22598_v37  ;;  %15828 = vxpose.xlu0.b32.cont [11/16] (narrow) %v13700_v31, 8  ;;  %v26970_v31 = vcombine.high %v26969_v39, %v26969_v39  ;;  %v5247_v56 = vcombine.high %v26971_v26, %v26971_v26  ;;  %v6684_v61 = vrot.slane %v26972_v60, %v18559_v11 }
 0x3e9   : > { %26966 = vst [vmem:[#allocation124_spill] sm:$0xff] %v22606_v41  ;;  %v11089_v54 = vcombine.high %v11081_v9, %v11081_v9  ;;  %v11090_v22 = vcombine.high %v11088_v24, %v11088_v24  ;;  %v22615_v55 = vrot.slane %v11081_v9, %v18540_v33  ;;  %v22618_v62 = vrot.slane %v11088_v24, %v18540_v33 }
 0x3ea   : > { %v3387_v50 = vrot.slane %v26970_v31, %v18540_v33  ;;  %v3389_v7 = vcombine.high %v26974_v47, %v26974_v47  ;;  %v6688_v15 = vrot.slane %v26971_v26, %v18559_v11  ;;  %v6696_v52 = vrot.slane %v5247_v56, %v18559_v11 }
 0x3eb   : > { %26967 = vst [vmem:[#allocation122_spill] sm:$0xff] %v22615_v55  ;;  %26968 = vst [vmem:[#allocation4_spill] sm:$0xff] %v22618_v62  ;;  %v22631_v9 = vrot.slane %v11089_v54, %v18540_v33  ;;  %v22634_v24 = vrot.slane %v11090_v22, %v18540_v33  ;;  %v26975_v54 = vcombine.high %v26972_v60, %v26972_v60  ;;  %v26978_v62 = vld [vmem:[#allocation5_spill] sm:$0xff]  ;;  %v26979_v60 = vld [vmem:[#allocation102_spill] sm:$0xff] }
 0x3ec   : > { %v3391_v25 = vcombine.high %v3387_v50, %v3387_v50  ;;  %v7806_v41 = vsel %vm7753_vm7, %v26974_v47, %v6684_v61  ;;  %v26977_v39 = vcombine.high %v26976_v40, %v26976_v40  ;;  %v7807_v31 = vsel %vm7753_vm7, %v3387_v50, %v6688_v15  ;;  %v26980_v47 = vld [vmem:[#allocation100_spill] sm:$0xff] }
 0x3ed   : > { %26973 = vst [vmem:[#allocation21_spill] sm:$0xff] %v22634_v24  ;;  %v6692_v22 = vrot.slane %v26975_v54, %v18559_v11  ;;  %v3242_v24 = vcombine.high %v26978_v62, %v26978_v62  ;;  %v5100_v54 = vcombine.high %v26979_v60, %v26979_v60  ;;  %v13939_v55 = vcombine.low %v7806_v41, %v7807_v31 }
 0x3ee   : > { %v3240_v37 = vrot.slane %v26977_v39, %v18540_v33  ;;  %v7809_v56 = vsel %vm7753_vm7, %v3391_v25, %v6696_v52  ;;  %v6588_v61 = vrot.slane %v26980_v47, %v18559_v11  ;;  %v6592_v40 = vrot.slane %v26979_v60, %v18559_v11 }
 0x3ef   : > { %v7808_v26 = vsel %vm7753_vm7, %v3389_v7, %v6692_v22  ;;  %v26981_v15 = vcombine.high %v26980_v47, %v26980_v47  ;;  %v6600_v50 = vrot.slane %v5100_v54, %v18559_v11  ;;  %v13947_v39 = vrot.slane %v13939_v55, %v19822_v43 }
 0x3f0   : > { %v3244_v58 = vcombine.high %v3240_v37, %v3240_v37  ;;  %v13940_v4 = vcombine.low %v7808_v26, %v7809_v56  ;;  %v7782_v25 = vsel %vm7753_vm7, %v26978_v62, %v6588_v61  ;;  %v2826_v41 = vadd.f32 %v21932_v3, %v21881_v23 }
 0x3f1   : > { %v6596_v7 = vrot.slane %v26981_v15, %v18559_v11  ;;  %v2818_v52 = vadd.f32 %v21932_v3, %v21890_v34  ;;  %v7783_v22 = vsel %vm7753_vm7, %v3240_v37, %v6592_v40 }
 0x3f2   : > { %v13954_v31 = vrot.slane %v13940_v4, %v19822_v43  ;;  %v7785_v60 = vsel %vm7753_vm7, %v3244_v58, %v6600_v50  ;;  %v13701_v54 = vcombine.low %v7782_v25, %v7783_v22  ;;  %v2942_v62 = vmul.f32 %v2826_v41, %v2826_v41 }
 0x3f3   : > { %v7784_v26 = vsel %vm7753_vm7, %v3242_v24, %v6596_v7  ;;  %v11221_v61 = vcombine.high %v2826_v41, %v2826_v41  ;;  %v11228_v23 = vrot.slane %v2826_v41, %v18540_v33  ;;  %v2894_v3 = vsel %vm910_vm4, %v2818_v52, 0.0 }
 0x3f4   : > { %v13702_v56 = vcombine.low %v7784_v26, %v7785_v60  ;;  %v13955_v47 = vcombine.low %v13947_v39, %v13954_v31  ;;  %v13709_v34 = vrot.slane %v13701_v54, %v19822_v43  ;;  %v22691_v37 = vsel %vm910_vm4, %v2826_v41, 0.0 }
 0x3f5   : > { %v2895_v58 = vadd.f32 %v2894_v3, %v22588_v14  ;;  %v11235_v24 = vrot.slane %v11221_v61, %v18540_v33  ;;  %v11236_v40 = vcombine.high %v11228_v23, %v11228_v23  ;;  %v22696_v15 = vrot.slane %v11228_v23, %v18540_v33 }
 0x3f6   : > { %v13716_v4 = vrot.slane %v13702_v56, %v19822_v43  ;;  %15859 = vxpose.xlu1.b32.cont [10/16] (narrow) %v13955_v47, 8  ;;  %v2940_v7 = vmul.f32 %v2818_v52, %v2818_v52  ;;  %v11123_v25 = vcombine.high %v2818_v52, %v2818_v52  ;;  %v11130_v31 = vrot.slane %v2818_v52, %v18540_v33 }
 0x3f7   : > { %26982 = vst [vmem:[#allocation7_spill] sm:$0xff] %v22696_v15  ;;  %v2897_v39 = vadd.f32 %v22577_v13, %v2895_v58  ;;  %v22701_v22 = vsel %vm910_vm4, %v2942_v62, 0.0  ;;  %v11237_v41 = vcombine.high %v11235_v24, %v11235_v24  ;;  %v22704_v14 = vrot.slane %v11235_v24, %v18540_v33  ;;  %v26992_v62 = vld [vmem:[#allocation33_spill] sm:$0xff] }
 0x3f8   : > { %v13717_v50 = vcombine.low %v13709_v34, %v13716_v4  ;;  %v22707_v26 = vrot.slane %v11236_v40, %v18540_v33  ;;  %v2996_v54 = vsel %vm910_vm4, %v2940_v7, 0.0  ;;  %v11137_v13 = vrot.slane %v11123_v25, %v18540_v33  ;;  %v26986_v40 = vld [vmem:[#allocation129_spill] sm:$0xff] }
 0x3f9   : > { %26983 = vst [vmem:[#allocation101_spill] sm:$0xff] %v22704_v14  ;;  %v11138_v56 = vcombine.high %v11130_v31, %v11130_v31  ;;  %v22714_v52 = vrot.slane %v11237_v41, %v18540_v33  ;;  %v2997_v61 = vadd.f32 %v2996_v54, %v22612_v59  ;;  %v22722_v3 = vrot.slane %v11130_v31, %v18540_v33  ;;  %v26987_v59 = vld [vmem:[#allocation127_spill] sm:$0xff] }
 0x3fa   : > { %26984 = vst [vmem:[#allocation99_spill] sm:$0xff] %v22707_v26  ;;  %15829 = vxpose.xlu0.b32.cont [12/16] (narrow) %v13717_v50, 8  ;;  %v11139_v23 = vcombine.high %v11137_v13, %v11137_v13  ;;  %v22725_v34 = vrot.slane %v11137_v13, %v18540_v33  ;;  %v6704_v7 = vrot.slane %v26986_v40, %v18559_v11  ;;  %v26989_v13 = vld [vmem:[#allocation14_spill] sm:$0xff]  ;;  %v26994_v41 = vld [vmem:[#allocation159_spill] sm:$0xff] }
 0x3fb   : > { %26985 = vst [vmem:[#allocation49_spill] sm:$0xff] %v22714_v52  ;;  %v22728_v4 = vrot.slane %v11138_v56, %v18540_v33  ;;  %v2999_v24 = vadd.f32 %v22592_v35, %v2997_v61  ;;  %v26988_v50 = vcombine.high %v26987_v59, %v26987_v59  ;;  %v3439_v35 = vcombine.high %v26989_v13, %v26989_v13  ;;  %v27012_v26 = vld [vmem:[#allocation158_spill] sm:$0xff] }
 0x3fc   : > { %v22740_v31 = vrot.slane %v11139_v23, %v18540_v33  ;;  %v26990_v61 = vcombine.high %v26986_v40, %v26986_v40  ;;  %v26991_v23 = vrot.slane %v26987_v59, %v18559_v11  ;;  %v7811_v58 = vsel %vm7753_vm7, %v26989_v13, %v6704_v7 }
 0x3fd   : > { %v6708_v25 = vrot.slane %v26988_v50, %v18559_v11  ;;  %v26993_v60 = vcombine.high %v26992_v62, %v26992_v62  ;;  %v8187_v55 = vcombine.high %v26994_v41, %v26994_v41  ;;  %v11537_v40 = vrot.slane %v21457_v19, %v18559_v11 }
 0x3fe   : > { %v6712_v50 = vrot.slane %v26990_v61, %v18559_v11  ;;  %v7810_v47 = vsel %vm7753_vm7, %v26992_v62, %v26991_v23  ;;  %v26995_v61 = vcombine.high %v21449_v42, %v21449_v42  ;;  %v26996_v62 = vcombine.high %v21457_v19, %v21457_v19 }
 0x3ff   : > { %v7812_v54 = vsel %vm7753_vm7, %v26993_v60, %v6708_v25  ;;  %v13956_v56 = vcombine.low %v7810_v47, %v7811_v58  ;;  %v26997_v60 = vrot.slane %v21449_v42, %v18559_v11  ;;  %v26998_v47 = vld [vmem:[#allocation157_spill] sm:$0xff] }
 0x400   : > { %v7813_v59 = vsel %vm7753_vm7, %v3439_v35, %v6712_v50  ;;  %v11541_v23 = vrot.slane %v26995_v61, %v18559_v11  ;;  %v11545_v7 = vrot.slane %v26996_v62, %v18559_v11  ;;  %v12763_v35 = vsel %vm7753_vm7, %v26994_v41, %v11537_v40  ;;  %v22790_v50 = vld [vmem:[%s25548_s2] ss:$0 sm:$0xff] }
 0x401   : > { %v12762_v58 = vsel %vm7753_vm7, %v26998_v47, %v26997_v60  ;;  %v13957_v13 = vcombine.low %v7812_v54, %v7813_v59  ;;  %v2839_v19 = vadd.f32 %v22790_v50, %v21996_v38  ;;  %v26999_v42 = vcombine.high %v26998_v47, %v26998_v47 }
 0x402   : > { %v12765_v62 = vsel %vm7753_vm7, %v8187_v55, %v11545_v7  ;;  %v13718_v60 = vcombine.low %v12762_v58, %v12763_v35  ;;  %v2831_v54 = vadd.f32 %v22790_v50, %v22004_v53  ;;  %v13964_v41 = vrot.slane %v13956_v56, %v19822_v43 }
 0x403   : > { %v12764_v61 = vsel %vm7753_vm7, %v26999_v42, %v11541_v23  ;;  %v13971_v40 = vrot.slane %v13957_v13, %v19822_v43  ;;  %v22804_v25 = vsel %vm910_vm4, %v2839_v19, 0.0  ;;  %v2945_v38 = vmul.f32 %v2839_v19, %v2839_v19 }
 0x404   : > { %v13719_v59 = vcombine.low %v12764_v61, %v12765_v62  ;;  %v11368_v14 = vcombine.high %v2839_v19, %v2839_v19  ;;  %v11375_v47 = vrot.slane %v2839_v19, %v18540_v33  ;;  %v2899_v23 = vadd.f32 %v22691_v37, %v2897_v39 }
 0x405   : > { %v13972_v42 = vcombine.low %v13964_v41, %v13971_v40  ;;  %v13726_v55 = vrot.slane %v13718_v60, %v19822_v43  ;;  %v2900_v53 = vsel %vm910_vm4, %v2831_v54, 0.0  ;;  %v2943_v19 = vmul.f32 %v2831_v54, %v2831_v54 }
 0x406   : > { %v13733_v7 = vrot.slane %v13719_v59, %v19822_v43  ;;  %v11382_v56 = vrot.slane %v11368_v14, %v18540_v33  ;;  %v11383_v58 = vcombine.high %v11375_v47, %v11375_v47  ;;  %v22813_v13 = vrot.slane %v11375_v47, %v18540_v33 }
 0x407   : > { %v22815_v35 = vadd.f32 %v2900_v53, %v2899_v23  ;;  %15860 = vxpose.xlu1.b32.cont [11/16] (narrow) %v13972_v42, 8  ;;  %v3001_v37 = vadd.f32 %v22701_v22, %v2999_v24  ;;  %v11270_v39 = vcombine.high %v2831_v54, %v2831_v54  ;;  %v22819_v62 = vsel %vm910_vm4, %v2945_v38, 0.0  ;;  %v27008_v23 = vld [vmem:[#allocation8_spill] sm:$0xff] }
 0x408   : > { %27000 = vst [vmem:[#allocation19_spill] sm:$0xff] %v22813_v13  ;;  %v13734_v61 = vcombine.low %v13726_v55, %v13733_v7  ;;  %v11384_v60 = vcombine.high %v11382_v56, %v11382_v56  ;;  %v22822_v41 = vrot.slane %v11382_v56, %v18540_v33  ;;  %v22825_v14 = vrot.slane %v11383_v58, %v18540_v33  ;;  %v27004_v58 = vld [vmem:[#allocation10_spill] sm:$0xff] }
 0x409   : > { %v3002_v59 = vsel %vm910_vm4, %v2943_v19, 0.0  ;;  %v11277_v47 = vrot.slane %v2831_v54, %v18540_v33  ;;  %v11284_v22 = vrot.slane %v11270_v39, %v18540_v33  ;;  %v27006_v39 = vld [vmem:[#allocation130_spill] sm:$0xff]  ;;  %v3438_v56 = vcombine.high %v27008_v23, %v27008_v23 }
 0x40a   : > { %27001 = vst [vmem:[#allocation126_spill] sm:$0xff] %v22822_v41  ;;  %27002 = vst [vmem:[#allocation123_spill] sm:$0xff] %v22825_v14  ;;  %15830 = vxpose.xlu0.b32.cont [13/16] (narrow) %v13734_v61, 8  ;;  %v22833_v24 = vrot.slane %v11384_v60, %v18540_v33  ;;  %v22839_v42 = vadd.f32 %v3002_v59, %v3001_v37  ;;  %v27005_v61 = vcombine.high %v27004_v58, %v27004_v58  ;;  %v27007_v60 = vld [vmem:[#allocation128_spill] sm:$0xff] }
 0x40b   : > { %v11285_v55 = vcombine.high %v11277_v47, %v11277_v47  ;;  %v11286_v7 = vcombine.high %v11284_v22, %v11284_v22  ;;  %v22842_v53 = vrot.slane %v11277_v47, %v18540_v33  ;;  %v22845_v54 = vrot.slane %v11284_v22, %v18540_v33 }
 0x40c   : > { %27003 = vst [vmem:[#allocation23_spill] sm:$0xff] %v22833_v24  ;;  %v3436_v19 = vrot.slane %v27005_v61, %v18540_v33  ;;  %v5296_v37 = vcombine.high %v27006_v39, %v27006_v39  ;;  %v6716_v59 = vrot.slane %v27007_v60, %v18559_v11  ;;  %v6720_v40 = vrot.slane %v27006_v39, %v18559_v11  ;;  %v27010_v24 = vld [vmem:[#allocation156_spill] sm:$0xff] }
 0x40d   : > { %v22858_v47 = vrot.slane %v11285_v55, %v18540_v33  ;;  %v22861_v22 = vrot.slane %v11286_v7, %v18540_v33  ;;  %v27009_v55 = vcombine.high %v27007_v60, %v27007_v60  ;;  %v27011_v58 = vcombine.high %v27010_v24, %v27010_v24 }
 0x40e   : > { %v3440_v52 = vcombine.high %v3436_v19, %v3436_v19  ;;  %v6728_v38 = vrot.slane %v5296_v37, %v18559_v11  ;;  %v7814_v41 = vsel %vm7753_vm7, %v27008_v23, %v6716_v59  ;;  %v7815_v61 = vsel %vm7753_vm7, %v3436_v19, %v6720_v40 }
 0x40f   : > { %v6724_v7 = vrot.slane %v27009_v55, %v18559_v11  ;;  %v8184_v15 = vrot.slane %v27011_v58, %v18540_v33  ;;  %v8186_v13 = vcombine.high %v27012_v26, %v27012_v26  ;;  %v10044_v60 = vcombine.high %v21461_v5, %v21461_v5 }
 0x410   : > { %v7817_v37 = vsel %vm7753_vm7, %v3440_v52, %v6728_v38  ;;  %v13973_v55 = vcombine.low %v7814_v41, %v7815_v61  ;;  %v11549_v23 = vrot.slane %v21452_v0, %v18559_v11  ;;  %v11553_v24 = vrot.slane %v21461_v5, %v18559_v11 }
 0x411   : > { %v7816_v39 = vsel %vm7753_vm7, %v3438_v56, %v6724_v7  ;;  %v8188_v14 = vcombine.high %v8184_v15, %v8184_v15  ;;  %v27013_v40 = vcombine.high %v21452_v0, %v21452_v0  ;;  %v11561_v19 = vrot.slane %v10044_v60, %v18559_v11 }
 0x412   : > { %v13974_v59 = vcombine.low %v7816_v39, %v7817_v37  ;;  %v13981_v58 = vrot.slane %v13973_v55, %v19822_v43  ;;  %v12766_v52 = vsel %vm7753_vm7, %v27012_v26, %v11549_v23  ;;  %v2842_v41 = vadd.f32 %v22790_v50, %v22119_v20 }
 0x413   : > { %v11557_v56 = vrot.slane %v27013_v40, %v18559_v11  ;;  %v2834_v38 = vadd.f32 %v22790_v50, %v22129_v28  ;;  %v12767_v61 = vsel %vm7753_vm7, %v8184_v15, %v11553_v24  ;;  %v12769_v7 = vsel %vm7753_vm7, %v8188_v14, %v11561_v19 }
 0x414   : > { %v13988_v5 = vrot.slane %v13974_v59, %v19822_v43  ;;  %v13735_v60 = vcombine.low %v12766_v52, %v12767_v61  ;;  %v2946_v26 = vmul.f32 %v2842_v41, %v2842_v41  ;;  %v11417_v23 = vcombine.high %v2842_v41, %v2842_v41 }
 0x415   : > { %v12768_v0 = vsel %vm7753_vm7, %v8186_v13, %v11557_v56  ;;  %v11424_v20 = vrot.slane %v2842_v41, %v18540_v33  ;;  %v2902_v28 = vsel %vm910_vm4, %v2834_v38, 0.0  ;;  %v2906_v13 = vsel %vm910_vm4, %v2842_v41, 0.0 }
 0x416   : > { %v13736_v37 = vcombine.low %v12768_v0, %v12769_v7  ;;  %v13989_v55 = vcombine.low %v13981_v58, %v13988_v5  ;;  %v13743_v50 = vrot.slane %v13735_v60, %v19822_v43  ;;  %v2903_v14 = vadd.f32 %v2902_v28, %v22815_v35 }
 0x417   : > { %v11431_v59 = vrot.slane %v11417_v23, %v18540_v33  ;;  %v11432_v24 = vcombine.high %v11424_v20, %v11424_v20  ;;  %v22921_v40 = vrot.slane %v11424_v20, %v18540_v33  ;;  %v2944_v56 = vmul.f32 %v2834_v38, %v2834_v38 }
 0x418   : > { %v13750_v15 = vrot.slane %v13736_v37, %v19822_v43  ;;  %15861 = vxpose.xlu1.b32.cont [12/16] (narrow) %v13989_v55, 8  ;;  %v2905_v58 = vadd.f32 %v22804_v25, %v2903_v14  ;;  %v11319_v52 = vcombine.high %v2834_v38, %v2834_v38  ;;  %v11326_v5 = vrot.slane %v2834_v38, %v18540_v33 }
 0x419   : > { %27014 = vst [vmem:[#allocation48_spill] sm:$0xff] %v22921_v40  ;;  %v3008_v61 = vsel %vm910_vm4, %v2946_v26, 0.0  ;;  %v11433_v0 = vcombine.high %v11431_v59, %v11431_v59  ;;  %v22927_v41 = vrot.slane %v11431_v59, %v18540_v33  ;;  %v22930_v35 = vrot.slane %v11432_v24, %v18540_v33  ;;  %v27018_v24 = vld [vmem:[#allocation189_spill] sm:$0xff] }
 0x41a   : > { %v13751_v19 = vcombine.low %v13743_v50, %v13750_v15  ;;  %v2907_v60 = vadd.f32 %v2906_v13, %v2905_v58  ;;  %v3004_v37 = vsel %vm910_vm4, %v2944_v56, 0.0  ;;  %v11333_v25 = vrot.slane %v11319_v52, %v18540_v33  ;;  %v27024_v13 = vld [vmem:[#allocation187_spill] sm:$0xff] }
 0x41b   : > { %27015 = vst [vmem:[#allocation5_spill] sm:$0xff] %v22927_v41  ;;  %27016 = vst [vmem:[#allocation102_spill] sm:$0xff] %v22930_v35  ;;  %v22937_v38 = vrot.slane %v11433_v0, %v18540_v33  ;;  %v3005_v23 = vadd.f32 %v3004_v37, %v22839_v42  ;;  %v11334_v28 = vcombine.high %v11326_v5, %v11326_v5  ;;  %v27019_v37 = vld [vmem:[#allocation359_spill] sm:$0xff]  ;;  %v27025_v0 = vld [vmem:[#allocation177_spill] sm:$0xff] }
 0x41c   : > { %15831 = vxpose.xlu0.b32.cont [14/16] (narrow) %v13751_v19, 8  ;;  %v2908_v20 = vrot.slane %v2907_v60, 4  ;;  %v11335_v50 = vcombine.high %v11333_v25, %v11333_v25  ;;  %v22945_v15 = vrot.slane %v11326_v5, %v18540_v33  ;;  %v22951_v59 = vrot.slane %v11333_v25, %v18540_v33 }
 0x41d   : > { %27017 = vst [vmem:[#allocation100_spill] sm:$0xff] %v22937_v38  ;;  %v3007_v14 = vadd.f32 %v22819_v62, %v3005_v23  ;;  %v8383_v56 = vcombine.high %v27018_v24, %v27018_v24  ;;  %v22956_v42 = vrot.slane %v11334_v28, %v18540_v33  ;;  %v8236_v23 = vcombine.high %v27025_v0, %v27025_v0 }
 0x41e   : > { %v2909_v19 = vadd.f32 %v2908_v20, %v2907_v60  ;;  %v22959_v58 = vrot.slane %v11335_v50, %v18540_v33  ;;  %v11665_v60 = vrot.slane %v27019_v37, %v18559_v11  ;;  %v27020_v20 = vld [vmem:[#allocation357_spill] sm:$0xff] }
 0x41f   : > { %v3009_v5 = vadd.f32 %v3008_v61, %v3007_v14  ;;  %v27021_v28 = vcombine.high %v27020_v20, %v27020_v20  ;;  %v27022_v61 = vcombine.high %v27019_v37, %v27019_v37  ;;  %v27023_v55 = vrot.slane %v27020_v20, %v18559_v11 }
 0x420   : > { %v2910_v25 = vrot.slane %v2909_v19, 2  ;;  %v12795_v62 = vsel %vm7753_vm7, %v27018_v24, %v11665_v60  ;;  %v27028_v24 = vld [vmem:[#allocation160_spill] sm:$0xff] }
 0x421   : > { %v11669_v50 = vrot.slane %v27021_v28, %v18559_v11  ;;  %v11673_v14 = vrot.slane %v27022_v61, %v18559_v11  ;;  %v3010_v26 = vrot.slane %v3009_v5, 4  ;;  %v12794_v7 = vsel %vm7753_vm7, %v27024_v13, %v27023_v55  ;;  %v27027_v55 = vld [vmem:[#allocation339_spill] sm:$0xff] }
 0x422   : > { %v2911_v52 = vadd.f32 %v2910_v25, %v2909_v19  ;;  %v27026_v28 = vcombine.high %v27024_v13, %v27024_v13  ;;  %v13990_v39 = vcombine.low %v12794_v7, %v12795_v62  ;;  %v11569_v38 = vrot.slane %v27027_v55, %v18559_v11 }
 0x423   : > { %v12797_v61 = vsel %vm7753_vm7, %v8383_v56, %v11673_v14  ;;  %v3011_v41 = vadd.f32 %v3010_v26, %v3009_v5  ;;  %v27029_v60 = vcombine.high %v27028_v24, %v27028_v24  ;;  %v27030_v13 = vcombine.high %v27027_v55, %v27027_v55  ;;  %v27032_v26 = vld [vmem:[#allocation175_spill] sm:$0xff] }
 0x424   : > { %v12796_v37 = vsel %vm7753_vm7, %v27026_v28, %v11669_v50  ;;  %v2912_v19 = vrot.slane %v2911_v52, 1  ;;  %v13998_v25 = vrot.slane %v13990_v39, %v19822_v43  ;;  %v27031_v7 = vrot.slane %v27028_v24, %v18559_v11  ;;  %v27034_v24 = vld [vmem:[#allocation186_spill] sm:$0xff] }
 0x425   : > { %v13991_v20 = vcombine.low %v12796_v37, %v12797_v61  ;;  %v11573_v40 = vrot.slane %v27029_v60, %v18559_v11  ;;  %v11577_v56 = vrot.slane %v27030_v13, %v18559_v11  ;;  %v3012_v62 = vrot.slane %v3011_v41, 2 }
 0x426   : > { %v12770_v5 = vsel %vm7753_vm7, %v27032_v26, %v27031_v7  ;;  %v12771_v14 = vsel %vm7753_vm7, %v27025_v0, %v11569_v38  ;;  %v27033_v39 = vcombine.high %v27032_v26, %v27032_v26  ;;  %v2913_v37 = vadd.f32 %v2912_v19, %v2911_v52  ;;  %v27036_v7 = vld [vmem:[#allocation188_spill] sm:$0xff] }
 0x427   : > { %v14005_v50 = vrot.slane %v13991_v20, %v19822_v43  ;;  %v12773_v61 = vsel %vm7753_vm7, %v8236_v23, %v11577_v56  ;;  %v13752_v55 = vcombine.low %v12770_v5, %v12771_v14  ;;  %v27035_v60 = vcombine.high %v27034_v24, %v27034_v24  ;;  %v27038_v56 = vld [vmem:[#allocation360_spill] sm:$0xff] }
 0x428   : > { %v12772_v28 = vsel %vm7753_vm7, %v27033_v39, %v11573_v40  ;;  %v3013_v20 = vadd.f32 %v3012_v62, %v3011_v41  ;;  %v8382_v26 = vcombine.high %v27036_v7, %v27036_v7  ;;  %v27037_v40 = vld [vmem:[#allocation361_spill] sm:$0xff]  ;;  %v10240_v5 = vcombine.high %v27038_v56, %v27038_v56  ;;  %v27039_v41 = vld [vmem:[#allocation358_spill] sm:$0xff] }
 0x429   : > { %v8380_v13 = vrot.slane %v27035_v60, %v18540_v33  ;;  %v14006_v38 = vcombine.low %v13998_v25, %v14005_v50  ;;  %v13753_v0 = vcombine.low %v12772_v28, %v12773_v61  ;;  %v2914_v52 = vadd.f32 %v2913_v37, %v27037_v40  ;;  %v27041_v61 = vld [vmem:[#allocation174_spill] sm:$0xff]  ;;  %v27043_v60 = vld [vmem:[#allocation176_spill] sm:$0xff] }
 0x42a   : > { %v13760_v23 = vrot.slane %v13752_v55, %v19822_v43  ;;  %v3014_v14 = vrot.slane %v3013_v20, 1  ;;  %v11677_v25 = vrot.slane %v27039_v41, %v18559_v11  ;;  %v11681_v62 = vrot.slane %v27038_v56, %v18559_v11 }
 0x42b   : > { %v8384_v19 = vcombine.high %v8380_v13, %v8380_v13  ;;  %15862 = vxpose.xlu1.b32.cont [13/16] (narrow) %v14006_v38, 8  ;;  %v13767_v39 = vrot.slane %v13753_v0, %v19822_v43  ;;  %16083 = vst.msk [vmem:[%s238_s27] sm:$0x1] %vm16082_vm8, %v2914_v52  ;;  %v27040_v50 = vcombine.high %v27039_v41, %v27039_v41 }
 0x42c   : > { %v11689_v37 = vrot.slane %v10240_v5, %v18559_v11  ;;  %v27042_v55 = vcombine.high %v27041_v61, %v27041_v61  ;;  %v8235_v38 = vcombine.high %v27043_v60, %v27043_v60  ;;  %v3015_v0 = vadd.f32 %v3014_v14, %v3013_v20 }
 0x42d   : > { %v11685_v28 = vrot.slane %v27040_v50, %v18559_v11  ;;  %v13768_v40 = vcombine.low %v13760_v23, %v13767_v39  ;;  %v12798_v52 = vsel %vm7753_vm7, %v27036_v7, %v11677_v25  ;;  %v12799_v56 = vsel %vm7753_vm7, %v8380_v13, %v11681_v62  ;;  %v27045_v23 = vld [vmem:[#allocation340_spill] sm:$0xff] }
 0x42e   : > { %v8233_v24 = vrot.slane %v27042_v55, %v18540_v33  ;;  %v12801_v41 = vsel %vm7753_vm7, %v8384_v19, %v11689_v37  ;;  %v14007_v50 = vcombine.low %v12798_v52, %v12799_v56  ;;  %v27044_v55 = vld [vmem:[#allocation362_spill] sm:$0xff]  ;;  %v10093_v14 = vcombine.high %v27045_v23, %v27045_v23  ;;  %v27046_v7 = vld [vmem:[#allocation164_spill] sm:$0xff]  ;;  %v27049_v52 = vld [vmem:[#allocation365_spill] sm:$0xff] }
 0x42f   : > { %v12800_v5 = vsel %vm7753_vm7, %v8382_v26, %v11685_v28  ;;  %v3016_v35 = vadd.f32 %v3015_v0, %v27044_v55  ;;  %15832 = vxpose.xlu0.b32.cont [15/16] (narrow) %v13768_v40, 8  ;;  %v11581_v13 = vrot.slane %v27046_v7, %v18559_v11  ;;  %v11585_v25 = vrot.slane %v27045_v23, %v18559_v11  ;;  %v27048_v62 = vld [vmem:[#allocation192_spill] sm:$0xff] }
 0x430   : > { %v8237_v61 = vcombine.high %v8233_v24, %v8233_v24  ;;  %v14008_v20 = vcombine.low %v12800_v5, %v12801_v41  ;;  %v14015_v39 = vrot.slane %v14007_v50, %v19822_v43  ;;  %v27047_v26 = vcombine.high %v27046_v7, %v27046_v7  ;;  %v27050_v50 = vld [vmem:[#allocation363_spill] sm:$0xff] }
 0x431   : > { %v8432_v28 = vcombine.high %v27048_v62, %v27048_v62  ;;  %16084 = vst.msk [vmem:[%s241_s30] sm:$0x1] %vm16082_vm8, %v3016_v35  ;;  %v11593_v0 = vrot.slane %v10093_v14, %v18559_v11  ;;  %v12774_v40 = vsel %vm7753_vm7, %v27043_v60, %v11581_v13  ;;  %v11697_v56 = vrot.slane %v27049_v52, %v18559_v11 }
 0x432   : > { %v11589_v19 = vrot.slane %v27047_v26, %v18559_v11  ;;  %v14022_v37 = vrot.slane %v14008_v20, %v19822_v43  ;;  %v12775_v5 = vsel %vm7753_vm7, %v8233_v24, %v11585_v25  ;;  %v27051_v55 = vcombine.high %v27050_v50, %v27050_v50  ;;  %v27054_v24 = vld [vmem:[#allocation93_spill] sm:$0xff] }
 0x433   : > { %v27052_v35 = vcombine.high %v27049_v52, %v27049_v52  ;;  %v12777_v60 = vsel %vm7753_vm7, %v8237_v61, %v11593_v0  ;;  %v13769_v7 = vcombine.low %v12774_v40, %v12775_v5  ;;  %v27053_v13 = vrot.slane %v27050_v50, %v18559_v11  ;;  %v27056_v40 = vld [vmem:[#allocation28_spill] sm:$0xff]  ;;  %v27057_v50 = vld [vmem:[#allocation163_spill] sm:$0xff] }
 0x434   : > { %v12776_v41 = vsel %vm7753_vm7, %v8235_v38, %v11589_v19  ;;  %v11701_v23 = vrot.slane %v27051_v55, %v18559_v11  ;;  %v14023_v14 = vcombine.low %v14015_v39, %v14022_v37  ;;  %v12803_v26 = vsel %vm7753_vm7, %v27048_v62, %v11697_v56  ;;  %v27058_v56 = vld [vmem:[#allocation161_spill] sm:$0xff] }
 0x435   : > { %v11705_v20 = vrot.slane %v27052_v35, %v18559_v11  ;;  %v12802_v38 = vsel %vm7753_vm7, %v27054_v24, %v27053_v13  ;;  %v13770_v25 = vcombine.low %v12776_v41, %v12777_v60  ;;  %v27055_v19 = vcombine.high %v27054_v24, %v27054_v24  ;;  %v27063_v24 = vld [vmem:[#allocation6_spill] sm:$0xff] }
 0x436   : > { %15863 = vxpose.xlu1.b32.cont [14/16] (narrow) %v14023_v14, 8  ;;  %v13777_v61 = vrot.slane %v13769_v7, %v19822_v43  ;;  %v14024_v37 = vcombine.low %v12802_v38, %v12803_v26  ;;  %v3488_v5 = vcombine.high %v27056_v40, %v27056_v40  ;;  %v6736_v62 = vrot.slane %v27057_v50, %v18559_v11  ;;  %v27062_v7 = vld [vmem:[#allocation26_spill] sm:$0xff] }
 0x437   : > { %v12804_v52 = vsel %vm7753_vm7, %v27055_v19, %v11701_v23  ;;  %v12805_v39 = vsel %vm7753_vm7, %v8432_v28, %v11705_v20  ;;  %v13784_v41 = vrot.slane %v13770_v25, %v19822_v43  ;;  %v27059_v55 = vcombine.high %v27058_v56, %v27058_v56 }
 0x438   : > { %v14025_v0 = vcombine.low %v12804_v52, %v12805_v39  ;;  %v27060_v28 = vcombine.high %v27057_v50, %v27057_v50  ;;  %v14032_v20 = vrot.slane %v14024_v37, %v19822_v43  ;;  %v27061_v60 = vrot.slane %v27058_v56, %v18559_v11 }
 0x439   : > { %v6740_v23 = vrot.slane %v27059_v55, %v18559_v11  ;;  %v27064_v38 = vcombine.high %v27063_v24, %v27063_v24  ;;  %v13785_v26 = vcombine.low %v13777_v61, %v13784_v41  ;;  %v7819_v19 = vsel %vm7753_vm7, %v27056_v40, %v6736_v62  ;;  %v27066_v55 = vld [vmem:[#allocation96_spill] sm:$0xff]  ;;  %v27067_v24 = vld [vmem:[#allocation366_spill] sm:$0xff] }
 0x43a   : > { %v6744_v35 = vrot.slane %v27060_v28, %v18559_v11  ;;  %v14039_v14 = vrot.slane %v14025_v0, %v19822_v43  ;;  %v7818_v13 = vsel %vm7753_vm7, %v27062_v7, %v27061_v60  ;;  %v27065_v52 = vcombine.high %v27062_v7, %v27062_v7  ;;  %v27068_v40 = vld [vmem:[#allocation364_spill] sm:$0xff] }
 0x43b   : > { %v8429_v25 = vrot.slane %v27064_v38, %v18540_v33  ;;  %v14058_v50 = vcombine.low %v7818_v13, %v7819_v19  ;;  %v8431_v28 = vcombine.high %v27066_v55, %v27066_v55  ;;  %15833 = vxpose.xlu0.b32.end [16/16] (narrow) %v13785_v26, 8  ;;  %v10289_v61 = vcombine.high %v27067_v24, %v27067_v24 }
 0x43c   : > { %v7820_v39 = vsel %vm7753_vm7, %v27065_v52, %v6740_v23  ;;  %v7821_v37 = vsel %vm7753_vm7, %v3488_v5, %v6744_v35  ;;  %v14040_v0 = vcombine.low %v14032_v20, %v14039_v14  ;;  %v11709_v41 = vrot.slane %v27068_v40, %v18559_v11  ;;  %v27070_v14 = vld [vmem:[#allocation22_spill] sm:$0xff]  ;;  %v27072_v52 = vld [vmem:[#allocation25_spill] sm:$0xff] }
 0x43d   : > { %v14059_v56 = vcombine.low %v7820_v39, %v7821_v37  ;;  %v8433_v60 = vcombine.high %v8429_v25, %v8429_v25  ;;  %v11713_v62 = vrot.slane %v27067_v24, %v18559_v11  ;;  %v14066_v5 = vrot.slane %v14058_v50, %v19822_v43 }
 0x43e   : > { %15864 = vxpose.xlu1.b32.cont [15/16] (narrow) %v14040_v0, 8  ;;  %v27069_v35 = vcombine.high %v27068_v40, %v27068_v40  ;;  %v27071_v7 = vcombine.high %v27070_v14, %v27070_v14  ;;  %v11721_v38 = vrot.slane %v10289_v61, %v18559_v11  ;;  %v12806_v26 = vsel %vm7753_vm7, %v27066_v55, %v11709_v41  ;;  %v27073_v40 = vld [vmem:[#allocation165_spill] sm:$0xff]  ;;  %v27074_v61 = vld [vmem:[#allocation162_spill] sm:$0xff] }
 0x43f   : > { %v14073_v23 = vrot.slane %v14059_v56, %v19822_v43  ;;  %v12807_v19 = vsel %vm7753_vm7, %v8429_v25, %v11713_v62  ;;  %v3487_v39 = vcombine.high %v27072_v52, %v27072_v52  ;;  %v6748_v14 = vrot.slane %v27074_v61, %v18559_v11 }
 0x440   : > { %v11717_v20 = vrot.slane %v27069_v35, %v18559_v11  ;;  %v3485_v13 = vrot.slane %v27071_v7, %v18540_v33  ;;  %v14041_v50 = vcombine.low %v12806_v26, %v12807_v19  ;;  %v12809_v24 = vsel %vm7753_vm7, %v8433_v60, %v11721_v38  ;;  %v27077_v38 = vld [vmem:[#allocation201_spill] sm:$0xff] }
 0x441   : > { %v14074_v37 = vcombine.low %v14066_v5, %v14073_v23  ;;  %v5345_v35 = vcombine.high %v27073_v40, %v27073_v40  ;;  %v6752_v55 = vrot.slane %v27073_v40, %v18559_v11  ;;  %v27076_v5 = vld [vmem:[#allocation52_spill] sm:$0xff]  ;;  %v6864_v26 = vrot.slane %v27077_v38, %v18559_v11 }
 0x442   : > { %v12808_v0 = vsel %vm7753_vm7, %v8431_v28, %v11717_v20  ;;  %v3489_v56 = vcombine.high %v3485_v13, %v3485_v13  ;;  %v14049_v41 = vrot.slane %v14041_v50, %v19822_v43  ;;  %v27075_v28 = vcombine.high %v27074_v61, %v27074_v61  ;;  %v27078_v50 = vld [vmem:[#allocation199_spill] sm:$0xff] }
 0x443   : > { %15882 = vxpose.xlu0.b32.start [1/16] (narrow) %v14074_v37, 8  ;;  %v14042_v25 = vcombine.low %v12808_v0, %v12809_v24  ;;  %v3684_v60 = vcombine.high %v27076_v5, %v27076_v5  ;;  %v6760_v23 = vrot.slane %v5345_v35, %v18559_v11  ;;  %v7822_v20 = vsel %vm7753_vm7, %v27072_v52, %v6748_v14  ;;  %v27082_v14 = vld [vmem:[#allocation47_spill] sm:$0xff] }
 0x444   : > { %v6756_v62 = vrot.slane %v27075_v28, %v18559_v11  ;;  %v7823_v7 = vsel %vm7753_vm7, %v3485_v13, %v6752_v55  ;;  %v27079_v24 = vcombine.high %v27078_v50, %v27078_v50  ;;  %v27080_v52 = vcombine.high %v27077_v38, %v27077_v38  ;;  %v27084_v38 = vld [vmem:[#allocation40_spill] sm:$0xff] }
 0x445   : > { %v14056_v19 = vrot.slane %v14042_v25, %v19822_v43  ;;  %v14075_v0 = vcombine.low %v7822_v20, %v7823_v7  ;;  %v7825_v35 = vsel %vm7753_vm7, %v3489_v56, %v6760_v23  ;;  %v27081_v61 = vrot.slane %v27078_v50, %v18559_v11 }
 0x446   : > { %v7824_v37 = vsel %vm7753_vm7, %v3487_v39, %v6756_v62  ;;  %v6868_v40 = vrot.slane %v27079_v24, %v18559_v11  ;;  %v6872_v13 = vrot.slane %v27080_v52, %v18559_v11  ;;  %v7851_v39 = vsel %vm7753_vm7, %v27076_v5, %v6864_v26  ;;  %v27085_v24 = vld [vmem:[#allocation180_spill] sm:$0xff]  ;;  %v27086_v26 = vld [vmem:[#allocation178_spill] sm:$0xff] }
 0x447   : > { %v7850_v55 = vsel %vm7753_vm7, %v27082_v14, %v27081_v61  ;;  %v14057_v25 = vcombine.low %v14049_v41, %v14056_v19  ;;  %v14076_v28 = vcombine.low %v7824_v37, %v7825_v35  ;;  %v14083_v62 = vrot.slane %v14075_v0, %v19822_v43 }
 0x448   : > { %v27083_v56 = vcombine.high %v27082_v14, %v27082_v14  ;;  %v7853_v20 = vsel %vm7753_vm7, %v3684_v60, %v6872_v13  ;;  %v14330_v7 = vcombine.low %v7850_v55, %v7851_v39  ;;  %v3537_v50 = vcombine.high %v27084_v38, %v27084_v38  ;;  %v27090_v13 = vld [vmem:[#allocation37_spill] sm:$0xff]  ;;  %v27091_v55 = vld [vmem:[#allocation44_spill] sm:$0xff] }
 0x449   : > { %v6768_v52 = vrot.slane %v27085_v24, %v18559_v11  ;;  %15865 = vxpose.xlu1.b32.end [16/16] (narrow) %v14057_v25, 8  ;;  %v14090_v41 = vrot.slane %v14076_v28, %v19822_v43  ;;  %v27087_v19 = vcombine.high %v27086_v26, %v27086_v26  ;;  %v27088_v60 = vcombine.high %v27085_v24, %v27085_v24 }
 0x44a   : > { %v7852_v23 = vsel %vm7753_vm7, %v27083_v56, %v6868_v40  ;;  %v14338_v40 = vrot.slane %v14330_v7, %v19822_v43  ;;  %v27089_v35 = vrot.slane %v27086_v26, %v18559_v11  ;;  %v27092_v39 = vcombine.high %v27091_v55, %v27091_v55 }
 0x44b   : > { %v14331_v5 = vcombine.low %v7852_v23, %v7853_v20  ;;  %v6772_v37 = vrot.slane %v27087_v19, %v18559_v11  ;;  %v6776_v0 = vrot.slane %v27088_v60, %v18559_v11  ;;  %v7827_v14 = vsel %vm7753_vm7, %v27084_v38, %v6768_v52  ;;  %v27094_v19 = vld [vmem:[#allocation46_spill] sm:$0xff] }
 0x44c   : > { %v7826_v61 = vsel %vm7753_vm7, %v27090_v13, %v27089_v35  ;;  %v3681_v25 = vrot.slane %v27092_v39, %v18540_v33  ;;  %v14091_v28 = vcombine.low %v14083_v62, %v14090_v41  ;;  %v27093_v23 = vcombine.high %v27090_v13, %v27090_v13  ;;  %v27095_v35 = vld [vmem:[#allocation202_spill] sm:$0xff]  ;;  %v27096_v41 = vld [vmem:[#allocation200_spill] sm:$0xff] }
 0x44d   : > { %v14345_v56 = vrot.slane %v14331_v5, %v19822_v43  ;;  %v7829_v7 = vsel %vm7753_vm7, %v3537_v50, %v6776_v0  ;;  %v14092_v24 = vcombine.low %v7826_v61, %v7827_v14  ;;  %v3683_v38 = vcombine.high %v27094_v19, %v27094_v19 }
 0x44e   : > { %v7828_v20 = vsel %vm7753_vm7, %v27093_v23, %v6772_v37  ;;  %v3685_v52 = vcombine.high %v3681_v25, %v3681_v25  ;;  %15883 = vxpose.xlu0.b32.cont [2/16] (narrow) %v14091_v28, 8  ;;  %v5541_v62 = vcombine.high %v27095_v35, %v27095_v35  ;;  %v6876_v5 = vrot.slane %v27096_v41, %v18559_v11  ;;  %v27100_v23 = vld [vmem:[#allocation36_spill] sm:$0xff] }
 0x44f   : > { %v14093_v26 = vcombine.low %v7828_v20, %v7829_v7  ;;  %v14346_v60 = vcombine.low %v14338_v40, %v14345_v56  ;;  %v6880_v13 = vrot.slane %v27095_v35, %v18559_v11  ;;  %v14100_v37 = vrot.slane %v14092_v24, %v19822_v43  ;;  %v27098_v40 = vld [vmem:[#allocation29_spill] sm:$0xff] }
 0x450   : > { %v27097_v0 = vcombine.high %v27096_v41, %v27096_v41  ;;  %v27099_v14 = vcombine.high %v27098_v40, %v27098_v40  ;;  %v6888_v39 = vrot.slane %v5541_v62, %v18559_v11  ;;  %v7854_v28 = vsel %vm7753_vm7, %v27094_v19, %v6876_v5  ;;  %v27102_v62 = vld [vmem:[#allocation179_spill] sm:$0xff] }
 0x451   : > { %v14107_v50 = vrot.slane %v14093_v26, %v19822_v43  ;;  %15914 = vxpose.xlu1.b32.start [1/16] (narrow) %v14346_v60, 8  ;;  %v7855_v56 = vsel %vm7753_vm7, %v3681_v25, %v6880_v13  ;;  %v3536_v20 = vcombine.high %v27100_v23, %v27100_v23  ;;  %v6780_v40 = vrot.slane %v27102_v62, %v18559_v11 }
 0x452   : > { %v6884_v61 = vrot.slane %v27097_v0, %v18559_v11  ;;  %v3534_v55 = vrot.slane %v27099_v14, %v18540_v33  ;;  %v14347_v26 = vcombine.low %v7854_v28, %v7855_v56  ;;  %v7857_v41 = vsel %vm7753_vm7, %v3685_v52, %v6888_v39  ;;  %v27101_v0 = vld [vmem:[#allocation181_spill] sm:$0xff]  ;;  %v27105_v39 = vld [vmem:[#allocation204_spill] sm:$0xff] }
 0x453   : > { %v14108_v7 = vcombine.low %v14100_v37, %v14107_v50  ;;  %v5394_v60 = vcombine.high %v27101_v0, %v27101_v0  ;;  %v6784_v19 = vrot.slane %v27101_v0, %v18559_v11  ;;  %v27104_v37 = vld [vmem:[#allocation59_spill] sm:$0xff]  ;;  %v6896_v28 = vrot.slane %v27105_v39, %v18559_v11 }
 0x454   : > { %v7856_v24 = vsel %vm7753_vm7, %v3683_v38, %v6884_v61  ;;  %v3538_v35 = vcombine.high %v3534_v55, %v3534_v55  ;;  %v14355_v5 = vrot.slane %v14347_v26, %v19822_v43  ;;  %v27103_v38 = vcombine.high %v27102_v62, %v27102_v62  ;;  %v27106_v26 = vld [vmem:[#allocation115_spill] sm:$0xff] }
 0x455   : > { %15884 = vxpose.xlu0.b32.cont [3/16] (narrow) %v14108_v7, 8  ;;  %v14348_v25 = vcombine.low %v7856_v24, %v7857_v41  ;;  %v3733_v52 = vcombine.high %v27104_v37, %v27104_v37  ;;  %v6792_v50 = vrot.slane %v5394_v60, %v18559_v11  ;;  %v7830_v61 = vsel %vm7753_vm7, %v27100_v23, %v6780_v40  ;;  %v27110_v40 = vld [vmem:[#allocation57_spill] sm:$0xff] }
 0x456   : > { %v6788_v13 = vrot.slane %v27103_v38, %v18559_v11  ;;  %v7831_v14 = vsel %vm7753_vm7, %v3534_v55, %v6784_v19  ;;  %v27107_v41 = vcombine.high %v27106_v26, %v27106_v26  ;;  %v27108_v23 = vcombine.high %v27105_v39, %v27105_v39  ;;  %v27112_v39 = vld [vmem:[#allocation211_spill] sm:$0xff] }
 0x457   : > { %v14362_v56 = vrot.slane %v14348_v25, %v19822_v43  ;;  %v14109_v24 = vcombine.low %v7830_v61, %v7831_v14  ;;  %v7833_v60 = vsel %vm7753_vm7, %v3538_v35, %v6792_v50  ;;  %v27109_v62 = vrot.slane %v27106_v26, %v18559_v11 }
 0x458   : > { %v7832_v7 = vsel %vm7753_vm7, %v3536_v20, %v6788_v13  ;;  %v6900_v0 = vrot.slane %v27107_v41, %v18559_v11  ;;  %v6904_v55 = vrot.slane %v27108_v23, %v18559_v11  ;;  %v7859_v20 = vsel %vm7753_vm7, %v27104_v37, %v6896_v28  ;;  %v27113_v41 = vld [vmem:[#allocation373_spill] sm:$0xff]  ;;  %v27114_v28 = vld [vmem:[#allocation371_spill] sm:$0xff] }
 0x459   : > { %v7858_v19 = vsel %vm7753_vm7, %v27110_v40, %v27109_v62  ;;  %v14363_v25 = vcombine.low %v14355_v5, %v14362_v56  ;;  %v14110_v38 = vcombine.low %v7832_v7, %v7833_v60  ;;  %v14117_v13 = vrot.slane %v14109_v24, %v19822_v43 }
 0x45a   : > { %v27111_v35 = vcombine.high %v27110_v40, %v27110_v40  ;;  %v7861_v61 = vsel %vm7753_vm7, %v3733_v52, %v6904_v55  ;;  %v14364_v14 = vcombine.low %v7858_v19, %v7859_v20  ;;  %v8481_v26 = vcombine.high %v27112_v39, %v27112_v39  ;;  %v27118_v55 = vld [vmem:[#allocation209_spill] sm:$0xff]  ;;  %v27119_v19 = vld [vmem:[#allocation54_spill] sm:$0xff] }
 0x45b   : > { %v11729_v23 = vrot.slane %v27113_v41, %v18559_v11  ;;  %15915 = vxpose.xlu1.b32.cont [2/16] (narrow) %v14363_v25, 8  ;;  %v14124_v5 = vrot.slane %v14110_v38, %v19822_v43  ;;  %v27115_v56 = vcombine.high %v27114_v28, %v27114_v28  ;;  %v27116_v52 = vcombine.high %v27113_v41, %v27113_v41 }
 0x45c   : > { %v7860_v50 = vsel %vm7753_vm7, %v27111_v35, %v6900_v0  ;;  %v14372_v0 = vrot.slane %v14364_v14, %v19822_v43  ;;  %v27117_v60 = vrot.slane %v27114_v28, %v18559_v11  ;;  %v27120_v20 = vcombine.high %v27119_v19, %v27119_v19 }
 0x45d   : > { %v14365_v37 = vcombine.low %v7860_v50, %v7861_v61  ;;  %v11733_v7 = vrot.slane %v27115_v56, %v18559_v11  ;;  %v11737_v24 = vrot.slane %v27116_v52, %v18559_v11  ;;  %v12811_v40 = vsel %vm7753_vm7, %v27112_v39, %v11729_v23  ;;  %v27122_v56 = vld [vmem:[#allocation58_spill] sm:$0xff] }
 0x45e   : > { %v12810_v62 = vsel %vm7753_vm7, %v27118_v55, %v27117_v60  ;;  %v3730_v25 = vrot.slane %v27120_v20, %v18540_v33  ;;  %v14125_v38 = vcombine.low %v14117_v13, %v14124_v5  ;;  %v27121_v50 = vcombine.high %v27118_v55, %v27118_v55  ;;  %v27123_v60 = vld [vmem:[#allocation121_spill] sm:$0xff]  ;;  %v27124_v5 = vld [vmem:[#allocation203_spill] sm:$0xff] }
 0x45f   : > { %v14379_v35 = vrot.slane %v14365_v37, %v19822_v43  ;;  %v12813_v14 = vsel %vm7753_vm7, %v8481_v26, %v11737_v24  ;;  %v14126_v41 = vcombine.low %v12810_v62, %v12811_v40  ;;  %v3732_v39 = vcombine.high %v27122_v56, %v27122_v56 }
 0x460   : > { %v12812_v61 = vsel %vm7753_vm7, %v27121_v50, %v11733_v7  ;;  %v3734_v23 = vcombine.high %v3730_v25, %v3730_v25  ;;  %15885 = vxpose.xlu0.b32.cont [4/16] (narrow) %v14125_v38, 8  ;;  %v5590_v13 = vcombine.high %v27123_v60, %v27123_v60  ;;  %v6908_v37 = vrot.slane %v27124_v5, %v18559_v11  ;;  %v27128_v50 = vld [vmem:[#allocation210_spill] sm:$0xff] }
 0x461   : > { %v14127_v28 = vcombine.low %v12812_v61, %v12813_v14  ;;  %v14380_v52 = vcombine.low %v14372_v0, %v14379_v35  ;;  %v6912_v55 = vrot.slane %v27123_v60, %v18559_v11  ;;  %v14134_v7 = vrot.slane %v14126_v41, %v19822_v43  ;;  %v27126_v0 = vld [vmem:[#allocation206_spill] sm:$0xff] }
 0x462   : > { %v27125_v24 = vcombine.high %v27124_v5, %v27124_v5  ;;  %v27127_v40 = vcombine.high %v27126_v0, %v27126_v0  ;;  %v6920_v20 = vrot.slane %v5590_v13, %v18559_v11  ;;  %v7862_v38 = vsel %vm7753_vm7, %v27122_v56, %v6908_v37  ;;  %v27130_v13 = vld [vmem:[#allocation372_spill] sm:$0xff] }
 0x463   : > { %v14141_v26 = vrot.slane %v14127_v28, %v19822_v43  ;;  %15916 = vxpose.xlu1.b32.cont [3/16] (narrow) %v14380_v52, 8  ;;  %v7863_v35 = vsel %vm7753_vm7, %v3730_v25, %v6912_v55  ;;  %v8480_v61 = vcombine.high %v27128_v50, %v27128_v50  ;;  %v11741_v0 = vrot.slane %v27130_v13, %v18559_v11 }
 0x464   : > { %v6916_v62 = vrot.slane %v27125_v24, %v18559_v11  ;;  %v8478_v19 = vrot.slane %v27127_v40, %v18540_v33  ;;  %v14381_v28 = vcombine.low %v7862_v38, %v7863_v35  ;;  %v7865_v5 = vsel %vm7753_vm7, %v3734_v23, %v6920_v20  ;;  %v27129_v24 = vld [vmem:[#allocation374_spill] sm:$0xff] }
 0x465   : > { %v14142_v14 = vcombine.low %v14134_v7, %v14141_v26  ;;  %v10338_v52 = vcombine.high %v27129_v24, %v27129_v24  ;;  %v11745_v56 = vrot.slane %v27129_v24, %v18559_v11  ;;  %v27132_v7 = vld [vmem:[#allocation226_spill] sm:$0xff]  ;;  %v11857_v20 = vrot.slane %v21985_v36, %v18559_v11 }
 0x466   : > { %v7864_v41 = vsel %vm7753_vm7, %v3732_v39, %v6916_v62  ;;  %v8482_v60 = vcombine.high %v8478_v19, %v8478_v19  ;;  %v14389_v37 = vrot.slane %v14381_v28, %v19822_v43  ;;  %v27131_v39 = vcombine.high %v27130_v13, %v27130_v13  ;;  %v27137_v13 = vld [vmem:[#allocation224_spill] sm:$0xff] }
 0x467   : > { %15886 = vxpose.xlu0.b32.cont [5/16] (narrow) %v14142_v14, 8  ;;  %v14382_v25 = vcombine.low %v7864_v41, %v7865_v5  ;;  %v8677_v23 = vcombine.high %v27132_v7, %v27132_v7  ;;  %v11753_v26 = vrot.slane %v10338_v52, %v18559_v11  ;;  %v12814_v62 = vsel %vm7753_vm7, %v27128_v50, %v11741_v0  ;;  %v27133_v41 = vld [vmem:[#allocation384_spill] sm:$0xff] }
 0x468   : > { %v11749_v55 = vrot.slane %v27131_v39, %v18559_v11  ;;  %v12815_v40 = vsel %vm7753_vm7, %v8478_v19, %v11745_v56  ;;  %v27134_v28 = vcombine.high %v27133_v41, %v27133_v41  ;;  %v27135_v50 = vcombine.high %v21985_v36, %v21985_v36 }
 0x469   : > { %v14396_v38 = vrot.slane %v14382_v25, %v19822_v43  ;;  %v14143_v14 = vcombine.low %v12814_v62, %v12815_v40  ;;  %v12817_v24 = vsel %vm7753_vm7, %v8482_v60, %v11753_v26  ;;  %v27136_v52 = vrot.slane %v27133_v41, %v18559_v11  ;;  %v27139_v62 = vld [vmem:[#allocation131_spill] sm:$0xff] }
 0x46a   : > { %v12816_v35 = vsel %vm7753_vm7, %v8480_v61, %v11749_v55  ;;  %v11861_v5 = vrot.slane %v27134_v28, %v18559_v11  ;;  %v11865_v19 = vrot.slane %v27135_v50, %v18559_v11  ;;  %v12843_v61 = vsel %vm7753_vm7, %v27132_v7, %v11857_v20  ;;  %v27140_v41 = vld [vmem:[#allocation379_spill] sm:$0xff]  ;;  %v27141_v20 = vld [vmem:[#allocation169_spill] sm:$0xff]  ;;  %v27145_v50 = vld [vmem:[#allocation12_spill] sm:$0xff] }
 0x46b   : > { %v12842_v0 = vsel %vm7753_vm7, %v27137_v13, %v27136_v52  ;;  %v14397_v56 = vcombine.low %v14389_v37, %v14396_v38  ;;  %v14144_v25 = vcombine.low %v12816_v35, %v12817_v24  ;;  %v14151_v39 = vrot.slane %v14143_v14, %v19822_v43 }
 0x46c   : > { %v27138_v60 = vcombine.high %v27137_v13, %v27137_v13  ;;  %v12845_v36 = vsel %vm7753_vm7, %v8677_v23, %v11865_v19  ;;  %v14398_v26 = vcombine.low %v12842_v0, %v12843_v61  ;;  %v8530_v40 = vcombine.high %v27139_v62, %v27139_v62  ;;  %v27146_v13 = vld [vmem:[#allocation222_spill] sm:$0xff] }
 0x46d   : > { %v11761_v28 = vrot.slane %v27140_v41, %v18559_v11  ;;  %15917 = vxpose.xlu1.b32.cont [4/16] (narrow) %v14397_v56, 8  ;;  %v14158_v37 = vrot.slane %v14144_v25, %v19822_v43  ;;  %v27142_v38 = vcombine.high %v27141_v20, %v27141_v20  ;;  %v27143_v23 = vcombine.high %v27140_v41, %v27140_v41 }
 0x46e   : > { %v12844_v55 = vsel %vm7753_vm7, %v27138_v60, %v11861_v5  ;;  %v14406_v5 = vrot.slane %v14398_v26, %v19822_v43  ;;  %v27144_v24 = vrot.slane %v27141_v20, %v18559_v11  ;;  %v27147_v0 = vcombine.high %v27146_v13, %v27146_v13  ;;  %v27149_v20 = vld [vmem:[#allocation225_spill] sm:$0xff] }
 0x46f   : > { %v14399_v7 = vcombine.low %v12844_v55, %v12845_v36  ;;  %v11765_v35 = vrot.slane %v27142_v38, %v18559_v11  ;;  %v11769_v14 = vrot.slane %v27143_v23, %v18559_v11  ;;  %v12819_v52 = vsel %vm7753_vm7, %v27139_v62, %v11761_v28  ;;  %v27150_v23 = vld [vmem:[#allocation386_spill] sm:$0xff] }
 0x470   : > { %v12818_v19 = vsel %vm7753_vm7, %v27145_v50, %v27144_v24  ;;  %v8674_v61 = vrot.slane %v27147_v0, %v18540_v33  ;;  %v14159_v56 = vcombine.low %v14151_v39, %v14158_v37  ;;  %v27148_v60 = vcombine.high %v27145_v50, %v27145_v50  ;;  %v27151_v37 = vld [vmem:[#allocation385_spill] sm:$0xff] }
 0x471   : > { %v14413_v25 = vrot.slane %v14399_v7, %v19822_v43  ;;  %v12821_v36 = vsel %vm7753_vm7, %v8530_v40, %v11769_v14  ;;  %v14160_v26 = vcombine.low %v12818_v19, %v12819_v52  ;;  %v8676_v62 = vcombine.high %v27149_v20, %v27149_v20 }
 0x472   : > { %v12820_v55 = vsel %vm7753_vm7, %v27148_v60, %v11765_v35  ;;  %v8678_v28 = vcombine.high %v8674_v61, %v8674_v61  ;;  %15887 = vxpose.xlu0.b32.cont [6/16] (narrow) %v14159_v56, 8  ;;  %v10534_v39 = vcombine.high %v27150_v23, %v27150_v23  ;;  %v11869_v7 = vrot.slane %v27151_v37, %v18559_v11 }
 0x473   : > { %v14161_v41 = vcombine.low %v12820_v55, %v12821_v36  ;;  %v14414_v38 = vcombine.low %v14406_v5, %v14413_v25  ;;  %v11873_v24 = vrot.slane %v27150_v23, %v18559_v11  ;;  %v14168_v35 = vrot.slane %v14160_v26, %v19822_v43  ;;  %v27153_v5 = vld [vmem:[#allocation213_spill] sm:$0xff]  ;;  %v27155_v25 = vld [vmem:[#allocation132_spill] sm:$0xff] }
 0x474   : > { %v27152_v14 = vcombine.high %v27151_v37, %v27151_v37  ;;  %v27154_v19 = vcombine.high %v27153_v5, %v27153_v5  ;;  %v11881_v13 = vrot.slane %v10534_v39, %v18559_v11  ;;  %v12846_v0 = vsel %vm7753_vm7, %v27149_v20, %v11869_v7  ;;  %v27156_v37 = vld [vmem:[#allocation380_spill] sm:$0xff]  ;;  %v27157_v39 = vld [vmem:[#allocation167_spill] sm:$0xff] }
 0x475   : > { %v14175_v40 = vrot.slane %v14161_v41, %v19822_v43  ;;  %15918 = vxpose.xlu1.b32.cont [5/16] (narrow) %v14414_v38, 8  ;;  %v12847_v56 = vsel %vm7753_vm7, %v8674_v61, %v11873_v24  ;;  %v8529_v60 = vcombine.high %v27155_v25, %v27155_v25  ;;  %v10387_v38 = vcombine.high %v27156_v37, %v27156_v37 }
 0x476   : > { %v11877_v50 = vrot.slane %v27152_v14, %v18559_v11  ;;  %v8527_v52 = vrot.slane %v27154_v19, %v18540_v33  ;;  %v14415_v26 = vcombine.low %v12846_v0, %v12847_v56  ;;  %v12849_v23 = vsel %vm7753_vm7, %v8678_v28, %v11881_v13 }
 0x477   : > { %v14176_v55 = vcombine.low %v14168_v35, %v14175_v40  ;;  %v11773_v14 = vrot.slane %v27157_v39, %v18559_v11  ;;  %v11777_v20 = vrot.slane %v27156_v37, %v18559_v11  ;;  %v27159_v35 = vld [vmem:[#allocation244_spill] sm:$0xff]  ;;  %v11785_v40 = vrot.slane %v10387_v38, %v18559_v11 }
 0x478   : > { %v12848_v36 = vsel %vm7753_vm7, %v8676_v62, %v11877_v50  ;;  %v8531_v41 = vcombine.high %v8527_v52, %v8527_v52  ;;  %v14423_v7 = vrot.slane %v14415_v26, %v19822_v43  ;;  %v27158_v62 = vcombine.high %v27157_v39, %v27157_v39  ;;  %v27163_v37 = vld [vmem:[#allocation240_spill] sm:$0xff] }
 0x479   : > { %15888 = vxpose.xlu0.b32.cont [7/16] (narrow) %v14176_v55, 8  ;;  %v14416_v61 = vcombine.low %v12848_v36, %v12849_v23  ;;  %v8726_v28 = vcombine.high %v27159_v35, %v27159_v35  ;;  %v12822_v50 = vsel %vm7753_vm7, %v27155_v25, %v11773_v14  ;;  %v12823_v5 = vsel %vm7753_vm7, %v8527_v52, %v11777_v20 }
 0x47a   : > { %v11781_v24 = vrot.slane %v27158_v62, %v18559_v11  ;;  %v11889_v19 = vrot.slane %v22087_v16, %v18559_v11  ;;  %v14177_v56 = vcombine.low %v12822_v50, %v12823_v5  ;;  %v27160_v55 = vcombine.high %v22067_v10, %v22067_v10  ;;  %v27167_v5 = vld [vmem:[#allocation152_spill] sm:$0xff] }
 0x47b   : > { %v14430_v13 = vrot.slane %v14416_v61, %v19822_v43  ;;  %v12825_v26 = vsel %vm7753_vm7, %v8531_v41, %v11785_v40  ;;  %v27161_v25 = vcombine.high %v22087_v16, %v22087_v16  ;;  %v27162_v23 = vrot.slane %v22067_v10, %v18559_v11  ;;  %v27166_v40 = vld [vmem:[#allocation154_spill] sm:$0xff] }
 0x47c   : > { %v12824_v0 = vsel %vm7753_vm7, %v8529_v60, %v11781_v24  ;;  %v11893_v36 = vrot.slane %v27160_v55, %v18559_v11  ;;  %v12851_v60 = vsel %vm7753_vm7, %v27159_v35, %v11889_v19  ;;  %v14185_v20 = vrot.slane %v14177_v56, %v19822_v43  ;;  %v27165_v24 = vld [vmem:[#allocation24_spill] sm:$0xff] }
 0x47d   : > { %v11897_v52 = vrot.slane %v27161_v25, %v18559_v11  ;;  %v12850_v38 = vsel %vm7753_vm7, %v27163_v37, %v27162_v23  ;;  %v14431_v39 = vcombine.low %v14423_v7, %v14430_v13  ;;  %v14178_v14 = vcombine.low %v12824_v0, %v12825_v26 }
 0x47e   : > { %v27164_v41 = vcombine.high %v27163_v37, %v27163_v37  ;;  %v14432_v62 = vcombine.low %v12850_v38, %v12851_v60  ;;  %v3586_v10 = vcombine.high %v27165_v24, %v27165_v24  ;;  %v6800_v50 = vrot.slane %v27166_v40, %v18559_v11 }
 0x47f   : > { %v12853_v16 = vsel %vm7753_vm7, %v8726_v28, %v11897_v52  ;;  %15919 = vxpose.xlu1.b32.cont [6/16] (narrow) %v14431_v39, 8  ;;  %v14192_v7 = vrot.slane %v14178_v14, %v19822_v43  ;;  %v27168_v19 = vcombine.high %v27167_v5, %v27167_v5  ;;  %v27169_v28 = vcombine.high %v27166_v40, %v27166_v40  ;;  %v27172_v52 = vld [vmem:[#allocation239_spill] sm:$0xff] }
 0x480   : > { %v12852_v61 = vsel %vm7753_vm7, %v27164_v41, %v11893_v36  ;;  %v14440_v56 = vrot.slane %v14432_v62, %v19822_v43  ;;  %v27170_v55 = vrot.slane %v27167_v5, %v18559_v11  ;;  %v27171_v36 = vld [vmem:[#allocation20_spill] sm:$0xff]  ;;  %v7835_v25 = vsel %vm7753_vm7, %v27165_v24, %v6800_v50  ;;  %v27175_v62 = vld [vmem:[#allocation243_spill] sm:$0xff] }
 0x481   : > { %v14433_v35 = vcombine.low %v12852_v61, %v12853_v16  ;;  %v6804_v13 = vrot.slane %v27168_v19, %v18559_v11  ;;  %v6808_v0 = vrot.slane %v27169_v28, %v18559_v11  ;;  %v27173_v23 = vcombine.high %v27172_v52, %v27172_v52  ;;  %v27177_v28 = vld [vmem:[#allocation15_spill] sm:$0xff] }
 0x482   : > { %v7834_v26 = vsel %vm7753_vm7, %v27171_v36, %v27170_v55  ;;  %v14193_v38 = vcombine.low %v14185_v20, %v14192_v7  ;;  %v27174_v39 = vcombine.high %v27171_v36, %v27171_v36  ;;  %v8725_v24 = vcombine.high %v27175_v62, %v27175_v62 }
 0x483   : > { %v8723_v37 = vrot.slane %v27173_v23, %v18540_v33  ;;  %v14447_v60 = vrot.slane %v14433_v35, %v19822_v43  ;;  %v7837_v41 = vsel %vm7753_vm7, %v3586_v10, %v6808_v0  ;;  %v14194_v61 = vcombine.low %v7834_v26, %v7835_v25  ;;  %v27179_v26 = vld [vmem:[#allocation18_spill] sm:$0xff] }
 0x484   : > { %v7836_v14 = vsel %vm7753_vm7, %v27174_v39, %v6804_v13  ;;  %15889 = vxpose.xlu0.b32.cont [8/16] (narrow) %v14193_v38, 8  ;;  %v10583_v20 = vcombine.high %v22092_v44, %v22092_v44  ;;  %v11901_v7 = vrot.slane %v22077_v2, %v18559_v11  ;;  %v11905_v35 = vrot.slane %v22092_v44, %v18559_v11  ;;  %v27180_v39 = vld [vmem:[#allocation155_spill] sm:$0xff] }
 0x485   : > { %v14195_v16 = vcombine.low %v7836_v14, %v7837_v41  ;;  %v8727_v40 = vcombine.high %v8723_v37, %v8723_v37  ;;  %v14448_v50 = vcombine.low %v14440_v56, %v14447_v60  ;;  %v14202_v5 = vrot.slane %v14194_v61, %v19822_v43  ;;  %v27181_v41 = vld [vmem:[#allocation153_spill] sm:$0xff] }
 0x486   : > { %v27176_v19 = vcombine.high %v22077_v2, %v22077_v2  ;;  %v27178_v0 = vcombine.high %v27177_v28, %v27177_v28  ;;  %v11913_v55 = vrot.slane %v10583_v20, %v18559_v11  ;;  %v12854_v44 = vsel %vm7753_vm7, %v27175_v62, %v11901_v7  ;;  %v27183_v20 = vld [vmem:[#allocation45_spill] sm:$0xff] }
 0x487   : > { %v14209_v10 = vrot.slane %v14195_v16, %v19822_v43  ;;  %15920 = vxpose.xlu1.b32.cont [7/16] (narrow) %v14448_v50, 8  ;;  %v12855_v36 = vsel %vm7753_vm7, %v8723_v37, %v11905_v35  ;;  %v3585_v25 = vcombine.high %v27179_v26, %v27179_v26  ;;  %v5443_v14 = vcombine.high %v27180_v39, %v27180_v39 }
 0x488   : > { %v11909_v13 = vrot.slane %v27176_v19, %v18559_v11  ;;  %v3583_v56 = vrot.slane %v27178_v0, %v18540_v33  ;;  %v14449_v23 = vcombine.low %v12854_v44, %v12855_v36  ;;  %v12857_v60 = vsel %vm7753_vm7, %v8727_v40, %v11913_v55  ;;  %v27185_v55 = vld [vmem:[#allocation196_spill] sm:$0xff] }
 0x489   : > { %v14210_v52 = vcombine.low %v14202_v5, %v14209_v10  ;;  %v6812_v61 = vrot.slane %v27181_v41, %v18559_v11  ;;  %v6816_v16 = vrot.slane %v27180_v39, %v18559_v11  ;;  %v3782_v40 = vcombine.high %v27183_v20, %v27183_v20  ;;  %v27184_v10 = vld [vmem:[#allocation198_spill] sm:$0xff] }
 0x48a   : > { %v12856_v2 = vsel %vm7753_vm7, %v8725_v24, %v11909_v13  ;;  %v3587_v38 = vcombine.high %v3583_v56, %v3583_v56  ;;  %v14457_v62 = vrot.slane %v14449_v23, %v19822_v43  ;;  %v27182_v24 = vcombine.high %v27181_v41, %v27181_v41  ;;  %v27189_v23 = vld [vmem:[#allocation43_spill] sm:$0xff] }
 0x48b   : > { %15890 = vxpose.xlu0.b32.cont [9/16] (narrow) %v14210_v52, 8  ;;  %v14450_v37 = vcombine.low %v12856_v2, %v12857_v60  ;;  %v6824_v7 = vrot.slane %v5443_v14, %v18559_v11  ;;  %v7838_v35 = vsel %vm7753_vm7, %v27179_v26, %v6812_v61  ;;  %v7839_v5 = vsel %vm7753_vm7, %v3583_v56, %v6816_v16 }
 0x48c   : > { %v6820_v50 = vrot.slane %v27182_v24, %v18559_v11  ;;  %v6928_v19 = vrot.slane %v27184_v10, %v18559_v11  ;;  %v14211_v0 = vcombine.low %v7838_v35, %v7839_v5  ;;  %v27186_v44 = vcombine.high %v27185_v55, %v27185_v55  ;;  %v27191_v24 = vld [vmem:[#allocation31_spill] sm:$0xff]  ;;  %v27193_v5 = vld [vmem:[#allocation170_spill] sm:$0xff] }
 0x48d   : > { %v14464_v13 = vrot.slane %v14450_v37, %v19822_v43  ;;  %v7841_v52 = vsel %vm7753_vm7, %v3587_v38, %v6824_v7  ;;  %v27187_v26 = vcombine.high %v27184_v10, %v27184_v10  ;;  %v27188_v2 = vrot.slane %v27185_v55, %v18559_v11  ;;  %v27192_v7 = vld [vmem:[#allocation172_spill] sm:$0xff]  ;;  %v27197_v55 = vld [vmem:[#allocation30_spill] sm:$0xff] }
 0x48e   : > { %v7840_v28 = vsel %vm7753_vm7, %v3585_v25, %v6820_v50  ;;  %v6932_v36 = vrot.slane %v27186_v44, %v18559_v11  ;;  %v7867_v25 = vsel %vm7753_vm7, %v27183_v20, %v6928_v19  ;;  %v14219_v41 = vrot.slane %v14211_v0, %v19822_v43 }
 0x48f   : > { %v6936_v56 = vrot.slane %v27187_v26, %v18559_v11  ;;  %v7866_v60 = vsel %vm7753_vm7, %v27189_v23, %v27188_v2  ;;  %v14465_v39 = vcombine.low %v14457_v62, %v14464_v13  ;;  %v14212_v14 = vcombine.low %v7840_v28, %v7841_v52  ;;  %v27198_v52 = vld [vmem:[#allocation39_spill] sm:$0xff] }
 0x490   : > { %v27190_v38 = vcombine.high %v27189_v23, %v27189_v23  ;;  %v14466_v37 = vcombine.low %v7866_v60, %v7867_v25  ;;  %v3635_v50 = vcombine.high %v27191_v24, %v27191_v24  ;;  %v6832_v35 = vrot.slane %v27192_v7, %v18559_v11 }
 0x491   : > { %v7869_v16 = vsel %vm7753_vm7, %v3782_v40, %v6936_v56  ;;  %15921 = vxpose.xlu1.b32.cont [8/16] (narrow) %v14465_v39, 8  ;;  %v14226_v62 = vrot.slane %v14212_v14, %v19822_v43  ;;  %v27194_v10 = vcombine.high %v27193_v5, %v27193_v5  ;;  %v27195_v40 = vcombine.high %v27192_v7, %v27192_v7  ;;  %v27202_v7 = vld [vmem:[#allocation3_spill] sm:$0xff] }
 0x492   : > { %v7868_v61 = vsel %vm7753_vm7, %v27190_v38, %v6932_v36  ;;  %v14474_v28 = vrot.slane %v14466_v37, %v19822_v43  ;;  %v27196_v0 = vrot.slane %v27193_v5, %v18559_v11  ;;  %v7843_v36 = vsel %vm7753_vm7, %v27191_v24, %v6832_v35  ;;  %v27203_v35 = vld [vmem:[#allocation197_spill] sm:$0xff] }
 0x493   : > { %v14467_v20 = vcombine.low %v7868_v61, %v7869_v16  ;;  %v6836_v19 = vrot.slane %v27194_v10, %v18559_v11  ;;  %v6840_v13 = vrot.slane %v27195_v40, %v18559_v11  ;;  %v27199_v26 = vcombine.high %v27198_v52, %v27198_v52  ;;  %v27201_v61 = vld [vmem:[#allocation42_spill] sm:$0xff]  ;;  %v27205_v40 = vld [vmem:[#allocation27_spill] sm:$0xff] }
 0x494   : > { %v7842_v44 = vsel %vm7753_vm7, %v27197_v55, %v27196_v0  ;;  %v14227_v2 = vcombine.low %v14219_v41, %v14226_v62  ;;  %v27200_v60 = vcombine.high %v27197_v55, %v27197_v55  ;;  %v3781_v16 = vcombine.high %v27201_v61, %v27201_v61 }
 0x495   : > { %v3779_v56 = vrot.slane %v27199_v26, %v18540_v33  ;;  %v14481_v23 = vrot.slane %v14467_v20, %v19822_v43  ;;  %v7845_v39 = vsel %vm7753_vm7, %v3635_v50, %v6840_v13  ;;  %v14228_v14 = vcombine.low %v7842_v44, %v7843_v36  ;;  %v27207_v36 = vld [vmem:[#allocation32_spill] sm:$0xff] }
 0x496   : > { %v7844_v25 = vsel %vm7753_vm7, %v27200_v60, %v6836_v19  ;;  %15891 = vxpose.xlu0.b32.cont [10/16] (narrow) %v14227_v2, 8  ;;  %v5639_v41 = vcombine.high %v27202_v7, %v27202_v7  ;;  %v6940_v62 = vrot.slane %v27203_v35, %v18559_v11  ;;  %v6944_v20 = vrot.slane %v27202_v7, %v18559_v11 }
 0x497   : > { %v14229_v38 = vcombine.low %v7844_v25, %v7845_v39  ;;  %v3783_v37 = vcombine.high %v3779_v56, %v3779_v56  ;;  %v14482_v24 = vcombine.low %v14474_v28, %v14481_v23  ;;  %v14236_v5 = vrot.slane %v14228_v14, %v19822_v43  ;;  %v27208_v39 = vld [vmem:[#allocation173_spill] sm:$0xff] }
 0x498   : > { %v27204_v10 = vcombine.high %v27203_v35, %v27203_v35  ;;  %v27206_v13 = vcombine.high %v27205_v40, %v27205_v40  ;;  %v6952_v0 = vrot.slane %v5639_v41, %v18559_v11  ;;  %v7870_v55 = vsel %vm7753_vm7, %v27201_v61, %v6940_v62  ;;  %v27211_v35 = vld [vmem:[#allocation56_spill] sm:$0xff] }
 0x499   : > { %v14243_v50 = vrot.slane %v14229_v38, %v19822_v43  ;;  %15922 = vxpose.xlu1.b32.cont [9/16] (narrow) %v14482_v24, 8  ;;  %v7871_v44 = vsel %vm7753_vm7, %v3779_v56, %v6944_v20  ;;  %v3634_v52 = vcombine.high %v27207_v36, %v27207_v36  ;;  %v5492_v14 = vcombine.high %v27208_v39, %v27208_v39  ;;  %v27209_v38 = vld [vmem:[#allocation171_spill] sm:$0xff] }
 0x49a   : > { %v6948_v19 = vrot.slane %v27204_v10, %v18559_v11  ;;  %v3632_v28 = vrot.slane %v27206_v13, %v18540_v33  ;;  %v14483_v23 = vcombine.low %v7870_v55, %v7871_v44  ;;  %v7873_v25 = vsel %vm7753_vm7, %v3783_v37, %v6952_v0  ;;  %v27213_v0 = vld [vmem:[#allocation11_spill] sm:$0xff] }
 0x49b   : > { %v14244_v26 = vcombine.low %v14236_v5, %v14243_v50  ;;  %v6844_v24 = vrot.slane %v27209_v38, %v18559_v11  ;;  %v6848_v61 = vrot.slane %v27208_v39, %v18559_v11  ;;  %v3831_v37 = vcombine.high %v27211_v35, %v27211_v35  ;;  %v27212_v50 = vld [vmem:[#allocation17_spill] sm:$0xff] }
 0x49c   : > { %v7872_v2 = vsel %vm7753_vm7, %v3781_v16, %v6948_v19  ;;  %v3636_v60 = vcombine.high %v3632_v28, %v3632_v28  ;;  %v14491_v7 = vrot.slane %v14483_v23, %v19822_v43  ;;  %v27210_v16 = vcombine.high %v27209_v38, %v27209_v38  ;;  %v27217_v23 = vld [vmem:[#allocation53_spill] sm:$0xff] }
 0x49d   : > { %15892 = vxpose.xlu0.b32.cont [11/16] (narrow) %v14244_v26, 8  ;;  %v14484_v56 = vcombine.low %v7872_v2, %v7873_v25  ;;  %v6856_v62 = vrot.slane %v5492_v14, %v18559_v11  ;;  %v7846_v20 = vsel %vm7753_vm7, %v27207_v36, %v6844_v24  ;;  %v7847_v5 = vsel %vm7753_vm7, %v3632_v28, %v6848_v61 }
 0x49e   : > { %v6852_v41 = vrot.slane %v27210_v16, %v18559_v11  ;;  %v6960_v10 = vrot.slane %v27212_v50, %v18559_v11  ;;  %v14245_v13 = vcombine.low %v7846_v20, %v7847_v5  ;;  %v27214_v55 = vcombine.high %v27213_v0, %v27213_v0  ;;  %v27219_v16 = vld [vmem:[#allocation208_spill] sm:$0xff]  ;;  %v27221_v5 = vld [vmem:[#allocation367_spill] sm:$0xff] }
 0x49f   : > { %v14498_v19 = vrot.slane %v14484_v56, %v19822_v43  ;;  %v7849_v26 = vsel %vm7753_vm7, %v3636_v60, %v6856_v62  ;;  %v27215_v36 = vcombine.high %v27212_v50, %v27212_v50  ;;  %v27216_v2 = vrot.slane %v27213_v0, %v18559_v11  ;;  %v27220_v62 = vld [vmem:[#allocation369_spill] sm:$0xff] }
 0x4a0   : > { %v7848_v40 = vsel %vm7753_vm7, %v3634_v52, %v6852_v41  ;;  %v6964_v44 = vrot.slane %v27214_v55, %v18559_v11  ;;  %v7875_v52 = vsel %vm7753_vm7, %v27211_v35, %v6960_v10  ;;  %v14253_v38 = vrot.slane %v14245_v13, %v19822_v43  ;;  %v27225_v0 = vld [vmem:[#allocation205_spill] sm:$0xff] }
 0x4a1   : > { %v6968_v28 = vrot.slane %v27215_v36, %v18559_v11  ;;  %v7874_v25 = vsel %vm7753_vm7, %v27217_v23, %v27216_v2  ;;  %v14499_v39 = vcombine.low %v14491_v7, %v14498_v19  ;;  %v14246_v14 = vcombine.low %v7848_v40, %v7849_v26  ;;  %v27226_v26 = vld [vmem:[#allocation51_spill] sm:$0xff] }
 0x4a2   : > { %v27218_v60 = vcombine.high %v27217_v23, %v27217_v23  ;;  %v14500_v56 = vcombine.low %v7874_v25, %v7875_v52  ;;  %v8579_v41 = vcombine.high %v27219_v16, %v27219_v16  ;;  %v11793_v20 = vrot.slane %v27220_v62, %v18559_v11 }
 0x4a3   : > { %v7877_v61 = vsel %vm7753_vm7, %v3831_v37, %v6968_v28  ;;  %15923 = vxpose.xlu1.b32.cont [10/16] (narrow) %v14499_v39, 8  ;;  %v14260_v7 = vrot.slane %v14246_v14, %v19822_v43  ;;  %v27222_v50 = vcombine.high %v27221_v5, %v27221_v5  ;;  %v27223_v37 = vcombine.high %v27220_v62, %v27220_v62  ;;  %v27230_v62 = vld [vmem:[#allocation113_spill] sm:$0xff] }
 0x4a4   : > { %v7876_v24 = vsel %vm7753_vm7, %v27218_v60, %v6964_v44  ;;  %v14508_v40 = vrot.slane %v14500_v56, %v19822_v43  ;;  %v27224_v13 = vrot.slane %v27221_v5, %v18559_v11  ;;  %v12827_v44 = vsel %vm7753_vm7, %v27219_v16, %v11793_v20  ;;  %v27231_v20 = vld [vmem:[#allocation50_spill] sm:$0xff] }
 0x4a5   : > { %v14501_v35 = vcombine.low %v7876_v24, %v7877_v61  ;;  %v11797_v10 = vrot.slane %v27222_v50, %v18559_v11  ;;  %v11801_v19 = vrot.slane %v27223_v37, %v18559_v11  ;;  %v27227_v36 = vcombine.high %v27226_v26, %v27226_v26  ;;  %v27229_v24 = vld [vmem:[#allocation55_spill] sm:$0xff]  ;;  %v27233_v37 = vld [vmem:[#allocation125_spill] sm:$0xff] }
 0x4a6   : > { %v12826_v55 = vsel %vm7753_vm7, %v27225_v0, %v27224_v13  ;;  %v14261_v2 = vcombine.low %v14253_v38, %v14260_v7  ;;  %v27228_v25 = vcombine.high %v27225_v0, %v27225_v0  ;;  %v3830_v61 = vcombine.high %v27229_v24, %v27229_v24 }
 0x4a7   : > { %v3828_v28 = vrot.slane %v27227_v36, %v18540_v33  ;;  %v14515_v23 = vrot.slane %v14501_v35, %v19822_v43  ;;  %v12829_v39 = vsel %vm7753_vm7, %v8579_v41, %v11801_v19  ;;  %v14262_v14 = vcombine.low %v12826_v55, %v12827_v44  ;;  %v27235_v44 = vld [vmem:[#allocation207_spill] sm:$0xff] }
 0x4a8   : > { %v12828_v52 = vsel %vm7753_vm7, %v27228_v25, %v11797_v10  ;;  %15893 = vxpose.xlu0.b32.cont [12/16] (narrow) %v14261_v2, 8  ;;  %v5688_v38 = vcombine.high %v27230_v62, %v27230_v62  ;;  %v6972_v7 = vrot.slane %v27231_v20, %v18559_v11  ;;  %v6976_v35 = vrot.slane %v27230_v62, %v18559_v11 }
 0x4a9   : > { %v14263_v60 = vcombine.low %v12828_v52, %v12829_v39  ;;  %v3832_v56 = vcombine.high %v3828_v28, %v3828_v28  ;;  %v14516_v16 = vcombine.low %v14508_v40, %v14515_v23  ;;  %v14270_v5 = vrot.slane %v14262_v14, %v19822_v43  ;;  %v27236_v39 = vld [vmem:[#allocation370_spill] sm:$0xff] }
 0x4aa   : > { %v27232_v50 = vcombine.high %v27231_v20, %v27231_v20  ;;  %v27234_v19 = vcombine.high %v27233_v37, %v27233_v37  ;;  %v6984_v13 = vrot.slane %v5688_v38, %v18559_v11  ;;  %v7878_v0 = vsel %vm7753_vm7, %v27229_v24, %v6972_v7  ;;  %v27239_v20 = vld [vmem:[#allocation218_spill] sm:$0xff] }
 0x4ab   : > { %v14277_v41 = vrot.slane %v14263_v60, %v19822_v43  ;;  %15924 = vxpose.xlu1.b32.cont [11/16] (narrow) %v14516_v16, 8  ;;  %v7879_v55 = vsel %vm7753_vm7, %v3828_v28, %v6976_v35  ;;  %v8578_v26 = vcombine.high %v27235_v44, %v27235_v44  ;;  %v10436_v14 = vcombine.high %v27236_v39, %v27236_v39  ;;  %v27237_v60 = vld [vmem:[#allocation368_spill] sm:$0xff] }
 0x4ac   : > { %v6980_v10 = vrot.slane %v27232_v50, %v18559_v11  ;;  %v8576_v40 = vrot.slane %v27234_v19, %v18540_v33  ;;  %v14517_v23 = vcombine.low %v7878_v0, %v7879_v55  ;;  %v7881_v52 = vsel %vm7753_vm7, %v3832_v56, %v6984_v13  ;;  %v27241_v13 = vld [vmem:[#allocation166_spill] sm:$0xff] }
 0x4ad   : > { %v14278_v36 = vcombine.low %v14270_v5, %v14277_v41  ;;  %v11805_v16 = vrot.slane %v27237_v60, %v18559_v11  ;;  %v11809_v24 = vrot.slane %v27236_v39, %v18559_v11  ;;  %v8775_v56 = vcombine.high %v27239_v20, %v27239_v20  ;;  %v27240_v41 = vld [vmem:[#allocation382_spill] sm:$0xff] }
 0x4ae   : > { %v7880_v2 = vsel %vm7753_vm7, %v3830_v61, %v6980_v10  ;;  %v8580_v25 = vcombine.high %v8576_v40, %v8576_v40  ;;  %v14525_v62 = vrot.slane %v14517_v23, %v19822_v43  ;;  %v27238_v61 = vcombine.high %v27237_v60, %v27237_v60  ;;  %v27245_v23 = vld [vmem:[#allocation216_spill] sm:$0xff] }
 0x4af   : > { %15894 = vxpose.xlu0.b32.cont [13/16] (narrow) %v14278_v36, 8  ;;  %v14518_v28 = vcombine.low %v7880_v2, %v7881_v52  ;;  %v11817_v7 = vrot.slane %v10436_v14, %v18559_v11  ;;  %v12830_v35 = vsel %vm7753_vm7, %v27235_v44, %v11805_v16  ;;  %v12831_v5 = vsel %vm7753_vm7, %v8576_v40, %v11809_v24 }
 0x4b0   : > { %v11813_v38 = vrot.slane %v27238_v61, %v18559_v11  ;;  %v11921_v50 = vrot.slane %v27240_v41, %v18559_v11  ;;  %v14279_v19 = vcombine.low %v12830_v35, %v12831_v5  ;;  %v27242_v0 = vcombine.high %v27241_v13, %v27241_v13  ;;  %v27247_v61 = vld [vmem:[#allocation212_spill] sm:$0xff]  ;;  %v27249_v5 = vld [vmem:[#allocation375_spill] sm:$0xff] }
 0x4b1   : > { %v14532_v10 = vrot.slane %v14518_v28, %v19822_v43  ;;  %v12833_v36 = vsel %vm7753_vm7, %v8580_v25, %v11817_v7  ;;  %v27243_v44 = vcombine.high %v27240_v41, %v27240_v41  ;;  %v27244_v2 = vrot.slane %v27241_v13, %v18559_v11  ;;  %v27248_v7 = vld [vmem:[#allocation377_spill] sm:$0xff] }
 0x4b2   : > { %v12832_v37 = vsel %vm7753_vm7, %v8578_v26, %v11813_v38  ;;  %v11925_v55 = vrot.slane %v27242_v0, %v18559_v11  ;;  %v12859_v26 = vsel %vm7753_vm7, %v27239_v20, %v11921_v50  ;;  %v14287_v60 = vrot.slane %v14279_v19, %v19822_v43  ;;  %v27253_v13 = vld [vmem:[#allocation13_spill] sm:$0xff] }
 0x4b3   : > { %v11929_v40 = vrot.slane %v27243_v44, %v18559_v11  ;;  %v12858_v52 = vsel %vm7753_vm7, %v27245_v23, %v27244_v2  ;;  %v14533_v39 = vcombine.low %v14525_v62, %v14532_v10  ;;  %v14280_v14 = vcombine.low %v12832_v37, %v12833_v36  ;;  %v27254_v36 = vld [vmem:[#allocation145_spill] sm:$0xff] }
 0x4b4   : > { %v27246_v25 = vcombine.high %v27245_v23, %v27245_v23  ;;  %v14534_v28 = vcombine.low %v12858_v52, %v12859_v26  ;;  %v8628_v38 = vcombine.high %v27247_v61, %v27247_v61  ;;  %v11825_v35 = vrot.slane %v27248_v7, %v18559_v11 }
 0x4b5   : > { %v12861_v24 = vsel %vm7753_vm7, %v8775_v56, %v11929_v40  ;;  %15925 = vxpose.xlu1.b32.cont [12/16] (narrow) %v14533_v39, 8  ;;  %v14294_v62 = vrot.slane %v14280_v14, %v19822_v43  ;;  %v27250_v41 = vcombine.high %v27249_v5, %v27249_v5  ;;  %v27251_v56 = vcombine.high %v27248_v7, %v27248_v7  ;;  %v27258_v7 = vld [vmem:[#allocation383_spill] sm:$0xff] }
 0x4b6   : > { %v12860_v16 = vsel %vm7753_vm7, %v27246_v25, %v11925_v55  ;;  %v14542_v37 = vrot.slane %v14534_v28, %v19822_v43  ;;  %v27252_v19 = vrot.slane %v27249_v5, %v18559_v11  ;;  %v12835_v55 = vsel %vm7753_vm7, %v27247_v61, %v11825_v35  ;;  %v27259_v35 = vld [vmem:[#allocation381_spill] sm:$0xff] }
 0x4b7   : > { %v14535_v20 = vcombine.low %v12860_v16, %v12861_v24  ;;  %v11829_v50 = vrot.slane %v27250_v41, %v18559_v11  ;;  %v11833_v10 = vrot.slane %v27251_v56, %v18559_v11  ;;  %v27255_v44 = vcombine.high %v27254_v36, %v27254_v36  ;;  %v27257_v16 = vld [vmem:[#allocation217_spill] sm:$0xff]  ;;  %v27261_v56 = vld [vmem:[#allocation16_spill] sm:$0xff] }
 0x4b8   : > { %v12834_v0 = vsel %vm7753_vm7, %v27253_v13, %v27252_v19  ;;  %v14295_v2 = vcombine.low %v14287_v60, %v14294_v62  ;;  %v27256_v52 = vcombine.high %v27253_v13, %v27253_v13  ;;  %v8774_v24 = vcombine.high %v27257_v16, %v27257_v16 }
 0x4b9   : > { %v8772_v40 = vrot.slane %v27255_v44, %v18540_v33  ;;  %v14549_v23 = vrot.slane %v14535_v20, %v19822_v43  ;;  %v12837_v39 = vsel %vm7753_vm7, %v8628_v38, %v11833_v10  ;;  %v14296_v14 = vcombine.low %v12834_v0, %v12835_v55  ;;  %v27263_v55 = vld [vmem:[#allocation9_spill] sm:$0xff] }
 0x4ba   : > { %v12836_v26 = vsel %vm7753_vm7, %v27256_v52, %v11829_v50  ;;  %15895 = vxpose.xlu0.b32.cont [14/16] (narrow) %v14295_v2, 8  ;;  %v10632_v60 = vcombine.high %v27258_v7, %v27258_v7  ;;  %v11933_v62 = vrot.slane %v27259_v35, %v18559_v11  ;;  %v11937_v20 = vrot.slane %v27258_v7, %v18559_v11 }
 0x4bb   : > { %v14297_v25 = vcombine.low %v12836_v26, %v12837_v39  ;;  %v8776_v28 = vcombine.high %v8772_v40, %v8772_v40  ;;  %v14550_v61 = vcombine.low %v14542_v37, %v14549_v23  ;;  %v14304_v5 = vrot.slane %v14296_v14, %v19822_v43  ;;  %v27264_v39 = vld [vmem:[#allocation378_spill] sm:$0xff] }
 0x4bc   : > { %v27260_v41 = vcombine.high %v27259_v35, %v27259_v35  ;;  %v27262_v10 = vcombine.high %v27261_v56, %v27261_v56  ;;  %v11945_v19 = vrot.slane %v10632_v60, %v18559_v11  ;;  %v12862_v13 = vsel %vm7753_vm7, %v27257_v16, %v11933_v62  ;;  %v27267_v35 = vld [vmem:[#allocation234_spill] sm:$0xff] }
 0x4bd   : > { %v14311_v38 = vrot.slane %v14297_v25, %v19822_v43  ;;  %15926 = vxpose.xlu1.b32.cont [13/16] (narrow) %v14550_v61, 8  ;;  %v12863_v0 = vsel %vm7753_vm7, %v8772_v40, %v11937_v20  ;;  %v8627_v36 = vcombine.high %v27263_v55, %v27263_v55  ;;  %v10485_v14 = vcombine.high %v27264_v39, %v27264_v39  ;;  %v27265_v25 = vld [vmem:[#allocation376_spill] sm:$0xff] }
 0x4be   : > { %v11941_v50 = vrot.slane %v27260_v41, %v18559_v11  ;;  %v8625_v37 = vrot.slane %v27262_v10, %v18540_v33  ;;  %v14551_v23 = vcombine.low %v12862_v13, %v12863_v0  ;;  %v12865_v26 = vsel %vm7753_vm7, %v8776_v28, %v11945_v19 }
 0x4bf   : > { %v14312_v44 = vcombine.low %v14304_v5, %v14311_v38  ;;  %v11837_v61 = vrot.slane %v27265_v25, %v18559_v11  ;;  %v11841_v16 = vrot.slane %v27264_v39, %v18559_v11  ;;  %v8824_v28 = vcombine.high %v27267_v35, %v27267_v35 }
 0x4c0   : > { %v12864_v2 = vsel %vm7753_vm7, %v8774_v24, %v11941_v50  ;;  %v8629_v52 = vcombine.high %v8625_v37, %v8625_v37  ;;  %v14559_v7 = vrot.slane %v14551_v23, %v19822_v43  ;;  %v27266_v24 = vcombine.high %v27265_v25, %v27265_v25 }
 0x4c1   : > { %15896 = vxpose.xlu0.b32.cont [15/16] (narrow) %v14312_v44, 8  ;;  %v14552_v40 = vcombine.low %v12864_v2, %v12865_v26  ;;  %v11849_v62 = vrot.slane %v10485_v14, %v18559_v11  ;;  %v12838_v20 = vsel %vm7753_vm7, %v27263_v55, %v11837_v61  ;;  %v12839_v5 = vsel %vm7753_vm7, %v8625_v37, %v11841_v16  ;;  %v27271_v44 = vld [vmem:[#allocation231_spill] sm:$0xff]  ;;  %v27274_v16 = vld [vmem:[#allocation221_spill] sm:$0xff] }
 0x4c2   : > { %v11845_v60 = vrot.slane %v27266_v24, %v18559_v11  ;;  %v11953_v38 = vrot.slane %v22043_v63, %v18559_v11  ;;  %v14313_v56 = vcombine.low %v12838_v20, %v12839_v5  ;;  %v27268_v10 = vcombine.high %v22034_v57, %v22034_v57  ;;  %v27273_v61 = vld [vmem:[#allocation67_spill] sm:$0xff] }
 0x4c3   : > { %v14566_v41 = vrot.slane %v14552_v40, %v19822_v43  ;;  %v12841_v13 = vsel %vm7753_vm7, %v8629_v52, %v11849_v62  ;;  %v27269_v0 = vcombine.high %v22043_v63, %v22043_v63  ;;  %v27270_v55 = vrot.slane %v22034_v57, %v18559_v11 }
 0x4c4   : > { %v12840_v50 = vsel %vm7753_vm7, %v8627_v36, %v11845_v60  ;;  %v11957_v19 = vrot.slane %v27268_v10, %v18559_v11  ;;  %v12867_v36 = vsel %vm7753_vm7, %v27267_v35, %v11953_v38  ;;  %v14321_v39 = vrot.slane %v14313_v56, %v19822_v43  ;;  %v27275_v60 = vld [vmem:[#allocation219_spill] sm:$0xff]  ;;  %v27280_v10 = vld [vmem:[#allocation230_spill] sm:$0xff] }
 0x4c5   : > { %v11961_v37 = vrot.slane %v27269_v0, %v18559_v11  ;;  %v12866_v2 = vsel %vm7753_vm7, %v27271_v44, %v27270_v55  ;;  %v14567_v23 = vcombine.low %v14559_v7, %v14566_v41  ;;  %v14314_v26 = vcombine.low %v12840_v50, %v12841_v13  ;;  %v27279_v41 = vld [vmem:[#allocation65_spill] sm:$0xff] }
 0x4c6   : > { %v27272_v52 = vcombine.high %v27271_v44, %v27271_v44  ;;  %v14568_v25 = vcombine.low %v12866_v2, %v12867_v36  ;;  %v3880_v57 = vcombine.high %v27273_v61, %v27273_v61  ;;  %v6992_v40 = vrot.slane %v27274_v16, %v18559_v11 }
 0x4c7   : > { %v12869_v63 = vsel %vm7753_vm7, %v8824_v28, %v11961_v37  ;;  %15927 = vxpose.xlu1.b32.cont [14/16] (narrow) %v14567_v23, 8  ;;  %v14328_v7 = vrot.slane %v14314_v26, %v19822_v43  ;;  %v27276_v35 = vcombine.high %v27275_v60, %v27275_v60  ;;  %v27277_v28 = vcombine.high %v27274_v16, %v27274_v16  ;;  %v27283_v26 = vld [vmem:[#allocation233_spill] sm:$0xff] }
 0x4c8   : > { %v12868_v14 = vsel %vm7753_vm7, %v27272_v52, %v11957_v19  ;;  %v14576_v5 = vrot.slane %v14568_v25, %v19822_v43  ;;  %v27278_v38 = vrot.slane %v27275_v60, %v18559_v11  ;;  %v7883_v56 = vsel %vm7753_vm7, %v27273_v61, %v6992_v40 }
 0x4c9   : > { %v14569_v24 = vcombine.low %v12868_v14, %v12869_v63  ;;  %v6996_v62 = vrot.slane %v27276_v35, %v18559_v11  ;;  %v7000_v20 = vrot.slane %v27277_v28, %v18559_v11  ;;  %v27281_v19 = vcombine.high %v27280_v10, %v27280_v10  ;;  %v27288_v10 = vld [vmem:[#allocation223_spill] sm:$0xff] }
 0x4ca   : > { %v7882_v50 = vsel %vm7753_vm7, %v27279_v41, %v27278_v38  ;;  %v14329_v0 = vcombine.low %v14321_v39, %v14328_v7  ;;  %v27282_v55 = vcombine.high %v27279_v41, %v27279_v41  ;;  %v8823_v52 = vcombine.high %v27283_v26, %v27283_v26 }
 0x4cb   : > { %v8821_v13 = vrot.slane %v27281_v19, %v18540_v33  ;;  %v14583_v37 = vrot.slane %v14569_v24, %v19822_v43  ;;  %v7885_v2 = vsel %vm7753_vm7, %v3880_v57, %v7000_v20  ;;  %v14602_v36 = vcombine.low %v7882_v50, %v7883_v56  ;;  %v27285_v24 = vld [vmem:[#allocation64_spill] sm:$0xff]  ;;  %v27287_v20 = vld [vmem:[#allocation66_spill] sm:$0xff] }
 0x4cc   : > { %v7884_v44 = vsel %vm7753_vm7, %v27282_v55, %v6996_v62  ;;  %15897 = vxpose.xlu0.b32.end [16/16] (narrow) %v14329_v0, 8  ;;  %v10681_v39 = vcombine.high %v22049_v6, %v22049_v6  ;;  %v11965_v25 = vrot.slane %v22040_v46, %v18559_v11  ;;  %v11969_v61 = vrot.slane %v22049_v6, %v18559_v11  ;;  %v27289_v0 = vld [vmem:[#allocation220_spill] sm:$0xff] }
 0x4cd   : > { %v14603_v23 = vcombine.low %v7884_v44, %v7885_v2  ;;  %v8825_v14 = vcombine.high %v8821_v13, %v8821_v13  ;;  %v14584_v63 = vcombine.low %v14576_v5, %v14583_v37  ;;  %v14610_v16 = vrot.slane %v14602_v36, %v19822_v43 }
 0x4ce   : > { %v27284_v40 = vcombine.high %v22040_v46, %v22040_v46  ;;  %v27286_v60 = vcombine.high %v27285_v24, %v27285_v24  ;;  %v11977_v62 = vrot.slane %v10681_v39, %v18559_v11  ;;  %v12870_v6 = vsel %vm7753_vm7, %v27283_v26, %v11965_v25  ;;  %v27292_v39 = vld [vmem:[#allocation265_spill] sm:$0xff] }
 0x4cf   : > { %v14617_v57 = vrot.slane %v14603_v23, %v19822_v43  ;;  %15928 = vxpose.xlu1.b32.cont [15/16] (narrow) %v14584_v63, 8  ;;  %v12871_v28 = vsel %vm7753_vm7, %v8821_v13, %v11969_v61  ;;  %v3879_v5 = vcombine.high %v27287_v20, %v27287_v20  ;;  %v5737_v19 = vcombine.high %v27288_v10, %v27288_v10  ;;  %v27291_v23 = vld [vmem:[#allocation83_spill] sm:$0xff] }
 0x4d0   : > { %v11973_v7 = vrot.slane %v27284_v40, %v18559_v11  ;;  %v3877_v35 = vrot.slane %v27286_v60, %v18540_v33  ;;  %v14585_v41 = vcombine.low %v12870_v6, %v12871_v28  ;;  %v12873_v56 = vsel %vm7753_vm7, %v8825_v14, %v11977_v62  ;;  %v27293_v40 = vld [vmem:[#allocation263_spill] sm:$0xff]  ;;  %v27297_v28 = vld [vmem:[#allocation81_spill] sm:$0xff] }
 0x4d1   : > { %v14618_v38 = vcombine.low %v14610_v16, %v14617_v57  ;;  %v7004_v37 = vrot.slane %v27289_v0, %v18559_v11  ;;  %v7008_v55 = vrot.slane %v27288_v10, %v18559_v11  ;;  %v27290_v2 = vcombine.high %v27289_v0, %v27289_v0  ;;  %v27299_v0 = vld [vmem:[#allocation75_spill] sm:$0xff] }
 0x4d2   : > { %v12872_v46 = vsel %vm7753_vm7, %v8823_v52, %v11973_v7  ;;  %v3881_v50 = vcombine.high %v3877_v35, %v3877_v35  ;;  %v14593_v44 = vrot.slane %v14585_v41, %v19822_v43  ;;  %v4076_v26 = vcombine.high %v27291_v23, %v27291_v23 }
 0x4d3   : > { %15946 = vxpose.xlu0.b32.start [1/16] (narrow) %v14618_v38, 8  ;;  %v14586_v13 = vcombine.low %v12872_v46, %v12873_v56  ;;  %v7012_v36 = vrot.slane %v27290_v2, %v18559_v11  ;;  %v7016_v52 = vrot.slane %v5737_v19, %v18559_v11  ;;  %v7886_v14 = vsel %vm7753_vm7, %v27287_v20, %v7004_v37 }
 0x4d4   : > { %v7887_v63 = vsel %vm7753_vm7, %v3877_v35, %v7008_v55  ;;  %v7120_v25 = vrot.slane %v27292_v39, %v18559_v11  ;;  %v27294_v7 = vcombine.high %v27293_v40, %v27293_v40  ;;  %v27295_v62 = vcombine.high %v27292_v39, %v27292_v39  ;;  %v27300_v55 = vld [vmem:[#allocation237_spill] sm:$0xff] }
 0x4d5   : > { %v14600_v61 = vrot.slane %v14586_v13, %v19822_v43  ;;  %v7888_v16 = vsel %vm7753_vm7, %v3879_v5, %v7012_v36  ;;  %v14619_v57 = vcombine.low %v7886_v14, %v7887_v63  ;;  %v7889_v60 = vsel %vm7753_vm7, %v3881_v50, %v7016_v52  ;;  %v27301_v36 = vld [vmem:[#allocation235_spill] sm:$0xff] }
 0x4d6   : > { %v7124_v24 = vrot.slane %v27294_v7, %v18559_v11  ;;  %v7128_v35 = vrot.slane %v27295_v62, %v18559_v11  ;;  %v27296_v6 = vrot.slane %v27293_v40, %v18559_v11  ;;  %v7915_v5 = vsel %vm7753_vm7, %v27291_v23, %v7120_v25  ;;  %v27305_v25 = vld [vmem:[#allocation73_spill] sm:$0xff] }
 0x4d7   : > { %v14601_v38 = vcombine.low %v14593_v44, %v14600_v61  ;;  %v14620_v46 = vcombine.low %v7888_v16, %v7889_v60  ;;  %v14627_v41 = vrot.slane %v14619_v57, %v19822_v43  ;;  %v27298_v50 = vcombine.high %v27297_v28, %v27297_v28  ;;  %v27306_v57 = vld [vmem:[#allocation80_spill] sm:$0xff] }
 0x4d8   : > { %v7914_v20 = vsel %vm7753_vm7, %v27297_v28, %v27296_v6  ;;  %v7917_v10 = vsel %vm7753_vm7, %v4076_v26, %v7128_v35  ;;  %v3929_v37 = vcombine.high %v27299_v0, %v27299_v0  ;;  %v7024_v13 = vrot.slane %v27300_v55, %v18559_v11 }
 0x4d9   : > { %v7916_v56 = vsel %vm7753_vm7, %v27298_v50, %v7124_v24  ;;  %v14874_v19 = vcombine.low %v7914_v20, %v7915_v5  ;;  %15929 = vxpose.xlu1.b32.end [16/16] (narrow) %v14601_v38, 8  ;;  %v14634_v44 = vrot.slane %v14620_v46, %v19822_v43  ;;  %v27302_v23 = vcombine.high %v27301_v36, %v27301_v36  ;;  %v27309_v5 = vld [vmem:[#allocation82_spill] sm:$0xff] }
 0x4da   : > { %v14875_v2 = vcombine.low %v7916_v56, %v7917_v10  ;;  %v27303_v26 = vcombine.high %v27300_v55, %v27300_v55  ;;  %v27304_v39 = vrot.slane %v27301_v36, %v18559_v11  ;;  %v7891_v16 = vsel %vm7753_vm7, %v27299_v0, %v7024_v13  ;;  %v27310_v56 = vld [vmem:[#allocation267_spill] sm:$0xff]  ;;  %v27311_v10 = vld [vmem:[#allocation264_spill] sm:$0xff] }
 0x4db   : > { %v7028_v52 = vrot.slane %v27302_v23, %v18559_v11  ;;  %v14882_v63 = vrot.slane %v14874_v19, %v19822_v43  ;;  %v27307_v40 = vcombine.high %v27306_v57, %v27306_v57  ;;  %v14635_v24 = vcombine.low %v14627_v41, %v14634_v44 }
 0x4dc   : > { %v7032_v14 = vrot.slane %v27303_v26, %v18559_v11  ;;  %v7890_v61 = vsel %vm7753_vm7, %v27305_v25, %v27304_v39  ;;  %v14889_v60 = vrot.slane %v14875_v2, %v19822_v43  ;;  %v27308_v62 = vcombine.high %v27305_v25, %v27305_v25  ;;  %v27313_v2 = vld [vmem:[#allocation70_spill] sm:$0xff] }
 0x4dd   : > { %v4073_v7 = vrot.slane %v27307_v40, %v18540_v33  ;;  %v14636_v28 = vcombine.low %v7890_v61, %v7891_v16  ;;  %v4075_v38 = vcombine.high %v27309_v5, %v27309_v5  ;;  %15947 = vxpose.xlu0.b32.cont [2/16] (narrow) %v14635_v24, 8  ;;  %v5933_v41 = vcombine.high %v27310_v56, %v27310_v56  ;;  %v27316_v24 = vld [vmem:[#allocation238_spill] sm:$0xff] }
 0x4de   : > { %v7892_v35 = vsel %vm7753_vm7, %v27308_v62, %v7028_v52  ;;  %v7893_v6 = vsel %vm7753_vm7, %v3929_v37, %v7032_v14  ;;  %v14890_v50 = vcombine.low %v14882_v63, %v14889_v60  ;;  %v7132_v19 = vrot.slane %v27311_v10, %v18559_v11  ;;  %v27315_v63 = vld [vmem:[#allocation74_spill] sm:$0xff]  ;;  %v27317_v62 = vld [vmem:[#allocation236_spill] sm:$0xff] }
 0x4df   : > { %v14637_v20 = vcombine.low %v7892_v35, %v7893_v6  ;;  %v4077_v46 = vcombine.high %v4073_v7, %v4073_v7  ;;  %v7136_v0 = vrot.slane %v27310_v56, %v18559_v11  ;;  %v14644_v55 = vrot.slane %v14636_v28, %v19822_v43 }
 0x4e0   : > { %v27312_v13 = vcombine.high %v27311_v10, %v27311_v10  ;;  %v27314_v36 = vcombine.high %v27313_v2, %v27313_v2  ;;  %15978 = vxpose.xlu1.b32.start [1/16] (narrow) %v14890_v50, 8  ;;  %v7144_v52 = vrot.slane %v5933_v41, %v18559_v11  ;;  %v7918_v26 = vsel %vm7753_vm7, %v27309_v5, %v7132_v19  ;;  %v27320_v10 = vld [vmem:[#allocation273_spill] sm:$0xff] }
 0x4e1   : > { %v14651_v37 = vrot.slane %v14637_v20, %v19822_v43  ;;  %v7919_v14 = vsel %vm7753_vm7, %v4073_v7, %v7136_v0  ;;  %v3928_v39 = vcombine.high %v27315_v63, %v27315_v63  ;;  %v5786_v60 = vcombine.high %v27316_v24, %v27316_v24 }
 0x4e2   : > { %v7140_v44 = vrot.slane %v27312_v13, %v18559_v11  ;;  %v3926_v23 = vrot.slane %v27314_v36, %v18540_v33  ;;  %v14891_v16 = vcombine.low %v7918_v26, %v7919_v14  ;;  %v7921_v40 = vsel %vm7753_vm7, %v4077_v46, %v7144_v52  ;;  %v27321_v13 = vld [vmem:[#allocation271_spill] sm:$0xff]  ;;  %v27325_v14 = vld [vmem:[#allocation89_spill] sm:$0xff] }
 0x4e3   : > { %v14652_v25 = vcombine.low %v14644_v55, %v14651_v37  ;;  %v7036_v35 = vrot.slane %v27317_v62, %v18559_v11  ;;  %v7040_v6 = vrot.slane %v27316_v24, %v18559_v11  ;;  %v27318_v20 = vcombine.high %v27317_v62, %v27317_v62  ;;  %v27327_v62 = vld [vmem:[#allocation251_spill] sm:$0xff] }
 0x4e4   : > { %v7920_v61 = vsel %vm7753_vm7, %v4075_v38, %v7140_v44  ;;  %v3930_v57 = vcombine.high %v3926_v23, %v3926_v23  ;;  %v14899_v28 = vrot.slane %v14891_v16, %v19822_v43  ;;  %v27319_v38 = vld [vmem:[#allocation91_spill] sm:$0xff]  ;;  %v7048_v50 = vrot.slane %v5786_v60, %v18559_v11 }
 0x4e5   : > { %15948 = vxpose.xlu0.b32.cont [3/16] (narrow) %v14652_v25, 8  ;;  %v14892_v7 = vcombine.low %v7920_v61, %v7921_v40  ;;  %v7044_v5 = vrot.slane %v27318_v20, %v18559_v11  ;;  %v4125_v46 = vcombine.high %v27319_v38, %v27319_v38  ;;  %v7894_v56 = vsel %vm7753_vm7, %v27315_v63, %v7036_v35 }
 0x4e6   : > { %v7895_v41 = vsel %vm7753_vm7, %v3926_v23, %v7040_v6  ;;  %v7152_v19 = vrot.slane %v27320_v10, %v18559_v11  ;;  %v27322_v44 = vcombine.high %v27321_v13, %v27321_v13  ;;  %v7897_v36 = vsel %vm7753_vm7, %v3930_v57, %v7048_v50 }
 0x4e7   : > { %v14906_v0 = vrot.slane %v14892_v7, %v19822_v43  ;;  %v7896_v55 = vsel %vm7753_vm7, %v3928_v39, %v7044_v5  ;;  %v14653_v37 = vcombine.low %v7894_v56, %v7895_v41  ;;  %v27323_v52 = vcombine.high %v27320_v10, %v27320_v10  ;;  %v27331_v41 = vld [vmem:[#allocation248_spill] sm:$0xff] }
 0x4e8   : > { %v7156_v2 = vrot.slane %v27322_v44, %v18559_v11  ;;  %v27324_v26 = vrot.slane %v27321_v13, %v18559_v11  ;;  %v7923_v39 = vsel %vm7753_vm7, %v27319_v38, %v7152_v19  ;;  %v14654_v61 = vcombine.low %v7896_v55, %v7897_v36 }
 0x4e9   : > { %v7160_v23 = vrot.slane %v27323_v52, %v18559_v11  ;;  %v14907_v25 = vcombine.low %v14899_v28, %v14906_v0  ;;  %v14661_v16 = vrot.slane %v14653_v37, %v19822_v43  ;;  %v27326_v57 = vcombine.high %v27325_v14, %v27325_v14  ;;  %v27332_v0 = vld [vmem:[#allocation86_spill] sm:$0xff] }
 0x4ea   : > { %v7922_v63 = vsel %vm7753_vm7, %v27325_v14, %v27324_v26  ;;  %v8873_v35 = vcombine.high %v27327_v62, %v27327_v62  ;;  %v11985_v6 = vrot.slane %v22187_v21, %v18559_v11  ;;  %v14668_v7 = vrot.slane %v14654_v61, %v19822_v43  ;;  %v27337_v61 = vld [vmem:[#allocation272_spill] sm:$0xff] }
 0x4eb   : > { %v7924_v40 = vsel %vm7753_vm7, %v27326_v57, %v7156_v2  ;;  %v7925_v24 = vsel %vm7753_vm7, %v4125_v46, %v7160_v23  ;;  %v14908_v60 = vcombine.low %v7922_v63, %v7923_v39  ;;  %15979 = vxpose.xlu1.b32.cont [2/16] (narrow) %v14907_v25, 8  ;;  %v27328_v20 = vcombine.high %v22173_v32, %v22173_v32  ;;  %v27335_v23 = vld [vmem:[#allocation90_spill] sm:$0xff]  ;;  %v27336_v39 = vld [vmem:[#allocation275_spill] sm:$0xff] }
 0x4ec   : > { %v14909_v28 = vcombine.low %v7924_v40, %v7925_v24  ;;  %v27329_v38 = vcombine.high %v22187_v21, %v22187_v21  ;;  %v27330_v56 = vrot.slane %v22173_v32, %v18559_v11  ;;  %v12875_v19 = vsel %vm7753_vm7, %v27327_v62, %v11985_v6 }
 0x4ed   : > { %v11989_v5 = vrot.slane %v27328_v20, %v18559_v11  ;;  %v14916_v50 = vrot.slane %v14908_v60, %v19822_v43  ;;  %v27333_v55 = vcombine.high %v27332_v0, %v27332_v0  ;;  %v14669_v13 = vcombine.low %v14661_v16, %v14668_v7 }
 0x4ee   : > { %v11993_v46 = vrot.slane %v27329_v38, %v18559_v11  ;;  %v12874_v10 = vsel %vm7753_vm7, %v27331_v41, %v27330_v56  ;;  %v14923_v21 = vrot.slane %v14909_v28, %v19822_v43  ;;  %v27334_v44 = vcombine.high %v27331_v41, %v27331_v41  ;;  %v27341_v38 = vld [vmem:[#allocation250_spill] sm:$0xff] }
 0x4ef   : > { %v4122_v37 = vrot.slane %v27333_v55, %v18540_v33  ;;  %v14670_v36 = vcombine.low %v12874_v10, %v12875_v19  ;;  %v4124_v26 = vcombine.high %v27335_v23, %v27335_v23  ;;  %15949 = vxpose.xlu0.b32.cont [4/16] (narrow) %v14669_v13, 8  ;;  %v5982_v25 = vcombine.high %v27336_v39, %v27336_v39  ;;  %v27342_v55 = vld [vmem:[#allocation190_spill] sm:$0xff] }
 0x4f0   : > { %v12876_v2 = vsel %vm7753_vm7, %v27334_v44, %v11989_v5  ;;  %v12877_v32 = vsel %vm7753_vm7, %v8873_v35, %v11993_v46  ;;  %v14924_v63 = vcombine.low %v14916_v50, %v14923_v21  ;;  %v7164_v16 = vrot.slane %v27337_v61, %v18559_v11  ;;  %v27339_v35 = vld [vmem:[#allocation247_spill] sm:$0xff] }
 0x4f1   : > { %v14671_v52 = vcombine.low %v12876_v2, %v12877_v32  ;;  %v4126_v14 = vcombine.high %v4122_v37, %v4122_v37  ;;  %v7168_v57 = vrot.slane %v27336_v39, %v18559_v11  ;;  %v14678_v40 = vrot.slane %v14670_v36, %v19822_v43  ;;  %v27344_v36 = vld [vmem:[#allocation282_spill] sm:$0xff] }
 0x4f2   : > { %v27338_v60 = vcombine.high %v27337_v61, %v27337_v61  ;;  %v27340_v6 = vcombine.high %v27339_v35, %v27339_v35  ;;  %15980 = vxpose.xlu1.b32.cont [3/16] (narrow) %v14924_v63, 8  ;;  %v7176_v28 = vrot.slane %v5982_v25, %v18559_v11  ;;  %v7926_v20 = vsel %vm7753_vm7, %v27335_v23, %v7164_v16 }
 0x4f3   : > { %v14685_v24 = vrot.slane %v14671_v52, %v19822_v43  ;;  %v7927_v5 = vsel %vm7753_vm7, %v4122_v37, %v7168_v57  ;;  %v8872_v46 = vcombine.high %v27341_v38, %v27341_v38  ;;  %v10730_v0 = vcombine.high %v22196_v1, %v22196_v1 }
 0x4f4   : > { %v7172_v62 = vrot.slane %v27338_v60, %v18559_v11  ;;  %v8870_v7 = vrot.slane %v27340_v6, %v18540_v33  ;;  %v14925_v41 = vcombine.low %v7926_v20, %v7927_v5  ;;  %v7929_v19 = vsel %vm7753_vm7, %v4126_v14, %v7176_v28 }
 0x4f5   : > { %v14686_v50 = vcombine.low %v14678_v40, %v14685_v24  ;;  %v11997_v13 = vrot.slane %v27342_v55, %v18559_v11  ;;  %v12001_v21 = vrot.slane %v22196_v1, %v18559_v11  ;;  %v27343_v2 = vcombine.high %v27342_v55, %v27342_v55 }
 0x4f6   : > { %v7928_v56 = vsel %vm7753_vm7, %v4124_v26, %v7172_v62  ;;  %v8874_v10 = vcombine.high %v8870_v7, %v8870_v7  ;;  %v14933_v44 = vrot.slane %v14925_v41, %v19822_v43  ;;  %v9069_v52 = vcombine.high %v27344_v36, %v27344_v36  ;;  %v27348_v62 = vld [vmem:[#allocation280_spill] sm:$0xff] }
 0x4f7   : > { %15950 = vxpose.xlu0.b32.cont [5/16] (narrow) %v14686_v50, 8  ;;  %v14926_v37 = vcombine.low %v7928_v56, %v7929_v19  ;;  %v12005_v32 = vrot.slane %v27343_v2, %v18559_v11  ;;  %v12009_v23 = vrot.slane %v10730_v0, %v18559_v11  ;;  %v12878_v26 = vsel %vm7753_vm7, %v27341_v38, %v11997_v13  ;;  %v27350_v50 = vld [vmem:[#allocation258_spill] sm:$0xff] }
 0x4f8   : > { %v12879_v14 = vsel %vm7753_vm7, %v8870_v7, %v12001_v21  ;;  %v12113_v1 = vrot.slane %v22409_v29, %v18559_v11  ;;  %v27345_v61 = vcombine.high %v22393_v48, %v22393_v48  ;;  %v27346_v40 = vcombine.high %v22409_v29, %v22409_v29 }
 0x4f9   : > { %v14940_v63 = vrot.slane %v14926_v37, %v19822_v43  ;;  %v12880_v39 = vsel %vm7753_vm7, %v8872_v46, %v12005_v32  ;;  %v14687_v25 = vcombine.low %v12878_v26, %v12879_v14  ;;  %v12881_v57 = vsel %vm7753_vm7, %v8874_v10, %v12009_v23 }
 0x4fa   : > { %v12117_v16 = vrot.slane %v27345_v61, %v18559_v11  ;;  %v12121_v24 = vrot.slane %v27346_v40, %v18559_v11  ;;  %v27347_v60 = vrot.slane %v22393_v48, %v18559_v11  ;;  %v12907_v6 = vsel %vm7753_vm7, %v27344_v36, %v12113_v1  ;;  %v27355_v36 = vld [vmem:[#allocation279_spill] sm:$0xff] }
 0x4fb   : > { %v14941_v7 = vcombine.low %v14933_v44, %v14940_v63  ;;  %v14688_v28 = vcombine.low %v12880_v39, %v12881_v57  ;;  %v14695_v20 = vrot.slane %v14687_v25, %v19822_v43  ;;  %v27349_v5 = vcombine.high %v27348_v62, %v27348_v62  ;;  %v27354_v44 = vld [vmem:[#allocation256_spill] sm:$0xff]  ;;  %v27358_v25 = vld [vmem:[#allocation281_spill] sm:$0xff] }
 0x4fc   : > { %v12906_v35 = vsel %vm7753_vm7, %v27348_v62, %v27347_v60  ;;  %v12909_v29 = vsel %vm7753_vm7, %v9069_v52, %v12121_v24  ;;  %v8922_v48 = vcombine.high %v27350_v50, %v27350_v50  ;;  %v12017_v56 = vrot.slane %v22284_v51, %v18559_v11 }
 0x4fd   : > { %v12908_v38 = vsel %vm7753_vm7, %v27349_v5, %v12117_v16  ;;  %v14942_v46 = vcombine.low %v12906_v35, %v12907_v6  ;;  %15981 = vxpose.xlu1.b32.cont [4/16] (narrow) %v14941_v7, 8  ;;  %v14702_v41 = vrot.slane %v14688_v28, %v19822_v43  ;;  %v27351_v19 = vcombine.high %v22278_v17, %v22278_v17  ;;  %v27360_v28 = vld [vmem:[#allocation255_spill] sm:$0xff] }
 0x4fe   : > { %v14943_v10 = vcombine.low %v12908_v38, %v12909_v29  ;;  %v27352_v55 = vcombine.high %v22284_v51, %v22284_v51  ;;  %v27353_v37 = vrot.slane %v22278_v17, %v18559_v11  ;;  %v12883_v32 = vsel %vm7753_vm7, %v27350_v50, %v12017_v56 }
 0x4ff   : > { %v12021_v0 = vrot.slane %v27351_v19, %v18559_v11  ;;  %v14950_v21 = vrot.slane %v14942_v46, %v19822_v43  ;;  %v27356_v52 = vcombine.high %v27355_v36, %v27355_v36  ;;  %v14703_v26 = vcombine.low %v14695_v20, %v14702_v41  ;;  %v27362_v46 = vld [vmem:[#allocation257_spill] sm:$0xff] }
 0x500   : > { %v12025_v13 = vrot.slane %v27352_v55, %v18559_v11  ;;  %v12882_v2 = vsel %vm7753_vm7, %v27354_v44, %v27353_v37  ;;  %v14957_v51 = vrot.slane %v14943_v10, %v19822_v43  ;;  %v27357_v14 = vcombine.high %v27354_v44, %v27354_v44 }
 0x501   : > { %v9066_v23 = vrot.slane %v27356_v52, %v18540_v33  ;;  %v14704_v63 = vcombine.low %v12882_v2, %v12883_v32  ;;  %v9068_v61 = vcombine.high %v27358_v25, %v27358_v25  ;;  %15951 = vxpose.xlu0.b32.cont [6/16] (narrow) %v14703_v26, 8  ;;  %v10926_v40 = vcombine.high %v22412_v45, %v22412_v45  ;;  %v27364_v2 = vld [vmem:[#allocation290_spill] sm:$0xff] }
 0x502   : > { %v12884_v1 = vsel %vm7753_vm7, %v27357_v14, %v12021_v0  ;;  %v12885_v17 = vsel %vm7753_vm7, %v8922_v48, %v12025_v13  ;;  %v14958_v57 = vcombine.low %v14950_v21, %v14957_v51  ;;  %v12125_v24 = vrot.slane %v22396_v18, %v18559_v11 }
 0x503   : > { %v14705_v39 = vcombine.low %v12884_v1, %v12885_v17  ;;  %v9070_v16 = vcombine.high %v9066_v23, %v9066_v23  ;;  %v12129_v60 = vrot.slane %v22412_v45, %v18559_v11  ;;  %v14712_v62 = vrot.slane %v14704_v63, %v19822_v43 }
 0x504   : > { %v27359_v6 = vcombine.high %v22396_v18, %v22396_v18  ;;  %v27361_v20 = vcombine.high %v27360_v28, %v27360_v28  ;;  %15982 = vxpose.xlu1.b32.cont [5/16] (narrow) %v14958_v57, 8  ;;  %v12137_v38 = vrot.slane %v10926_v40, %v18559_v11  ;;  %v12910_v45 = vsel %vm7753_vm7, %v27358_v25, %v12125_v24  ;;  %v27371_v28 = vld [vmem:[#allocation214_spill] sm:$0xff] }
 0x505   : > { %v14719_v35 = vrot.slane %v14705_v39, %v19822_v43  ;;  %v12911_v29 = vsel %vm7753_vm7, %v9066_v23, %v12129_v60  ;;  %v8921_v50 = vcombine.high %v27362_v46, %v27362_v46  ;;  %v10779_v19 = vcombine.high %v22296_v12, %v22296_v12 }
 0x506   : > { %v12133_v7 = vrot.slane %v27359_v6, %v18559_v11  ;;  %v8919_v5 = vrot.slane %v27361_v20, %v18540_v33  ;;  %v14959_v56 = vcombine.low %v12910_v45, %v12911_v29  ;;  %v12913_v10 = vsel %vm7753_vm7, %v9070_v16, %v12137_v38  ;;  %v27372_v45 = vld [vmem:[#allocation142_spill] sm:$0xff] }
 0x507   : > { %v14720_v48 = vcombine.low %v14712_v62, %v14719_v35  ;;  %v12029_v0 = vrot.slane %v22281_v27, %v18559_v11  ;;  %v12033_v55 = vrot.slane %v22296_v12, %v18559_v11  ;;  %v27363_v37 = vcombine.high %v22281_v27, %v22281_v27 }
 0x508   : > { %v12912_v18 = vsel %vm7753_vm7, %v9068_v61, %v12133_v7  ;;  %v8923_v41 = vcombine.high %v8919_v5, %v8919_v5  ;;  %v14967_v21 = vrot.slane %v14959_v56, %v19822_v43  ;;  %v9118_v32 = vcombine.high %v27364_v2, %v27364_v2  ;;  %v27368_v61 = vld [vmem:[#allocation288_spill] sm:$0xff]  ;;  %v27370_v7 = vld [vmem:[#allocation63_spill] sm:$0xff] }
 0x509   : > { %15952 = vxpose.xlu0.b32.cont [7/16] (narrow) %v14720_v48, 8  ;;  %v14960_v13 = vcombine.low %v12912_v18, %v12913_v10  ;;  %v12037_v44 = vrot.slane %v27363_v37, %v18559_v11  ;;  %v12041_v36 = vrot.slane %v10779_v19, %v18559_v11  ;;  %v12886_v52 = vsel %vm7753_vm7, %v27362_v46, %v12029_v0  ;;  %v27377_v0 = vld [vmem:[#allocation287_spill] sm:$0xff] }
 0x50a   : > { %v12887_v23 = vsel %vm7753_vm7, %v8919_v5, %v12033_v55  ;;  %v12145_v12 = vrot.slane %v22506_v49, %v18559_v11  ;;  %v27365_v27 = vcombine.high %v22500_v30, %v22500_v30  ;;  %v27366_v63 = vcombine.high %v22506_v49, %v22506_v49 }
 0x50b   : > { %v14974_v26 = vrot.slane %v14960_v13, %v19822_v43  ;;  %v12888_v51 = vsel %vm7753_vm7, %v8921_v50, %v12037_v44  ;;  %v14721_v14 = vcombine.low %v12886_v52, %v12887_v23  ;;  %v12889_v17 = vsel %vm7753_vm7, %v8923_v41, %v12041_v36  ;;  %v27376_v41 = vld [vmem:[#allocation61_spill] sm:$0xff] }
 0x50c   : > { %v12149_v1 = vrot.slane %v27365_v27, %v18559_v11  ;;  %v12153_v39 = vrot.slane %v27366_v63, %v18559_v11  ;;  %v27367_v25 = vrot.slane %v22500_v30, %v18559_v11  ;;  %v12915_v57 = vsel %vm7753_vm7, %v27364_v2, %v12145_v12  ;;  %v27380_v23 = vld [vmem:[#allocation289_spill] sm:$0xff]  ;;  %v27381_v27 = vld [vmem:[#allocation34_spill] sm:$0xff] }
 0x50d   : > { %v14975_v40 = vcombine.low %v14967_v21, %v14974_v26  ;;  %v14722_v24 = vcombine.low %v12888_v51, %v12889_v17  ;;  %v14729_v60 = vrot.slane %v14721_v14, %v19822_v43  ;;  %v27369_v62 = vcombine.high %v27368_v61, %v27368_v61 }
 0x50e   : > { %v12914_v16 = vsel %vm7753_vm7, %v27368_v61, %v27367_v25  ;;  %v12917_v49 = vsel %vm7753_vm7, %v9118_v32, %v12153_v39  ;;  %v3978_v30 = vcombine.high %v27370_v7, %v27370_v7  ;;  %v7056_v20 = vrot.slane %v27371_v28, %v18559_v11 }
 0x50f   : > { %v12916_v35 = vsel %vm7753_vm7, %v27369_v62, %v12149_v1  ;;  %v14976_v6 = vcombine.low %v12914_v16, %v12915_v57  ;;  %15983 = vxpose.xlu1.b32.cont [6/16] (narrow) %v14975_v40, 8  ;;  %v14736_v5 = vrot.slane %v14722_v24, %v19822_v43  ;;  %v27373_v29 = vcombine.high %v27372_v45, %v27372_v45  ;;  %v27383_v16 = vld [vmem:[#allocation60_spill] sm:$0xff]  ;;  %v27385_v62 = vld [vmem:[#allocation62_spill] sm:$0xff] }
 0x510   : > { %v14977_v38 = vcombine.low %v12916_v35, %v12917_v49  ;;  %v27374_v50 = vcombine.high %v27371_v28, %v27371_v28  ;;  %v27375_v56 = vrot.slane %v27372_v45, %v18559_v11  ;;  %v7899_v19 = vsel %vm7753_vm7, %v27370_v7, %v7056_v20  ;;  %v27386_v20 = vld [vmem:[#allocation215_spill] sm:$0xff] }
 0x511   : > { %v7060_v46 = vrot.slane %v27373_v29, %v18559_v11  ;;  %v14984_v18 = vrot.slane %v14976_v6, %v19822_v43  ;;  %v27378_v55 = vcombine.high %v27377_v0, %v27377_v0  ;;  %v14737_v21 = vcombine.low %v14729_v60, %v14736_v5 }
 0x512   : > { %v7064_v48 = vrot.slane %v27374_v50, %v18559_v11  ;;  %v7898_v10 = vsel %vm7753_vm7, %v27376_v41, %v27375_v56  ;;  %v14991_v37 = vrot.slane %v14977_v38, %v19822_v43  ;;  %v27379_v44 = vcombine.high %v27376_v41, %v27376_v41  ;;  %v27387_v38 = vld [vmem:[#allocation144_spill] sm:$0xff]  ;;  %v27389_v56 = vld [vmem:[#allocation79_spill] sm:$0xff] }
 0x513   : > { %v9115_v13 = vrot.slane %v27378_v55, %v18540_v33  ;;  %v14738_v36 = vcombine.low %v7898_v10, %v7899_v19  ;;  %v9117_v12 = vcombine.high %v27380_v23, %v27380_v23  ;;  %15953 = vxpose.xlu0.b32.cont [8/16] (narrow) %v14737_v21, 8  ;;  %v10975_v14 = vcombine.high %v22518_v8, %v22518_v8  ;;  %v27390_v55 = vld [vmem:[#allocation261_spill] sm:$0xff] }
 0x514   : > { %v7900_v2 = vsel %vm7753_vm7, %v27379_v44, %v7060_v46  ;;  %v7901_v32 = vsel %vm7753_vm7, %v3978_v30, %v7064_v48  ;;  %v14992_v51 = vcombine.low %v14984_v18, %v14991_v37  ;;  %v12157_v1 = vrot.slane %v27381_v27, %v18559_v11 }
 0x515   : > { %v14739_v52 = vcombine.low %v7900_v2, %v7901_v32  ;;  %v9119_v26 = vcombine.high %v9115_v13, %v9115_v13  ;;  %v12161_v17 = vrot.slane %v22518_v8, %v18559_v11  ;;  %v14746_v63 = vrot.slane %v14738_v36, %v19822_v43  ;;  %v27391_v2 = vld [vmem:[#allocation259_spill] sm:$0xff] }
 0x516   : > { %v27382_v25 = vcombine.high %v27381_v27, %v27381_v27  ;;  %v27384_v57 = vcombine.high %v27383_v16, %v27383_v16  ;;  %15984 = vxpose.xlu1.b32.cont [7/16] (narrow) %v14992_v51, 8  ;;  %v12169_v24 = vrot.slane %v10975_v14, %v18559_v11  ;;  %v12918_v8 = vsel %vm7753_vm7, %v27380_v23, %v12157_v1  ;;  %v27395_v51 = vld [vmem:[#allocation77_spill] sm:$0xff] }
 0x517   : > { %v14753_v39 = vrot.slane %v14739_v52, %v19822_v43  ;;  %v12919_v60 = vsel %vm7753_vm7, %v9115_v13, %v12161_v17  ;;  %v3977_v35 = vcombine.high %v27385_v62, %v27385_v62  ;;  %v5835_v5 = vcombine.high %v27386_v20, %v27386_v20 }
 0x518   : > { %v12165_v61 = vrot.slane %v27382_v25, %v18559_v11  ;;  %v3975_v40 = vrot.slane %v27384_v57, %v18540_v33  ;;  %v14993_v7 = vcombine.low %v12918_v8, %v12919_v60  ;;  %v12921_v28 = vsel %vm7753_vm7, %v9119_v26, %v12169_v24  ;;  %v27397_v57 = vld [vmem:[#allocation72_spill] sm:$0xff]  ;;  %v27398_v24 = vld [vmem:[#allocation229_spill] sm:$0xff] }
 0x519   : > { %v14754_v49 = vcombine.low %v14746_v63, %v14753_v39  ;;  %v7068_v45 = vrot.slane %v27387_v38, %v18559_v11  ;;  %v7072_v29 = vrot.slane %v27386_v20, %v18559_v11  ;;  %v27388_v48 = vcombine.high %v27387_v38, %v27387_v38 }
 0x51a   : > { %v12920_v6 = vsel %vm7753_vm7, %v9117_v12, %v12165_v61  ;;  %v3979_v30 = vcombine.high %v3975_v40, %v3975_v40  ;;  %v15001_v50 = vrot.slane %v14993_v7, %v19822_v43  ;;  %v4174_v41 = vcombine.high %v27389_v56, %v27389_v56 }
 0x51b   : > { %15954 = vxpose.xlu0.b32.cont [9/16] (narrow) %v14754_v49, 8  ;;  %v14994_v46 = vcombine.low %v12920_v6, %v12921_v28  ;;  %v7076_v18 = vrot.slane %v27388_v48, %v18559_v11  ;;  %v7080_v10 = vrot.slane %v5835_v5, %v18559_v11  ;;  %v7902_v19 = vsel %vm7753_vm7, %v27385_v62, %v7068_v45  ;;  %v27403_v5 = vld [vmem:[#allocation69_spill] sm:$0xff] }
 0x51c   : > { %v7903_v0 = vsel %vm7753_vm7, %v3975_v40, %v7072_v29  ;;  %v7184_v13 = vrot.slane %v27390_v55, %v18559_v11  ;;  %v27392_v32 = vcombine.high %v27391_v2, %v27391_v2  ;;  %v27393_v23 = vcombine.high %v27390_v55, %v27390_v55  ;;  %v27404_v29 = vld [vmem:[#allocation76_spill] sm:$0xff]  ;;  %v27407_v55 = vld [vmem:[#allocation78_spill] sm:$0xff] }
 0x51d   : > { %v15008_v21 = vrot.slane %v14994_v46, %v19822_v43  ;;  %v7904_v37 = vsel %vm7753_vm7, %v3977_v35, %v7076_v18  ;;  %v14755_v44 = vcombine.low %v7902_v19, %v7903_v0  ;;  %v7905_v52 = vsel %vm7753_vm7, %v3979_v30, %v7080_v10  ;;  %v27399_v35 = vld [vmem:[#allocation227_spill] sm:$0xff] }
 0x51e   : > { %v7188_v36 = vrot.slane %v27392_v32, %v18559_v11  ;;  %v7192_v12 = vrot.slane %v27393_v23, %v18559_v11  ;;  %v27394_v26 = vrot.slane %v27391_v2, %v18559_v11  ;;  %v7931_v27 = vsel %vm7753_vm7, %v27389_v56, %v7184_v13  ;;  %v27409_v32 = vld [vmem:[#allocation260_spill] sm:$0xff] }
 0x51f   : > { %v15009_v1 = vcombine.low %v15001_v50, %v15008_v21  ;;  %v14756_v17 = vcombine.low %v7904_v37, %v7905_v52  ;;  %v14763_v63 = vrot.slane %v14755_v44, %v19822_v43  ;;  %v27396_v39 = vcombine.high %v27395_v51, %v27395_v51  ;;  %v27408_v44 = vld [vmem:[#allocation262_spill] sm:$0xff] }
 0x520   : > { %v7930_v14 = vsel %vm7753_vm7, %v27395_v51, %v27394_v26  ;;  %v7933_v61 = vsel %vm7753_vm7, %v4174_v41, %v7192_v12  ;;  %v4027_v40 = vcombine.high %v27397_v57, %v27397_v57  ;;  %v7088_v8 = vrot.slane %v27398_v24, %v18559_v11 }
 0x521   : > { %v7932_v25 = vsel %vm7753_vm7, %v27396_v39, %v7188_v36  ;;  %v15010_v16 = vcombine.low %v7930_v14, %v7931_v27  ;;  %15985 = vxpose.xlu1.b32.cont [8/16] (narrow) %v15009_v1, 8  ;;  %v14770_v60 = vrot.slane %v14756_v17, %v19822_v43  ;;  %v27400_v49 = vcombine.high %v27399_v35, %v27399_v35  ;;  %v27411_v14 = vld [vmem:[#allocation68_spill] sm:$0xff] }
 0x522   : > { %v15011_v62 = vcombine.low %v7932_v25, %v7933_v61  ;;  %v27401_v7 = vcombine.high %v27398_v24, %v27398_v24  ;;  %v27402_v20 = vrot.slane %v27399_v35, %v18559_v11  ;;  %v7907_v45 = vsel %vm7753_vm7, %v27397_v57, %v7088_v8  ;;  %v27413_v25 = vld [vmem:[#allocation71_spill] sm:$0xff]  ;;  %v27415_v35 = vld [vmem:[#allocation228_spill] sm:$0xff] }
 0x523   : > { %v7092_v6 = vrot.slane %v27400_v49, %v18559_v11  ;;  %v15018_v28 = vrot.slane %v15010_v16, %v19822_v43  ;;  %v27405_v46 = vcombine.high %v27404_v29, %v27404_v29  ;;  %v14771_v48 = vcombine.low %v14763_v63, %v14770_v60  ;;  %v27414_v60 = vld [vmem:[#allocation232_spill] sm:$0xff] }
 0x524   : > { %v7096_v30 = vrot.slane %v27401_v7, %v18559_v11  ;;  %v7906_v38 = vsel %vm7753_vm7, %v27403_v5, %v27402_v20  ;;  %v15025_v18 = vrot.slane %v15011_v62, %v19822_v43  ;;  %v27406_v56 = vcombine.high %v27403_v5, %v27403_v5  ;;  %v27417_v5 = vld [vmem:[#allocation88_spill] sm:$0xff] }
 0x525   : > { %v4171_v50 = vrot.slane %v27405_v46, %v18540_v33  ;;  %v14772_v19 = vcombine.low %v7906_v38, %v7907_v45  ;;  %v4173_v13 = vcombine.high %v27407_v55, %v27407_v55  ;;  %15955 = vxpose.xlu0.b32.cont [10/16] (narrow) %v14771_v48, 8  ;;  %v6031_v2 = vcombine.high %v27408_v44, %v27408_v44 }
 0x526   : > { %v7908_v41 = vsel %vm7753_vm7, %v27406_v56, %v7092_v6  ;;  %v7909_v10 = vsel %vm7753_vm7, %v4027_v40, %v7096_v30  ;;  %v15026_v37 = vcombine.low %v15018_v28, %v15025_v18  ;;  %v7196_v36 = vrot.slane %v27409_v32, %v18559_v11 }
 0x527   : > { %v14773_v0 = vcombine.low %v7908_v41, %v7909_v10  ;;  %v4175_v21 = vcombine.high %v4171_v50, %v4171_v50  ;;  %v7200_v52 = vrot.slane %v27408_v44, %v18559_v11  ;;  %v14780_v23 = vrot.slane %v14772_v19, %v19822_v43  ;;  %v27419_v10 = vld [vmem:[#allocation266_spill] sm:$0xff]  ;;  %v27423_v44 = vld [vmem:[#allocation85_spill] sm:$0xff] }
 0x528   : > { %v27410_v26 = vcombine.high %v27409_v32, %v27409_v32  ;;  %v27412_v27 = vcombine.high %v27411_v14, %v27411_v14  ;;  %15986 = vxpose.xlu1.b32.cont [9/16] (narrow) %v15026_v37, 8  ;;  %v7208_v17 = vrot.slane %v6031_v2, %v18559_v11  ;;  %v7934_v63 = vsel %vm7753_vm7, %v27407_v55, %v7196_v36 }
 0x529   : > { %v14787_v12 = vrot.slane %v14773_v0, %v19822_v43  ;;  %v7935_v39 = vsel %vm7753_vm7, %v4171_v50, %v7200_v52  ;;  %v4026_v61 = vcombine.high %v27413_v25, %v27413_v25  ;;  %v5884_v62 = vcombine.high %v27414_v60, %v27414_v60  ;;  %v27418_v50 = vld [vmem:[#allocation269_spill] sm:$0xff] }
 0x52a   : > { %v7204_v51 = vrot.slane %v27410_v26, %v18559_v11  ;;  %v4024_v1 = vrot.slane %v27412_v27, %v18540_v33  ;;  %v15027_v40 = vcombine.low %v7934_v63, %v7935_v39  ;;  %v7937_v8 = vsel %vm7753_vm7, %v4175_v21, %v7208_v17  ;;  %v27425_v27 = vld [vmem:[#allocation246_spill] sm:$0xff]  ;;  %v27426_v17 = vld [vmem:[#allocation183_spill] sm:$0xff] }
 0x52b   : > { %v14788_v16 = vcombine.low %v14780_v23, %v14787_v12  ;;  %v7100_v49 = vrot.slane %v27415_v35, %v18559_v11  ;;  %v7104_v6 = vrot.slane %v27414_v60, %v18559_v11  ;;  %v27416_v28 = vcombine.high %v27415_v35, %v27415_v35 }
 0x52c   : > { %v7936_v57 = vsel %vm7753_vm7, %v4173_v13, %v7204_v51  ;;  %v4028_v24 = vcombine.high %v4024_v1, %v4024_v1  ;;  %v15035_v30 = vrot.slane %v15027_v40, %v19822_v43  ;;  %v4223_v38 = vcombine.high %v27417_v5, %v27417_v5 }
 0x52d   : > { %15956 = vxpose.xlu0.b32.cont [11/16] (narrow) %v14788_v16, 8  ;;  %v15028_v7 = vcombine.low %v7936_v57, %v7937_v8  ;;  %v7108_v20 = vrot.slane %v27416_v28, %v18559_v11  ;;  %v7112_v45 = vrot.slane %v5884_v62, %v18559_v11  ;;  %v7910_v29 = vsel %vm7753_vm7, %v27413_v25, %v7100_v49  ;;  %v27431_v62 = vld [vmem:[#allocation242_spill] sm:$0xff] }
 0x52e   : > { %v7911_v46 = vsel %vm7753_vm7, %v4024_v1, %v7104_v6  ;;  %v7216_v48 = vrot.slane %v27418_v50, %v18559_v11  ;;  %v27420_v19 = vcombine.high %v27419_v10, %v27419_v10  ;;  %v27421_v13 = vcombine.high %v27418_v50, %v27418_v50  ;;  %v27432_v6 = vld [vmem:[#allocation84_spill] sm:$0xff]  ;;  %v27435_v50 = vld [vmem:[#allocation87_spill] sm:$0xff] }
 0x52f   : > { %v15042_v18 = vrot.slane %v15028_v7, %v19822_v43  ;;  %v7912_v56 = vsel %vm7753_vm7, %v4026_v61, %v7108_v20  ;;  %v14789_v41 = vcombine.low %v7910_v29, %v7911_v46  ;;  %v7913_v55 = vsel %vm7753_vm7, %v4028_v24, %v7112_v45  ;;  %v27427_v61 = vld [vmem:[#allocation168_spill] sm:$0xff] }
 0x530   : > { %v7220_v0 = vrot.slane %v27420_v19, %v18559_v11  ;;  %v7224_v21 = vrot.slane %v27421_v13, %v18559_v11  ;;  %v27422_v37 = vrot.slane %v27419_v10, %v18559_v11  ;;  %v7939_v32 = vsel %vm7753_vm7, %v27417_v5, %v7216_v48  ;;  %v27437_v19 = vld [vmem:[#allocation268_spill] sm:$0xff] }
 0x531   : > { %v15043_v36 = vcombine.low %v15035_v30, %v15042_v18  ;;  %v14790_v52 = vcombine.low %v7912_v56, %v7913_v55  ;;  %v14797_v23 = vrot.slane %v14789_v41, %v19822_v43  ;;  %v27424_v12 = vcombine.high %v27423_v44, %v27423_v44  ;;  %v27436_v41 = vld [vmem:[#allocation270_spill] sm:$0xff] }
 0x532   : > { %v7938_v2 = vsel %vm7753_vm7, %v27423_v44, %v27422_v37  ;;  %v7941_v51 = vsel %vm7753_vm7, %v4223_v38, %v7224_v21  ;;  %v8971_v1 = vcombine.high %v27425_v27, %v27425_v27  ;;  %v12049_v63 = vrot.slane %v27426_v17, %v18559_v11 }
 0x533   : > { %v7940_v26 = vsel %vm7753_vm7, %v27424_v12, %v7220_v0  ;;  %v15044_v14 = vcombine.low %v7938_v2, %v7939_v32  ;;  %15987 = vxpose.xlu1.b32.cont [10/16] (narrow) %v15043_v36, 8  ;;  %v14804_v39 = vrot.slane %v14790_v52, %v19822_v43  ;;  %v27428_v16 = vcombine.high %v27427_v61, %v27427_v61  ;;  %v27439_v2 = vld [vmem:[#allocation241_spill] sm:$0xff] }
 0x534   : > { %v15045_v25 = vcombine.low %v7940_v26, %v7941_v51  ;;  %v27429_v40 = vcombine.high %v27426_v17, %v27426_v17  ;;  %v27430_v60 = vrot.slane %v27427_v61, %v18559_v11  ;;  %v12891_v49 = vsel %vm7753_vm7, %v27425_v27, %v12049_v63  ;;  %v27441_v26 = vld [vmem:[#allocation245_spill] sm:$0xff] }
 0x535   : > { %v12053_v57 = vrot.slane %v27428_v16, %v18559_v11  ;;  %v15052_v8 = vrot.slane %v15044_v14, %v19822_v43  ;;  %v27433_v7 = vcombine.high %v27432_v6, %v27432_v6  ;;  %v14805_v28 = vcombine.low %v14797_v23, %v14804_v39  ;;  %v27442_v39 = vld [vmem:[#allocation387_spill] sm:$0xff]  ;;  %v27443_v61 = vld [vmem:[#allocation185_spill] sm:$0xff] }
 0x536   : > { %v12057_v24 = vrot.slane %v27429_v40, %v18559_v11  ;;  %v12890_v35 = vsel %vm7753_vm7, %v27431_v62, %v27430_v60  ;;  %v15059_v20 = vrot.slane %v15045_v25, %v19822_v43  ;;  %v27434_v5 = vcombine.high %v27431_v62, %v27431_v62  ;;  %v27445_v62 = vld [vmem:[#allocation278_spill] sm:$0xff] }
 0x537   : > { %v4220_v30 = vrot.slane %v27433_v7, %v18540_v33  ;;  %v14806_v29 = vcombine.low %v12890_v35, %v12891_v49  ;;  %v4222_v48 = vcombine.high %v27435_v50, %v27435_v50  ;;  %15957 = vxpose.xlu0.b32.cont [12/16] (narrow) %v14805_v28, 8  ;;  %v6080_v10 = vcombine.high %v27436_v41, %v27436_v41 }
 0x538   : > { %v12892_v38 = vsel %vm7753_vm7, %v27434_v5, %v12053_v57  ;;  %v12893_v45 = vsel %vm7753_vm7, %v8971_v1, %v12057_v24  ;;  %v15060_v56 = vcombine.low %v15052_v8, %v15059_v20  ;;  %v7228_v0 = vrot.slane %v27437_v19, %v18559_v11 }
 0x539   : > { %v14807_v46 = vcombine.low %v12892_v38, %v12893_v45  ;;  %v4224_v18 = vcombine.high %v4220_v30, %v4220_v30  ;;  %v7232_v55 = vrot.slane %v27436_v41, %v18559_v11  ;;  %v14814_v13 = vrot.slane %v14806_v29, %v19822_v43  ;;  %v27447_v45 = vld [vmem:[#allocation195_spill] sm:$0xff]  ;;  %v27451_v41 = vld [vmem:[#allocation276_spill] sm:$0xff] }
 0x53a   : > { %v27438_v37 = vcombine.high %v27437_v19, %v27437_v19  ;;  %v27440_v32 = vcombine.high %v27439_v2, %v27439_v2  ;;  %15988 = vxpose.xlu1.b32.cont [11/16] (narrow) %v15060_v56, 8  ;;  %v7240_v52 = vrot.slane %v6080_v10, %v18559_v11  ;;  %v7942_v23 = vsel %vm7753_vm7, %v27435_v50, %v7228_v0 }
 0x53b   : > { %v14821_v21 = vrot.slane %v14807_v46, %v19822_v43  ;;  %v7943_v12 = vsel %vm7753_vm7, %v4220_v30, %v7232_v55  ;;  %v8970_v51 = vcombine.high %v27441_v26, %v27441_v26  ;;  %v10828_v25 = vcombine.high %v27442_v39, %v27442_v39  ;;  %v27446_v30 = vld [vmem:[#allocation41_spill] sm:$0xff] }
 0x53c   : > { %v7236_v44 = vrot.slane %v27438_v37, %v18559_v11  ;;  %v8968_v36 = vrot.slane %v27440_v32, %v18540_v33  ;;  %v15061_v1 = vcombine.low %v7942_v23, %v7943_v12  ;;  %v7945_v63 = vsel %vm7753_vm7, %v4224_v18, %v7240_v52  ;;  %v27453_v32 = vld [vmem:[#allocation254_spill] sm:$0xff]  ;;  %v27454_v52 = vld [vmem:[#allocation184_spill] sm:$0xff] }
 0x53d   : > { %v14822_v14 = vcombine.low %v14814_v13, %v14821_v21  ;;  %v12061_v16 = vrot.slane %v27443_v61, %v18559_v11  ;;  %v12065_v57 = vrot.slane %v27442_v39, %v18559_v11  ;;  %v27444_v8 = vcombine.high %v27443_v61, %v27443_v61 }
 0x53e   : > { %v7944_v27 = vsel %vm7753_vm7, %v4222_v48, %v7236_v44  ;;  %v8972_v17 = vcombine.high %v8968_v36, %v8968_v36  ;;  %v15069_v24 = vrot.slane %v15061_v1, %v19822_v43  ;;  %v9167_v35 = vcombine.high %v27445_v62, %v27445_v62 }
 0x53f   : > { %15958 = vxpose.xlu0.b32.cont [13/16] (narrow) %v14822_v14, 8  ;;  %v15062_v40 = vcombine.low %v7944_v27, %v7945_v63  ;;  %v12069_v60 = vrot.slane %v27444_v8, %v18559_v11  ;;  %v12073_v49 = vrot.slane %v10828_v25, %v18559_v11  ;;  %v12894_v6 = vsel %vm7753_vm7, %v27441_v26, %v12061_v16  ;;  %v27459_v25 = vld [vmem:[#allocation252_spill] sm:$0xff] }
 0x540   : > { %v12895_v7 = vsel %vm7753_vm7, %v8968_v36, %v12065_v57  ;;  %v12177_v28 = vrot.slane %v27446_v30, %v18559_v11  ;;  %v27448_v29 = vcombine.high %v27447_v45, %v27447_v45  ;;  %v27449_v48 = vcombine.high %v27446_v30, %v27446_v30  ;;  %v27460_v57 = vld [vmem:[#allocation274_spill] sm:$0xff]  ;;  %v27463_v30 = vld [vmem:[#allocation277_spill] sm:$0xff] }
 0x541   : > { %v15076_v20 = vrot.slane %v15062_v40, %v19822_v43  ;;  %v12896_v5 = vsel %vm7753_vm7, %v8970_v51, %v12069_v60  ;;  %v14823_v38 = vcombine.low %v12894_v6, %v12895_v7  ;;  %v12897_v50 = vsel %vm7753_vm7, %v8972_v17, %v12073_v49  ;;  %v27455_v51 = vld [vmem:[#allocation191_spill] sm:$0xff] }
 0x542   : > { %v12181_v46 = vrot.slane %v27448_v29, %v18559_v11  ;;  %v12185_v18 = vrot.slane %v27449_v48, %v18559_v11  ;;  %v27450_v56 = vrot.slane %v27447_v45, %v18559_v11  ;;  %v12923_v19 = vsel %vm7753_vm7, %v27445_v62, %v12177_v28  ;;  %v27465_v29 = vld [vmem:[#allocation98_spill] sm:$0xff] }
 0x543   : > { %v15077_v0 = vcombine.low %v15069_v24, %v15076_v20  ;;  %v14824_v55 = vcombine.low %v12896_v5, %v12897_v50  ;;  %v14831_v13 = vrot.slane %v14823_v38, %v19822_v43  ;;  %v27452_v21 = vcombine.high %v27451_v41, %v27451_v41  ;;  %v27464_v38 = vld [vmem:[#allocation95_spill] sm:$0xff] }
 0x544   : > { %v12922_v10 = vsel %vm7753_vm7, %v27451_v41, %v27450_v56  ;;  %v12925_v44 = vsel %vm7753_vm7, %v9167_v35, %v12185_v18  ;;  %v9020_v36 = vcombine.high %v27453_v32, %v27453_v32  ;;  %v12081_v23 = vrot.slane %v27454_v52, %v18559_v11 }
 0x545   : > { %v12924_v37 = vsel %vm7753_vm7, %v27452_v21, %v12181_v46  ;;  %v15078_v2 = vcombine.low %v12922_v10, %v12923_v19  ;;  %15989 = vxpose.xlu1.b32.cont [12/16] (narrow) %v15077_v0, 8  ;;  %v14838_v12 = vrot.slane %v14824_v55, %v19822_v43  ;;  %v27456_v14 = vcombine.high %v27455_v51, %v27455_v51  ;;  %v27467_v10 = vld [vmem:[#allocation249_spill] sm:$0xff] }
 0x546   : > { %v15079_v26 = vcombine.low %v12924_v37, %v12925_v44  ;;  %v27457_v1 = vcombine.high %v27454_v52, %v27454_v52  ;;  %v27458_v39 = vrot.slane %v27455_v51, %v18559_v11  ;;  %v12899_v16 = vsel %vm7753_vm7, %v27453_v32, %v12081_v23  ;;  %v27469_v37 = vld [vmem:[#allocation253_spill] sm:$0xff]  ;;  %v27471_v51 = vld [vmem:[#allocation182_spill] sm:$0xff] }
 0x547   : > { %v12085_v27 = vrot.slane %v27456_v14, %v18559_v11  ;;  %v15086_v63 = vrot.slane %v15078_v2, %v19822_v43  ;;  %v27461_v40 = vcombine.high %v27460_v57, %v27460_v57  ;;  %v14839_v8 = vcombine.low %v14831_v13, %v14838_v12  ;;  %v27470_v12 = vld [vmem:[#allocation388_spill] sm:$0xff] }
 0x548   : > { %v12089_v17 = vrot.slane %v27457_v1, %v18559_v11  ;;  %v12898_v61 = vsel %vm7753_vm7, %v27459_v25, %v27458_v39  ;;  %v15093_v60 = vrot.slane %v15079_v26, %v19822_v43  ;;  %v27462_v62 = vcombine.high %v27459_v25, %v27459_v25  ;;  %v27473_v25 = vld [vmem:[#allocation286_spill] sm:$0xff] }
 0x549   : > { %v9164_v24 = vrot.slane %v27461_v40, %v18540_v33  ;;  %v14840_v6 = vcombine.low %v12898_v61, %v12899_v16  ;;  %v9166_v28 = vcombine.high %v27463_v30, %v27463_v30  ;;  %15959 = vxpose.xlu0.b32.cont [14/16] (narrow) %v14839_v8, 8  ;;  %v11024_v45 = vcombine.high %v27464_v38, %v27464_v38 }
 0x54a   : > { %v12900_v35 = vsel %vm7753_vm7, %v27462_v62, %v12085_v27  ;;  %v12901_v49 = vsel %vm7753_vm7, %v9020_v36, %v12089_v17  ;;  %v15094_v5 = vcombine.low %v15086_v63, %v15093_v60  ;;  %v12189_v46 = vrot.slane %v27465_v29, %v18559_v11 }
 0x54b   : > { %v14841_v7 = vcombine.low %v12900_v35, %v12901_v49  ;;  %v9168_v20 = vcombine.high %v9164_v24, %v9164_v24  ;;  %v12193_v50 = vrot.slane %v27464_v38, %v18559_v11  ;;  %v14848_v48 = vrot.slane %v14840_v6, %v19822_v43  ;;  %v27475_v49 = vld [vmem:[#allocation92_spill] sm:$0xff] }
 0x54c   : > { %v27466_v56 = vcombine.high %v27465_v29, %v27465_v29  ;;  %v27468_v19 = vcombine.high %v27467_v10, %v27467_v10  ;;  %15990 = vxpose.xlu1.b32.cont [13/16] (narrow) %v15094_v5, 8  ;;  %v12201_v55 = vrot.slane %v11024_v45, %v18559_v11  ;;  %v12926_v13 = vsel %vm7753_vm7, %v27463_v30, %v12189_v46  ;;  %v27479_v38 = vld [vmem:[#allocation284_spill] sm:$0xff] }
 0x54d   : > { %v14855_v18 = vrot.slane %v14841_v7, %v19822_v43  ;;  %v12927_v21 = vsel %vm7753_vm7, %v9164_v24, %v12193_v50  ;;  %v9019_v44 = vcombine.high %v27469_v37, %v27469_v37  ;;  %v10877_v26 = vcombine.high %v27470_v12, %v27470_v12  ;;  %v27474_v24 = vld [vmem:[#allocation193_spill] sm:$0xff] }
 0x54e   : > { %v12197_v41 = vrot.slane %v27466_v56, %v18559_v11  ;;  %v9017_v0 = vrot.slane %v27468_v19, %v18540_v33  ;;  %v15095_v36 = vcombine.low %v12926_v13, %v12927_v21  ;;  %v12929_v23 = vsel %vm7753_vm7, %v9168_v20, %v12201_v55  ;;  %v27481_v19 = vld [vmem:[#allocation110_spill] sm:$0xff]  ;;  %v27482_v55 = vld [vmem:[#allocation301_spill] sm:$0xff] }
 0x54f   : > { %v14856_v2 = vcombine.low %v14848_v48, %v14855_v18  ;;  %v12093_v14 = vrot.slane %v27471_v51, %v18559_v11  ;;  %v12097_v27 = vrot.slane %v27470_v12, %v18559_v11  ;;  %v27472_v63 = vcombine.high %v27471_v51, %v27471_v51 }
 0x550   : > { %v12928_v32 = vsel %vm7753_vm7, %v9166_v28, %v12197_v41  ;;  %v9021_v52 = vcombine.high %v9017_v0, %v9017_v0  ;;  %v15103_v17 = vrot.slane %v15095_v36, %v19822_v43  ;;  %v9216_v61 = vcombine.high %v27473_v25, %v27473_v25 }
 0x551   : > { %15960 = vxpose.xlu0.b32.cont [15/16] (narrow) %v14856_v2, 8  ;;  %v15096_v1 = vcombine.low %v12928_v32, %v12929_v23  ;;  %v12101_v39 = vrot.slane %v27472_v63, %v18559_v11  ;;  %v12105_v16 = vrot.slane %v10877_v26, %v18559_v11  ;;  %v12902_v57 = vsel %vm7753_vm7, %v27469_v37, %v12093_v14  ;;  %v27487_v26 = vld [vmem:[#allocation108_spill] sm:$0xff] }
 0x552   : > { %v12903_v40 = vsel %vm7753_vm7, %v9017_v0, %v12097_v27  ;;  %v12209_v8 = vrot.slane %v27474_v24, %v18559_v11  ;;  %v27476_v6 = vcombine.high %v27475_v49, %v27475_v49  ;;  %v27477_v28 = vcombine.high %v27474_v24, %v27474_v24  ;;  %v27488_v27 = vld [vmem:[#allocation283_spill] sm:$0xff]  ;;  %v27491_v24 = vld [vmem:[#allocation285_spill] sm:$0xff] }
 0x553   : > { %v15110_v60 = vrot.slane %v15096_v1, %v19822_v43  ;;  %v12904_v62 = vsel %vm7753_vm7, %v9019_v44, %v12101_v39  ;;  %v14857_v35 = vcombine.low %v12902_v57, %v12903_v40  ;;  %v12905_v30 = vsel %vm7753_vm7, %v9021_v52, %v12105_v16  ;;  %v27483_v44 = vld [vmem:[#allocation299_spill] sm:$0xff] }
 0x554   : > { %v12213_v7 = vrot.slane %v27476_v6, %v18559_v11  ;;  %v12217_v20 = vrot.slane %v27477_v28, %v18559_v11  ;;  %v27478_v5 = vrot.slane %v27475_v49, %v18559_v11  ;;  %v12931_v29 = vsel %vm7753_vm7, %v27473_v25, %v12209_v8  ;;  %v27492_v6 = vld [vmem:[#allocation194_spill] sm:$0xff] }
 0x555   : > { %v15111_v46 = vcombine.low %v15103_v17, %v15110_v60  ;;  %v14858_v50 = vcombine.low %v12904_v62, %v12905_v30  ;;  %v14865_v48 = vrot.slane %v14857_v35, %v19822_v43  ;;  %v27480_v18 = vcombine.high %v27479_v38, %v27479_v38  ;;  %v15866_v62 = vpop.trf.xlu1  ;;  %v15834_v35 = vpop.trf.xlu0  ;;  %v27493_v30 = vld [vmem:[#allocation35_spill] sm:$0xff] }
 0x556   : > { %v12930_v45 = vsel %vm7753_vm7, %v27479_v38, %v27478_v5  ;;  %v12933_v41 = vsel %vm7753_vm7, %v9216_v61, %v12217_v20  ;;  %v4272_v0 = vcombine.high %v27481_v19, %v27481_v19  ;;  %v7248_v13 = vrot.slane %v27482_v55, %v18559_v11  ;;  %16075 = vst [vmem:[%s24745_s9 + $0x8] sm:$0xff] %v15866_v62 }
 0x557   : > { %v12932_v56 = vsel %vm7753_vm7, %v27480_v18, %v12213_v7  ;;  %v15112_v10 = vcombine.low %v12930_v45, %v12931_v29  ;;  %15991 = vxpose.xlu1.b32.cont [14/16] (narrow) %v15111_v46, 8  ;;  %v14872_v21 = vrot.slane %v14858_v50, %v19822_v43  ;;  %v27484_v2 = vcombine.high %v27483_v44, %v27483_v44  ;;  %v27495_v46 = vld [vmem:[#allocation105_spill] sm:$0xff] }
 0x558   : > { %v15113_v37 = vcombine.low %v12932_v56, %v12933_v41  ;;  %v27485_v36 = vcombine.high %v27482_v55, %v27482_v55  ;;  %v27486_v12 = vrot.slane %v27483_v44, %v18559_v11  ;;  %v7947_v14 = vsel %vm7753_vm7, %v27481_v19, %v7248_v13  ;;  %16074 = vst [vmem:[%s24745_s9] sm:$0xff] %v15834_v35 }
 0x559   : > { %v7252_v32 = vrot.slane %v27484_v2, %v18559_v11  ;;  %v15120_v23 = vrot.slane %v15112_v10, %v19822_v43  ;;  %v27489_v1 = vcombine.high %v27488_v27, %v27488_v27  ;;  %v14873_v63 = vcombine.low %v14865_v48, %v14872_v21  ;;  %v27497_v10 = vld [vmem:[#allocation109_spill] sm:$0xff]  ;;  %v15898_v44 = vpop.trf.xlu0 }
 0x55a   : > { %v7256_v52 = vrot.slane %v27485_v36, %v18559_v11  ;;  %v7946_v51 = vsel %vm7753_vm7, %v27487_v26, %v27486_v12  ;;  %v15127_v39 = vrot.slane %v15113_v37, %v19822_v43  ;;  %v27490_v25 = vcombine.high %v27487_v26, %v27487_v26  ;;  %v15930_v37 = vpop.trf.xlu1  ;;  %16076 = vst [vmem:[%s24745_s9 + $0x10] sm:$0xff] %v15898_v44 }
 0x55b   : > { %v9213_v17 = vrot.slane %v27489_v1, %v18540_v33  ;;  %v15146_v57 = vcombine.low %v7946_v51, %v7947_v14  ;;  %v9215_v8 = vcombine.high %v27491_v24, %v27491_v24  ;;  %15961 = vxpose.xlu0.b32.end [16/16] (narrow) %v14873_v63, 8  ;;  %v11073_v7 = vcombine.high %v27492_v6, %v27492_v6  ;;  %v27501_v1 = vld [vmem:[#allocation140_spill] sm:$0xff] }
 0x55c   : > { %v7948_v61 = vsel %vm7753_vm7, %v27490_v25, %v7252_v32  ;;  %v7949_v16 = vsel %vm7753_vm7, %v4272_v0, %v7256_v52  ;;  %v15128_v49 = vcombine.low %v15120_v23, %v15127_v39  ;;  %v12221_v28 = vrot.slane %v27493_v30, %v18559_v11  ;;  %v27498_v32 = vld [vmem:[#allocation303_spill] sm:$0xff]  ;;  %v27499_v52 = vld [vmem:[#allocation300_spill] sm:$0xff]  ;;  %16077 = vst [vmem:[%s24745_s9 + $0x18] sm:$0xff] %v15930_v37 }
 0x55d   : > { %v15147_v40 = vcombine.low %v7948_v61, %v7949_v16  ;;  %v9217_v60 = vcombine.high %v9213_v17, %v9213_v17  ;;  %v12225_v20 = vrot.slane %v27492_v6, %v18559_v11  ;;  %v15154_v5 = vrot.slane %v15146_v57, %v19822_v43  ;;  %v27502_v61 = vld [vmem:[#allocation330_spill] sm:$0xff] }
 0x55e   : > { %v27494_v45 = vcombine.high %v27493_v30, %v27493_v30  ;;  %v27496_v50 = vcombine.high %v27495_v46, %v27495_v46  ;;  %15992 = vxpose.xlu1.b32.cont [15/16] (narrow) %v15128_v49, 8  ;;  %v12233_v18 = vrot.slane %v11073_v7, %v18559_v11  ;;  %v12934_v56 = vsel %vm7753_vm7, %v27491_v24, %v12221_v28  ;;  %v27507_v30 = vld [vmem:[#allocation138_spill] sm:$0xff] }
 0x55f   : > { %v15161_v38 = vrot.slane %v15147_v40, %v19822_v43  ;;  %v12935_v41 = vsel %vm7753_vm7, %v9213_v17, %v12225_v20  ;;  %v4271_v19 = vcombine.high %v27497_v10, %v27497_v10  ;;  %v6129_v36 = vcombine.high %v27498_v32, %v27498_v32 }
 0x560   : > { %v12229_v29 = vrot.slane %v27494_v45, %v18559_v11  ;;  %v4269_v48 = vrot.slane %v27496_v50, %v18540_v33  ;;  %v15129_v13 = vcombine.low %v12934_v56, %v12935_v41  ;;  %v12937_v2 = vsel %vm7753_vm7, %v9217_v60, %v12233_v18  ;;  %v27509_v18 = vld [vmem:[#allocation120_spill] sm:$0xff]  ;;  %v27510_v41 = vld [vmem:[#allocation317_spill] sm:$0xff] }
 0x561   : > { %v15162_v0 = vcombine.low %v15154_v5, %v15161_v38  ;;  %v7260_v23 = vrot.slane %v27499_v52, %v18559_v11  ;;  %v7264_v12 = vrot.slane %v27498_v32, %v18559_v11  ;;  %v27500_v14 = vcombine.high %v27499_v52, %v27499_v52 }
 0x562   : > { %v12936_v55 = vsel %vm7753_vm7, %v9215_v8, %v12229_v29  ;;  %v4273_v21 = vcombine.high %v4269_v48, %v4269_v48  ;;  %v15137_v51 = vrot.slane %v15129_v13, %v19822_v43  ;;  %v4468_v17 = vcombine.high %v27501_v1, %v27501_v1  ;;  %v27503_v8 = vld [vmem:[#allocation327_spill] sm:$0xff] }
 0x563   : > { %16010 = vxpose.xlu0.b32.start [1/16] (narrow) %v15162_v0, 8  ;;  %v15130_v26 = vcombine.low %v12936_v55, %v12937_v2  ;;  %v7268_v27 = vrot.slane %v27500_v14, %v18559_v11  ;;  %v7272_v63 = vrot.slane %v6129_v36, %v18559_v11  ;;  %v7950_v39 = vsel %vm7753_vm7, %v27497_v10, %v7260_v23  ;;  %v27511_v55 = vld [vmem:[#allocation315_spill] sm:$0xff]  ;;  %v27515_v36 = vld [vmem:[#allocation118_spill] sm:$0xff] }
 0x564   : > { %v7951_v25 = vsel %vm7753_vm7, %v4269_v48, %v7264_v12  ;;  %v7376_v16 = vrot.slane %v27502_v61, %v18559_v11  ;;  %v27504_v60 = vcombine.high %v27503_v8, %v27503_v8  ;;  %v27505_v49 = vcombine.high %v27502_v61, %v27502_v61  ;;  %v27516_v12 = vld [vmem:[#allocation137_spill] sm:$0xff]  ;;  %v27519_v61 = vld [vmem:[#allocation139_spill] sm:$0xff] }
 0x565   : > { %v15144_v57 = vrot.slane %v15130_v26, %v19822_v43  ;;  %v7952_v40 = vsel %vm7753_vm7, %v4271_v19, %v7268_v27  ;;  %v15163_v24 = vcombine.low %v7950_v39, %v7951_v25  ;;  %v7953_v35 = vsel %vm7753_vm7, %v4273_v21, %v7272_v63 }
 0x566   : > { %v7380_v62 = vrot.slane %v27504_v60, %v18559_v11  ;;  %v7384_v6 = vrot.slane %v27505_v49, %v18559_v11  ;;  %v27506_v7 = vrot.slane %v27503_v8, %v18559_v11  ;;  %v7979_v20 = vsel %vm7753_vm7, %v27501_v1, %v7376_v16  ;;  %v27521_v60 = vld [vmem:[#allocation329_spill] sm:$0xff] }
 0x567   : > { %v15145_v5 = vcombine.low %v15137_v51, %v15144_v57  ;;  %v15164_v38 = vcombine.low %v7952_v40, %v7953_v35  ;;  %v15171_v45 = vrot.slane %v15163_v24, %v19822_v43  ;;  %v27508_v29 = vcombine.high %v27507_v30, %v27507_v30  ;;  %v27520_v24 = vld [vmem:[#allocation333_spill] sm:$0xff] }
 0x568   : > { %v7978_v28 = vsel %vm7753_vm7, %v27507_v30, %v27506_v7  ;;  %v7981_v50 = vsel %vm7753_vm7, %v4468_v17, %v7384_v6  ;;  %v4321_v56 = vcombine.high %v27509_v18, %v27509_v18  ;;  %v7280_v10 = vrot.slane %v27510_v41, %v18559_v11 }
 0x569   : > { %v7980_v46 = vsel %vm7753_vm7, %v27508_v29, %v7380_v62  ;;  %v15418_v48 = vcombine.low %v7978_v28, %v7979_v20  ;;  %15993 = vxpose.xlu1.b32.end [16/16] (narrow) %v15145_v5, 8  ;;  %v15178_v19 = vrot.slane %v15164_v38, %v19822_v43  ;;  %v27512_v13 = vcombine.high %v27511_v55, %v27511_v55  ;;  %v27523_v28 = vld [vmem:[#allocation114_spill] sm:$0xff] }
 0x56a   : > { %v15419_v0 = vcombine.low %v7980_v46, %v7981_v50  ;;  %v27513_v37 = vcombine.high %v27510_v41, %v27510_v41  ;;  %v27514_v32 = vrot.slane %v27511_v55, %v18559_v11  ;;  %v7955_v23 = vsel %vm7753_vm7, %v27509_v18, %v7280_v10  ;;  %v27525_v46 = vld [vmem:[#allocation119_spill] sm:$0xff]  ;;  %v27527_v55 = vld [vmem:[#allocation316_spill] sm:$0xff] }
 0x56b   : > { %v7284_v21 = vrot.slane %v27512_v13, %v18559_v11  ;;  %v15426_v2 = vrot.slane %v15418_v48, %v19822_v43  ;;  %v27517_v26 = vcombine.high %v27516_v12, %v27516_v12  ;;  %v15179_v14 = vcombine.low %v15171_v45, %v15178_v19  ;;  %v27526_v19 = vld [vmem:[#allocation318_spill] sm:$0xff] }
 0x56c   : > { %v7288_v44 = vrot.slane %v27513_v37, %v18559_v11  ;;  %v7954_v52 = vsel %vm7753_vm7, %v27515_v36, %v27514_v32  ;;  %v15433_v27 = vrot.slane %v15419_v0, %v19822_v43  ;;  %v27518_v1 = vcombine.high %v27515_v36, %v27515_v36  ;;  %v27529_v36 = vld [vmem:[#allocation151_spill] sm:$0xff] }
 0x56d   : > { %v4465_v51 = vrot.slane %v27517_v26, %v18540_v33  ;;  %v15180_v39 = vcombine.low %v7954_v52, %v7955_v23  ;;  %v4467_v16 = vcombine.high %v27519_v61, %v27519_v61  ;;  %16011 = vxpose.xlu0.b32.cont [2/16] (narrow) %v15179_v14, 8  ;;  %v6325_v8 = vcombine.high %v27520_v24, %v27520_v24 }
 0x56e   : > { %v7956_v17 = vsel %vm7753_vm7, %v27518_v1, %v7284_v21  ;;  %v7957_v63 = vsel %vm7753_vm7, %v4321_v56, %v7288_v44  ;;  %v15434_v40 = vcombine.low %v15426_v2, %v15433_v27  ;;  %v7388_v62 = vrot.slane %v27521_v60, %v18559_v11 }
 0x56f   : > { %v15181_v25 = vcombine.low %v7956_v17, %v7957_v63  ;;  %v4469_v57 = vcombine.high %v4465_v51, %v4465_v51  ;;  %v7392_v35 = vrot.slane %v27520_v24, %v18559_v11  ;;  %v15188_v49 = vrot.slane %v15180_v39, %v19822_v43  ;;  %v27531_v63 = vld [vmem:[#allocation335_spill] sm:$0xff]  ;;  %v27535_v24 = vld [vmem:[#allocation149_spill] sm:$0xff] }
 0x570   : > { %v27522_v7 = vcombine.high %v27521_v60, %v27521_v60  ;;  %v27524_v20 = vcombine.high %v27523_v28, %v27523_v28  ;;  %16042 = vxpose.xlu1.b32.start [1/16] (narrow) %v15434_v40, 8  ;;  %v7400_v38 = vrot.slane %v6325_v8, %v18559_v11  ;;  %v7982_v45 = vsel %vm7753_vm7, %v27519_v61, %v7388_v62 }
 0x571   : > { %v15195_v6 = vrot.slane %v15181_v25, %v19822_v43  ;;  %v7983_v29 = vsel %vm7753_vm7, %v4465_v51, %v7392_v35  ;;  %v4320_v50 = vcombine.high %v27525_v46, %v27525_v46  ;;  %v6178_v0 = vcombine.high %v27526_v19, %v27526_v19  ;;  %v27530_v51 = vld [vmem:[#allocation337_spill] sm:$0xff] }
 0x572   : > { %v7396_v30 = vrot.slane %v27522_v7, %v18559_v11  ;;  %v4318_v5 = vrot.slane %v27524_v20, %v18540_v33  ;;  %v15435_v56 = vcombine.low %v7982_v45, %v7983_v29  ;;  %v7985_v10 = vsel %vm7753_vm7, %v4469_v57, %v7400_v38  ;;  %v27537_v20 = vld [vmem:[#allocation306_spill] sm:$0xff] }
 0x573   : > { %v15196_v48 = vcombine.low %v15188_v49, %v15195_v6  ;;  %v7292_v13 = vrot.slane %v27527_v55, %v18559_v11  ;;  %v7296_v21 = vrot.slane %v27526_v19, %v18559_v11  ;;  %v27528_v2 = vcombine.high %v27527_v55, %v27527_v55  ;;  %v27542_v19 = vld [vmem:[#allocation304_spill] sm:$0xff] }
 0x574   : > { %v7984_v18 = vsel %vm7753_vm7, %v4467_v16, %v7396_v30  ;;  %v4322_v41 = vcombine.high %v4318_v5, %v4318_v5  ;;  %v15443_v44 = vrot.slane %v15435_v56, %v19822_v43  ;;  %v4517_v52 = vcombine.high %v27529_v36, %v27529_v36 }
 0x575   : > { %16012 = vxpose.xlu0.b32.cont [3/16] (narrow) %v15196_v48, 8  ;;  %v15436_v37 = vcombine.low %v7984_v18, %v7985_v10  ;;  %v7300_v32 = vrot.slane %v27528_v2, %v18559_v11  ;;  %v7304_v23 = vrot.slane %v6178_v0, %v18559_v11  ;;  %v7958_v12 = vsel %vm7753_vm7, %v27525_v46, %v7292_v13  ;;  %v27538_v46 = vld [vmem:[#allocation122_spill] sm:$0xff]  ;;  %v27543_v13 = vld [vmem:[#allocation148_spill] sm:$0xff] }
 0x576   : > { %v7959_v26 = vsel %vm7753_vm7, %v4318_v5, %v7296_v21  ;;  %v7408_v14 = vrot.slane %v27530_v51, %v18559_v11  ;;  %v27532_v39 = vcombine.high %v27531_v63, %v27531_v63  ;;  %v27533_v16 = vcombine.high %v27530_v51, %v27530_v51 }
 0x577   : > { %v15450_v27 = vrot.slane %v15436_v37, %v19822_v43  ;;  %v7960_v1 = vsel %vm7753_vm7, %v4320_v50, %v7300_v32  ;;  %v15197_v17 = vcombine.low %v7958_v12, %v7959_v26  ;;  %v7961_v61 = vsel %vm7753_vm7, %v4322_v41, %v7304_v23  ;;  %v27546_v12 = vld [vmem:[#allocation150_spill] sm:$0xff] }
 0x578   : > { %v7412_v25 = vrot.slane %v27532_v39, %v18559_v11  ;;  %v7416_v57 = vrot.slane %v27533_v16, %v18559_v11  ;;  %v27534_v40 = vrot.slane %v27531_v63, %v18559_v11  ;;  %v7987_v60 = vsel %vm7753_vm7, %v27529_v36, %v7408_v14 }
 0x579   : > { %v15451_v62 = vcombine.low %v15443_v44, %v15450_v27  ;;  %v15198_v35 = vcombine.low %v7960_v1, %v7961_v61  ;;  %v15205_v49 = vrot.slane %v15197_v17, %v19822_v43  ;;  %v27536_v6 = vcombine.high %v27535_v24, %v27535_v24  ;;  %v27547_v27 = vld [vmem:[#allocation338_spill] sm:$0xff]  ;;  %v27548_v17 = vld [vmem:[#allocation336_spill] sm:$0xff] }
 0x57a   : > { %v7986_v8 = vsel %vm7753_vm7, %v27535_v24, %v27534_v40  ;;  %v7989_v30 = vsel %vm7753_vm7, %v4517_v52, %v7416_v57  ;;  %v9265_v5 = vcombine.high %v27537_v20, %v27537_v20  ;;  %v12241_v38 = vrot.slane %v22631_v9, %v18559_v11  ;;  %v27550_v40 = vld [vmem:[#allocation302_spill] sm:$0xff] }
 0x57b   : > { %v7988_v7 = vsel %vm7753_vm7, %v27536_v6, %v7412_v25  ;;  %v15452_v28 = vcombine.low %v7986_v8, %v7987_v60  ;;  %16043 = vxpose.xlu1.b32.cont [2/16] (narrow) %v15451_v62, 8  ;;  %v15212_v45 = vrot.slane %v15198_v35, %v19822_v43  ;;  %v27539_v50 = vcombine.high %v27538_v46, %v27538_v46 }
 0x57c   : > { %v15453_v29 = vcombine.low %v7988_v7, %v7989_v30  ;;  %v27540_v18 = vcombine.high %v22631_v9, %v22631_v9  ;;  %v27541_v10 = vrot.slane %v27538_v46, %v18559_v11  ;;  %v12939_v55 = vsel %vm7753_vm7, %v27537_v20, %v12241_v38  ;;  %v27553_v38 = vld [vmem:[#allocation21_spill] sm:$0xff] }
 0x57d   : > { %v12245_v48 = vrot.slane %v27539_v50, %v18559_v11  ;;  %v15460_v41 = vrot.slane %v15452_v28, %v19822_v43  ;;  %v27544_v21 = vcombine.high %v27543_v13, %v27543_v13  ;;  %v15213_v44 = vcombine.low %v15205_v49, %v15212_v45  ;;  %v27552_v49 = vld [vmem:[#allocation305_spill] sm:$0xff] }
 0x57e   : > { %v12249_v56 = vrot.slane %v27540_v18, %v18559_v11  ;;  %v12938_v0 = vsel %vm7753_vm7, %v27542_v19, %v27541_v10  ;;  %v15467_v9 = vrot.slane %v15453_v29, %v19822_v43  ;;  %v27545_v2 = vcombine.high %v27542_v19, %v27542_v19  ;;  %v27554_v29 = vld [vmem:[#allocation4_spill] sm:$0xff] }
 0x57f   : > { %v4514_v37 = vrot.slane %v27544_v21, %v18540_v33  ;;  %v15214_v52 = vcombine.low %v12938_v0, %v12939_v55  ;;  %v4516_v26 = vcombine.high %v27546_v12, %v27546_v12  ;;  %16013 = vxpose.xlu0.b32.cont [4/16] (narrow) %v15213_v44, 8  ;;  %v6374_v1 = vcombine.high %v27547_v27, %v27547_v27  ;;  %v27556_v10 = vld [vmem:[#allocation348_spill] sm:$0xff] }
 0x580   : > { %v12940_v32 = vsel %vm7753_vm7, %v27545_v2, %v12245_v48  ;;  %v12941_v36 = vsel %vm7753_vm7, %v9265_v5, %v12249_v56  ;;  %v15468_v14 = vcombine.low %v15460_v41, %v15467_v9  ;;  %v7420_v63 = vrot.slane %v27548_v17, %v18559_v11 }
 0x581   : > { %v15215_v23 = vcombine.low %v12940_v32, %v12941_v36  ;;  %v4518_v51 = vcombine.high %v4514_v37, %v4514_v37  ;;  %v7424_v39 = vrot.slane %v27547_v27, %v18559_v11  ;;  %v15222_v25 = vrot.slane %v15214_v52, %v19822_v43 }
 0x582   : > { %v27549_v16 = vcombine.high %v27548_v17, %v27548_v17  ;;  %v27551_v24 = vcombine.high %v27550_v40, %v27550_v40  ;;  %16044 = vxpose.xlu1.b32.cont [3/16] (narrow) %v15468_v14, 8  ;;  %v7432_v60 = vrot.slane %v6374_v1, %v18559_v11  ;;  %v7990_v62 = vsel %vm7753_vm7, %v27546_v12, %v7420_v63 }
 0x583   : > { %v15229_v61 = vrot.slane %v15215_v23, %v19822_v43  ;;  %v7991_v35 = vsel %vm7753_vm7, %v4514_v37, %v7424_v39  ;;  %v9264_v6 = vcombine.high %v27552_v49, %v27552_v49  ;;  %v11122_v45 = vcombine.high %v27553_v38, %v27553_v38 }
 0x584   : > { %v7428_v57 = vrot.slane %v27549_v16, %v18559_v11  ;;  %v9262_v8 = vrot.slane %v27551_v24, %v18540_v33  ;;  %v15469_v28 = vcombine.low %v7990_v62, %v7991_v35  ;;  %v7993_v5 = vsel %vm7753_vm7, %v4518_v51, %v7432_v60 }
 0x585   : > { %v15230_v7 = vcombine.low %v15222_v25, %v15229_v61  ;;  %v12253_v46 = vrot.slane %v27554_v29, %v18559_v11  ;;  %v12257_v50 = vrot.slane %v27553_v38, %v18559_v11  ;;  %v27555_v56 = vcombine.high %v27554_v29, %v27554_v29  ;;  %v27562_v61 = vld [vmem:[#allocation323_spill] sm:$0xff] }
 0x586   : > { %v7992_v30 = vsel %vm7753_vm7, %v4516_v26, %v7428_v57  ;;  %v9266_v20 = vcombine.high %v9262_v8, %v9262_v8  ;;  %v15477_v18 = vrot.slane %v15469_v28, %v19822_v43  ;;  %v9461_v19 = vcombine.high %v27556_v10, %v27556_v10  ;;  %v27560_v26 = vld [vmem:[#allocation346_spill] sm:$0xff]  ;;  %v27567_v28 = vld [vmem:[#allocation345_spill] sm:$0xff] }
 0x587   : > { %16014 = vxpose.xlu0.b32.cont [5/16] (narrow) %v15230_v7, 8  ;;  %v15470_v48 = vcombine.low %v7992_v30, %v7993_v5  ;;  %v12261_v41 = vrot.slane %v27555_v56, %v18559_v11  ;;  %v12265_v0 = vrot.slane %v11122_v45, %v18559_v11  ;;  %v12942_v55 = vsel %vm7753_vm7, %v27552_v49, %v12253_v46 }
 0x588   : > { %v12943_v13 = vsel %vm7753_vm7, %v9262_v8, %v12257_v50  ;;  %v12369_v21 = vrot.slane %v22858_v47, %v18559_v11  ;;  %v27557_v2 = vcombine.high %v22842_v53, %v22842_v53  ;;  %v27558_v52 = vcombine.high %v22858_v47, %v22858_v47 }
 0x589   : > { %v15484_v37 = vrot.slane %v15470_v48, %v19822_v43  ;;  %v12944_v44 = vsel %vm7753_vm7, %v9264_v6, %v12261_v41  ;;  %v15231_v9 = vcombine.low %v12942_v55, %v12943_v13  ;;  %v12945_v36 = vsel %vm7753_vm7, %v9266_v20, %v12265_v0  ;;  %v27566_v6 = vld [vmem:[#allocation320_spill] sm:$0xff]  ;;  %v27570_v48 = vld [vmem:[#allocation347_spill] sm:$0xff] }
 0x58a   : > { %v12373_v32 = vrot.slane %v27557_v2, %v18559_v11  ;;  %v12377_v23 = vrot.slane %v27558_v52, %v18559_v11  ;;  %v27559_v12 = vrot.slane %v22842_v53, %v18559_v11  ;;  %v12971_v14 = vsel %vm7753_vm7, %v27556_v10, %v12369_v21  ;;  %v27574_v52 = vld [vmem:[#allocation322_spill] sm:$0xff] }
 0x58b   : > { %v15485_v27 = vcombine.low %v15477_v18, %v15484_v37  ;;  %v15232_v1 = vcombine.low %v12944_v44, %v12945_v36  ;;  %v15239_v17 = vrot.slane %v15231_v9, %v19822_v43  ;;  %v27561_v63 = vcombine.high %v27560_v26, %v27560_v26  ;;  %v27572_v44 = vld [vmem:[#allocation319_spill] sm:$0xff] }
 0x58c   : > { %v12970_v51 = vsel %vm7753_vm7, %v27560_v26, %v27559_v12  ;;  %v12973_v47 = vsel %vm7753_vm7, %v9461_v19, %v12377_v23  ;;  %v9314_v53 = vcombine.high %v27562_v61, %v27562_v61  ;;  %v12273_v16 = vrot.slane %v22728_v4, %v18559_v11 }
 0x58d   : > { %v12972_v39 = vsel %vm7753_vm7, %v27561_v63, %v12373_v32  ;;  %v15486_v25 = vcombine.low %v12970_v51, %v12971_v14  ;;  %16045 = vxpose.xlu1.b32.cont [4/16] (narrow) %v15485_v27, 8  ;;  %v15246_v57 = vrot.slane %v15232_v1, %v19822_v43  ;;  %v27563_v24 = vcombine.high %v22722_v3, %v22722_v3 }
 0x58e   : > { %v15487_v40 = vcombine.low %v12972_v39, %v12973_v47  ;;  %v27564_v60 = vcombine.high %v22728_v4, %v22728_v4  ;;  %v27565_v49 = vrot.slane %v22722_v3, %v18559_v11  ;;  %v12947_v30 = vsel %vm7753_vm7, %v27562_v61, %v12273_v16  ;;  %v27576_v61 = vld [vmem:[#allocation356_spill] sm:$0xff] }
 0x58f   : > { %v12277_v8 = vrot.slane %v27563_v24, %v18559_v11  ;;  %v15494_v35 = vrot.slane %v15486_v25, %v19822_v43  ;;  %v27568_v20 = vcombine.high %v27567_v28, %v27567_v28  ;;  %v15247_v38 = vcombine.low %v15239_v17, %v15246_v57 }
 0x590   : > { %v12281_v62 = vrot.slane %v27564_v60, %v18559_v11  ;;  %v12946_v7 = vsel %vm7753_vm7, %v27566_v6, %v27565_v49  ;;  %v15501_v4 = vrot.slane %v15487_v40, %v19822_v43  ;;  %v27569_v45 = vcombine.high %v27566_v6, %v27566_v6 }
 0x591   : > { %v9458_v5 = vrot.slane %v27568_v20, %v18540_v33  ;;  %v15248_v46 = vcombine.low %v12946_v7, %v12947_v30  ;;  %v9460_v18 = vcombine.high %v27570_v48, %v27570_v48  ;;  %16015 = vxpose.xlu0.b32.cont [6/16] (narrow) %v15247_v38, 8  ;;  %v11318_v10 = vcombine.high %v22861_v22, %v22861_v22  ;;  %v27580_v30 = vld [vmem:[#allocation354_spill] sm:$0xff] }
 0x592   : > { %v12948_v29 = vsel %vm7753_vm7, %v27569_v45, %v12277_v8  ;;  %v12949_v3 = vsel %vm7753_vm7, %v9314_v53, %v12281_v62  ;;  %v15502_v41 = vcombine.low %v15494_v35, %v15501_v4  ;;  %v12381_v19 = vrot.slane %v22845_v54, %v18559_v11 }
 0x593   : > { %v15249_v50 = vcombine.low %v12948_v29, %v12949_v3  ;;  %v9462_v56 = vcombine.high %v9458_v5, %v9458_v5  ;;  %v12385_v0 = vrot.slane %v22861_v22, %v18559_v11  ;;  %v15256_v55 = vrot.slane %v15248_v46, %v19822_v43  ;;  %v27582_v46 = vld [vmem:[#allocation107_spill] sm:$0xff] }
 0x594   : > { %v27571_v21 = vcombine.high %v22845_v54, %v22845_v54  ;;  %v27573_v9 = vcombine.high %v27572_v44, %v27572_v44  ;;  %16046 = vxpose.xlu1.b32.cont [5/16] (narrow) %v15502_v41, 8  ;;  %v12393_v32 = vrot.slane %v11318_v10, %v18559_v11  ;;  %v12974_v22 = vsel %vm7753_vm7, %v27570_v48, %v12381_v19  ;;  %v27584_v41 = vld [vmem:[#allocation291_spill] sm:$0xff] }
 0x595   : > { %v15263_v13 = vrot.slane %v15249_v50, %v19822_v43  ;;  %v12975_v36 = vsel %vm7753_vm7, %v9458_v5, %v12385_v0  ;;  %v9313_v23 = vcombine.high %v27574_v52, %v27574_v52  ;;  %v11171_v27 = vcombine.high %v22740_v31, %v22740_v31  ;;  %v27583_v50 = vld [vmem:[#allocation294_spill] sm:$0xff] }
 0x596   : > { %v12389_v37 = vrot.slane %v27571_v21, %v18559_v11  ;;  %v9311_v2 = vrot.slane %v27573_v9, %v18540_v33  ;;  %v15503_v26 = vcombine.low %v12974_v22, %v12975_v36  ;;  %v12977_v14 = vsel %vm7753_vm7, %v9462_v56, %v12393_v32 }
 0x597   : > { %v15264_v12 = vcombine.low %v15256_v55, %v15263_v13  ;;  %v12285_v1 = vrot.slane %v22725_v34, %v18559_v11  ;;  %v12289_v17 = vrot.slane %v22740_v31, %v18559_v11  ;;  %v27575_v47 = vcombine.high %v22725_v34, %v22725_v34 }
 0x598   : > { %v12976_v54 = vsel %vm7753_vm7, %v9460_v18, %v12389_v37  ;;  %v9315_v51 = vcombine.high %v9311_v2, %v9311_v2  ;;  %v15511_v39 = vrot.slane %v15503_v26, %v19822_v43  ;;  %v9510_v53 = vcombine.high %v27576_v61, %v27576_v61  ;;  %v27588_v37 = vld [vmem:[#allocation104_spill] sm:$0xff] }
 0x599   : > { %16016 = vxpose.xlu0.b32.cont [7/16] (narrow) %v15264_v12, 8  ;;  %v15504_v63 = vcombine.low %v12976_v54, %v12977_v14  ;;  %v12293_v25 = vrot.slane %v27575_v47, %v18559_v11  ;;  %v12297_v16 = vrot.slane %v11171_v27, %v18559_v11  ;;  %v12950_v57 = vsel %vm7753_vm7, %v27574_v52, %v12285_v1  ;;  %v27592_v14 = vld [vmem:[#allocation355_spill] sm:$0xff] }
 0x59a   : > { %v12951_v40 = vsel %vm7753_vm7, %v9311_v2, %v12289_v17  ;;  %v12401_v31 = vrot.slane %v22956_v42, %v18559_v11  ;;  %v27577_v34 = vcombine.high %v22945_v15, %v22945_v15  ;;  %v27578_v49 = vcombine.high %v22956_v42, %v22956_v42  ;;  %v27589_v2 = vld [vmem:[#allocation353_spill] sm:$0xff] }
 0x59b   : > { %v15518_v24 = vrot.slane %v15504_v63, %v19822_v43  ;;  %v12952_v8 = vsel %vm7753_vm7, %v9313_v23, %v12293_v25  ;;  %v15265_v60 = vcombine.low %v12950_v57, %v12951_v40  ;;  %v12953_v35 = vsel %vm7753_vm7, %v9315_v51, %v12297_v16  ;;  %v27594_v57 = vld [vmem:[#allocation103_spill] sm:$0xff] }
 0x59c   : > { %v12405_v62 = vrot.slane %v27577_v34, %v18559_v11  ;;  %v12409_v6 = vrot.slane %v27578_v49, %v18559_v11  ;;  %v27579_v7 = vrot.slane %v22945_v15, %v18559_v11  ;;  %v12979_v20 = vsel %vm7753_vm7, %v27576_v61, %v12401_v31 }
 0x59d   : > { %v15519_v5 = vcombine.low %v15511_v39, %v15518_v24  ;;  %v15266_v38 = vcombine.low %v12952_v8, %v12953_v35  ;;  %v15273_v4 = vrot.slane %v15265_v60, %v19822_v43  ;;  %v27581_v45 = vcombine.high %v27580_v30, %v27580_v30  ;;  %v27596_v60 = vld [vmem:[#allocation106_spill] sm:$0xff] }
 0x59e   : > { %v12978_v28 = vsel %vm7753_vm7, %v27580_v30, %v27579_v7  ;;  %v12981_v42 = vsel %vm7753_vm7, %v9510_v53, %v12409_v6  ;;  %v4370_v15 = vcombine.high %v27582_v46, %v27582_v46  ;;  %v7312_v48 = vrot.slane %v27583_v50, %v18559_v11  ;;  %v27597_v7 = vld [vmem:[#allocation295_spill] sm:$0xff] }
 0x59f   : > { %v12980_v29 = vsel %vm7753_vm7, %v27581_v45, %v12405_v62  ;;  %v15520_v3 = vcombine.low %v12978_v28, %v12979_v20  ;;  %16047 = vxpose.xlu1.b32.cont [6/16] (narrow) %v15519_v5, 8  ;;  %v15280_v18 = vrot.slane %v15266_v38, %v19822_v43  ;;  %v27585_v10 = vcombine.high %v27584_v41, %v27584_v41  ;;  %v27598_v28 = vld [vmem:[#allocation292_spill] sm:$0xff] }
 0x5a0   : > { %v15521_v56 = vcombine.low %v12980_v29, %v12981_v42  ;;  %v27586_v0 = vcombine.high %v27583_v50, %v27583_v50  ;;  %v27587_v21 = vrot.slane %v27584_v41, %v18559_v11  ;;  %v7963_v9 = vsel %vm7753_vm7, %v27582_v46, %v7312_v48  ;;  %v27600_v42 = vld [vmem:[#allocation136_spill] sm:$0xff]  ;;  %v27601_v48 = vld [vmem:[#allocation325_spill] sm:$0xff] }
 0x5a1   : > { %v7316_v19 = vrot.slane %v27585_v10, %v18559_v11  ;;  %v15528_v13 = vrot.slane %v15520_v3, %v19822_v43  ;;  %v27590_v32 = vcombine.high %v27589_v2, %v27589_v2  ;;  %v15281_v36 = vcombine.low %v15273_v4, %v15280_v18 }
 0x5a2   : > { %v7320_v55 = vrot.slane %v27586_v0, %v18559_v11  ;;  %v7962_v44 = vsel %vm7753_vm7, %v27588_v37, %v27587_v21  ;;  %v15535_v52 = vrot.slane %v15521_v56, %v19822_v43  ;;  %v27591_v23 = vcombine.high %v27588_v37, %v27588_v37 }
 0x5a3   : > { %v9507_v22 = vrot.slane %v27590_v32, %v18540_v33  ;;  %v15282_v26 = vcombine.low %v7962_v44, %v7963_v9  ;;  %v9509_v27 = vcombine.high %v27592_v14, %v27592_v14  ;;  %16017 = vxpose.xlu0.b32.cont [8/16] (narrow) %v15281_v36, 8  ;;  %v11367_v63 = vcombine.high %v22959_v58, %v22959_v58  ;;  %v27606_v9 = vld [vmem:[#allocation134_spill] sm:$0xff] }
 0x5a4   : > { %v7964_v12 = vsel %vm7753_vm7, %v27591_v23, %v7316_v19  ;;  %v7965_v54 = vsel %vm7753_vm7, %v4370_v15, %v7320_v55  ;;  %v15536_v17 = vcombine.low %v15528_v13, %v15535_v52  ;;  %v12413_v39 = vrot.slane %v22951_v59, %v18559_v11  ;;  %v27602_v19 = vld [vmem:[#allocation321_spill] sm:$0xff] }
 0x5a5   : > { %v15283_v51 = vcombine.low %v7964_v12, %v7965_v54  ;;  %v9511_v1 = vcombine.high %v9507_v22, %v9507_v22  ;;  %v12417_v47 = vrot.slane %v22959_v58, %v18559_v11  ;;  %v15290_v25 = vrot.slane %v15282_v26, %v19822_v43 }
 0x5a6   : > { %v27593_v53 = vcombine.high %v22951_v59, %v22951_v59  ;;  %v27595_v40 = vcombine.high %v27594_v57, %v27594_v57  ;;  %16048 = vxpose.xlu1.b32.cont [7/16] (narrow) %v15536_v17, 8  ;;  %v12425_v24 = vrot.slane %v11367_v63, %v18559_v11  ;;  %v12982_v58 = vsel %vm7753_vm7, %v27592_v14, %v12413_v39  ;;  %v27608_v14 = vld [vmem:[#allocation117_spill] sm:$0xff] }
 0x5a7   : > { %v15297_v61 = vrot.slane %v15283_v51, %v19822_v43  ;;  %v12983_v8 = vsel %vm7753_vm7, %v9507_v22, %v12417_v47  ;;  %v4369_v34 = vcombine.high %v27596_v60, %v27596_v60  ;;  %v6227_v30 = vcombine.high %v27597_v7, %v27597_v7  ;;  %v15962_v22 = vpop.trf.xlu0  ;;  %v27610_v47 = vld [vmem:[#allocation307_spill] sm:$0xff] }
 0x5a8   : > { %v12421_v16 = vrot.slane %v27593_v53, %v18559_v11  ;;  %v4367_v31 = vrot.slane %v27595_v40, %v18540_v33  ;;  %v15537_v35 = vcombine.low %v12982_v58, %v12983_v8  ;;  %v12985_v6 = vsel %vm7753_vm7, %v9511_v1, %v12425_v24  ;;  %16078 = vst [vmem:[%s24745_s9 + $0x20] sm:$0xff] %v15962_v22  ;;  %v27609_v1 = vld [vmem:[#allocation309_spill] sm:$0xff] }
 0x5a9   : > { %v15298_v62 = vcombine.low %v15290_v25, %v15297_v61  ;;  %v7324_v20 = vrot.slane %v27598_v28, %v18559_v11  ;;  %v7328_v5 = vrot.slane %v27597_v7, %v18559_v11  ;;  %v27599_v45 = vcombine.high %v27598_v28, %v27598_v28  ;;  %v27615_v8 = vld [vmem:[#allocation133_spill] sm:$0xff]  ;;  %v27618_v28 = vld [vmem:[#allocation135_spill] sm:$0xff] }
 0x5aa   : > { %v12984_v59 = vsel %vm7753_vm7, %v9509_v27, %v12421_v16  ;;  %v4371_v49 = vcombine.high %v4367_v31, %v4367_v31  ;;  %v15545_v4 = vrot.slane %v15537_v35, %v19822_v43  ;;  %v4566_v3 = vcombine.high %v27600_v42, %v27600_v42 }
 0x5ab   : > { %16018 = vxpose.xlu0.b32.cont [9/16] (narrow) %v15298_v62, 8  ;;  %v15538_v38 = vcombine.low %v12984_v59, %v12985_v6  ;;  %v7332_v29 = vrot.slane %v27599_v45, %v18559_v11  ;;  %v7336_v46 = vrot.slane %v6227_v30, %v18559_v11  ;;  %v7966_v15 = vsel %vm7753_vm7, %v27596_v60, %v7324_v20 }
 0x5ac   : > { %v7967_v50 = vsel %vm7753_vm7, %v4367_v31, %v7328_v5  ;;  %v7440_v18 = vrot.slane %v27601_v48, %v18559_v11  ;;  %v27603_v0 = vcombine.high %v27602_v19, %v27602_v19  ;;  %v27604_v21 = vcombine.high %v27601_v48, %v27601_v48  ;;  %v27614_v31 = vld [vmem:[#allocation112_spill] sm:$0xff] }
 0x5ad   : > { %v15552_v56 = vrot.slane %v15538_v38, %v19822_v43  ;;  %v7968_v41 = vsel %vm7753_vm7, %v4369_v34, %v7332_v29  ;;  %v15299_v10 = vcombine.low %v7966_v15, %v7967_v50  ;;  %v7969_v13 = vsel %vm7753_vm7, %v4371_v49, %v7336_v46  ;;  %v27620_v29 = vld [vmem:[#allocation324_spill] sm:$0xff] }
 0x5ae   : > { %v7444_v55 = vrot.slane %v27603_v0, %v18559_v11  ;;  %v7448_v37 = vrot.slane %v27604_v21, %v18559_v11  ;;  %v27605_v44 = vrot.slane %v27602_v19, %v18559_v11  ;;  %v7995_v32 = vsel %vm7753_vm7, %v27600_v42, %v7440_v18  ;;  %v27622_v18 = vld [vmem:[#allocation111_spill] sm:$0xff] }
 0x5af   : > { %v15553_v36 = vcombine.low %v15545_v4, %v15552_v56  ;;  %v15300_v52 = vcombine.low %v7968_v41, %v7969_v13  ;;  %v15307_v23 = vrot.slane %v15299_v10, %v19822_v43  ;;  %v27607_v12 = vcombine.high %v27606_v9, %v27606_v9  ;;  %v27619_v4 = vld [vmem:[#allocation326_spill] sm:$0xff] }
 0x5b0   : > { %v7994_v2 = vsel %vm7753_vm7, %v27606_v9, %v27605_v44  ;;  %v7997_v26 = vsel %vm7753_vm7, %v4566_v3, %v7448_v37  ;;  %v4419_v27 = vcombine.high %v27608_v14, %v27608_v14  ;;  %v7344_v17 = vrot.slane %v27609_v1, %v18559_v11 }
 0x5b1   : > { %v7996_v54 = vsel %vm7753_vm7, %v27607_v12, %v7444_v55  ;;  %v15554_v51 = vcombine.low %v7994_v2, %v7995_v32  ;;  %16049 = vxpose.xlu1.b32.cont [8/16] (narrow) %v15553_v36, 8  ;;  %v15314_v63 = vrot.slane %v15300_v52, %v19822_v43  ;;  %v27611_v25 = vcombine.high %v27610_v47, %v27610_v47  ;;  %v27624_v55 = vld [vmem:[#allocation116_spill] sm:$0xff]  ;;  %v15994_v12 = vpop.trf.xlu1 }
 0x5b2   : > { %v15555_v39 = vcombine.low %v7996_v54, %v7997_v26  ;;  %v27612_v53 = vcombine.high %v27609_v1, %v27609_v1  ;;  %v27613_v40 = vrot.slane %v27610_v47, %v18559_v11  ;;  %v7971_v58 = vsel %vm7753_vm7, %v27608_v14, %v7344_v17  ;;  %v27625_v32 = vld [vmem:[#allocation312_spill] sm:$0xff]  ;;  %16079 = vst [vmem:[%s24745_s9 + $0x28] sm:$0xff] %v15994_v12 }
 0x5b3   : > { %v7348_v61 = vrot.slane %v27611_v25, %v18559_v11  ;;  %v15562_v57 = vrot.slane %v15554_v51, %v19822_v43  ;;  %v27616_v60 = vcombine.high %v27615_v8, %v27615_v8  ;;  %v15315_v62 = vcombine.low %v15307_v23, %v15314_v63  ;;  %v27626_v36 = vld [vmem:[#allocation308_spill] sm:$0xff] }
 0x5b4   : > { %v7352_v16 = vrot.slane %v27612_v53, %v18559_v11  ;;  %v7970_v24 = vsel %vm7753_vm7, %v27614_v31, %v27613_v40  ;;  %v15569_v59 = vrot.slane %v15555_v39, %v19822_v43  ;;  %v27617_v35 = vcombine.high %v27614_v31, %v27614_v31  ;;  %v27629_v47 = vld [vmem:[#allocation332_spill] sm:$0xff] }
 0x5b5   : > { %v4563_v34 = vrot.slane %v27616_v60, %v18540_v33  ;;  %v15316_v7 = vcombine.low %v7970_v24, %v7971_v58  ;;  %v4565_v20 = vcombine.high %v27618_v28, %v27618_v28  ;;  %16019 = vxpose.xlu0.b32.cont [10/16] (narrow) %v15315_v62, 8  ;;  %v6423_v45 = vcombine.high %v27619_v4, %v27619_v4 }
 0x5b6   : > { %v7972_v49 = vsel %vm7753_vm7, %v27617_v35, %v7348_v61  ;;  %v7973_v6 = vsel %vm7753_vm7, %v4419_v27, %v7352_v16  ;;  %v15570_v38 = vcombine.low %v15562_v57, %v15569_v59  ;;  %v7452_v42 = vrot.slane %v27620_v29, %v18559_v11  ;;  %v27628_v27 = vld [vmem:[#allocation147_spill] sm:$0xff]  ;;  %v27630_v57 = vld [vmem:[#allocation328_spill] sm:$0xff] }
 0x5b7   : > { %v15317_v30 = vcombine.low %v7972_v49, %v7973_v6  ;;  %v4567_v5 = vcombine.high %v4563_v34, %v4563_v34  ;;  %v7456_v3 = vrot.slane %v27619_v4, %v18559_v11  ;;  %v15324_v46 = vrot.slane %v15316_v7, %v19822_v43  ;;  %v27637_v4 = vld [vmem:[#allocation94_spill] sm:$0xff] }
 0x5b8   : > { %v27621_v50 = vcombine.high %v27620_v29, %v27620_v29  ;;  %v27623_v56 = vcombine.high %v27622_v18, %v27622_v18  ;;  %16050 = vxpose.xlu1.b32.cont [9/16] (narrow) %v15570_v38, 8  ;;  %v7464_v10 = vrot.slane %v6423_v45, %v18559_v11  ;;  %v7998_v19 = vsel %vm7753_vm7, %v27618_v28, %v7452_v42 }
 0x5b9   : > { %v15331_v15 = vrot.slane %v15317_v30, %v19822_v43  ;;  %v7999_v0 = vsel %vm7753_vm7, %v4563_v34, %v7456_v3  ;;  %v4418_v13 = vcombine.high %v27624_v55, %v27624_v55  ;;  %v6276_v22 = vcombine.high %v27625_v32, %v27625_v32  ;;  %v27634_v34 = vld [vmem:[#allocation143_spill] sm:$0xff]  ;;  %v27638_v3 = vld [vmem:[#allocation38_spill] sm:$0xff] }
 0x5ba   : > { %v7460_v48 = vrot.slane %v27621_v50, %v18559_v11  ;;  %v4416_v41 = vrot.slane %v27623_v56, %v18540_v33  ;;  %v15571_v44 = vcombine.low %v7998_v19, %v7999_v0  ;;  %v8001_v2 = vsel %vm7753_vm7, %v4567_v5, %v7464_v10  ;;  %v27636_v5 = vld [vmem:[#allocation298_spill] sm:$0xff]  ;;  %v27643_v0 = vld [vmem:[#allocation141_spill] sm:$0xff] }
 0x5bb   : > { %v15332_v21 = vcombine.low %v15324_v46, %v15331_v15  ;;  %v7356_v52 = vrot.slane %v27626_v36, %v18559_v11  ;;  %v7360_v23 = vrot.slane %v27625_v32, %v18559_v11  ;;  %v27627_v51 = vcombine.high %v27626_v36, %v27626_v36  ;;  %v27646_v36 = vld [vmem:[#allocation146_spill] sm:$0xff] }
 0x5bc   : > { %v8000_v37 = vsel %vm7753_vm7, %v4565_v20, %v7460_v48  ;;  %v4420_v9 = vcombine.high %v4416_v41, %v4416_v41  ;;  %v15579_v26 = vrot.slane %v15571_v44, %v19822_v43  ;;  %v4615_v1 = vcombine.high %v27628_v27, %v27628_v27 }
 0x5bd   : > { %16020 = vxpose.xlu0.b32.cont [11/16] (narrow) %v15332_v21, 8  ;;  %v15572_v54 = vcombine.low %v8000_v37, %v8001_v2  ;;  %v7364_v14 = vrot.slane %v27627_v51, %v18559_v11  ;;  %v7368_v17 = vrot.slane %v6276_v22, %v18559_v11  ;;  %v7974_v63 = vsel %vm7753_vm7, %v27624_v55, %v7356_v52  ;;  %v27648_v51 = vld [vmem:[#allocation331_spill] sm:$0xff] }
 0x5be   : > { %v7975_v39 = vsel %vm7753_vm7, %v4416_v41, %v7360_v23  ;;  %v7472_v25 = vrot.slane %v27629_v47, %v18559_v11  ;;  %v27631_v40 = vcombine.high %v27630_v57, %v27630_v57  ;;  %v27632_v58 = vcombine.high %v27629_v47, %v27629_v47  ;;  %v27642_v41 = vld [vmem:[#allocation296_spill] sm:$0xff]  ;;  %v27650_v47 = vld [vmem:[#allocation293_spill] sm:$0xff] }
 0x5bf   : > { %v15586_v61 = vrot.slane %v15572_v54, %v19822_v43  ;;  %v7976_v53 = vsel %vm7753_vm7, %v4418_v13, %v7364_v14  ;;  %v15333_v16 = vcombine.low %v7974_v63, %v7975_v39  ;;  %v7977_v24 = vsel %vm7753_vm7, %v4420_v9, %v7368_v17  ;;  %v27647_v54 = vld [vmem:[#allocation334_spill] sm:$0xff] }
 0x5c0   : > { %v7476_v31 = vrot.slane %v27631_v40, %v18559_v11  ;;  %v7480_v8 = vrot.slane %v27632_v58, %v18559_v11  ;;  %v27633_v60 = vrot.slane %v27630_v57, %v18559_v11  ;;  %v8003_v59 = vsel %vm7753_vm7, %v27628_v27, %v7472_v25  ;;  %v27652_v40 = vld [vmem:[#allocation297_spill] sm:$0xff] }
 0x5c1   : > { %v15587_v35 = vcombine.low %v15579_v26, %v15586_v61  ;;  %v15334_v49 = vcombine.low %v7976_v53, %v7977_v24  ;;  %v15341_v6 = vrot.slane %v15333_v16, %v19822_v43  ;;  %v27635_v7 = vcombine.high %v27634_v34, %v27634_v34 }
 0x5c2   : > { %v8002_v62 = vsel %vm7753_vm7, %v27634_v34, %v27633_v60  ;;  %v8005_v28 = vsel %vm7753_vm7, %v4615_v1, %v7480_v8  ;;  %v9363_v38 = vcombine.high %v27636_v5, %v27636_v5  ;;  %v12305_v45 = vrot.slane %v27637_v4, %v18559_v11 }
 0x5c3   : > { %v8004_v30 = vsel %vm7753_vm7, %v27635_v7, %v7476_v31  ;;  %v15588_v20 = vcombine.low %v8002_v62, %v8003_v59  ;;  %16051 = vxpose.xlu1.b32.cont [10/16] (narrow) %v15587_v35, 8  ;;  %v15348_v29 = vrot.slane %v15334_v49, %v19822_v43  ;;  %v27639_v46 = vcombine.high %v27638_v3, %v27638_v3  ;;  %v27653_v62 = vld [vmem:[#allocation124_spill] sm:$0xff]  ;;  %v27654_v35 = vld [vmem:[#allocation97_spill] sm:$0xff] }
 0x5c4   : > { %v15589_v42 = vcombine.low %v8004_v30, %v8005_v28  ;;  %v27640_v50 = vcombine.high %v27637_v4, %v27637_v4  ;;  %v27641_v56 = vrot.slane %v27638_v3, %v18559_v11  ;;  %v12955_v19 = vsel %vm7753_vm7, %v27636_v5, %v12305_v45  ;;  %v27656_v5 = vld [vmem:[#allocation344_spill] sm:$0xff] }
 0x5c5   : > { %v12309_v15 = vrot.slane %v27639_v46, %v18559_v11  ;;  %v15596_v18 = vrot.slane %v15588_v20, %v19822_v43  ;;  %v27644_v55 = vcombine.high %v27643_v0, %v27643_v0  ;;  %v15349_v21 = vcombine.low %v15341_v6, %v15348_v29 }
 0x5c6   : > { %v12313_v48 = vrot.slane %v27640_v50, %v18559_v11  ;;  %v12954_v10 = vsel %vm7753_vm7, %v27642_v41, %v27641_v56  ;;  %v15603_v37 = vrot.slane %v15589_v42, %v19822_v43  ;;  %v27645_v44 = vcombine.high %v27642_v41, %v27642_v41  ;;  %v27657_v42 = vld [vmem:[#allocation123_spill] sm:$0xff] }
 0x5c7   : > { %v4612_v13 = vrot.slane %v27644_v55, %v18540_v33  ;;  %v15350_v32 = vcombine.low %v12954_v10, %v12955_v19  ;;  %v4614_v52 = vcombine.high %v27646_v36, %v27646_v36  ;;  %16021 = vxpose.xlu0.b32.cont [12/16] (narrow) %v15349_v21, 8  ;;  %v6472_v26 = vcombine.high %v27647_v54, %v27647_v54  ;;  %v27662_v55 = vld [vmem:[#allocation342_spill] sm:$0xff] }
 0x5c8   : > { %v12956_v9 = vsel %vm7753_vm7, %v27645_v44, %v12309_v15  ;;  %v12957_v2 = vsel %vm7753_vm7, %v9363_v38, %v12313_v48  ;;  %v15604_v12 = vcombine.low %v15596_v18, %v15603_v37  ;;  %v7484_v14 = vrot.slane %v27648_v51, %v18559_v11  ;;  %v27658_v48 = vld [vmem:[#allocation19_spill] sm:$0xff] }
 0x5c9   : > { %v15351_v22 = vcombine.low %v12956_v9, %v12957_v2  ;;  %v4616_v23 = vcombine.high %v4612_v13, %v4612_v13  ;;  %v7488_v27 = vrot.slane %v27647_v54, %v18559_v11  ;;  %v15358_v1 = vrot.slane %v15350_v32, %v19822_v43 }
 0x5ca   : > { %v27649_v63 = vcombine.high %v27648_v51, %v27648_v51  ;;  %v27651_v25 = vcombine.high %v27650_v47, %v27650_v47  ;;  %16052 = vxpose.xlu1.b32.cont [11/16] (narrow) %v15604_v12, 8  ;;  %v7496_v53 = vrot.slane %v6472_v26, %v18559_v11  ;;  %v8006_v16 = vsel %vm7753_vm7, %v27646_v36, %v7484_v14  ;;  %v27665_v12 = vld [vmem:[#allocation99_spill] sm:$0xff] }
 0x5cb   : > { %v15365_v17 = vrot.slane %v15351_v22, %v19822_v43  ;;  %v8007_v57 = vsel %vm7753_vm7, %v4612_v13, %v7488_v27  ;;  %v9362_v31 = vcombine.high %v27652_v40, %v27652_v40  ;;  %v11220_v59 = vcombine.high %v27653_v62, %v27653_v62  ;;  %v27666_v14 = vld [vmem:[#allocation7_spill] sm:$0xff] }
 0x5cc   : > { %v7492_v39 = vrot.slane %v27649_v63, %v18559_v11  ;;  %v9360_v61 = vrot.slane %v27651_v25, %v18540_v33  ;;  %v15605_v8 = vcombine.low %v8006_v16, %v8007_v57  ;;  %v8009_v34 = vsel %vm7753_vm7, %v4616_v23, %v7496_v53  ;;  %v27670_v25 = vld [vmem:[#allocation311_spill] sm:$0xff]  ;;  %v27671_v16 = vld [vmem:[#allocation341_spill] sm:$0xff] }
 0x5cd   : > { %v15366_v24 = vcombine.low %v15358_v1, %v15365_v17  ;;  %v12317_v49 = vrot.slane %v27654_v35, %v18559_v11  ;;  %v12321_v6 = vrot.slane %v27653_v62, %v18559_v11  ;;  %v27655_v28 = vcombine.high %v27654_v35, %v27654_v35 }
 0x5ce   : > { %v8008_v58 = vsel %vm7753_vm7, %v4614_v52, %v7492_v39  ;;  %v9364_v60 = vcombine.high %v9360_v61, %v9360_v61  ;;  %v15613_v30 = vrot.slane %v15605_v8, %v19822_v43  ;;  %v9559_v38 = vcombine.high %v27656_v5, %v27656_v5  ;;  %v27664_v52 = vld [vmem:[#allocation314_spill] sm:$0xff] }
 0x5cf   : > { %16022 = vxpose.xlu0.b32.cont [13/16] (narrow) %v15366_v24, 8  ;;  %v15606_v7 = vcombine.low %v8008_v58, %v8009_v34  ;;  %v12325_v20 = vrot.slane %v27655_v28, %v18559_v11  ;;  %v12329_v4 = vrot.slane %v11220_v59, %v18559_v11  ;;  %v12958_v45 = vsel %vm7753_vm7, %v27652_v40, %v12317_v49  ;;  %v27674_v59 = vld [vmem:[#allocation343_spill] sm:$0xff]  ;;  %v27676_v28 = vld [vmem:[#allocation126_spill] sm:$0xff] }
 0x5d0   : > { %v12959_v29 = vsel %vm7753_vm7, %v9360_v61, %v12321_v6  ;;  %v12433_v3 = vrot.slane %v27657_v42, %v18559_v11  ;;  %v27659_v18 = vcombine.high %v27658_v48, %v27658_v48  ;;  %v27660_v10 = vcombine.high %v27657_v42, %v27657_v42  ;;  %v27678_v42 = vld [vmem:[#allocation310_spill] sm:$0xff] }
 0x5d1   : > { %v15620_v46 = vrot.slane %v15606_v7, %v19822_v43  ;;  %v12960_v15 = vsel %vm7753_vm7, %v9362_v31, %v12325_v20  ;;  %v15367_v50 = vcombine.low %v12958_v45, %v12959_v29  ;;  %v12961_v41 = vsel %vm7753_vm7, %v9364_v60, %v12329_v4  ;;  %v27675_v7 = vld [vmem:[#allocation23_spill] sm:$0xff] }
 0x5d2   : > { %v12437_v56 = vrot.slane %v27659_v18, %v18559_v11  ;;  %v12441_v19 = vrot.slane %v27660_v10, %v18559_v11  ;;  %v27661_v0 = vrot.slane %v27658_v48, %v18559_v11  ;;  %v12987_v21 = vsel %vm7753_vm7, %v27656_v5, %v12433_v3  ;;  %v27680_v18 = vld [vmem:[#allocation313_spill] sm:$0xff] }
 0x5d3   : > { %v15621_v37 = vcombine.low %v15613_v30, %v15620_v46  ;;  %v15368_v44 = vcombine.low %v12960_v15, %v12961_v41  ;;  %v15375_v9 = vrot.slane %v15367_v50, %v19822_v43  ;;  %v27663_v2 = vcombine.high %v27662_v55, %v27662_v55 }
 0x5d4   : > { %v12986_v13 = vsel %vm7753_vm7, %v27662_v55, %v27661_v0  ;;  %v12989_v22 = vsel %vm7753_vm7, %v9559_v38, %v12441_v19  ;;  %v9412_v23 = vcombine.high %v27664_v52, %v27664_v52  ;;  %v12337_v54 = vrot.slane %v27665_v12, %v18559_v11 }
 0x5d5   : > { %v12988_v32 = vsel %vm7753_vm7, %v27663_v2, %v12437_v56  ;;  %v15622_v36 = vcombine.low %v12986_v13, %v12987_v21  ;;  %16053 = vxpose.xlu1.b32.cont [12/16] (narrow) %v15621_v37, 8  ;;  %v15382_v26 = vrot.slane %v15368_v44, %v19822_v43  ;;  %v27667_v27 = vcombine.high %v27666_v14, %v27666_v14  ;;  %v27681_v13 = vld [vmem:[#allocation49_spill] sm:$0xff] }
 0x5d6   : > { %v15623_v51 = vcombine.low %v12988_v32, %v12989_v22  ;;  %v27668_v17 = vcombine.high %v27665_v12, %v27665_v12  ;;  %v27669_v47 = vrot.slane %v27666_v14, %v18559_v11  ;;  %v12963_v53 = vsel %vm7753_vm7, %v27664_v52, %v12337_v54  ;;  %v27682_v37 = vld [vmem:[#allocation101_spill] sm:$0xff]  ;;  %v27684_v52 = vld [vmem:[#allocation352_spill] sm:$0xff] }
 0x5d7   : > { %v12341_v1 = vrot.slane %v27667_v27, %v18559_v11  ;;  %v15630_v39 = vrot.slane %v15622_v36, %v19822_v43  ;;  %v27672_v57 = vcombine.high %v27671_v16, %v27671_v16  ;;  %v15383_v31 = vcombine.low %v15375_v9, %v15382_v26 }
 0x5d8   : > { %v12345_v63 = vrot.slane %v27668_v17, %v18559_v11  ;;  %v12962_v61 = vsel %vm7753_vm7, %v27670_v25, %v27669_v47  ;;  %v15637_v24 = vrot.slane %v15623_v51, %v19822_v43  ;;  %v27673_v58 = vcombine.high %v27670_v25, %v27670_v25  ;;  %v27685_v51 = vld [vmem:[#allocation102_spill] sm:$0xff] }
 0x5d9   : > { %v9556_v40 = vrot.slane %v27672_v57, %v18540_v33  ;;  %v15384_v34 = vcombine.low %v12962_v61, %v12963_v53  ;;  %v9558_v35 = vcombine.high %v27674_v59, %v27674_v59  ;;  %16023 = vxpose.xlu0.b32.cont [14/16] (narrow) %v15383_v31, 8  ;;  %v11416_v30 = vcombine.high %v27675_v7, %v27675_v7  ;;  %v27690_v57 = vld [vmem:[#allocation350_spill] sm:$0xff] }
 0x5da   : > { %v12964_v8 = vsel %vm7753_vm7, %v27673_v58, %v12341_v1  ;;  %v12965_v60 = vsel %vm7753_vm7, %v9412_v23, %v12345_v63  ;;  %v15638_v6 = vcombine.low %v15630_v39, %v15637_v24  ;;  %v12445_v20 = vrot.slane %v27676_v28, %v18559_v11  ;;  %v27686_v63 = vld [vmem:[#allocation48_spill] sm:$0xff] }
 0x5db   : > { %v15385_v62 = vcombine.low %v12964_v8, %v12965_v60  ;;  %v9560_v49 = vcombine.high %v9556_v40, %v9556_v40  ;;  %v12449_v5 = vrot.slane %v27675_v7, %v18559_v11  ;;  %v15392_v38 = vrot.slane %v15384_v34, %v19822_v43  ;;  %v27694_v7 = vld [vmem:[#allocation351_spill] sm:$0xff] }
 0x5dc   : > { %v27677_v45 = vcombine.high %v27676_v28, %v27676_v28  ;;  %v27679_v3 = vcombine.high %v27678_v42, %v27678_v42  ;;  %16054 = vxpose.xlu1.b32.cont [13/16] (narrow) %v15638_v6, 8  ;;  %v12457_v15 = vrot.slane %v11416_v30, %v18559_v11  ;;  %v12990_v50 = vsel %vm7753_vm7, %v27674_v59, %v12445_v20 }
 0x5dd   : > { %v15399_v4 = vrot.slane %v15385_v62, %v19822_v43  ;;  %v12991_v48 = vsel %vm7753_vm7, %v9556_v40, %v12449_v5  ;;  %v9411_v56 = vcombine.high %v27680_v18, %v27680_v18  ;;  %v11269_v21 = vcombine.high %v27681_v13, %v27681_v13  ;;  %v27695_v5 = vld [vmem:[#allocation100_spill] sm:$0xff] }
 0x5de   : > { %v12453_v29 = vrot.slane %v27677_v45, %v18559_v11  ;;  %v9409_v46 = vrot.slane %v27679_v3, %v18540_v33  ;;  %v15639_v19 = vcombine.low %v12990_v50, %v12991_v48  ;;  %v12993_v55 = vsel %vm7753_vm7, %v9560_v49, %v12457_v15 }
 0x5df   : > { %v15400_v41 = vcombine.low %v15392_v38, %v15399_v4  ;;  %v12349_v44 = vrot.slane %v27682_v37, %v18559_v11  ;;  %v12353_v9 = vrot.slane %v27681_v13, %v18559_v11  ;;  %v27683_v22 = vcombine.high %v27682_v37, %v27682_v37  ;;  %v27696_v4 = vld [vmem:[#allocation5_spill] sm:$0xff] }
 0x5e0   : > { %v12992_v10 = vsel %vm7753_vm7, %v9558_v35, %v12453_v29  ;;  %v9413_v0 = vcombine.high %v9409_v46, %v9409_v46  ;;  %v15647_v32 = vrot.slane %v15639_v19, %v19822_v43  ;;  %v9608_v23 = vcombine.high %v27684_v52, %v27684_v52  ;;  %v27692_v35 = vld [vmem:[#allocation349_spill] sm:$0xff] }
 0x5e1   : > { %16024 = vxpose.xlu0.b32.cont [15/16] (narrow) %v15400_v41, 8  ;;  %v15640_v2 = vcombine.low %v12992_v10, %v12993_v55  ;;  %v12357_v36 = vrot.slane %v27683_v22, %v18559_v11  ;;  %v12361_v12 = vrot.slane %v11269_v21, %v18559_v11  ;;  %v12966_v54 = vsel %vm7753_vm7, %v27680_v18, %v12349_v44 }
 0x5e2   : > { %v12967_v26 = vsel %vm7753_vm7, %v9409_v46, %v12353_v9  ;;  %v12465_v14 = vrot.slane %v27685_v51, %v18559_v11  ;;  %v27687_v39 = vcombine.high %v27686_v63, %v27686_v63  ;;  %v27688_v61 = vcombine.high %v27685_v51, %v27685_v51 }
 0x5e3   : > { %v15654_v27 = vrot.slane %v15640_v2, %v19822_v43  ;;  %v12968_v1 = vsel %vm7753_vm7, %v9411_v56, %v12357_v36  ;;  %v15401_v17 = vcombine.low %v12966_v54, %v12967_v26  ;;  %v12969_v25 = vsel %vm7753_vm7, %v9413_v0, %v12361_v12 }
 0x5e4   : > { %v12469_v47 = vrot.slane %v27687_v39, %v18559_v11  ;;  %v12473_v53 = vrot.slane %v27688_v61, %v18559_v11  ;;  %v27689_v16 = vrot.slane %v27686_v63, %v18559_v11  ;;  %v12995_v31 = vsel %vm7753_vm7, %v27684_v52, %v12465_v14 }
 0x5e5   : > { %v15655_v24 = vcombine.low %v15647_v32, %v15654_v27  ;;  %v15402_v58 = vcombine.low %v12968_v1, %v12969_v25  ;;  %v15409_v8 = vrot.slane %v15401_v17, %v19822_v43  ;;  %v27691_v60 = vcombine.high %v27690_v57, %v27690_v57 }
 0x5e6   : > { %v12994_v40 = vsel %vm7753_vm7, %v27690_v57, %v27689_v16  ;;  %v12997_v62 = vsel %vm7753_vm7, %v9608_v23, %v12473_v53  ;;  %v27693_v49 = vcombine.high %v27692_v35, %v27692_v35  ;;  %v9607_v30 = vcombine.high %v27694_v7, %v27694_v7 }
 0x5e7   : > { %v12996_v34 = vsel %vm7753_vm7, %v27691_v60, %v12469_v47  ;;  %v15656_v59 = vcombine.low %v12994_v40, %v12995_v31  ;;  %16055 = vxpose.xlu1.b32.cont [14/16] (narrow) %v15655_v24, 8  ;;  %v15416_v28 = vrot.slane %v15402_v58, %v19822_v43  ;;  %v11465_v38 = vcombine.high %v27695_v5, %v27695_v5 }
 0x5e8   : > { %v9605_v6 = vrot.slane %v27693_v49, %v18540_v33  ;;  %v15657_v20 = vcombine.low %v12996_v34, %v12997_v62  ;;  %v12477_v45 = vrot.slane %v27696_v4, %v18559_v11  ;;  %v12481_v3 = vrot.slane %v27695_v5, %v18559_v11 }
 0x5e9   : > { %v15664_v29 = vrot.slane %v15656_v59, %v19822_v43  ;;  %v27697_v33 = vcombine.high %v27696_v4, %v27696_v4  ;;  %v15417_v15 = vcombine.low %v15409_v8, %v15416_v28  ;;  %v12489_v48 = vrot.slane %v11465_v38, %v18559_v11 }
 0x5ea   : > { %v9609_v42 = vcombine.high %v9605_v6, %v9605_v6  ;;  %v15671_v50 = vrot.slane %v15657_v20, %v19822_v43  ;;  %v12998_v18 = vsel %vm7753_vm7, %v27694_v7, %v12477_v45  ;;  %v12999_v56 = vsel %vm7753_vm7, %v9605_v6, %v12481_v3 }
 0x5eb   : > { %v12485_v46 = vrot.slane %v27697_v33, %v18559_v11  ;;  %16025 = vxpose.xlu0.b32.end [16/16] (narrow) %v15417_v15, 8  ;;  %v15673_v0 = vcombine.low %v12998_v18, %v12999_v56 }
 0x5ec   : > { %v15672_v10 = vcombine.low %v15664_v29, %v15671_v50  ;;  %v13001_v19 = vsel %vm7753_vm7, %v9609_v42, %v12489_v48 }
 0x5ed   : > { %v13000_v41 = vsel %vm7753_vm7, %v9607_v30, %v12485_v46  ;;  %v15681_v13 = vrot.slane %v15673_v0, %v19822_v43 }
 0x5ee   : > { %v15674_v55 = vcombine.low %v13000_v41, %v13001_v19  ;;  %16056 = vxpose.xlu1.b32.cont [15/16] (narrow) %v15672_v10, 8 }
 0x5f0   : > { %v15688_v21 = vrot.slane %v15674_v55, %v19822_v43 }
 0x5f2   : > { %v15689_v11 = vcombine.low %v15681_v13, %v15688_v21 }
 0x5f4   : > { %16057 = vxpose.xlu1.b32.end [16/16] (narrow) %v15689_v11, 8 }
 0x62f   : > { %v16026_v37 = vpop.trf.xlu0 }
 0x630   : > { %16080 = vst [vmem:[%s24745_s9 + $0x30] sm:$0xff] %v16026_v37 }
 0x638   : > { %v16058_v44 = vpop.trf.xlu1 }
 0x639   : > { %16081 = vst [vmem:[%s24745_s9 + $0x38] sm:$0xff] %v16058_v44 }
 0x63a PF: > { %s16_s18 = sadd.s32 1, %s17044_s18  }
 0x63b   : > { %p13_p4 = scmp.ge.s32.totalorder %s16_s18, 4  }
 0x63d   :  { %15 = sbr.rel (!%p13_p4) target bundleno = 1 (0x1), region = 90 }

</bundles_post_ra>
